<compile_context>
chip_gen: v7x
topology: tpu7x:2x2x1
jax: 0.10.0
libtpu: 0.0.40
codegen_flags: <defaults>
</compile_context>

<pallas_src>
import functools

import numpy as np
import jax
import jax.numpy as jnp
from jax.experimental import pallas as pl
from jax.experimental.pallas import tpu as pltpu


# ---------------------------------------------------------------------------
# Fused Pallas kernel: whole MultiConv forward for one batch image.
# Refs: x, padding_masks, [w1,b1,w2,b2] per block, wa1, ba1, wa2, ba2, out.
# ---------------------------------------------------------------------------
def _multiconv_kernel(*refs, H, W, kernel_list, kmax):
    HW = H * W
    nb = len(kernel_list)

    x_ref, masks_ref = refs[0], refs[1]
    o_ref = refs[-1]
    prefs = refs[2:-1]                     # 4*nb block params + 4 agg params
    pm = (kmax - 1) // 2

    x = x_ref[...].astype(jnp.float32)     # (C, H*W), lane-dense

    def shifted_set(t, k_win):
        """Zero-padded spatial shifts of t (C, H*W) for a k_win x k_win window."""
        p = (k_win - 1) // 2
        out = {}
        for dy in range(-p, p + 1):
            for dx in range(-p, p + 1):
                s = dy * W + dx
                r = t if s == 0 else pltpu.roll(t, (-s) % HW, axis=1)  # XLU rotate
                if dy == 0 and dx == 0:
                    out[(dy, dx)] = r
                else:
                    m = masks_ref[(dy + pm) * kmax + (dx + pm)]        # (1, H*W) {0,1}
                    out[(dy, dx)] = r * m                              # zero 'same' pad
        return out

    def conv(shifts, w_ref, k, base=0):
        """sum_{di,dj} W[base+di*k+dj] (Cout,Cin) @ shifted (Cin,H*W) on the MXU."""
        p = (k - 1) // 2
        acc = None
        for di in range(k):
            for dj in range(k):
                wm = w_ref[base + di * k + dj]                         # (Cout, Cin)
                t = jnp.dot(wm, shifts[(di - p, dj - p)],
                            preferred_element_type=jnp.float32)
                acc = t if acc is None else acc + t
        return acc

    def lrelu(v, slope):
        return jnp.where(v >= 0, v, slope * v)

    # Shifts of the input are shared by all branch conv1's and agg group 0.
    xsh = shifted_set(x, kmax)

    feats = [x]
    for bi, k in enumerate(kernel_list):
        w1, b1, w2, b2 = prefs[4 * bi: 4 * bi + 4]
        h1 = lrelu(conv(xsh, w1, k) + b1[...], 0.2)      # conv1 + BN1 + LeakyReLU(0.2)
        h2 = conv(shifted_set(h1, 3), w2, 3) + b2[...]   # conv2 + BN2
        feats.append(lrelu(h2 + x, 0.2))                 # + x residual, LeakyReLU(0.2)

    wa1, ba1, wa2, ba2 = prefs[4 * nb: 4 * nb + 4]

    # agg[0]: 5x5 conv over concat(feats) == sum of per-group 5x5 convs (no concat).
    a = None
    for g, f in enumerate(feats):
        sh = xsh if g == 0 else shifted_set(f, 5)
        t = conv(sh, wa1, 5, base=g * 25)
        a = t if a is None else a + t
    a = lrelu(a + ba1[...], 0.01)                        # BN + LeakyReLU() default slope

    # agg[1]: 3x3 conv with bias, then the outer + x residual.
    y = conv(shifted_set(a, 3), wa2, 3) + ba2[...] + x
    o_ref[...] = y.astype(o_ref.dtype)


# ---------------------------------------------------------------------------
# Weight packing (JAX glue, runs once): fold BN scale, transpose to (Cout, Cin).
# ---------------------------------------------------------------------------
def _pack_conv(w_hwio, scale=None):
    """(KH,KW,Cin,Cout) [* per-Cout BN scale] -> (KH*KW, Cout, Cin) float32."""
    kh, kw, cin, cout = w_hwio.shape
    w = w_hwio.astype(jnp.float32)
    if scale is not None:
        w = w * scale.astype(jnp.float32)[None, None, None, :]
    return jnp.transpose(w, (0, 1, 3, 2)).reshape(kh * kw, cout, cin)


def _pack_agg1(w_hwio, scale, c):
    """(5,5,(L+1)*c,c) -> ((L+1)*25, c, c), group-major, BN scale folded."""
    kh, kw, cin_total, cout = w_hwio.shape
    w = w_hwio.astype(jnp.float32) * scale.astype(jnp.float32)[None, None, None, :]
    parts = []
    for g in range(cin_total // c):
        wg = w[:, :, g * c:(g + 1) * c, :]
        parts.append(jnp.transpose(wg, (0, 1, 3, 2)).reshape(kh * kw, cout, c))
    return jnp.concatenate(parts, axis=0)


def _padding_masks(H, W, kmax):
    """(kmax*kmax, 1, H*W) float32 {0,1}: 'same' zero-padding validity per shift."""
    p = (kmax - 1) // 2
    hh, ww = np.meshgrid(np.arange(H), np.arange(W), indexing="ij")
    hh, ww = hh.reshape(-1), ww.reshape(-1)
    masks = np.zeros((kmax * kmax, 1, H * W), np.float32)
    for dy in range(-p, p + 1):
        for dx in range(-p, p + 1):
            valid = ((hh + dy >= 0) & (hh + dy < H) &
                     (ww + dx >= 0) & (ww + dx < W))
            masks[(dy + p) * kmax + (dx + p), 0, :] = valid.astype(np.float32)
    return jnp.asarray(masks)


# ---------------------------------------------------------------------------
# MultiConv forward: NCHW in, NCHW out (matches the PyTorch module).
# ---------------------------------------------------------------------------
def multiconv_forward(x_nchw, params):
    n, c, h, w = x_nchw.shape
    hw = h * w
    kernel_list = tuple(int(b["w1"].shape[0]) for b in params["blocks"])
    L = len(kernel_list)
    kmax = max(kernel_list + (5,))

    x = x_nchw.reshape(n, c, hw).astype(jnp.float32)     # channels-first, lane-dense

    args = [x, _padding_masks(h, w, kmax)]
    in_specs = [
        pl.BlockSpec((None, c, hw), lambda i: (i, 0, 0)),
        pl.BlockSpec((kmax * kmax, 1, hw), lambda i: (0, 0, 0)),
    ]

    def add_const(arr):
        args.append(arr)
        in_specs.append(pl.BlockSpec(arr.shape, lambda i, _z=(0,) * arr.ndim: _z))

    for blk in params["blocks"]:
        add_const(_pack_conv(blk["w1"], blk["s1"]))      # BN scale folded into weights
        add_const(blk["b1"].astype(jnp.float32).reshape(c, 1))
        add_const(_pack_conv(blk["w2"], blk["s2"]))
        add_const(blk["b2"].astype(jnp.float32).reshape(c, 1))

    add_const(_pack_agg1(params["agg1_w"], params["agg1_s"], c))
    add_const(params["agg1_b"].astype(jnp.float32).reshape(c, 1))
    add_const(_pack_conv(params["agg2_w"]))              # plain conv bias (no BN)
    add_const(params["agg2_bias"].astype(jnp.float32).reshape(c, 1))

    kernel = functools.partial(_multiconv_kernel, H=h, W=w,
                               kernel_list=kernel_list, kmax=kmax)

    # Advisory cost estimate so XLA schedules surrounding ops around the call.
    k_total = sum(k * k + 9 for k in kernel_list) + 25 * (L + 1) + 9
    flops = 2 * n * hw * c * c * k_total
    bytes_accessed = 4 * (sum(int(a.size) for a in args) + n * c * hw)

    out = pl.pallas_call(
        kernel,
        out_shape=jax.ShapeDtypeStruct((n, c, hw), jnp.float32),
        grid=(n,),
        in_specs=in_specs,
        out_specs=pl.BlockSpec((None, c, hw), lambda i: (i, 0, 0)),
        compiler_params=pltpu.CompilerParams(
            dimension_semantics=("parallel",),
            vmem_limit_bytes=32 * 1024 * 1024),
        cost_estimate=pl.CostEstimate(flops=flops, transcendentals=0,
                                      bytes_accessed=bytes_accessed),
    )(*args)

    return out.reshape(n, c, h, w)


# ---------------------------------------------------------------------------
# Deterministic parameter init (mirrors the PyTorch module's shapes, BN folded).
# ---------------------------------------------------------------------------
def init_params(key, in_channels=6, kernel_list=(3, 5, 7)):
    c = in_channels

    def conv_w(k, kh, kw, cin, cout):
        fan_in = kh * kw * cin
        return (jax.random.normal(k, (kh, kw, cin, cout), jnp.float32)
                / jnp.sqrt(jnp.float32(fan_in)))

    def bn_fold(k, ch, eps=1e-5):
        k1, k2, k3, k4 = jax.random.split(k, 4)
        gamma = jax.random.uniform(k1, (ch,), minval=0.5, maxval=1.5)
        beta = 0.1 * jax.random.normal(k2, (ch,))
        mean = 0.1 * jax.random.normal(k3, (ch,))
        var = jax.random.uniform(k4, (ch,), minval=0.5, maxval=1.5)
        scale = gamma / jnp.sqrt(var + eps)
        bias = beta - mean * scale
        return scale.astype(jnp.float32), bias.astype(jnp.float32)

    keys = jax.random.split(key, 4 * len(kernel_list) + 4)
    ki = 0
    blocks = []
    for ksz in kernel_list:
        w1 = conv_w(keys[ki], ksz, ksz, c, c); ki += 1
        s1, b1 = bn_fold(keys[ki], c); ki += 1
        w2 = conv_w(keys[ki], 3, 3, c, c); ki += 1
        s2, b2 = bn_fold(keys[ki], c); ki += 1
        blocks.append(dict(w1=w1, s1=s1, b1=b1, w2=w2, s2=s2, b2=b2))

    agg1_w = conv_w(keys[ki], 5, 5, (len(kernel_list) + 1) * c, c); ki += 1
    agg1_s, agg1_b = bn_fold(keys[ki], c); ki += 1
    agg2_w = conv_w(keys[ki], 3, 3, c, c); ki += 1
    agg2_bias = (0.1 * jax.random.normal(keys[ki], (c,))).astype(jnp.float32); ki += 1

    return dict(blocks=blocks,
                agg1_w=agg1_w, agg1_s=agg1_s, agg1_b=agg1_b,
                agg2_w=agg2_w, agg2_bias=agg2_bias)


# ---------------------------------------------------------------------------
# Pure-JAX (XLA conv) reference of the same module, for a numerical check.
# ---------------------------------------------------------------------------
def _conv_same_ref(x, w):
    return jax.lax.conv_general_dilated(
        x, w, window_strides=(1, 1), padding="SAME",
        dimension_numbers=("NCHW", "HWIO", "NCHW"),
        precision=jax.lax.Precision.HIGHEST)


def multiconv_reference(x, params):
    def lrelu(v, s):
        return jnp.where(v >= 0, v, s * v)

    def affine(v, s, b):
        return v * s[None, :, None, None] + b[None, :, None, None]

    feats = [x]
    for blk in params["blocks"]:
        h = lrelu(affine(_conv_same_ref(x, blk["w1"]), blk["s1"], blk["b1"]), 0.2)
        h = affine(_conv_same_ref(h, blk["w2"]), blk["s2"], blk["b2"])
        feats.append(lrelu(h + x, 0.2))
    cat = jnp.concatenate(feats, axis=1)
    a = lrelu(affine(_conv_same_ref(cat, params["agg1_w"]),
                     params["agg1_s"], params["agg1_b"]), 0.01)
    y = _conv_same_ref(a, params["agg2_w"]) + params["agg2_bias"][None, :, None, None]
    return y + x


if __name__ == "__main__":
    key = jax.random.PRNGKey(0)
    kx, kp = jax.random.split(key)

    # Small shapes consistent with the module: batch=2, in_channels=6, 16x16.
    x = jax.random.normal(kx, (2, 6, 16, 16), dtype=jnp.float32)
    params = init_params(kp, in_channels=6, kernel_list=(3, 5, 7))

    fwd = jax.jit(multiconv_forward)
    y = jax.block_until_ready(fwd(x, params))

    assert y.shape == (2, 6, 16, 16), y.shape
    assert bool(jnp.all(jnp.isfinite(y)))

    # Check against a pure-JAX reference (loose tolerance; catches structural bugs).
    y_ref = jax.block_until_ready(multiconv_reference(x, params))
    assert float(jnp.max(jnp.abs(y - y_ref))) < 1e-1

    print("KERNEL_OK")
</pallas_src>

<mosaic_0001>
module attributes {stable_mosaic.version = 11 : i64} {
  func.func @_multiconv_kernel(%arg0: i32, %arg1: memref<1x6x256xf32, #tpu.memory_space<vmem>>, %arg2: memref<49x1x256xf32, #tpu.memory_space<vmem>>, %arg3: memref<9x6x6xf32, #tpu.memory_space<vmem>>, %arg4: memref<6x1xf32, #tpu.memory_space<vmem>>, %arg5: memref<9x6x6xf32, #tpu.memory_space<vmem>>, %arg6: memref<6x1xf32, #tpu.memory_space<vmem>>, %arg7: memref<25x6x6xf32, #tpu.memory_space<vmem>>, %arg8: memref<6x1xf32, #tpu.memory_space<vmem>>, %arg9: memref<9x6x6xf32, #tpu.memory_space<vmem>>, %arg10: memref<6x1xf32, #tpu.memory_space<vmem>>, %arg11: memref<49x6x6xf32, #tpu.memory_space<vmem>>, %arg12: memref<6x1xf32, #tpu.memory_space<vmem>>, %arg13: memref<9x6x6xf32, #tpu.memory_space<vmem>>, %arg14: memref<6x1xf32, #tpu.memory_space<vmem>>, %arg15: memref<100x6x6xf32, #tpu.memory_space<vmem>>, %arg16: memref<6x1xf32, #tpu.memory_space<vmem>>, %arg17: memref<9x6x6xf32, #tpu.memory_space<vmem>>, %arg18: memref<6x1xf32, #tpu.memory_space<vmem>>, %arg19: memref<1x6x256xf32, #tpu.memory_space<vmem>>) attributes {dimension_semantics = [#tpu.dimension_semantics<parallel>], iteration_bounds = array<i64: 2>, scalar_prefetch = 0 : i64, scratch_operands = 0 : i64, tpu.core_type = #tpu.core_type<tc>, window_params = [{transform_indices = @transform_0, window_bounds = array<i64: 1, 6, 256>}, {pipeline_mode = #tpu.pipeline_mode<synchronous>, transform_indices = @transform_1, window_bounds = array<i64: 49, 1, 256>}, {pipeline_mode = #tpu.pipeline_mode<synchronous>, transform_indices = @transform_2, window_bounds = array<i64: 9, 6, 6>}, {pipeline_mode = #tpu.pipeline_mode<synchronous>, transform_indices = @transform_3, window_bounds = array<i64: 6, 1>}, {pipeline_mode = #tpu.pipeline_mode<synchronous>, transform_indices = @transform_4, window_bounds = array<i64: 9, 6, 6>}, {pipeline_mode = #tpu.pipeline_mode<synchronous>, transform_indices = @transform_5, window_bounds = array<i64: 6, 1>}, {pipeline_mode = #tpu.pipeline_mode<synchronous>, transform_indices = @transform_6, window_bounds = array<i64: 25, 6, 6>}, {pipeline_mode = #tpu.pipeline_mode<synchronous>, transform_indices = @transform_7, window_bounds = array<i64: 6, 1>}, {pipeline_mode = #tpu.pipeline_mode<synchronous>, transform_indices = @transform_8, window_bounds = array<i64: 9, 6, 6>}, {pipeline_mode = #tpu.pipeline_mode<synchronous>, transform_indices = @transform_9, window_bounds = array<i64: 6, 1>}, {pipeline_mode = #tpu.pipeline_mode<synchronous>, transform_indices = @transform_10, window_bounds = array<i64: 49, 6, 6>}, {pipeline_mode = #tpu.pipeline_mode<synchronous>, transform_indices = @transform_11, window_bounds = array<i64: 6, 1>}, {pipeline_mode = #tpu.pipeline_mode<synchronous>, transform_indices = @transform_12, window_bounds = array<i64: 9, 6, 6>}, {pipeline_mode = #tpu.pipeline_mode<synchronous>, transform_indices = @transform_13, window_bounds = array<i64: 6, 1>}, {pipeline_mode = #tpu.pipeline_mode<synchronous>, transform_indices = @transform_14, window_bounds = array<i64: 100, 6, 6>}, {pipeline_mode = #tpu.pipeline_mode<synchronous>, transform_indices = @transform_15, window_bounds = array<i64: 6, 1>}, {pipeline_mode = #tpu.pipeline_mode<synchronous>, transform_indices = @transform_16, window_bounds = array<i64: 9, 6, 6>}, {pipeline_mode = #tpu.pipeline_mode<synchronous>, transform_indices = @transform_17, window_bounds = array<i64: 6, 1>}, {transform_indices = @transform_18, window_bounds = array<i64: 1, 6, 256>}]} {
    %c0 = arith.constant 0 : index
    %c0_0 = arith.constant 0 : index
    %c0_1 = arith.constant 0 : index
    %0 = vector.load %arg1[%c0, %c0_0, %c0_1] : memref<1x6x256xf32, #tpu.memory_space<vmem>>, vector<1x6x256xf32>
    %1 = vector.shape_cast %0 : vector<1x6x256xf32> to vector<6x256xf32>
    %c51_i32 = arith.constant 51 : i32
    %2 = tpu.dynamic_rotate %1 by %c51_i32 dim 1 : vector<6x256xf32>, i32 -> vector<6x256xf32>
    %c0_2 = arith.constant 0 : index
    %c0_3 = arith.constant 0 : index
    %c0_4 = arith.constant 0 : index
    %3 = vector.load %arg2[%c0_2, %c0_3, %c0_4] : memref<49x1x256xf32, #tpu.memory_space<vmem>>, vector<1x1x256xf32>
    %4 = vector.shape_cast %3 : vector<1x1x256xf32> to vector<1x256xf32>
    %5 = vector.broadcast %4 : vector<1x256xf32> to vector<6x256xf32>
    %6 = arith.mulf %2, %5 : vector<6x256xf32>
    %c50_i32 = arith.constant 50 : i32
    %7 = tpu.dynamic_rotate %1 by %c50_i32 dim 1 : vector<6x256xf32>, i32 -> vector<6x256xf32>
    %c1 = arith.constant 1 : index
    %c0_5 = arith.constant 0 : index
    %c0_6 = arith.constant 0 : index
    %8 = vector.load %arg2[%c1, %c0_5, %c0_6] : memref<49x1x256xf32, #tpu.memory_space<vmem>>, vector<1x1x256xf32>
    %9 = vector.shape_cast %8 : vector<1x1x256xf32> to vector<1x256xf32>
    %10 = vector.broadcast %9 : vector<1x256xf32> to vector<6x256xf32>
    %11 = arith.mulf %7, %10 : vector<6x256xf32>
    %c49_i32 = arith.constant 49 : i32
    %12 = tpu.dynamic_rotate %1 by %c49_i32 dim 1 : vector<6x256xf32>, i32 -> vector<6x256xf32>
    %c2 = arith.constant 2 : index
    %c0_7 = arith.constant 0 : index
    %c0_8 = arith.constant 0 : index
    %13 = vector.load %arg2[%c2, %c0_7, %c0_8] : memref<49x1x256xf32, #tpu.memory_space<vmem>>, vector<1x1x256xf32>
    %14 = vector.shape_cast %13 : vector<1x1x256xf32> to vector<1x256xf32>
    %15 = vector.broadcast %14 : vector<1x256xf32> to vector<6x256xf32>
    %16 = arith.mulf %12, %15 : vector<6x256xf32>
    %c48_i32 = arith.constant 48 : i32
    %17 = tpu.dynamic_rotate %1 by %c48_i32 dim 1 : vector<6x256xf32>, i32 -> vector<6x256xf32>
    %c3 = arith.constant 3 : index
    %c0_9 = arith.constant 0 : index
    %c0_10 = arith.constant 0 : index
    %18 = vector.load %arg2[%c3, %c0_9, %c0_10] : memref<49x1x256xf32, #tpu.memory_space<vmem>>, vector<1x1x256xf32>
    %19 = vector.shape_cast %18 : vector<1x1x256xf32> to vector<1x256xf32>
    %20 = vector.broadcast %19 : vector<1x256xf32> to vector<6x256xf32>
    %21 = arith.mulf %17, %20 : vector<6x256xf32>
    %c47_i32 = arith.constant 47 : i32
    %22 = tpu.dynamic_rotate %1 by %c47_i32 dim 1 : vector<6x256xf32>, i32 -> vector<6x256xf32>
    %c4 = arith.constant 4 : index
    %c0_11 = arith.constant 0 : index
    %c0_12 = arith.constant 0 : index
    %23 = vector.load %arg2[%c4, %c0_11, %c0_12] : memref<49x1x256xf32, #tpu.memory_space<vmem>>, vector<1x1x256xf32>
    %24 = vector.shape_cast %23 : vector<1x1x256xf32> to vector<1x256xf32>
    %25 = vector.broadcast %24 : vector<1x256xf32> to vector<6x256xf32>
    %26 = arith.mulf %22, %25 : vector<6x256xf32>
    %c46_i32 = arith.constant 46 : i32
    %27 = tpu.dynamic_rotate %1 by %c46_i32 dim 1 : vector<6x256xf32>, i32 -> vector<6x256xf32>
    %c5 = arith.constant 5 : index
    %c0_13 = arith.constant 0 : index
    %c0_14 = arith.constant 0 : index
    %28 = vector.load %arg2[%c5, %c0_13, %c0_14] : memref<49x1x256xf32, #tpu.memory_space<vmem>>, vector<1x1x256xf32>
    %29 = vector.shape_cast %28 : vector<1x1x256xf32> to vector<1x256xf32>
    %30 = vector.broadcast %29 : vector<1x256xf32> to vector<6x256xf32>
    %31 = arith.mulf %27, %30 : vector<6x256xf32>
    %c45_i32 = arith.constant 45 : i32
    %32 = tpu.dynamic_rotate %1 by %c45_i32 dim 1 : vector<6x256xf32>, i32 -> vector<6x256xf32>
    %c6 = arith.constant 6 : index
    %c0_15 = arith.constant 0 : index
    %c0_16 = arith.constant 0 : index
    %33 = vector.load %arg2[%c6, %c0_15, %c0_16] : memref<49x1x256xf32, #tpu.memory_space<vmem>>, vector<1x1x256xf32>
    %34 = vector.shape_cast %33 : vector<1x1x256xf32> to vector<1x256xf32>
    %35 = vector.broadcast %34 : vector<1x256xf32> to vector<6x256xf32>
    %36 = arith.mulf %32, %35 : vector<6x256xf32>
    %c35_i32 = arith.constant 35 : i32
    %37 = tpu.dynamic_rotate %1 by %c35_i32 dim 1 : vector<6x256xf32>, i32 -> vector<6x256xf32>
    %c7 = arith.constant 7 : index
    %c0_17 = arith.constant 0 : index
    %c0_18 = arith.constant 0 : index
    %38 = vector.load %arg2[%c7, %c0_17, %c0_18] : memref<49x1x256xf32, #tpu.memory_space<vmem>>, vector<1x1x256xf32>
    %39 = vector.shape_cast %38 : vector<1x1x256xf32> to vector<1x256xf32>
    %40 = vector.broadcast %39 : vector<1x256xf32> to vector<6x256xf32>
    %41 = arith.mulf %37, %40 : vector<6x256xf32>
    %c34_i32 = arith.constant 34 : i32
    %42 = tpu.dynamic_rotate %1 by %c34_i32 dim 1 : vector<6x256xf32>, i32 -> vector<6x256xf32>
    %c8 = arith.constant 8 : index
    %c0_19 = arith.constant 0 : index
    %c0_20 = arith.constant 0 : index
    %43 = vector.load %arg2[%c8, %c0_19, %c0_20] : memref<49x1x256xf32, #tpu.memory_space<vmem>>, vector<1x1x256xf32>
    %44 = vector.shape_cast %43 : vector<1x1x256xf32> to vector<1x256xf32>
    %45 = vector.broadcast %44 : vector<1x256xf32> to vector<6x256xf32>
    %46 = arith.mulf %42, %45 : vector<6x256xf32>
    %c33_i32 = arith.constant 33 : i32
    %47 = tpu.dynamic_rotate %1 by %c33_i32 dim 1 : vector<6x256xf32>, i32 -> vector<6x256xf32>
    %c9 = arith.constant 9 : index
    %c0_21 = arith.constant 0 : index
    %c0_22 = arith.constant 0 : index
    %48 = vector.load %arg2[%c9, %c0_21, %c0_22] : memref<49x1x256xf32, #tpu.memory_space<vmem>>, vector<1x1x256xf32>
    %49 = vector.shape_cast %48 : vector<1x1x256xf32> to vector<1x256xf32>
    %50 = vector.broadcast %49 : vector<1x256xf32> to vector<6x256xf32>
    %51 = arith.mulf %47, %50 : vector<6x256xf32>
    %c32_i32 = arith.constant 32 : i32
    %52 = tpu.dynamic_rotate %1 by %c32_i32 dim 1 : vector<6x256xf32>, i32 -> vector<6x256xf32>
    %c10 = arith.constant 10 : index
    %c0_23 = arith.constant 0 : index
    %c0_24 = arith.constant 0 : index
    %53 = vector.load %arg2[%c10, %c0_23, %c0_24] : memref<49x1x256xf32, #tpu.memory_space<vmem>>, vector<1x1x256xf32>
    %54 = vector.shape_cast %53 : vector<1x1x256xf32> to vector<1x256xf32>
    %55 = vector.broadcast %54 : vector<1x256xf32> to vector<6x256xf32>
    %56 = arith.mulf %52, %55 : vector<6x256xf32>
    %c31_i32 = arith.constant 31 : i32
    %57 = tpu.dynamic_rotate %1 by %c31_i32 dim 1 : vector<6x256xf32>, i32 -> vector<6x256xf32>
    %c11 = arith.constant 11 : index
    %c0_25 = arith.constant 0 : index
    %c0_26 = arith.constant 0 : index
    %58 = vector.load %arg2[%c11, %c0_25, %c0_26] : memref<49x1x256xf32, #tpu.memory_space<vmem>>, vector<1x1x256xf32>
    %59 = vector.shape_cast %58 : vector<1x1x256xf32> to vector<1x256xf32>
    %60 = vector.broadcast %59 : vector<1x256xf32> to vector<6x256xf32>
    %61 = arith.mulf %57, %60 : vector<6x256xf32>
    %c30_i32 = arith.constant 30 : i32
    %62 = tpu.dynamic_rotate %1 by %c30_i32 dim 1 : vector<6x256xf32>, i32 -> vector<6x256xf32>
    %c12 = arith.constant 12 : index
    %c0_27 = arith.constant 0 : index
    %c0_28 = arith.constant 0 : index
    %63 = vector.load %arg2[%c12, %c0_27, %c0_28] : memref<49x1x256xf32, #tpu.memory_space<vmem>>, vector<1x1x256xf32>
    %64 = vector.shape_cast %63 : vector<1x1x256xf32> to vector<1x256xf32>
    %65 = vector.broadcast %64 : vector<1x256xf32> to vector<6x256xf32>
    %66 = arith.mulf %62, %65 : vector<6x256xf32>
    %c29_i32 = arith.constant 29 : i32
    %67 = tpu.dynamic_rotate %1 by %c29_i32 dim 1 : vector<6x256xf32>, i32 -> vector<6x256xf32>
    %c13 = arith.constant 13 : index
    %c0_29 = arith.constant 0 : index
    %c0_30 = arith.constant 0 : index
    %68 = vector.load %arg2[%c13, %c0_29, %c0_30] : memref<49x1x256xf32, #tpu.memory_space<vmem>>, vector<1x1x256xf32>
    %69 = vector.shape_cast %68 : vector<1x1x256xf32> to vector<1x256xf32>
    %70 = vector.broadcast %69 : vector<1x256xf32> to vector<6x256xf32>
    %71 = arith.mulf %67, %70 : vector<6x256xf32>
    %c19_i32 = arith.constant 19 : i32
    %72 = tpu.dynamic_rotate %1 by %c19_i32 dim 1 : vector<6x256xf32>, i32 -> vector<6x256xf32>
    %c14 = arith.constant 14 : index
    %c0_31 = arith.constant 0 : index
    %c0_32 = arith.constant 0 : index
    %73 = vector.load %arg2[%c14, %c0_31, %c0_32] : memref<49x1x256xf32, #tpu.memory_space<vmem>>, vector<1x1x256xf32>
    %74 = vector.shape_cast %73 : vector<1x1x256xf32> to vector<1x256xf32>
    %75 = vector.broadcast %74 : vector<1x256xf32> to vector<6x256xf32>
    %76 = arith.mulf %72, %75 : vector<6x256xf32>
    %c18_i32 = arith.constant 18 : i32
    %77 = tpu.dynamic_rotate %1 by %c18_i32 dim 1 : vector<6x256xf32>, i32 -> vector<6x256xf32>
    %c15 = arith.constant 15 : index
    %c0_33 = arith.constant 0 : index
    %c0_34 = arith.constant 0 : index
    %78 = vector.load %arg2[%c15, %c0_33, %c0_34] : memref<49x1x256xf32, #tpu.memory_space<vmem>>, vector<1x1x256xf32>
    %79 = vector.shape_cast %78 : vector<1x1x256xf32> to vector<1x256xf32>
    %80 = vector.broadcast %79 : vector<1x256xf32> to vector<6x256xf32>
    %81 = arith.mulf %77, %80 : vector<6x256xf32>
    %c17_i32 = arith.constant 17 : i32
    %82 = tpu.dynamic_rotate %1 by %c17_i32 dim 1 : vector<6x256xf32>, i32 -> vector<6x256xf32>
    %c16 = arith.constant 16 : index
    %c0_35 = arith.constant 0 : index
    %c0_36 = arith.constant 0 : index
    %83 = vector.load %arg2[%c16, %c0_35, %c0_36] : memref<49x1x256xf32, #tpu.memory_space<vmem>>, vector<1x1x256xf32>
    %84 = vector.shape_cast %83 : vector<1x1x256xf32> to vector<1x256xf32>
    %85 = vector.broadcast %84 : vector<1x256xf32> to vector<6x256xf32>
    %86 = arith.mulf %82, %85 : vector<6x256xf32>
    %c16_i32 = arith.constant 16 : i32
    %87 = tpu.dynamic_rotate %1 by %c16_i32 dim 1 : vector<6x256xf32>, i32 -> vector<6x256xf32>
    %c17 = arith.constant 17 : index
    %c0_37 = arith.constant 0 : index
    %c0_38 = arith.constant 0 : index
    %88 = vector.load %arg2[%c17, %c0_37, %c0_38] : memref<49x1x256xf32, #tpu.memory_space<vmem>>, vector<1x1x256xf32>
    %89 = vector.shape_cast %88 : vector<1x1x256xf32> to vector<1x256xf32>
    %90 = vector.broadcast %89 : vector<1x256xf32> to vector<6x256xf32>
    %91 = arith.mulf %87, %90 : vector<6x256xf32>
    %c15_i32 = arith.constant 15 : i32
    %92 = tpu.dynamic_rotate %1 by %c15_i32 dim 1 : vector<6x256xf32>, i32 -> vector<6x256xf32>
    %c18 = arith.constant 18 : index
    %c0_39 = arith.constant 0 : index
    %c0_40 = arith.constant 0 : index
    %93 = vector.load %arg2[%c18, %c0_39, %c0_40] : memref<49x1x256xf32, #tpu.memory_space<vmem>>, vector<1x1x256xf32>
    %94 = vector.shape_cast %93 : vector<1x1x256xf32> to vector<1x256xf32>
    %95 = vector.broadcast %94 : vector<1x256xf32> to vector<6x256xf32>
    %96 = arith.mulf %92, %95 : vector<6x256xf32>
    %c14_i32 = arith.constant 14 : i32
    %97 = tpu.dynamic_rotate %1 by %c14_i32 dim 1 : vector<6x256xf32>, i32 -> vector<6x256xf32>
    %c19 = arith.constant 19 : index
    %c0_41 = arith.constant 0 : index
    %c0_42 = arith.constant 0 : index
    %98 = vector.load %arg2[%c19, %c0_41, %c0_42] : memref<49x1x256xf32, #tpu.memory_space<vmem>>, vector<1x1x256xf32>
    %99 = vector.shape_cast %98 : vector<1x1x256xf32> to vector<1x256xf32>
    %100 = vector.broadcast %99 : vector<1x256xf32> to vector<6x256xf32>
    %101 = arith.mulf %97, %100 : vector<6x256xf32>
    %c13_i32 = arith.constant 13 : i32
    %102 = tpu.dynamic_rotate %1 by %c13_i32 dim 1 : vector<6x256xf32>, i32 -> vector<6x256xf32>
    %c20 = arith.constant 20 : index
    %c0_43 = arith.constant 0 : index
    %c0_44 = arith.constant 0 : index
    %103 = vector.load %arg2[%c20, %c0_43, %c0_44] : memref<49x1x256xf32, #tpu.memory_space<vmem>>, vector<1x1x256xf32>
    %104 = vector.shape_cast %103 : vector<1x1x256xf32> to vector<1x256xf32>
    %105 = vector.broadcast %104 : vector<1x256xf32> to vector<6x256xf32>
    %106 = arith.mulf %102, %105 : vector<6x256xf32>
    %c3_i32 = arith.constant 3 : i32
    %107 = tpu.dynamic_rotate %1 by %c3_i32 dim 1 : vector<6x256xf32>, i32 -> vector<6x256xf32>
    %c21 = arith.constant 21 : index
    %c0_45 = arith.constant 0 : index
    %c0_46 = arith.constant 0 : index
    %108 = vector.load %arg2[%c21, %c0_45, %c0_46] : memref<49x1x256xf32, #tpu.memory_space<vmem>>, vector<1x1x256xf32>
    %109 = vector.shape_cast %108 : vector<1x1x256xf32> to vector<1x256xf32>
    %110 = vector.broadcast %109 : vector<1x256xf32> to vector<6x256xf32>
    %111 = arith.mulf %107, %110 : vector<6x256xf32>
    %c2_i32 = arith.constant 2 : i32
    %112 = tpu.dynamic_rotate %1 by %c2_i32 dim 1 : vector<6x256xf32>, i32 -> vector<6x256xf32>
    %c22 = arith.constant 22 : index
    %c0_47 = arith.constant 0 : index
    %c0_48 = arith.constant 0 : index
    %113 = vector.load %arg2[%c22, %c0_47, %c0_48] : memref<49x1x256xf32, #tpu.memory_space<vmem>>, vector<1x1x256xf32>
    %114 = vector.shape_cast %113 : vector<1x1x256xf32> to vector<1x256xf32>
    %115 = vector.broadcast %114 : vector<1x256xf32> to vector<6x256xf32>
    %116 = arith.mulf %112, %115 : vector<6x256xf32>
    %c1_i32 = arith.constant 1 : i32
    %117 = tpu.dynamic_rotate %1 by %c1_i32 dim 1 : vector<6x256xf32>, i32 -> vector<6x256xf32>
    %c23 = arith.constant 23 : index
    %c0_49 = arith.constant 0 : index
    %c0_50 = arith.constant 0 : index
    %118 = vector.load %arg2[%c23, %c0_49, %c0_50] : memref<49x1x256xf32, #tpu.memory_space<vmem>>, vector<1x1x256xf32>
    %119 = vector.shape_cast %118 : vector<1x1x256xf32> to vector<1x256xf32>
    %120 = vector.broadcast %119 : vector<1x256xf32> to vector<6x256xf32>
    %121 = arith.mulf %117, %120 : vector<6x256xf32>
    %c255_i32 = arith.constant 255 : i32
    %122 = tpu.dynamic_rotate %1 by %c255_i32 dim 1 : vector<6x256xf32>, i32 -> vector<6x256xf32>
    %c25 = arith.constant 25 : index
    %c0_51 = arith.constant 0 : index
    %c0_52 = arith.constant 0 : index
    %123 = vector.load %arg2[%c25, %c0_51, %c0_52] : memref<49x1x256xf32, #tpu.memory_space<vmem>>, vector<1x1x256xf32>
    %124 = vector.shape_cast %123 : vector<1x1x256xf32> to vector<1x256xf32>
    %125 = vector.broadcast %124 : vector<1x256xf32> to vector<6x256xf32>
    %126 = arith.mulf %122, %125 : vector<6x256xf32>
    %c254_i32 = arith.constant 254 : i32
    %127 = tpu.dynamic_rotate %1 by %c254_i32 dim 1 : vector<6x256xf32>, i32 -> vector<6x256xf32>
    %c26 = arith.constant 26 : index
    %c0_53 = arith.constant 0 : index
    %c0_54 = arith.constant 0 : index
    %128 = vector.load %arg2[%c26, %c0_53, %c0_54] : memref<49x1x256xf32, #tpu.memory_space<vmem>>, vector<1x1x256xf32>
    %129 = vector.shape_cast %128 : vector<1x1x256xf32> to vector<1x256xf32>
    %130 = vector.broadcast %129 : vector<1x256xf32> to vector<6x256xf32>
    %131 = arith.mulf %127, %130 : vector<6x256xf32>
    %c253_i32 = arith.constant 253 : i32
    %132 = tpu.dynamic_rotate %1 by %c253_i32 dim 1 : vector<6x256xf32>, i32 -> vector<6x256xf32>
    %c27 = arith.constant 27 : index
    %c0_55 = arith.constant 0 : index
    %c0_56 = arith.constant 0 : index
    %133 = vector.load %arg2[%c27, %c0_55, %c0_56] : memref<49x1x256xf32, #tpu.memory_space<vmem>>, vector<1x1x256xf32>
    %134 = vector.shape_cast %133 : vector<1x1x256xf32> to vector<1x256xf32>
    %135 = vector.broadcast %134 : vector<1x256xf32> to vector<6x256xf32>
    %136 = arith.mulf %132, %135 : vector<6x256xf32>
    %c243_i32 = arith.constant 243 : i32
    %137 = tpu.dynamic_rotate %1 by %c243_i32 dim 1 : vector<6x256xf32>, i32 -> vector<6x256xf32>
    %c28 = arith.constant 28 : index
    %c0_57 = arith.constant 0 : index
    %c0_58 = arith.constant 0 : index
    %138 = vector.load %arg2[%c28, %c0_57, %c0_58] : memref<49x1x256xf32, #tpu.memory_space<vmem>>, vector<1x1x256xf32>
    %139 = vector.shape_cast %138 : vector<1x1x256xf32> to vector<1x256xf32>
    %140 = vector.broadcast %139 : vector<1x256xf32> to vector<6x256xf32>
    %141 = arith.mulf %137, %140 : vector<6x256xf32>
    %c242_i32 = arith.constant 242 : i32
    %142 = tpu.dynamic_rotate %1 by %c242_i32 dim 1 : vector<6x256xf32>, i32 -> vector<6x256xf32>
    %c29 = arith.constant 29 : index
    %c0_59 = arith.constant 0 : index
    %c0_60 = arith.constant 0 : index
    %143 = vector.load %arg2[%c29, %c0_59, %c0_60] : memref<49x1x256xf32, #tpu.memory_space<vmem>>, vector<1x1x256xf32>
    %144 = vector.shape_cast %143 : vector<1x1x256xf32> to vector<1x256xf32>
    %145 = vector.broadcast %144 : vector<1x256xf32> to vector<6x256xf32>
    %146 = arith.mulf %142, %145 : vector<6x256xf32>
    %c241_i32 = arith.constant 241 : i32
    %147 = tpu.dynamic_rotate %1 by %c241_i32 dim 1 : vector<6x256xf32>, i32 -> vector<6x256xf32>
    %c30 = arith.constant 30 : index
    %c0_61 = arith.constant 0 : index
    %c0_62 = arith.constant 0 : index
    %148 = vector.load %arg2[%c30, %c0_61, %c0_62] : memref<49x1x256xf32, #tpu.memory_space<vmem>>, vector<1x1x256xf32>
    %149 = vector.shape_cast %148 : vector<1x1x256xf32> to vector<1x256xf32>
    %150 = vector.broadcast %149 : vector<1x256xf32> to vector<6x256xf32>
    %151 = arith.mulf %147, %150 : vector<6x256xf32>
    %c240_i32 = arith.constant 240 : i32
    %152 = tpu.dynamic_rotate %1 by %c240_i32 dim 1 : vector<6x256xf32>, i32 -> vector<6x256xf32>
    %c31 = arith.constant 31 : index
    %c0_63 = arith.constant 0 : index
    %c0_64 = arith.constant 0 : index
    %153 = vector.load %arg2[%c31, %c0_63, %c0_64] : memref<49x1x256xf32, #tpu.memory_space<vmem>>, vector<1x1x256xf32>
    %154 = vector.shape_cast %153 : vector<1x1x256xf32> to vector<1x256xf32>
    %155 = vector.broadcast %154 : vector<1x256xf32> to vector<6x256xf32>
    %156 = arith.mulf %152, %155 : vector<6x256xf32>
    %c239_i32 = arith.constant 239 : i32
    %157 = tpu.dynamic_rotate %1 by %c239_i32 dim 1 : vector<6x256xf32>, i32 -> vector<6x256xf32>
    %c32 = arith.constant 32 : index
    %c0_65 = arith.constant 0 : index
    %c0_66 = arith.constant 0 : index
    %158 = vector.load %arg2[%c32, %c0_65, %c0_66] : memref<49x1x256xf32, #tpu.memory_space<vmem>>, vector<1x1x256xf32>
    %159 = vector.shape_cast %158 : vector<1x1x256xf32> to vector<1x256xf32>
    %160 = vector.broadcast %159 : vector<1x256xf32> to vector<6x256xf32>
    %161 = arith.mulf %157, %160 : vector<6x256xf32>
    %c238_i32 = arith.constant 238 : i32
    %162 = tpu.dynamic_rotate %1 by %c238_i32 dim 1 : vector<6x256xf32>, i32 -> vector<6x256xf32>
    %c33 = arith.constant 33 : index
    %c0_67 = arith.constant 0 : index
    %c0_68 = arith.constant 0 : index
    %163 = vector.load %arg2[%c33, %c0_67, %c0_68] : memref<49x1x256xf32, #tpu.memory_space<vmem>>, vector<1x1x256xf32>
    %164 = vector.shape_cast %163 : vector<1x1x256xf32> to vector<1x256xf32>
    %165 = vector.broadcast %164 : vector<1x256xf32> to vector<6x256xf32>
    %166 = arith.mulf %162, %165 : vector<6x256xf32>
    %c237_i32 = arith.constant 237 : i32
    %167 = tpu.dynamic_rotate %1 by %c237_i32 dim 1 : vector<6x256xf32>, i32 -> vector<6x256xf32>
    %c34 = arith.constant 34 : index
    %c0_69 = arith.constant 0 : index
    %c0_70 = arith.constant 0 : index
    %168 = vector.load %arg2[%c34, %c0_69, %c0_70] : memref<49x1x256xf32, #tpu.memory_space<vmem>>, vector<1x1x256xf32>
    %169 = vector.shape_cast %168 : vector<1x1x256xf32> to vector<1x256xf32>
    %170 = vector.broadcast %169 : vector<1x256xf32> to vector<6x256xf32>
    %171 = arith.mulf %167, %170 : vector<6x256xf32>
    %c227_i32 = arith.constant 227 : i32
    %172 = tpu.dynamic_rotate %1 by %c227_i32 dim 1 : vector<6x256xf32>, i32 -> vector<6x256xf32>
    %c35 = arith.constant 35 : index
    %c0_71 = arith.constant 0 : index
    %c0_72 = arith.constant 0 : index
    %173 = vector.load %arg2[%c35, %c0_71, %c0_72] : memref<49x1x256xf32, #tpu.memory_space<vmem>>, vector<1x1x256xf32>
    %174 = vector.shape_cast %173 : vector<1x1x256xf32> to vector<1x256xf32>
    %175 = vector.broadcast %174 : vector<1x256xf32> to vector<6x256xf32>
    %176 = arith.mulf %172, %175 : vector<6x256xf32>
    %c226_i32 = arith.constant 226 : i32
    %177 = tpu.dynamic_rotate %1 by %c226_i32 dim 1 : vector<6x256xf32>, i32 -> vector<6x256xf32>
    %c36 = arith.constant 36 : index
    %c0_73 = arith.constant 0 : index
    %c0_74 = arith.constant 0 : index
    %178 = vector.load %arg2[%c36, %c0_73, %c0_74] : memref<49x1x256xf32, #tpu.memory_space<vmem>>, vector<1x1x256xf32>
    %179 = vector.shape_cast %178 : vector<1x1x256xf32> to vector<1x256xf32>
    %180 = vector.broadcast %179 : vector<1x256xf32> to vector<6x256xf32>
    %181 = arith.mulf %177, %180 : vector<6x256xf32>
    %c225_i32 = arith.constant 225 : i32
    %182 = tpu.dynamic_rotate %1 by %c225_i32 dim 1 : vector<6x256xf32>, i32 -> vector<6x256xf32>
    %c37 = arith.constant 37 : index
    %c0_75 = arith.constant 0 : index
    %c0_76 = arith.constant 0 : index
    %183 = vector.load %arg2[%c37, %c0_75, %c0_76] : memref<49x1x256xf32, #tpu.memory_space<vmem>>, vector<1x1x256xf32>
    %184 = vector.shape_cast %183 : vector<1x1x256xf32> to vector<1x256xf32>
    %185 = vector.broadcast %184 : vector<1x256xf32> to vector<6x256xf32>
    %186 = arith.mulf %182, %185 : vector<6x256xf32>
    %c224_i32 = arith.constant 224 : i32
    %187 = tpu.dynamic_rotate %1 by %c224_i32 dim 1 : vector<6x256xf32>, i32 -> vector<6x256xf32>
    %c38 = arith.constant 38 : index
    %c0_77 = arith.constant 0 : index
    %c0_78 = arith.constant 0 : index
    %188 = vector.load %arg2[%c38, %c0_77, %c0_78] : memref<49x1x256xf32, #tpu.memory_space<vmem>>, vector<1x1x256xf32>
    %189 = vector.shape_cast %188 : vector<1x1x256xf32> to vector<1x256xf32>
    %190 = vector.broadcast %189 : vector<1x256xf32> to vector<6x256xf32>
    %191 = arith.mulf %187, %190 : vector<6x256xf32>
    %c223_i32 = arith.constant 223 : i32
    %192 = tpu.dynamic_rotate %1 by %c223_i32 dim 1 : vector<6x256xf32>, i32 -> vector<6x256xf32>
    %c39 = arith.constant 39 : index
    %c0_79 = arith.constant 0 : index
    %c0_80 = arith.constant 0 : index
    %193 = vector.load %arg2[%c39, %c0_79, %c0_80] : memref<49x1x256xf32, #tpu.memory_space<vmem>>, vector<1x1x256xf32>
    %194 = vector.shape_cast %193 : vector<1x1x256xf32> to vector<1x256xf32>
    %195 = vector.broadcast %194 : vector<1x256xf32> to vector<6x256xf32>
    %196 = arith.mulf %192, %195 : vector<6x256xf32>
    %c222_i32 = arith.constant 222 : i32
    %197 = tpu.dynamic_rotate %1 by %c222_i32 dim 1 : vector<6x256xf32>, i32 -> vector<6x256xf32>
    %c40 = arith.constant 40 : index
    %c0_81 = arith.constant 0 : index
    %c0_82 = arith.constant 0 : index
    %198 = vector.load %arg2[%c40, %c0_81, %c0_82] : memref<49x1x256xf32, #tpu.memory_space<vmem>>, vector<1x1x256xf32>
    %199 = vector.shape_cast %198 : vector<1x1x256xf32> to vector<1x256xf32>
    %200 = vector.broadcast %199 : vector<1x256xf32> to vector<6x256xf32>
    %201 = arith.mulf %197, %200 : vector<6x256xf32>
    %c221_i32 = arith.constant 221 : i32
    %202 = tpu.dynamic_rotate %1 by %c221_i32 dim 1 : vector<6x256xf32>, i32 -> vector<6x256xf32>
    %c41 = arith.constant 41 : index
    %c0_83 = arith.constant 0 : index
    %c0_84 = arith.constant 0 : index
    %203 = vector.load %arg2[%c41, %c0_83, %c0_84] : memref<49x1x256xf32, #tpu.memory_space<vmem>>, vector<1x1x256xf32>
    %204 = vector.shape_cast %203 : vector<1x1x256xf32> to vector<1x256xf32>
    %205 = vector.broadcast %204 : vector<1x256xf32> to vector<6x256xf32>
    %206 = arith.mulf %202, %205 : vector<6x256xf32>
    %c211_i32 = arith.constant 211 : i32
    %207 = tpu.dynamic_rotate %1 by %c211_i32 dim 1 : vector<6x256xf32>, i32 -> vector<6x256xf32>
    %c42 = arith.constant 42 : index
    %c0_85 = arith.constant 0 : index
    %c0_86 = arith.constant 0 : index
    %208 = vector.load %arg2[%c42, %c0_85, %c0_86] : memref<49x1x256xf32, #tpu.memory_space<vmem>>, vector<1x1x256xf32>
    %209 = vector.shape_cast %208 : vector<1x1x256xf32> to vector<1x256xf32>
    %210 = vector.broadcast %209 : vector<1x256xf32> to vector<6x256xf32>
    %211 = arith.mulf %207, %210 : vector<6x256xf32>
    %c210_i32 = arith.constant 210 : i32
    %212 = tpu.dynamic_rotate %1 by %c210_i32 dim 1 : vector<6x256xf32>, i32 -> vector<6x256xf32>
    %c43 = arith.constant 43 : index
    %c0_87 = arith.constant 0 : index
    %c0_88 = arith.constant 0 : index
    %213 = vector.load %arg2[%c43, %c0_87, %c0_88] : memref<49x1x256xf32, #tpu.memory_space<vmem>>, vector<1x1x256xf32>
    %214 = vector.shape_cast %213 : vector<1x1x256xf32> to vector<1x256xf32>
    %215 = vector.broadcast %214 : vector<1x256xf32> to vector<6x256xf32>
    %216 = arith.mulf %212, %215 : vector<6x256xf32>
    %c209_i32 = arith.constant 209 : i32
    %217 = tpu.dynamic_rotate %1 by %c209_i32 dim 1 : vector<6x256xf32>, i32 -> vector<6x256xf32>
    %c44 = arith.constant 44 : index
    %c0_89 = arith.constant 0 : index
    %c0_90 = arith.constant 0 : index
    %218 = vector.load %arg2[%c44, %c0_89, %c0_90] : memref<49x1x256xf32, #tpu.memory_space<vmem>>, vector<1x1x256xf32>
    %219 = vector.shape_cast %218 : vector<1x1x256xf32> to vector<1x256xf32>
    %220 = vector.broadcast %219 : vector<1x256xf32> to vector<6x256xf32>
    %221 = arith.mulf %217, %220 : vector<6x256xf32>
    %c208_i32 = arith.constant 208 : i32
    %222 = tpu.dynamic_rotate %1 by %c208_i32 dim 1 : vector<6x256xf32>, i32 -> vector<6x256xf32>
    %c45 = arith.constant 45 : index
    %c0_91 = arith.constant 0 : index
    %c0_92 = arith.constant 0 : index
    %223 = vector.load %arg2[%c45, %c0_91, %c0_92] : memref<49x1x256xf32, #tpu.memory_space<vmem>>, vector<1x1x256xf32>
    %224 = vector.shape_cast %223 : vector<1x1x256xf32> to vector<1x256xf32>
    %225 = vector.broadcast %224 : vector<1x256xf32> to vector<6x256xf32>
    %226 = arith.mulf %222, %225 : vector<6x256xf32>
    %c207_i32 = arith.constant 207 : i32
    %227 = tpu.dynamic_rotate %1 by %c207_i32 dim 1 : vector<6x256xf32>, i32 -> vector<6x256xf32>
    %c46 = arith.constant 46 : index
    %c0_93 = arith.constant 0 : index
    %c0_94 = arith.constant 0 : index
    %228 = vector.load %arg2[%c46, %c0_93, %c0_94] : memref<49x1x256xf32, #tpu.memory_space<vmem>>, vector<1x1x256xf32>
    %229 = vector.shape_cast %228 : vector<1x1x256xf32> to vector<1x256xf32>
    %230 = vector.broadcast %229 : vector<1x256xf32> to vector<6x256xf32>
    %231 = arith.mulf %227, %230 : vector<6x256xf32>
    %c206_i32 = arith.constant 206 : i32
    %232 = tpu.dynamic_rotate %1 by %c206_i32 dim 1 : vector<6x256xf32>, i32 -> vector<6x256xf32>
    %c47 = arith.constant 47 : index
    %c0_95 = arith.constant 0 : index
    %c0_96 = arith.constant 0 : index
    %233 = vector.load %arg2[%c47, %c0_95, %c0_96] : memref<49x1x256xf32, #tpu.memory_space<vmem>>, vector<1x1x256xf32>
    %234 = vector.shape_cast %233 : vector<1x1x256xf32> to vector<1x256xf32>
    %235 = vector.broadcast %234 : vector<1x256xf32> to vector<6x256xf32>
    %236 = arith.mulf %232, %235 : vector<6x256xf32>
    %c205_i32 = arith.constant 205 : i32
    %237 = tpu.dynamic_rotate %1 by %c205_i32 dim 1 : vector<6x256xf32>, i32 -> vector<6x256xf32>
    %c48 = arith.constant 48 : index
    %c0_97 = arith.constant 0 : index
    %c0_98 = arith.constant 0 : index
    %238 = vector.load %arg2[%c48, %c0_97, %c0_98] : memref<49x1x256xf32, #tpu.memory_space<vmem>>, vector<1x1x256xf32>
    %239 = vector.shape_cast %238 : vector<1x1x256xf32> to vector<1x256xf32>
    %240 = vector.broadcast %239 : vector<1x256xf32> to vector<6x256xf32>
    %241 = arith.mulf %237, %240 : vector<6x256xf32>
    %c0_99 = arith.constant 0 : index
    %c0_100 = arith.constant 0 : index
    %c0_101 = arith.constant 0 : index
    %242 = vector.load %arg3[%c0_99, %c0_100, %c0_101] : memref<9x6x6xf32, #tpu.memory_space<vmem>>, vector<1x6x6xf32>
    %243 = vector.shape_cast %242 : vector<1x6x6xf32> to vector<6x6xf32>
    %cst = arith.constant dense<0.000000e+00> : vector<6x256xf32>
    %244 = tpu.matmul %243, %86, %cst {dimension_numbers = #tpu.dot_dimension_numbers<[1], [0], [0], [1], [0, 0, 1, 1], [], []>} : vector<6x6xf32>, vector<6x256xf32>, vector<6x256xf32> -> vector<6x256xf32>
    %c1_102 = arith.constant 1 : index
    %c0_103 = arith.constant 0 : index
    %c0_104 = arith.constant 0 : index
    %245 = vector.load %arg3[%c1_102, %c0_103, %c0_104] : memref<9x6x6xf32, #tpu.memory_space<vmem>>, vector<1x6x6xf32>
    %246 = vector.shape_cast %245 : vector<1x6x6xf32> to vector<6x6xf32>
    %cst_105 = arith.constant dense<0.000000e+00> : vector<6x256xf32>
    %247 = tpu.matmul %246, %91, %cst_105 {dimension_numbers = #tpu.dot_dimension_numbers<[1], [0], [0], [1], [0, 0, 1, 1], [], []>} : vector<6x6xf32>, vector<6x256xf32>, vector<6x256xf32> -> vector<6x256xf32>
    %248 = arith.addf %244, %247 : vector<6x256xf32>
    %c2_106 = arith.constant 2 : index
    %c0_107 = arith.constant 0 : index
    %c0_108 = arith.constant 0 : index
    %249 = vector.load %arg3[%c2_106, %c0_107, %c0_108] : memref<9x6x6xf32, #tpu.memory_space<vmem>>, vector<1x6x6xf32>
    %250 = vector.shape_cast %249 : vector<1x6x6xf32> to vector<6x6xf32>
    %cst_109 = arith.constant dense<0.000000e+00> : vector<6x256xf32>
    %251 = tpu.matmul %250, %96, %cst_109 {dimension_numbers = #tpu.dot_dimension_numbers<[1], [0], [0], [1], [0, 0, 1, 1], [], []>} : vector<6x6xf32>, vector<6x256xf32>, vector<6x256xf32> -> vector<6x256xf32>
    %252 = arith.addf %248, %251 : vector<6x256xf32>
    %c3_110 = arith.constant 3 : index
    %c0_111 = arith.constant 0 : index
    %c0_112 = arith.constant 0 : index
    %253 = vector.load %arg3[%c3_110, %c0_111, %c0_112] : memref<9x6x6xf32, #tpu.memory_space<vmem>>, vector<1x6x6xf32>
    %254 = vector.shape_cast %253 : vector<1x6x6xf32> to vector<6x6xf32>
    %cst_113 = arith.constant dense<0.000000e+00> : vector<6x256xf32>
    %255 = tpu.matmul %254, %121, %cst_113 {dimension_numbers = #tpu.dot_dimension_numbers<[1], [0], [0], [1], [0, 0, 1, 1], [], []>} : vector<6x6xf32>, vector<6x256xf32>, vector<6x256xf32> -> vector<6x256xf32>
    %256 = arith.addf %252, %255 : vector<6x256xf32>
    %c4_114 = arith.constant 4 : index
    %c0_115 = arith.constant 0 : index
    %c0_116 = arith.constant 0 : index
    %257 = vector.load %arg3[%c4_114, %c0_115, %c0_116] : memref<9x6x6xf32, #tpu.memory_space<vmem>>, vector<1x6x6xf32>
    %258 = vector.shape_cast %257 : vector<1x6x6xf32> to vector<6x6xf32>
    %cst_117 = arith.constant dense<0.000000e+00> : vector<6x256xf32>
    %259 = tpu.matmul %258, %1, %cst_117 {dimension_numbers = #tpu.dot_dimension_numbers<[1], [0], [0], [1], [0, 0, 1, 1], [], []>} : vector<6x6xf32>, vector<6x256xf32>, vector<6x256xf32> -> vector<6x256xf32>
    %260 = arith.addf %256, %259 : vector<6x256xf32>
    %c5_118 = arith.constant 5 : index
    %c0_119 = arith.constant 0 : index
    %c0_120 = arith.constant 0 : index
    %261 = vector.load %arg3[%c5_118, %c0_119, %c0_120] : memref<9x6x6xf32, #tpu.memory_space<vmem>>, vector<1x6x6xf32>
    %262 = vector.shape_cast %261 : vector<1x6x6xf32> to vector<6x6xf32>
    %cst_121 = arith.constant dense<0.000000e+00> : vector<6x256xf32>
    %263 = tpu.matmul %262, %126, %cst_121 {dimension_numbers = #tpu.dot_dimension_numbers<[1], [0], [0], [1], [0, 0, 1, 1], [], []>} : vector<6x6xf32>, vector<6x256xf32>, vector<6x256xf32> -> vector<6x256xf32>
    %264 = arith.addf %260, %263 : vector<6x256xf32>
    %c6_122 = arith.constant 6 : index
    %c0_123 = arith.constant 0 : index
    %c0_124 = arith.constant 0 : index
    %265 = vector.load %arg3[%c6_122, %c0_123, %c0_124] : memref<9x6x6xf32, #tpu.memory_space<vmem>>, vector<1x6x6xf32>
    %266 = vector.shape_cast %265 : vector<1x6x6xf32> to vector<6x6xf32>
    %cst_125 = arith.constant dense<0.000000e+00> : vector<6x256xf32>
    %267 = tpu.matmul %266, %151, %cst_125 {dimension_numbers = #tpu.dot_dimension_numbers<[1], [0], [0], [1], [0, 0, 1, 1], [], []>} : vector<6x6xf32>, vector<6x256xf32>, vector<6x256xf32> -> vector<6x256xf32>
    %268 = arith.addf %264, %267 : vector<6x256xf32>
    %c7_126 = arith.constant 7 : index
    %c0_127 = arith.constant 0 : index
    %c0_128 = arith.constant 0 : index
    %269 = vector.load %arg3[%c7_126, %c0_127, %c0_128] : memref<9x6x6xf32, #tpu.memory_space<vmem>>, vector<1x6x6xf32>
    %270 = vector.shape_cast %269 : vector<1x6x6xf32> to vector<6x6xf32>
    %cst_129 = arith.constant dense<0.000000e+00> : vector<6x256xf32>
    %271 = tpu.matmul %270, %156, %cst_129 {dimension_numbers = #tpu.dot_dimension_numbers<[1], [0], [0], [1], [0, 0, 1, 1], [], []>} : vector<6x6xf32>, vector<6x256xf32>, vector<6x256xf32> -> vector<6x256xf32>
    %272 = arith.addf %268, %271 : vector<6x256xf32>
    %c8_130 = arith.constant 8 : index
    %c0_131 = arith.constant 0 : index
    %c0_132 = arith.constant 0 : index
    %273 = vector.load %arg3[%c8_130, %c0_131, %c0_132] : memref<9x6x6xf32, #tpu.memory_space<vmem>>, vector<1x6x6xf32>
    %274 = vector.shape_cast %273 : vector<1x6x6xf32> to vector<6x6xf32>
    %cst_133 = arith.constant dense<0.000000e+00> : vector<6x256xf32>
    %275 = tpu.matmul %274, %161, %cst_133 {dimension_numbers = #tpu.dot_dimension_numbers<[1], [0], [0], [1], [0, 0, 1, 1], [], []>} : vector<6x6xf32>, vector<6x256xf32>, vector<6x256xf32> -> vector<6x256xf32>
    %276 = arith.addf %272, %275 : vector<6x256xf32>
    %c0_134 = arith.constant 0 : index
    %c0_135 = arith.constant 0 : index
    %277 = vector.load %arg4[%c0_134, %c0_135] : memref<6x1xf32, #tpu.memory_space<vmem>>, vector<6x1xf32>
    %278 = vector.broadcast %277 : vector<6x1xf32> to vector<6x256xf32>
    %279 = arith.addf %276, %278 : vector<6x256xf32>
    %cst_136 = arith.constant 0.000000e+00 : f32
    %280 = vector.broadcast %cst_136 : f32 to vector<6x256xf32>
    %281 = arith.cmpf oge, %279, %280 : vector<6x256xf32>
    %cst_137 = arith.constant 2.000000e-01 : f32
    %282 = vector.broadcast %cst_137 : f32 to vector<6x256xf32>
    %283 = arith.mulf %282, %279 : vector<6x256xf32>
    %284 = arith.select %281, %279, %283 : vector<6x256xi1>, vector<6x256xf32>
    %c17_i32_138 = arith.constant 17 : i32
    %285 = tpu.dynamic_rotate %284 by %c17_i32_138 dim 1 : vector<6x256xf32>, i32 -> vector<6x256xf32>
    %c16_139 = arith.constant 16 : index
    %c0_140 = arith.constant 0 : index
    %c0_141 = arith.constant 0 : index
    %286 = vector.load %arg2[%c16_139, %c0_140, %c0_141] : memref<49x1x256xf32, #tpu.memory_space<vmem>>, vector<1x1x256xf32>
    %287 = vector.shape_cast %286 : vector<1x1x256xf32> to vector<1x256xf32>
    %288 = vector.broadcast %287 : vector<1x256xf32> to vector<6x256xf32>
    %289 = arith.mulf %285, %288 : vector<6x256xf32>
    %c16_i32_142 = arith.constant 16 : i32
    %290 = tpu.dynamic_rotate %284 by %c16_i32_142 dim 1 : vector<6x256xf32>, i32 -> vector<6x256xf32>
    %c17_143 = arith.constant 17 : index
    %c0_144 = arith.constant 0 : index
    %c0_145 = arith.constant 0 : index
    %291 = vector.load %arg2[%c17_143, %c0_144, %c0_145] : memref<49x1x256xf32, #tpu.memory_space<vmem>>, vector<1x1x256xf32>
    %292 = vector.shape_cast %291 : vector<1x1x256xf32> to vector<1x256xf32>
    %293 = vector.broadcast %292 : vector<1x256xf32> to vector<6x256xf32>
    %294 = arith.mulf %290, %293 : vector<6x256xf32>
    %c15_i32_146 = arith.constant 15 : i32
    %295 = tpu.dynamic_rotate %284 by %c15_i32_146 dim 1 : vector<6x256xf32>, i32 -> vector<6x256xf32>
    %c18_147 = arith.constant 18 : index
    %c0_148 = arith.constant 0 : index
    %c0_149 = arith.constant 0 : index
    %296 = vector.load %arg2[%c18_147, %c0_148, %c0_149] : memref<49x1x256xf32, #tpu.memory_space<vmem>>, vector<1x1x256xf32>
    %297 = vector.shape_cast %296 : vector<1x1x256xf32> to vector<1x256xf32>
    %298 = vector.broadcast %297 : vector<1x256xf32> to vector<6x256xf32>
    %299 = arith.mulf %295, %298 : vector<6x256xf32>
    %c1_i32_150 = arith.constant 1 : i32
    %300 = tpu.dynamic_rotate %284 by %c1_i32_150 dim 1 : vector<6x256xf32>, i32 -> vector<6x256xf32>
    %c23_151 = arith.constant 23 : index
    %c0_152 = arith.constant 0 : index
    %c0_153 = arith.constant 0 : index
    %301 = vector.load %arg2[%c23_151, %c0_152, %c0_153] : memref<49x1x256xf32, #tpu.memory_space<vmem>>, vector<1x1x256xf32>
    %302 = vector.shape_cast %301 : vector<1x1x256xf32> to vector<1x256xf32>
    %303 = vector.broadcast %302 : vector<1x256xf32> to vector<6x256xf32>
    %304 = arith.mulf %300, %303 : vector<6x256xf32>
    %c255_i32_154 = arith.constant 255 : i32
    %305 = tpu.dynamic_rotate %284 by %c255_i32_154 dim 1 : vector<6x256xf32>, i32 -> vector<6x256xf32>
    %c25_155 = arith.constant 25 : index
    %c0_156 = arith.constant 0 : index
    %c0_157 = arith.constant 0 : index
    %306 = vector.load %arg2[%c25_155, %c0_156, %c0_157] : memref<49x1x256xf32, #tpu.memory_space<vmem>>, vector<1x1x256xf32>
    %307 = vector.shape_cast %306 : vector<1x1x256xf32> to vector<1x256xf32>
    %308 = vector.broadcast %307 : vector<1x256xf32> to vector<6x256xf32>
    %309 = arith.mulf %305, %308 : vector<6x256xf32>
    %c241_i32_158 = arith.constant 241 : i32
    %310 = tpu.dynamic_rotate %284 by %c241_i32_158 dim 1 : vector<6x256xf32>, i32 -> vector<6x256xf32>
    %c30_159 = arith.constant 30 : index
    %c0_160 = arith.constant 0 : index
    %c0_161 = arith.constant 0 : index
    %311 = vector.load %arg2[%c30_159, %c0_160, %c0_161] : memref<49x1x256xf32, #tpu.memory_space<vmem>>, vector<1x1x256xf32>
    %312 = vector.shape_cast %311 : vector<1x1x256xf32> to vector<1x256xf32>
    %313 = vector.broadcast %312 : vector<1x256xf32> to vector<6x256xf32>
    %314 = arith.mulf %310, %313 : vector<6x256xf32>
    %c240_i32_162 = arith.constant 240 : i32
    %315 = tpu.dynamic_rotate %284 by %c240_i32_162 dim 1 : vector<6x256xf32>, i32 -> vector<6x256xf32>
    %c31_163 = arith.constant 31 : index
    %c0_164 = arith.constant 0 : index
    %c0_165 = arith.constant 0 : index
    %316 = vector.load %arg2[%c31_163, %c0_164, %c0_165] : memref<49x1x256xf32, #tpu.memory_space<vmem>>, vector<1x1x256xf32>
    %317 = vector.shape_cast %316 : vector<1x1x256xf32> to vector<1x256xf32>
    %318 = vector.broadcast %317 : vector<1x256xf32> to vector<6x256xf32>
    %319 = arith.mulf %315, %318 : vector<6x256xf32>
    %c239_i32_166 = arith.constant 239 : i32
    %320 = tpu.dynamic_rotate %284 by %c239_i32_166 dim 1 : vector<6x256xf32>, i32 -> vector<6x256xf32>
    %c32_167 = arith.constant 32 : index
    %c0_168 = arith.constant 0 : index
    %c0_169 = arith.constant 0 : index
    %321 = vector.load %arg2[%c32_167, %c0_168, %c0_169] : memref<49x1x256xf32, #tpu.memory_space<vmem>>, vector<1x1x256xf32>
    %322 = vector.shape_cast %321 : vector<1x1x256xf32> to vector<1x256xf32>
    %323 = vector.broadcast %322 : vector<1x256xf32> to vector<6x256xf32>
    %324 = arith.mulf %320, %323 : vector<6x256xf32>
    %c0_170 = arith.constant 0 : index
    %c0_171 = arith.constant 0 : index
    %c0_172 = arith.constant 0 : index
    %325 = vector.load %arg5[%c0_170, %c0_171, %c0_172] : memref<9x6x6xf32, #tpu.memory_space<vmem>>, vector<1x6x6xf32>
    %326 = vector.shape_cast %325 : vector<1x6x6xf32> to vector<6x6xf32>
    %cst_173 = arith.constant dense<0.000000e+00> : vector<6x256xf32>
    %327 = tpu.matmul %326, %289, %cst_173 {dimension_numbers = #tpu.dot_dimension_numbers<[1], [0], [0], [1], [0, 0, 1, 1], [], []>} : vector<6x6xf32>, vector<6x256xf32>, vector<6x256xf32> -> vector<6x256xf32>
    %c1_174 = arith.constant 1 : index
    %c0_175 = arith.constant 0 : index
    %c0_176 = arith.constant 0 : index
    %328 = vector.load %arg5[%c1_174, %c0_175, %c0_176] : memref<9x6x6xf32, #tpu.memory_space<vmem>>, vector<1x6x6xf32>
    %329 = vector.shape_cast %328 : vector<1x6x6xf32> to vector<6x6xf32>
    %cst_177 = arith.constant dense<0.000000e+00> : vector<6x256xf32>
    %330 = tpu.matmul %329, %294, %cst_177 {dimension_numbers = #tpu.dot_dimension_numbers<[1], [0], [0], [1], [0, 0, 1, 1], [], []>} : vector<6x6xf32>, vector<6x256xf32>, vector<6x256xf32> -> vector<6x256xf32>
    %331 = arith.addf %327, %330 : vector<6x256xf32>
    %c2_178 = arith.constant 2 : index
    %c0_179 = arith.constant 0 : index
    %c0_180 = arith.constant 0 : index
    %332 = vector.load %arg5[%c2_178, %c0_179, %c0_180] : memref<9x6x6xf32, #tpu.memory_space<vmem>>, vector<1x6x6xf32>
    %333 = vector.shape_cast %332 : vector<1x6x6xf32> to vector<6x6xf32>
    %cst_181 = arith.constant dense<0.000000e+00> : vector<6x256xf32>
    %334 = tpu.matmul %333, %299, %cst_181 {dimension_numbers = #tpu.dot_dimension_numbers<[1], [0], [0], [1], [0, 0, 1, 1], [], []>} : vector<6x6xf32>, vector<6x256xf32>, vector<6x256xf32> -> vector<6x256xf32>
    %335 = arith.addf %331, %334 : vector<6x256xf32>
    %c3_182 = arith.constant 3 : index
    %c0_183 = arith.constant 0 : index
    %c0_184 = arith.constant 0 : index
    %336 = vector.load %arg5[%c3_182, %c0_183, %c0_184] : memref<9x6x6xf32, #tpu.memory_space<vmem>>, vector<1x6x6xf32>
    %337 = vector.shape_cast %336 : vector<1x6x6xf32> to vector<6x6xf32>
    %cst_185 = arith.constant dense<0.000000e+00> : vector<6x256xf32>
    %338 = tpu.matmul %337, %304, %cst_185 {dimension_numbers = #tpu.dot_dimension_numbers<[1], [0], [0], [1], [0, 0, 1, 1], [], []>} : vector<6x6xf32>, vector<6x256xf32>, vector<6x256xf32> -> vector<6x256xf32>
    %339 = arith.addf %335, %338 : vector<6x256xf32>
    %c4_186 = arith.constant 4 : index
    %c0_187 = arith.constant 0 : index
    %c0_188 = arith.constant 0 : index
    %340 = vector.load %arg5[%c4_186, %c0_187, %c0_188] : memref<9x6x6xf32, #tpu.memory_space<vmem>>, vector<1x6x6xf32>
    %341 = vector.shape_cast %340 : vector<1x6x6xf32> to vector<6x6xf32>
    %cst_189 = arith.constant dense<0.000000e+00> : vector<6x256xf32>
    %342 = tpu.matmul %341, %284, %cst_189 {dimension_numbers = #tpu.dot_dimension_numbers<[1], [0], [0], [1], [0, 0, 1, 1], [], []>} : vector<6x6xf32>, vector<6x256xf32>, vector<6x256xf32> -> vector<6x256xf32>
    %343 = arith.addf %339, %342 : vector<6x256xf32>
    %c5_190 = arith.constant 5 : index
    %c0_191 = arith.constant 0 : index
    %c0_192 = arith.constant 0 : index
    %344 = vector.load %arg5[%c5_190, %c0_191, %c0_192] : memref<9x6x6xf32, #tpu.memory_space<vmem>>, vector<1x6x6xf32>
    %345 = vector.shape_cast %344 : vector<1x6x6xf32> to vector<6x6xf32>
    %cst_193 = arith.constant dense<0.000000e+00> : vector<6x256xf32>
    %346 = tpu.matmul %345, %309, %cst_193 {dimension_numbers = #tpu.dot_dimension_numbers<[1], [0], [0], [1], [0, 0, 1, 1], [], []>} : vector<6x6xf32>, vector<6x256xf32>, vector<6x256xf32> -> vector<6x256xf32>
    %347 = arith.addf %343, %346 : vector<6x256xf32>
    %c6_194 = arith.constant 6 : index
    %c0_195 = arith.constant 0 : index
    %c0_196 = arith.constant 0 : index
    %348 = vector.load %arg5[%c6_194, %c0_195, %c0_196] : memref<9x6x6xf32, #tpu.memory_space<vmem>>, vector<1x6x6xf32>
    %349 = vector.shape_cast %348 : vector<1x6x6xf32> to vector<6x6xf32>
    %cst_197 = arith.constant dense<0.000000e+00> : vector<6x256xf32>
    %350 = tpu.matmul %349, %314, %cst_197 {dimension_numbers = #tpu.dot_dimension_numbers<[1], [0], [0], [1], [0, 0, 1, 1], [], []>} : vector<6x6xf32>, vector<6x256xf32>, vector<6x256xf32> -> vector<6x256xf32>
    %351 = arith.addf %347, %350 : vector<6x256xf32>
    %c7_198 = arith.constant 7 : index
    %c0_199 = arith.constant 0 : index
    %c0_200 = arith.constant 0 : index
    %352 = vector.load %arg5[%c7_198, %c0_199, %c0_200] : memref<9x6x6xf32, #tpu.memory_space<vmem>>, vector<1x6x6xf32>
    %353 = vector.shape_cast %352 : vector<1x6x6xf32> to vector<6x6xf32>
    %cst_201 = arith.constant dense<0.000000e+00> : vector<6x256xf32>
    %354 = tpu.matmul %353, %319, %cst_201 {dimension_numbers = #tpu.dot_dimension_numbers<[1], [0], [0], [1], [0, 0, 1, 1], [], []>} : vector<6x6xf32>, vector<6x256xf32>, vector<6x256xf32> -> vector<6x256xf32>
    %355 = arith.addf %351, %354 : vector<6x256xf32>
    %c8_202 = arith.constant 8 : index
    %c0_203 = arith.constant 0 : index
    %c0_204 = arith.constant 0 : index
    %356 = vector.load %arg5[%c8_202, %c0_203, %c0_204] : memref<9x6x6xf32, #tpu.memory_space<vmem>>, vector<1x6x6xf32>
    %357 = vector.shape_cast %356 : vector<1x6x6xf32> to vector<6x6xf32>
    %cst_205 = arith.constant dense<0.000000e+00> : vector<6x256xf32>
    %358 = tpu.matmul %357, %324, %cst_205 {dimension_numbers = #tpu.dot_dimension_numbers<[1], [0], [0], [1], [0, 0, 1, 1], [], []>} : vector<6x6xf32>, vector<6x256xf32>, vector<6x256xf32> -> vector<6x256xf32>
    %359 = arith.addf %355, %358 : vector<6x256xf32>
    %c0_206 = arith.constant 0 : index
    %c0_207 = arith.constant 0 : index
    %360 = vector.load %arg6[%c0_206, %c0_207] : memref<6x1xf32, #tpu.memory_space<vmem>>, vector<6x1xf32>
    %361 = vector.broadcast %360 : vector<6x1xf32> to vector<6x256xf32>
    %362 = arith.addf %359, %361 : vector<6x256xf32>
    %363 = arith.addf %362, %1 : vector<6x256xf32>
    %cst_208 = arith.constant 0.000000e+00 : f32
    %364 = vector.broadcast %cst_208 : f32 to vector<6x256xf32>
    %365 = arith.cmpf oge, %363, %364 : vector<6x256xf32>
    %cst_209 = arith.constant 2.000000e-01 : f32
    %366 = vector.broadcast %cst_209 : f32 to vector<6x256xf32>
    %367 = arith.mulf %366, %363 : vector<6x256xf32>
    %368 = arith.select %365, %363, %367 : vector<6x256xi1>, vector<6x256xf32>
    %c0_210 = arith.constant 0 : index
    %c0_211 = arith.constant 0 : index
    %c0_212 = arith.constant 0 : index
    %369 = vector.load %arg7[%c0_210, %c0_211, %c0_212] : memref<25x6x6xf32, #tpu.memory_space<vmem>>, vector<1x6x6xf32>
    %370 = vector.shape_cast %369 : vector<1x6x6xf32> to vector<6x6xf32>
    %cst_213 = arith.constant dense<0.000000e+00> : vector<6x256xf32>
    %371 = tpu.matmul %370, %46, %cst_213 {dimension_numbers = #tpu.dot_dimension_numbers<[1], [0], [0], [1], [0, 0, 1, 1], [], []>} : vector<6x6xf32>, vector<6x256xf32>, vector<6x256xf32> -> vector<6x256xf32>
    %c1_214 = arith.constant 1 : index
    %c0_215 = arith.constant 0 : index
    %c0_216 = arith.constant 0 : index
    %372 = vector.load %arg7[%c1_214, %c0_215, %c0_216] : memref<25x6x6xf32, #tpu.memory_space<vmem>>, vector<1x6x6xf32>
    %373 = vector.shape_cast %372 : vector<1x6x6xf32> to vector<6x6xf32>
    %cst_217 = arith.constant dense<0.000000e+00> : vector<6x256xf32>
    %374 = tpu.matmul %373, %51, %cst_217 {dimension_numbers = #tpu.dot_dimension_numbers<[1], [0], [0], [1], [0, 0, 1, 1], [], []>} : vector<6x6xf32>, vector<6x256xf32>, vector<6x256xf32> -> vector<6x256xf32>
    %375 = arith.addf %371, %374 : vector<6x256xf32>
    %c2_218 = arith.constant 2 : index
    %c0_219 = arith.constant 0 : index
    %c0_220 = arith.constant 0 : index
    %376 = vector.load %arg7[%c2_218, %c0_219, %c0_220] : memref<25x6x6xf32, #tpu.memory_space<vmem>>, vector<1x6x6xf32>
    %377 = vector.shape_cast %376 : vector<1x6x6xf32> to vector<6x6xf32>
    %cst_221 = arith.constant dense<0.000000e+00> : vector<6x256xf32>
    %378 = tpu.matmul %377, %56, %cst_221 {dimension_numbers = #tpu.dot_dimension_numbers<[1], [0], [0], [1], [0, 0, 1, 1], [], []>} : vector<6x6xf32>, vector<6x256xf32>, vector<6x256xf32> -> vector<6x256xf32>
    %379 = arith.addf %375, %378 : vector<6x256xf32>
    %c3_222 = arith.constant 3 : index
    %c0_223 = arith.constant 0 : index
    %c0_224 = arith.constant 0 : index
    %380 = vector.load %arg7[%c3_222, %c0_223, %c0_224] : memref<25x6x6xf32, #tpu.memory_space<vmem>>, vector<1x6x6xf32>
    %381 = vector.shape_cast %380 : vector<1x6x6xf32> to vector<6x6xf32>
    %cst_225 = arith.constant dense<0.000000e+00> : vector<6x256xf32>
    %382 = tpu.matmul %381, %61, %cst_225 {dimension_numbers = #tpu.dot_dimension_numbers<[1], [0], [0], [1], [0, 0, 1, 1], [], []>} : vector<6x6xf32>, vector<6x256xf32>, vector<6x256xf32> -> vector<6x256xf32>
    %383 = arith.addf %379, %382 : vector<6x256xf32>
    %c4_226 = arith.constant 4 : index
    %c0_227 = arith.constant 0 : index
    %c0_228 = arith.constant 0 : index
    %384 = vector.load %arg7[%c4_226, %c0_227, %c0_228] : memref<25x6x6xf32, #tpu.memory_space<vmem>>, vector<1x6x6xf32>
    %385 = vector.shape_cast %384 : vector<1x6x6xf32> to vector<6x6xf32>
    %cst_229 = arith.constant dense<0.000000e+00> : vector<6x256xf32>
    %386 = tpu.matmul %385, %66, %cst_229 {dimension_numbers = #tpu.dot_dimension_numbers<[1], [0], [0], [1], [0, 0, 1, 1], [], []>} : vector<6x6xf32>, vector<6x256xf32>, vector<6x256xf32> -> vector<6x256xf32>
    %387 = arith.addf %383, %386 : vector<6x256xf32>
    %c5_230 = arith.constant 5 : index
    %c0_231 = arith.constant 0 : index
    %c0_232 = arith.constant 0 : index
    %388 = vector.load %arg7[%c5_230, %c0_231, %c0_232] : memref<25x6x6xf32, #tpu.memory_space<vmem>>, vector<1x6x6xf32>
    %389 = vector.shape_cast %388 : vector<1x6x6xf32> to vector<6x6xf32>
    %cst_233 = arith.constant dense<0.000000e+00> : vector<6x256xf32>
    %390 = tpu.matmul %389, %81, %cst_233 {dimension_numbers = #tpu.dot_dimension_numbers<[1], [0], [0], [1], [0, 0, 1, 1], [], []>} : vector<6x6xf32>, vector<6x256xf32>, vector<6x256xf32> -> vector<6x256xf32>
    %391 = arith.addf %387, %390 : vector<6x256xf32>
    %c6_234 = arith.constant 6 : index
    %c0_235 = arith.constant 0 : index
    %c0_236 = arith.constant 0 : index
    %392 = vector.load %arg7[%c6_234, %c0_235, %c0_236] : memref<25x6x6xf32, #tpu.memory_space<vmem>>, vector<1x6x6xf32>
    %393 = vector.shape_cast %392 : vector<1x6x6xf32> to vector<6x6xf32>
    %cst_237 = arith.constant dense<0.000000e+00> : vector<6x256xf32>
    %394 = tpu.matmul %393, %86, %cst_237 {dimension_numbers = #tpu.dot_dimension_numbers<[1], [0], [0], [1], [0, 0, 1, 1], [], []>} : vector<6x6xf32>, vector<6x256xf32>, vector<6x256xf32> -> vector<6x256xf32>
    %395 = arith.addf %391, %394 : vector<6x256xf32>
    %c7_238 = arith.constant 7 : index
    %c0_239 = arith.constant 0 : index
    %c0_240 = arith.constant 0 : index
    %396 = vector.load %arg7[%c7_238, %c0_239, %c0_240] : memref<25x6x6xf32, #tpu.memory_space<vmem>>, vector<1x6x6xf32>
    %397 = vector.shape_cast %396 : vector<1x6x6xf32> to vector<6x6xf32>
    %cst_241 = arith.constant dense<0.000000e+00> : vector<6x256xf32>
    %398 = tpu.matmul %397, %91, %cst_241 {dimension_numbers = #tpu.dot_dimension_numbers<[1], [0], [0], [1], [0, 0, 1, 1], [], []>} : vector<6x6xf32>, vector<6x256xf32>, vector<6x256xf32> -> vector<6x256xf32>
    %399 = arith.addf %395, %398 : vector<6x256xf32>
    %c8_242 = arith.constant 8 : index
    %c0_243 = arith.constant 0 : index
    %c0_244 = arith.constant 0 : index
    %400 = vector.load %arg7[%c8_242, %c0_243, %c0_244] : memref<25x6x6xf32, #tpu.memory_space<vmem>>, vector<1x6x6xf32>
    %401 = vector.shape_cast %400 : vector<1x6x6xf32> to vector<6x6xf32>
    %cst_245 = arith.constant dense<0.000000e+00> : vector<6x256xf32>
    %402 = tpu.matmul %401, %96, %cst_245 {dimension_numbers = #tpu.dot_dimension_numbers<[1], [0], [0], [1], [0, 0, 1, 1], [], []>} : vector<6x6xf32>, vector<6x256xf32>, vector<6x256xf32> -> vector<6x256xf32>
    %403 = arith.addf %399, %402 : vector<6x256xf32>
    %c9_246 = arith.constant 9 : index
    %c0_247 = arith.constant 0 : index
    %c0_248 = arith.constant 0 : index
    %404 = vector.load %arg7[%c9_246, %c0_247, %c0_248] : memref<25x6x6xf32, #tpu.memory_space<vmem>>, vector<1x6x6xf32>
    %405 = vector.shape_cast %404 : vector<1x6x6xf32> to vector<6x6xf32>
    %cst_249 = arith.constant dense<0.000000e+00> : vector<6x256xf32>
    %406 = tpu.matmul %405, %101, %cst_249 {dimension_numbers = #tpu.dot_dimension_numbers<[1], [0], [0], [1], [0, 0, 1, 1], [], []>} : vector<6x6xf32>, vector<6x256xf32>, vector<6x256xf32> -> vector<6x256xf32>
    %407 = arith.addf %403, %406 : vector<6x256xf32>
    %c10_250 = arith.constant 10 : index
    %c0_251 = arith.constant 0 : index
    %c0_252 = arith.constant 0 : index
    %408 = vector.load %arg7[%c10_250, %c0_251, %c0_252] : memref<25x6x6xf32, #tpu.memory_space<vmem>>, vector<1x6x6xf32>
    %409 = vector.shape_cast %408 : vector<1x6x6xf32> to vector<6x6xf32>
    %cst_253 = arith.constant dense<0.000000e+00> : vector<6x256xf32>
    %410 = tpu.matmul %409, %116, %cst_253 {dimension_numbers = #tpu.dot_dimension_numbers<[1], [0], [0], [1], [0, 0, 1, 1], [], []>} : vector<6x6xf32>, vector<6x256xf32>, vector<6x256xf32> -> vector<6x256xf32>
    %411 = arith.addf %407, %410 : vector<6x256xf32>
    %c11_254 = arith.constant 11 : index
    %c0_255 = arith.constant 0 : index
    %c0_256 = arith.constant 0 : index
    %412 = vector.load %arg7[%c11_254, %c0_255, %c0_256] : memref<25x6x6xf32, #tpu.memory_space<vmem>>, vector<1x6x6xf32>
    %413 = vector.shape_cast %412 : vector<1x6x6xf32> to vector<6x6xf32>
    %cst_257 = arith.constant dense<0.000000e+00> : vector<6x256xf32>
    %414 = tpu.matmul %413, %121, %cst_257 {dimension_numbers = #tpu.dot_dimension_numbers<[1], [0], [0], [1], [0, 0, 1, 1], [], []>} : vector<6x6xf32>, vector<6x256xf32>, vector<6x256xf32> -> vector<6x256xf32>
    %415 = arith.addf %411, %414 : vector<6x256xf32>
    %c12_258 = arith.constant 12 : index
    %c0_259 = arith.constant 0 : index
    %c0_260 = arith.constant 0 : index
    %416 = vector.load %arg7[%c12_258, %c0_259, %c0_260] : memref<25x6x6xf32, #tpu.memory_space<vmem>>, vector<1x6x6xf32>
    %417 = vector.shape_cast %416 : vector<1x6x6xf32> to vector<6x6xf32>
    %cst_261 = arith.constant dense<0.000000e+00> : vector<6x256xf32>
    %418 = tpu.matmul %417, %1, %cst_261 {dimension_numbers = #tpu.dot_dimension_numbers<[1], [0], [0], [1], [0, 0, 1, 1], [], []>} : vector<6x6xf32>, vector<6x256xf32>, vector<6x256xf32> -> vector<6x256xf32>
    %419 = arith.addf %415, %418 : vector<6x256xf32>
    %c13_262 = arith.constant 13 : index
    %c0_263 = arith.constant 0 : index
    %c0_264 = arith.constant 0 : index
    %420 = vector.load %arg7[%c13_262, %c0_263, %c0_264] : memref<25x6x6xf32, #tpu.memory_space<vmem>>, vector<1x6x6xf32>
    %421 = vector.shape_cast %420 : vector<1x6x6xf32> to vector<6x6xf32>
    %cst_265 = arith.constant dense<0.000000e+00> : vector<6x256xf32>
    %422 = tpu.matmul %421, %126, %cst_265 {dimension_numbers = #tpu.dot_dimension_numbers<[1], [0], [0], [1], [0, 0, 1, 1], [], []>} : vector<6x6xf32>, vector<6x256xf32>, vector<6x256xf32> -> vector<6x256xf32>
    %423 = arith.addf %419, %422 : vector<6x256xf32>
    %c14_266 = arith.constant 14 : index
    %c0_267 = arith.constant 0 : index
    %c0_268 = arith.constant 0 : index
    %424 = vector.load %arg7[%c14_266, %c0_267, %c0_268] : memref<25x6x6xf32, #tpu.memory_space<vmem>>, vector<1x6x6xf32>
    %425 = vector.shape_cast %424 : vector<1x6x6xf32> to vector<6x6xf32>
    %cst_269 = arith.constant dense<0.000000e+00> : vector<6x256xf32>
    %426 = tpu.matmul %425, %131, %cst_269 {dimension_numbers = #tpu.dot_dimension_numbers<[1], [0], [0], [1], [0, 0, 1, 1], [], []>} : vector<6x6xf32>, vector<6x256xf32>, vector<6x256xf32> -> vector<6x256xf32>
    %427 = arith.addf %423, %426 : vector<6x256xf32>
    %c15_270 = arith.constant 15 : index
    %c0_271 = arith.constant 0 : index
    %c0_272 = arith.constant 0 : index
    %428 = vector.load %arg7[%c15_270, %c0_271, %c0_272] : memref<25x6x6xf32, #tpu.memory_space<vmem>>, vector<1x6x6xf32>
    %429 = vector.shape_cast %428 : vector<1x6x6xf32> to vector<6x6xf32>
    %cst_273 = arith.constant dense<0.000000e+00> : vector<6x256xf32>
    %430 = tpu.matmul %429, %146, %cst_273 {dimension_numbers = #tpu.dot_dimension_numbers<[1], [0], [0], [1], [0, 0, 1, 1], [], []>} : vector<6x6xf32>, vector<6x256xf32>, vector<6x256xf32> -> vector<6x256xf32>
    %431 = arith.addf %427, %430 : vector<6x256xf32>
    %c16_274 = arith.constant 16 : index
    %c0_275 = arith.constant 0 : index
    %c0_276 = arith.constant 0 : index
    %432 = vector.load %arg7[%c16_274, %c0_275, %c0_276] : memref<25x6x6xf32, #tpu.memory_space<vmem>>, vector<1x6x6xf32>
    %433 = vector.shape_cast %432 : vector<1x6x6xf32> to vector<6x6xf32>
    %cst_277 = arith.constant dense<0.000000e+00> : vector<6x256xf32>
    %434 = tpu.matmul %433, %151, %cst_277 {dimension_numbers = #tpu.dot_dimension_numbers<[1], [0], [0], [1], [0, 0, 1, 1], [], []>} : vector<6x6xf32>, vector<6x256xf32>, vector<6x256xf32> -> vector<6x256xf32>
    %435 = arith.addf %431, %434 : vector<6x256xf32>
    %c17_278 = arith.constant 17 : index
    %c0_279 = arith.constant 0 : index
    %c0_280 = arith.constant 0 : index
    %436 = vector.load %arg7[%c17_278, %c0_279, %c0_280] : memref<25x6x6xf32, #tpu.memory_space<vmem>>, vector<1x6x6xf32>
    %437 = vector.shape_cast %436 : vector<1x6x6xf32> to vector<6x6xf32>
    %cst_281 = arith.constant dense<0.000000e+00> : vector<6x256xf32>
    %438 = tpu.matmul %437, %156, %cst_281 {dimension_numbers = #tpu.dot_dimension_numbers<[1], [0], [0], [1], [0, 0, 1, 1], [], []>} : vector<6x6xf32>, vector<6x256xf32>, vector<6x256xf32> -> vector<6x256xf32>
    %439 = arith.addf %435, %438 : vector<6x256xf32>
    %c18_282 = arith.constant 18 : index
    %c0_283 = arith.constant 0 : index
    %c0_284 = arith.constant 0 : index
    %440 = vector.load %arg7[%c18_282, %c0_283, %c0_284] : memref<25x6x6xf32, #tpu.memory_space<vmem>>, vector<1x6x6xf32>
    %441 = vector.shape_cast %440 : vector<1x6x6xf32> to vector<6x6xf32>
    %cst_285 = arith.constant dense<0.000000e+00> : vector<6x256xf32>
    %442 = tpu.matmul %441, %161, %cst_285 {dimension_numbers = #tpu.dot_dimension_numbers<[1], [0], [0], [1], [0, 0, 1, 1], [], []>} : vector<6x6xf32>, vector<6x256xf32>, vector<6x256xf32> -> vector<6x256xf32>
    %443 = arith.addf %439, %442 : vector<6x256xf32>
    %c19_286 = arith.constant 19 : index
    %c0_287 = arith.constant 0 : index
    %c0_288 = arith.constant 0 : index
    %444 = vector.load %arg7[%c19_286, %c0_287, %c0_288] : memref<25x6x6xf32, #tpu.memory_space<vmem>>, vector<1x6x6xf32>
    %445 = vector.shape_cast %444 : vector<1x6x6xf32> to vector<6x6xf32>
    %cst_289 = arith.constant dense<0.000000e+00> : vector<6x256xf32>
    %446 = tpu.matmul %445, %166, %cst_289 {dimension_numbers = #tpu.dot_dimension_numbers<[1], [0], [0], [1], [0, 0, 1, 1], [], []>} : vector<6x6xf32>, vector<6x256xf32>, vector<6x256xf32> -> vector<6x256xf32>
    %447 = arith.addf %443, %446 : vector<6x256xf32>
    %c20_290 = arith.constant 20 : index
    %c0_291 = arith.constant 0 : index
    %c0_292 = arith.constant 0 : index
    %448 = vector.load %arg7[%c20_290, %c0_291, %c0_292] : memref<25x6x6xf32, #tpu.memory_space<vmem>>, vector<1x6x6xf32>
    %449 = vector.shape_cast %448 : vector<1x6x6xf32> to vector<6x6xf32>
    %cst_293 = arith.constant dense<0.000000e+00> : vector<6x256xf32>
    %450 = tpu.matmul %449, %181, %cst_293 {dimension_numbers = #tpu.dot_dimension_numbers<[1], [0], [0], [1], [0, 0, 1, 1], [], []>} : vector<6x6xf32>, vector<6x256xf32>, vector<6x256xf32> -> vector<6x256xf32>
    %451 = arith.addf %447, %450 : vector<6x256xf32>
    %c21_294 = arith.constant 21 : index
    %c0_295 = arith.constant 0 : index
    %c0_296 = arith.constant 0 : index
    %452 = vector.load %arg7[%c21_294, %c0_295, %c0_296] : memref<25x6x6xf32, #tpu.memory_space<vmem>>, vector<1x6x6xf32>
    %453 = vector.shape_cast %452 : vector<1x6x6xf32> to vector<6x6xf32>
    %cst_297 = arith.constant dense<0.000000e+00> : vector<6x256xf32>
    %454 = tpu.matmul %453, %186, %cst_297 {dimension_numbers = #tpu.dot_dimension_numbers<[1], [0], [0], [1], [0, 0, 1, 1], [], []>} : vector<6x6xf32>, vector<6x256xf32>, vector<6x256xf32> -> vector<6x256xf32>
    %455 = arith.addf %451, %454 : vector<6x256xf32>
    %c22_298 = arith.constant 22 : index
    %c0_299 = arith.constant 0 : index
    %c0_300 = arith.constant 0 : index
    %456 = vector.load %arg7[%c22_298, %c0_299, %c0_300] : memref<25x6x6xf32, #tpu.memory_space<vmem>>, vector<1x6x6xf32>
    %457 = vector.shape_cast %456 : vector<1x6x6xf32> to vector<6x6xf32>
    %cst_301 = arith.constant dense<0.000000e+00> : vector<6x256xf32>
    %458 = tpu.matmul %457, %191, %cst_301 {dimension_numbers = #tpu.dot_dimension_numbers<[1], [0], [0], [1], [0, 0, 1, 1], [], []>} : vector<6x6xf32>, vector<6x256xf32>, vector<6x256xf32> -> vector<6x256xf32>
    %459 = arith.addf %455, %458 : vector<6x256xf32>
    %c23_302 = arith.constant 23 : index
    %c0_303 = arith.constant 0 : index
    %c0_304 = arith.constant 0 : index
    %460 = vector.load %arg7[%c23_302, %c0_303, %c0_304] : memref<25x6x6xf32, #tpu.memory_space<vmem>>, vector<1x6x6xf32>
    %461 = vector.shape_cast %460 : vector<1x6x6xf32> to vector<6x6xf32>
    %cst_305 = arith.constant dense<0.000000e+00> : vector<6x256xf32>
    %462 = tpu.matmul %461, %196, %cst_305 {dimension_numbers = #tpu.dot_dimension_numbers<[1], [0], [0], [1], [0, 0, 1, 1], [], []>} : vector<6x6xf32>, vector<6x256xf32>, vector<6x256xf32> -> vector<6x256xf32>
    %463 = arith.addf %459, %462 : vector<6x256xf32>
    %c24 = arith.constant 24 : index
    %c0_306 = arith.constant 0 : index
    %c0_307 = arith.constant 0 : index
    %464 = vector.load %arg7[%c24, %c0_306, %c0_307] : memref<25x6x6xf32, #tpu.memory_space<vmem>>, vector<1x6x6xf32>
    %465 = vector.shape_cast %464 : vector<1x6x6xf32> to vector<6x6xf32>
    %cst_308 = arith.constant dense<0.000000e+00> : vector<6x256xf32>
    %466 = tpu.matmul %465, %201, %cst_308 {dimension_numbers = #tpu.dot_dimension_numbers<[1], [0], [0], [1], [0, 0, 1, 1], [], []>} : vector<6x6xf32>, vector<6x256xf32>, vector<6x256xf32> -> vector<6x256xf32>
    %467 = arith.addf %463, %466 : vector<6x256xf32>
    %c0_309 = arith.constant 0 : index
    %c0_310 = arith.constant 0 : index
    %468 = vector.load %arg8[%c0_309, %c0_310] : memref<6x1xf32, #tpu.memory_space<vmem>>, vector<6x1xf32>
    %469 = vector.broadcast %468 : vector<6x1xf32> to vector<6x256xf32>
    %470 = arith.addf %467, %469 : vector<6x256xf32>
    %cst_311 = arith.constant 0.000000e+00 : f32
    %471 = vector.broadcast %cst_311 : f32 to vector<6x256xf32>
    %472 = arith.cmpf oge, %470, %471 : vector<6x256xf32>
    %cst_312 = arith.constant 2.000000e-01 : f32
    %473 = vector.broadcast %cst_312 : f32 to vector<6x256xf32>
    %474 = arith.mulf %473, %470 : vector<6x256xf32>
    %475 = arith.select %472, %470, %474 : vector<6x256xi1>, vector<6x256xf32>
    %c17_i32_313 = arith.constant 17 : i32
    %476 = tpu.dynamic_rotate %475 by %c17_i32_313 dim 1 : vector<6x256xf32>, i32 -> vector<6x256xf32>
    %c16_314 = arith.constant 16 : index
    %c0_315 = arith.constant 0 : index
    %c0_316 = arith.constant 0 : index
    %477 = vector.load %arg2[%c16_314, %c0_315, %c0_316] : memref<49x1x256xf32, #tpu.memory_space<vmem>>, vector<1x1x256xf32>
    %478 = vector.shape_cast %477 : vector<1x1x256xf32> to vector<1x256xf32>
    %479 = vector.broadcast %478 : vector<1x256xf32> to vector<6x256xf32>
    %480 = arith.mulf %476, %479 : vector<6x256xf32>
    %c16_i32_317 = arith.constant 16 : i32
    %481 = tpu.dynamic_rotate %475 by %c16_i32_317 dim 1 : vector<6x256xf32>, i32 -> vector<6x256xf32>
    %c17_318 = arith.constant 17 : index
    %c0_319 = arith.constant 0 : index
    %c0_320 = arith.constant 0 : index
    %482 = vector.load %arg2[%c17_318, %c0_319, %c0_320] : memref<49x1x256xf32, #tpu.memory_space<vmem>>, vector<1x1x256xf32>
    %483 = vector.shape_cast %482 : vector<1x1x256xf32> to vector<1x256xf32>
    %484 = vector.broadcast %483 : vector<1x256xf32> to vector<6x256xf32>
    %485 = arith.mulf %481, %484 : vector<6x256xf32>
    %c15_i32_321 = arith.constant 15 : i32
    %486 = tpu.dynamic_rotate %475 by %c15_i32_321 dim 1 : vector<6x256xf32>, i32 -> vector<6x256xf32>
    %c18_322 = arith.constant 18 : index
    %c0_323 = arith.constant 0 : index
    %c0_324 = arith.constant 0 : index
    %487 = vector.load %arg2[%c18_322, %c0_323, %c0_324] : memref<49x1x256xf32, #tpu.memory_space<vmem>>, vector<1x1x256xf32>
    %488 = vector.shape_cast %487 : vector<1x1x256xf32> to vector<1x256xf32>
    %489 = vector.broadcast %488 : vector<1x256xf32> to vector<6x256xf32>
    %490 = arith.mulf %486, %489 : vector<6x256xf32>
    %c1_i32_325 = arith.constant 1 : i32
    %491 = tpu.dynamic_rotate %475 by %c1_i32_325 dim 1 : vector<6x256xf32>, i32 -> vector<6x256xf32>
    %c23_326 = arith.constant 23 : index
    %c0_327 = arith.constant 0 : index
    %c0_328 = arith.constant 0 : index
    %492 = vector.load %arg2[%c23_326, %c0_327, %c0_328] : memref<49x1x256xf32, #tpu.memory_space<vmem>>, vector<1x1x256xf32>
    %493 = vector.shape_cast %492 : vector<1x1x256xf32> to vector<1x256xf32>
    %494 = vector.broadcast %493 : vector<1x256xf32> to vector<6x256xf32>
    %495 = arith.mulf %491, %494 : vector<6x256xf32>
    %c255_i32_329 = arith.constant 255 : i32
    %496 = tpu.dynamic_rotate %475 by %c255_i32_329 dim 1 : vector<6x256xf32>, i32 -> vector<6x256xf32>
    %c25_330 = arith.constant 25 : index
    %c0_331 = arith.constant 0 : index
    %c0_332 = arith.constant 0 : index
    %497 = vector.load %arg2[%c25_330, %c0_331, %c0_332] : memref<49x1x256xf32, #tpu.memory_space<vmem>>, vector<1x1x256xf32>
    %498 = vector.shape_cast %497 : vector<1x1x256xf32> to vector<1x256xf32>
    %499 = vector.broadcast %498 : vector<1x256xf32> to vector<6x256xf32>
    %500 = arith.mulf %496, %499 : vector<6x256xf32>
    %c241_i32_333 = arith.constant 241 : i32
    %501 = tpu.dynamic_rotate %475 by %c241_i32_333 dim 1 : vector<6x256xf32>, i32 -> vector<6x256xf32>
    %c30_334 = arith.constant 30 : index
    %c0_335 = arith.constant 0 : index
    %c0_336 = arith.constant 0 : index
    %502 = vector.load %arg2[%c30_334, %c0_335, %c0_336] : memref<49x1x256xf32, #tpu.memory_space<vmem>>, vector<1x1x256xf32>
    %503 = vector.shape_cast %502 : vector<1x1x256xf32> to vector<1x256xf32>
    %504 = vector.broadcast %503 : vector<1x256xf32> to vector<6x256xf32>
    %505 = arith.mulf %501, %504 : vector<6x256xf32>
    %c240_i32_337 = arith.constant 240 : i32
    %506 = tpu.dynamic_rotate %475 by %c240_i32_337 dim 1 : vector<6x256xf32>, i32 -> vector<6x256xf32>
    %c31_338 = arith.constant 31 : index
    %c0_339 = arith.constant 0 : index
    %c0_340 = arith.constant 0 : index
    %507 = vector.load %arg2[%c31_338, %c0_339, %c0_340] : memref<49x1x256xf32, #tpu.memory_space<vmem>>, vector<1x1x256xf32>
    %508 = vector.shape_cast %507 : vector<1x1x256xf32> to vector<1x256xf32>
    %509 = vector.broadcast %508 : vector<1x256xf32> to vector<6x256xf32>
    %510 = arith.mulf %506, %509 : vector<6x256xf32>
    %c239_i32_341 = arith.constant 239 : i32
    %511 = tpu.dynamic_rotate %475 by %c239_i32_341 dim 1 : vector<6x256xf32>, i32 -> vector<6x256xf32>
    %c32_342 = arith.constant 32 : index
    %c0_343 = arith.constant 0 : index
    %c0_344 = arith.constant 0 : index
    %512 = vector.load %arg2[%c32_342, %c0_343, %c0_344] : memref<49x1x256xf32, #tpu.memory_space<vmem>>, vector<1x1x256xf32>
    %513 = vector.shape_cast %512 : vector<1x1x256xf32> to vector<1x256xf32>
    %514 = vector.broadcast %513 : vector<1x256xf32> to vector<6x256xf32>
    %515 = arith.mulf %511, %514 : vector<6x256xf32>
    %c0_345 = arith.constant 0 : index
    %c0_346 = arith.constant 0 : index
    %c0_347 = arith.constant 0 : index
    %516 = vector.load %arg9[%c0_345, %c0_346, %c0_347] : memref<9x6x6xf32, #tpu.memory_space<vmem>>, vector<1x6x6xf32>
    %517 = vector.shape_cast %516 : vector<1x6x6xf32> to vector<6x6xf32>
    %cst_348 = arith.constant dense<0.000000e+00> : vector<6x256xf32>
    %518 = tpu.matmul %517, %480, %cst_348 {dimension_numbers = #tpu.dot_dimension_numbers<[1], [0], [0], [1], [0, 0, 1, 1], [], []>} : vector<6x6xf32>, vector<6x256xf32>, vector<6x256xf32> -> vector<6x256xf32>
    %c1_349 = arith.constant 1 : index
    %c0_350 = arith.constant 0 : index
    %c0_351 = arith.constant 0 : index
    %519 = vector.load %arg9[%c1_349, %c0_350, %c0_351] : memref<9x6x6xf32, #tpu.memory_space<vmem>>, vector<1x6x6xf32>
    %520 = vector.shape_cast %519 : vector<1x6x6xf32> to vector<6x6xf32>
    %cst_352 = arith.constant dense<0.000000e+00> : vector<6x256xf32>
    %521 = tpu.matmul %520, %485, %cst_352 {dimension_numbers = #tpu.dot_dimension_numbers<[1], [0], [0], [1], [0, 0, 1, 1], [], []>} : vector<6x6xf32>, vector<6x256xf32>, vector<6x256xf32> -> vector<6x256xf32>
    %522 = arith.addf %518, %521 : vector<6x256xf32>
    %c2_353 = arith.constant 2 : index
    %c0_354 = arith.constant 0 : index
    %c0_355 = arith.constant 0 : index
    %523 = vector.load %arg9[%c2_353, %c0_354, %c0_355] : memref<9x6x6xf32, #tpu.memory_space<vmem>>, vector<1x6x6xf32>
    %524 = vector.shape_cast %523 : vector<1x6x6xf32> to vector<6x6xf32>
    %cst_356 = arith.constant dense<0.000000e+00> : vector<6x256xf32>
    %525 = tpu.matmul %524, %490, %cst_356 {dimension_numbers = #tpu.dot_dimension_numbers<[1], [0], [0], [1], [0, 0, 1, 1], [], []>} : vector<6x6xf32>, vector<6x256xf32>, vector<6x256xf32> -> vector<6x256xf32>
    %526 = arith.addf %522, %525 : vector<6x256xf32>
    %c3_357 = arith.constant 3 : index
    %c0_358 = arith.constant 0 : index
    %c0_359 = arith.constant 0 : index
    %527 = vector.load %arg9[%c3_357, %c0_358, %c0_359] : memref<9x6x6xf32, #tpu.memory_space<vmem>>, vector<1x6x6xf32>
    %528 = vector.shape_cast %527 : vector<1x6x6xf32> to vector<6x6xf32>
    %cst_360 = arith.constant dense<0.000000e+00> : vector<6x256xf32>
    %529 = tpu.matmul %528, %495, %cst_360 {dimension_numbers = #tpu.dot_dimension_numbers<[1], [0], [0], [1], [0, 0, 1, 1], [], []>} : vector<6x6xf32>, vector<6x256xf32>, vector<6x256xf32> -> vector<6x256xf32>
    %530 = arith.addf %526, %529 : vector<6x256xf32>
    %c4_361 = arith.constant 4 : index
    %c0_362 = arith.constant 0 : index
    %c0_363 = arith.constant 0 : index
    %531 = vector.load %arg9[%c4_361, %c0_362, %c0_363] : memref<9x6x6xf32, #tpu.memory_space<vmem>>, vector<1x6x6xf32>
    %532 = vector.shape_cast %531 : vector<1x6x6xf32> to vector<6x6xf32>
    %cst_364 = arith.constant dense<0.000000e+00> : vector<6x256xf32>
    %533 = tpu.matmul %532, %475, %cst_364 {dimension_numbers = #tpu.dot_dimension_numbers<[1], [0], [0], [1], [0, 0, 1, 1], [], []>} : vector<6x6xf32>, vector<6x256xf32>, vector<6x256xf32> -> vector<6x256xf32>
    %534 = arith.addf %530, %533 : vector<6x256xf32>
    %c5_365 = arith.constant 5 : index
    %c0_366 = arith.constant 0 : index
    %c0_367 = arith.constant 0 : index
    %535 = vector.load %arg9[%c5_365, %c0_366, %c0_367] : memref<9x6x6xf32, #tpu.memory_space<vmem>>, vector<1x6x6xf32>
    %536 = vector.shape_cast %535 : vector<1x6x6xf32> to vector<6x6xf32>
    %cst_368 = arith.constant dense<0.000000e+00> : vector<6x256xf32>
    %537 = tpu.matmul %536, %500, %cst_368 {dimension_numbers = #tpu.dot_dimension_numbers<[1], [0], [0], [1], [0, 0, 1, 1], [], []>} : vector<6x6xf32>, vector<6x256xf32>, vector<6x256xf32> -> vector<6x256xf32>
    %538 = arith.addf %534, %537 : vector<6x256xf32>
    %c6_369 = arith.constant 6 : index
    %c0_370 = arith.constant 0 : index
    %c0_371 = arith.constant 0 : index
    %539 = vector.load %arg9[%c6_369, %c0_370, %c0_371] : memref<9x6x6xf32, #tpu.memory_space<vmem>>, vector<1x6x6xf32>
    %540 = vector.shape_cast %539 : vector<1x6x6xf32> to vector<6x6xf32>
    %cst_372 = arith.constant dense<0.000000e+00> : vector<6x256xf32>
    %541 = tpu.matmul %540, %505, %cst_372 {dimension_numbers = #tpu.dot_dimension_numbers<[1], [0], [0], [1], [0, 0, 1, 1], [], []>} : vector<6x6xf32>, vector<6x256xf32>, vector<6x256xf32> -> vector<6x256xf32>
    %542 = arith.addf %538, %541 : vector<6x256xf32>
    %c7_373 = arith.constant 7 : index
    %c0_374 = arith.constant 0 : index
    %c0_375 = arith.constant 0 : index
    %543 = vector.load %arg9[%c7_373, %c0_374, %c0_375] : memref<9x6x6xf32, #tpu.memory_space<vmem>>, vector<1x6x6xf32>
    %544 = vector.shape_cast %543 : vector<1x6x6xf32> to vector<6x6xf32>
    %cst_376 = arith.constant dense<0.000000e+00> : vector<6x256xf32>
    %545 = tpu.matmul %544, %510, %cst_376 {dimension_numbers = #tpu.dot_dimension_numbers<[1], [0], [0], [1], [0, 0, 1, 1], [], []>} : vector<6x6xf32>, vector<6x256xf32>, vector<6x256xf32> -> vector<6x256xf32>
    %546 = arith.addf %542, %545 : vector<6x256xf32>
    %c8_377 = arith.constant 8 : index
    %c0_378 = arith.constant 0 : index
    %c0_379 = arith.constant 0 : index
    %547 = vector.load %arg9[%c8_377, %c0_378, %c0_379] : memref<9x6x6xf32, #tpu.memory_space<vmem>>, vector<1x6x6xf32>
    %548 = vector.shape_cast %547 : vector<1x6x6xf32> to vector<6x6xf32>
    %cst_380 = arith.constant dense<0.000000e+00> : vector<6x256xf32>
    %549 = tpu.matmul %548, %515, %cst_380 {dimension_numbers = #tpu.dot_dimension_numbers<[1], [0], [0], [1], [0, 0, 1, 1], [], []>} : vector<6x6xf32>, vector<6x256xf32>, vector<6x256xf32> -> vector<6x256xf32>
    %550 = arith.addf %546, %549 : vector<6x256xf32>
    %c0_381 = arith.constant 0 : index
    %c0_382 = arith.constant 0 : index
    %551 = vector.load %arg10[%c0_381, %c0_382] : memref<6x1xf32, #tpu.memory_space<vmem>>, vector<6x1xf32>
    %552 = vector.broadcast %551 : vector<6x1xf32> to vector<6x256xf32>
    %553 = arith.addf %550, %552 : vector<6x256xf32>
    %554 = arith.addf %553, %1 : vector<6x256xf32>
    %cst_383 = arith.constant 0.000000e+00 : f32
    %555 = vector.broadcast %cst_383 : f32 to vector<6x256xf32>
    %556 = arith.cmpf oge, %554, %555 : vector<6x256xf32>
    %cst_384 = arith.constant 2.000000e-01 : f32
    %557 = vector.broadcast %cst_384 : f32 to vector<6x256xf32>
    %558 = arith.mulf %557, %554 : vector<6x256xf32>
    %559 = arith.select %556, %554, %558 : vector<6x256xi1>, vector<6x256xf32>
    %c0_385 = arith.constant 0 : index
    %c0_386 = arith.constant 0 : index
    %c0_387 = arith.constant 0 : index
    %560 = vector.load %arg11[%c0_385, %c0_386, %c0_387] : memref<49x6x6xf32, #tpu.memory_space<vmem>>, vector<1x6x6xf32>
    %561 = vector.shape_cast %560 : vector<1x6x6xf32> to vector<6x6xf32>
    %cst_388 = arith.constant dense<0.000000e+00> : vector<6x256xf32>
    %562 = tpu.matmul %561, %6, %cst_388 {dimension_numbers = #tpu.dot_dimension_numbers<[1], [0], [0], [1], [0, 0, 1, 1], [], []>} : vector<6x6xf32>, vector<6x256xf32>, vector<6x256xf32> -> vector<6x256xf32>
    %c1_389 = arith.constant 1 : index
    %c0_390 = arith.constant 0 : index
    %c0_391 = arith.constant 0 : index
    %563 = vector.load %arg11[%c1_389, %c0_390, %c0_391] : memref<49x6x6xf32, #tpu.memory_space<vmem>>, vector<1x6x6xf32>
    %564 = vector.shape_cast %563 : vector<1x6x6xf32> to vector<6x6xf32>
    %cst_392 = arith.constant dense<0.000000e+00> : vector<6x256xf32>
    %565 = tpu.matmul %564, %11, %cst_392 {dimension_numbers = #tpu.dot_dimension_numbers<[1], [0], [0], [1], [0, 0, 1, 1], [], []>} : vector<6x6xf32>, vector<6x256xf32>, vector<6x256xf32> -> vector<6x256xf32>
    %566 = arith.addf %562, %565 : vector<6x256xf32>
    %c2_393 = arith.constant 2 : index
    %c0_394 = arith.constant 0 : index
    %c0_395 = arith.constant 0 : index
    %567 = vector.load %arg11[%c2_393, %c0_394, %c0_395] : memref<49x6x6xf32, #tpu.memory_space<vmem>>, vector<1x6x6xf32>
    %568 = vector.shape_cast %567 : vector<1x6x6xf32> to vector<6x6xf32>
    %cst_396 = arith.constant dense<0.000000e+00> : vector<6x256xf32>
    %569 = tpu.matmul %568, %16, %cst_396 {dimension_numbers = #tpu.dot_dimension_numbers<[1], [0], [0], [1], [0, 0, 1, 1], [], []>} : vector<6x6xf32>, vector<6x256xf32>, vector<6x256xf32> -> vector<6x256xf32>
    %570 = arith.addf %566, %569 : vector<6x256xf32>
    %c3_397 = arith.constant 3 : index
    %c0_398 = arith.constant 0 : index
    %c0_399 = arith.constant 0 : index
    %571 = vector.load %arg11[%c3_397, %c0_398, %c0_399] : memref<49x6x6xf32, #tpu.memory_space<vmem>>, vector<1x6x6xf32>
    %572 = vector.shape_cast %571 : vector<1x6x6xf32> to vector<6x6xf32>
    %cst_400 = arith.constant dense<0.000000e+00> : vector<6x256xf32>
    %573 = tpu.matmul %572, %21, %cst_400 {dimension_numbers = #tpu.dot_dimension_numbers<[1], [0], [0], [1], [0, 0, 1, 1], [], []>} : vector<6x6xf32>, vector<6x256xf32>, vector<6x256xf32> -> vector<6x256xf32>
    %574 = arith.addf %570, %573 : vector<6x256xf32>
    %c4_401 = arith.constant 4 : index
    %c0_402 = arith.constant 0 : index
    %c0_403 = arith.constant 0 : index
    %575 = vector.load %arg11[%c4_401, %c0_402, %c0_403] : memref<49x6x6xf32, #tpu.memory_space<vmem>>, vector<1x6x6xf32>
    %576 = vector.shape_cast %575 : vector<1x6x6xf32> to vector<6x6xf32>
    %cst_404 = arith.constant dense<0.000000e+00> : vector<6x256xf32>
    %577 = tpu.matmul %576, %26, %cst_404 {dimension_numbers = #tpu.dot_dimension_numbers<[1], [0], [0], [1], [0, 0, 1, 1], [], []>} : vector<6x6xf32>, vector<6x256xf32>, vector<6x256xf32> -> vector<6x256xf32>
    %578 = arith.addf %574, %577 : vector<6x256xf32>
    %c5_405 = arith.constant 5 : index
    %c0_406 = arith.constant 0 : index
    %c0_407 = arith.constant 0 : index
    %579 = vector.load %arg11[%c5_405, %c0_406, %c0_407] : memref<49x6x6xf32, #tpu.memory_space<vmem>>, vector<1x6x6xf32>
    %580 = vector.shape_cast %579 : vector<1x6x6xf32> to vector<6x6xf32>
    %cst_408 = arith.constant dense<0.000000e+00> : vector<6x256xf32>
    %581 = tpu.matmul %580, %31, %cst_408 {dimension_numbers = #tpu.dot_dimension_numbers<[1], [0], [0], [1], [0, 0, 1, 1], [], []>} : vector<6x6xf32>, vector<6x256xf32>, vector<6x256xf32> -> vector<6x256xf32>
    %582 = arith.addf %578, %581 : vector<6x256xf32>
    %c6_409 = arith.constant 6 : index
    %c0_410 = arith.constant 0 : index
    %c0_411 = arith.constant 0 : index
    %583 = vector.load %arg11[%c6_409, %c0_410, %c0_411] : memref<49x6x6xf32, #tpu.memory_space<vmem>>, vector<1x6x6xf32>
    %584 = vector.shape_cast %583 : vector<1x6x6xf32> to vector<6x6xf32>
    %cst_412 = arith.constant dense<0.000000e+00> : vector<6x256xf32>
    %585 = tpu.matmul %584, %36, %cst_412 {dimension_numbers = #tpu.dot_dimension_numbers<[1], [0], [0], [1], [0, 0, 1, 1], [], []>} : vector<6x6xf32>, vector<6x256xf32>, vector<6x256xf32> -> vector<6x256xf32>
    %586 = arith.addf %582, %585 : vector<6x256xf32>
    %c7_413 = arith.constant 7 : index
    %c0_414 = arith.constant 0 : index
    %c0_415 = arith.constant 0 : index
    %587 = vector.load %arg11[%c7_413, %c0_414, %c0_415] : memref<49x6x6xf32, #tpu.memory_space<vmem>>, vector<1x6x6xf32>
    %588 = vector.shape_cast %587 : vector<1x6x6xf32> to vector<6x6xf32>
    %cst_416 = arith.constant dense<0.000000e+00> : vector<6x256xf32>
    %589 = tpu.matmul %588, %41, %cst_416 {dimension_numbers = #tpu.dot_dimension_numbers<[1], [0], [0], [1], [0, 0, 1, 1], [], []>} : vector<6x6xf32>, vector<6x256xf32>, vector<6x256xf32> -> vector<6x256xf32>
    %590 = arith.addf %586, %589 : vector<6x256xf32>
    %c8_417 = arith.constant 8 : index
    %c0_418 = arith.constant 0 : index
    %c0_419 = arith.constant 0 : index
    %591 = vector.load %arg11[%c8_417, %c0_418, %c0_419] : memref<49x6x6xf32, #tpu.memory_space<vmem>>, vector<1x6x6xf32>
    %592 = vector.shape_cast %591 : vector<1x6x6xf32> to vector<6x6xf32>
    %cst_420 = arith.constant dense<0.000000e+00> : vector<6x256xf32>
    %593 = tpu.matmul %592, %46, %cst_420 {dimension_numbers = #tpu.dot_dimension_numbers<[1], [0], [0], [1], [0, 0, 1, 1], [], []>} : vector<6x6xf32>, vector<6x256xf32>, vector<6x256xf32> -> vector<6x256xf32>
    %594 = arith.addf %590, %593 : vector<6x256xf32>
    %c9_421 = arith.constant 9 : index
    %c0_422 = arith.constant 0 : index
    %c0_423 = arith.constant 0 : index
    %595 = vector.load %arg11[%c9_421, %c0_422, %c0_423] : memref<49x6x6xf32, #tpu.memory_space<vmem>>, vector<1x6x6xf32>
    %596 = vector.shape_cast %595 : vector<1x6x6xf32> to vector<6x6xf32>
    %cst_424 = arith.constant dense<0.000000e+00> : vector<6x256xf32>
    %597 = tpu.matmul %596, %51, %cst_424 {dimension_numbers = #tpu.dot_dimension_numbers<[1], [0], [0], [1], [0, 0, 1, 1], [], []>} : vector<6x6xf32>, vector<6x256xf32>, vector<6x256xf32> -> vector<6x256xf32>
    %598 = arith.addf %594, %597 : vector<6x256xf32>
    %c10_425 = arith.constant 10 : index
    %c0_426 = arith.constant 0 : index
    %c0_427 = arith.constant 0 : index
    %599 = vector.load %arg11[%c10_425, %c0_426, %c0_427] : memref<49x6x6xf32, #tpu.memory_space<vmem>>, vector<1x6x6xf32>
    %600 = vector.shape_cast %599 : vector<1x6x6xf32> to vector<6x6xf32>
    %cst_428 = arith.constant dense<0.000000e+00> : vector<6x256xf32>
    %601 = tpu.matmul %600, %56, %cst_428 {dimension_numbers = #tpu.dot_dimension_numbers<[1], [0], [0], [1], [0, 0, 1, 1], [], []>} : vector<6x6xf32>, vector<6x256xf32>, vector<6x256xf32> -> vector<6x256xf32>
    %602 = arith.addf %598, %601 : vector<6x256xf32>
    %c11_429 = arith.constant 11 : index
    %c0_430 = arith.constant 0 : index
    %c0_431 = arith.constant 0 : index
    %603 = vector.load %arg11[%c11_429, %c0_430, %c0_431] : memref<49x6x6xf32, #tpu.memory_space<vmem>>, vector<1x6x6xf32>
    %604 = vector.shape_cast %603 : vector<1x6x6xf32> to vector<6x6xf32>
    %cst_432 = arith.constant dense<0.000000e+00> : vector<6x256xf32>
    %605 = tpu.matmul %604, %61, %cst_432 {dimension_numbers = #tpu.dot_dimension_numbers<[1], [0], [0], [1], [0, 0, 1, 1], [], []>} : vector<6x6xf32>, vector<6x256xf32>, vector<6x256xf32> -> vector<6x256xf32>
    %606 = arith.addf %602, %605 : vector<6x256xf32>
    %c12_433 = arith.constant 12 : index
    %c0_434 = arith.constant 0 : index
    %c0_435 = arith.constant 0 : index
    %607 = vector.load %arg11[%c12_433, %c0_434, %c0_435] : memref<49x6x6xf32, #tpu.memory_space<vmem>>, vector<1x6x6xf32>
    %608 = vector.shape_cast %607 : vector<1x6x6xf32> to vector<6x6xf32>
    %cst_436 = arith.constant dense<0.000000e+00> : vector<6x256xf32>
    %609 = tpu.matmul %608, %66, %cst_436 {dimension_numbers = #tpu.dot_dimension_numbers<[1], [0], [0], [1], [0, 0, 1, 1], [], []>} : vector<6x6xf32>, vector<6x256xf32>, vector<6x256xf32> -> vector<6x256xf32>
    %610 = arith.addf %606, %609 : vector<6x256xf32>
    %c13_437 = arith.constant 13 : index
    %c0_438 = arith.constant 0 : index
    %c0_439 = arith.constant 0 : index
    %611 = vector.load %arg11[%c13_437, %c0_438, %c0_439] : memref<49x6x6xf32, #tpu.memory_space<vmem>>, vector<1x6x6xf32>
    %612 = vector.shape_cast %611 : vector<1x6x6xf32> to vector<6x6xf32>
    %cst_440 = arith.constant dense<0.000000e+00> : vector<6x256xf32>
    %613 = tpu.matmul %612, %71, %cst_440 {dimension_numbers = #tpu.dot_dimension_numbers<[1], [0], [0], [1], [0, 0, 1, 1], [], []>} : vector<6x6xf32>, vector<6x256xf32>, vector<6x256xf32> -> vector<6x256xf32>
    %614 = arith.addf %610, %613 : vector<6x256xf32>
    %c14_441 = arith.constant 14 : index
    %c0_442 = arith.constant 0 : index
    %c0_443 = arith.constant 0 : index
    %615 = vector.load %arg11[%c14_441, %c0_442, %c0_443] : memref<49x6x6xf32, #tpu.memory_space<vmem>>, vector<1x6x6xf32>
    %616 = vector.shape_cast %615 : vector<1x6x6xf32> to vector<6x6xf32>
    %cst_444 = arith.constant dense<0.000000e+00> : vector<6x256xf32>
    %617 = tpu.matmul %616, %76, %cst_444 {dimension_numbers = #tpu.dot_dimension_numbers<[1], [0], [0], [1], [0, 0, 1, 1], [], []>} : vector<6x6xf32>, vector<6x256xf32>, vector<6x256xf32> -> vector<6x256xf32>
    %618 = arith.addf %614, %617 : vector<6x256xf32>
    %c15_445 = arith.constant 15 : index
    %c0_446 = arith.constant 0 : index
    %c0_447 = arith.constant 0 : index
    %619 = vector.load %arg11[%c15_445, %c0_446, %c0_447] : memref<49x6x6xf32, #tpu.memory_space<vmem>>, vector<1x6x6xf32>
    %620 = vector.shape_cast %619 : vector<1x6x6xf32> to vector<6x6xf32>
    %cst_448 = arith.constant dense<0.000000e+00> : vector<6x256xf32>
    %621 = tpu.matmul %620, %81, %cst_448 {dimension_numbers = #tpu.dot_dimension_numbers<[1], [0], [0], [1], [0, 0, 1, 1], [], []>} : vector<6x6xf32>, vector<6x256xf32>, vector<6x256xf32> -> vector<6x256xf32>
    %622 = arith.addf %618, %621 : vector<6x256xf32>
    %c16_449 = arith.constant 16 : index
    %c0_450 = arith.constant 0 : index
    %c0_451 = arith.constant 0 : index
    %623 = vector.load %arg11[%c16_449, %c0_450, %c0_451] : memref<49x6x6xf32, #tpu.memory_space<vmem>>, vector<1x6x6xf32>
    %624 = vector.shape_cast %623 : vector<1x6x6xf32> to vector<6x6xf32>
    %cst_452 = arith.constant dense<0.000000e+00> : vector<6x256xf32>
    %625 = tpu.matmul %624, %86, %cst_452 {dimension_numbers = #tpu.dot_dimension_numbers<[1], [0], [0], [1], [0, 0, 1, 1], [], []>} : vector<6x6xf32>, vector<6x256xf32>, vector<6x256xf32> -> vector<6x256xf32>
    %626 = arith.addf %622, %625 : vector<6x256xf32>
    %c17_453 = arith.constant 17 : index
    %c0_454 = arith.constant 0 : index
    %c0_455 = arith.constant 0 : index
    %627 = vector.load %arg11[%c17_453, %c0_454, %c0_455] : memref<49x6x6xf32, #tpu.memory_space<vmem>>, vector<1x6x6xf32>
    %628 = vector.shape_cast %627 : vector<1x6x6xf32> to vector<6x6xf32>
    %cst_456 = arith.constant dense<0.000000e+00> : vector<6x256xf32>
    %629 = tpu.matmul %628, %91, %cst_456 {dimension_numbers = #tpu.dot_dimension_numbers<[1], [0], [0], [1], [0, 0, 1, 1], [], []>} : vector<6x6xf32>, vector<6x256xf32>, vector<6x256xf32> -> vector<6x256xf32>
    %630 = arith.addf %626, %629 : vector<6x256xf32>
    %c18_457 = arith.constant 18 : index
    %c0_458 = arith.constant 0 : index
    %c0_459 = arith.constant 0 : index
    %631 = vector.load %arg11[%c18_457, %c0_458, %c0_459] : memref<49x6x6xf32, #tpu.memory_space<vmem>>, vector<1x6x6xf32>
    %632 = vector.shape_cast %631 : vector<1x6x6xf32> to vector<6x6xf32>
    %cst_460 = arith.constant dense<0.000000e+00> : vector<6x256xf32>
    %633 = tpu.matmul %632, %96, %cst_460 {dimension_numbers = #tpu.dot_dimension_numbers<[1], [0], [0], [1], [0, 0, 1, 1], [], []>} : vector<6x6xf32>, vector<6x256xf32>, vector<6x256xf32> -> vector<6x256xf32>
    %634 = arith.addf %630, %633 : vector<6x256xf32>
    %c19_461 = arith.constant 19 : index
    %c0_462 = arith.constant 0 : index
    %c0_463 = arith.constant 0 : index
    %635 = vector.load %arg11[%c19_461, %c0_462, %c0_463] : memref<49x6x6xf32, #tpu.memory_space<vmem>>, vector<1x6x6xf32>
    %636 = vector.shape_cast %635 : vector<1x6x6xf32> to vector<6x6xf32>
    %cst_464 = arith.constant dense<0.000000e+00> : vector<6x256xf32>
    %637 = tpu.matmul %636, %101, %cst_464 {dimension_numbers = #tpu.dot_dimension_numbers<[1], [0], [0], [1], [0, 0, 1, 1], [], []>} : vector<6x6xf32>, vector<6x256xf32>, vector<6x256xf32> -> vector<6x256xf32>
    %638 = arith.addf %634, %637 : vector<6x256xf32>
    %c20_465 = arith.constant 20 : index
    %c0_466 = arith.constant 0 : index
    %c0_467 = arith.constant 0 : index
    %639 = vector.load %arg11[%c20_465, %c0_466, %c0_467] : memref<49x6x6xf32, #tpu.memory_space<vmem>>, vector<1x6x6xf32>
    %640 = vector.shape_cast %639 : vector<1x6x6xf32> to vector<6x6xf32>
    %cst_468 = arith.constant dense<0.000000e+00> : vector<6x256xf32>
    %641 = tpu.matmul %640, %106, %cst_468 {dimension_numbers = #tpu.dot_dimension_numbers<[1], [0], [0], [1], [0, 0, 1, 1], [], []>} : vector<6x6xf32>, vector<6x256xf32>, vector<6x256xf32> -> vector<6x256xf32>
    %642 = arith.addf %638, %641 : vector<6x256xf32>
    %c21_469 = arith.constant 21 : index
    %c0_470 = arith.constant 0 : index
    %c0_471 = arith.constant 0 : index
    %643 = vector.load %arg11[%c21_469, %c0_470, %c0_471] : memref<49x6x6xf32, #tpu.memory_space<vmem>>, vector<1x6x6xf32>
    %644 = vector.shape_cast %643 : vector<1x6x6xf32> to vector<6x6xf32>
    %cst_472 = arith.constant dense<0.000000e+00> : vector<6x256xf32>
    %645 = tpu.matmul %644, %111, %cst_472 {dimension_numbers = #tpu.dot_dimension_numbers<[1], [0], [0], [1], [0, 0, 1, 1], [], []>} : vector<6x6xf32>, vector<6x256xf32>, vector<6x256xf32> -> vector<6x256xf32>
    %646 = arith.addf %642, %645 : vector<6x256xf32>
    %c22_473 = arith.constant 22 : index
    %c0_474 = arith.constant 0 : index
    %c0_475 = arith.constant 0 : index
    %647 = vector.load %arg11[%c22_473, %c0_474, %c0_475] : memref<49x6x6xf32, #tpu.memory_space<vmem>>, vector<1x6x6xf32>
    %648 = vector.shape_cast %647 : vector<1x6x6xf32> to vector<6x6xf32>
    %cst_476 = arith.constant dense<0.000000e+00> : vector<6x256xf32>
    %649 = tpu.matmul %648, %116, %cst_476 {dimension_numbers = #tpu.dot_dimension_numbers<[1], [0], [0], [1], [0, 0, 1, 1], [], []>} : vector<6x6xf32>, vector<6x256xf32>, vector<6x256xf32> -> vector<6x256xf32>
    %650 = arith.addf %646, %649 : vector<6x256xf32>
    %c23_477 = arith.constant 23 : index
    %c0_478 = arith.constant 0 : index
    %c0_479 = arith.constant 0 : index
    %651 = vector.load %arg11[%c23_477, %c0_478, %c0_479] : memref<49x6x6xf32, #tpu.memory_space<vmem>>, vector<1x6x6xf32>
    %652 = vector.shape_cast %651 : vector<1x6x6xf32> to vector<6x6xf32>
    %cst_480 = arith.constant dense<0.000000e+00> : vector<6x256xf32>
    %653 = tpu.matmul %652, %121, %cst_480 {dimension_numbers = #tpu.dot_dimension_numbers<[1], [0], [0], [1], [0, 0, 1, 1], [], []>} : vector<6x6xf32>, vector<6x256xf32>, vector<6x256xf32> -> vector<6x256xf32>
    %654 = arith.addf %650, %653 : vector<6x256xf32>
    %c24_481 = arith.constant 24 : index
    %c0_482 = arith.constant 0 : index
    %c0_483 = arith.constant 0 : index
    %655 = vector.load %arg11[%c24_481, %c0_482, %c0_483] : memref<49x6x6xf32, #tpu.memory_space<vmem>>, vector<1x6x6xf32>
    %656 = vector.shape_cast %655 : vector<1x6x6xf32> to vector<6x6xf32>
    %cst_484 = arith.constant dense<0.000000e+00> : vector<6x256xf32>
    %657 = tpu.matmul %656, %1, %cst_484 {dimension_numbers = #tpu.dot_dimension_numbers<[1], [0], [0], [1], [0, 0, 1, 1], [], []>} : vector<6x6xf32>, vector<6x256xf32>, vector<6x256xf32> -> vector<6x256xf32>
    %658 = arith.addf %654, %657 : vector<6x256xf32>
    %c25_485 = arith.constant 25 : index
    %c0_486 = arith.constant 0 : index
    %c0_487 = arith.constant 0 : index
    %659 = vector.load %arg11[%c25_485, %c0_486, %c0_487] : memref<49x6x6xf32, #tpu.memory_space<vmem>>, vector<1x6x6xf32>
    %660 = vector.shape_cast %659 : vector<1x6x6xf32> to vector<6x6xf32>
    %cst_488 = arith.constant dense<0.000000e+00> : vector<6x256xf32>
    %661 = tpu.matmul %660, %126, %cst_488 {dimension_numbers = #tpu.dot_dimension_numbers<[1], [0], [0], [1], [0, 0, 1, 1], [], []>} : vector<6x6xf32>, vector<6x256xf32>, vector<6x256xf32> -> vector<6x256xf32>
    %662 = arith.addf %658, %661 : vector<6x256xf32>
    %c26_489 = arith.constant 26 : index
    %c0_490 = arith.constant 0 : index
    %c0_491 = arith.constant 0 : index
    %663 = vector.load %arg11[%c26_489, %c0_490, %c0_491] : memref<49x6x6xf32, #tpu.memory_space<vmem>>, vector<1x6x6xf32>
    %664 = vector.shape_cast %663 : vector<1x6x6xf32> to vector<6x6xf32>
    %cst_492 = arith.constant dense<0.000000e+00> : vector<6x256xf32>
    %665 = tpu.matmul %664, %131, %cst_492 {dimension_numbers = #tpu.dot_dimension_numbers<[1], [0], [0], [1], [0, 0, 1, 1], [], []>} : vector<6x6xf32>, vector<6x256xf32>, vector<6x256xf32> -> vector<6x256xf32>
    %666 = arith.addf %662, %665 : vector<6x256xf32>
    %c27_493 = arith.constant 27 : index
    %c0_494 = arith.constant 0 : index
    %c0_495 = arith.constant 0 : index
    %667 = vector.load %arg11[%c27_493, %c0_494, %c0_495] : memref<49x6x6xf32, #tpu.memory_space<vmem>>, vector<1x6x6xf32>
    %668 = vector.shape_cast %667 : vector<1x6x6xf32> to vector<6x6xf32>
    %cst_496 = arith.constant dense<0.000000e+00> : vector<6x256xf32>
    %669 = tpu.matmul %668, %136, %cst_496 {dimension_numbers = #tpu.dot_dimension_numbers<[1], [0], [0], [1], [0, 0, 1, 1], [], []>} : vector<6x6xf32>, vector<6x256xf32>, vector<6x256xf32> -> vector<6x256xf32>
    %670 = arith.addf %666, %669 : vector<6x256xf32>
    %c28_497 = arith.constant 28 : index
    %c0_498 = arith.constant 0 : index
    %c0_499 = arith.constant 0 : index
    %671 = vector.load %arg11[%c28_497, %c0_498, %c0_499] : memref<49x6x6xf32, #tpu.memory_space<vmem>>, vector<1x6x6xf32>
    %672 = vector.shape_cast %671 : vector<1x6x6xf32> to vector<6x6xf32>
    %cst_500 = arith.constant dense<0.000000e+00> : vector<6x256xf32>
    %673 = tpu.matmul %672, %141, %cst_500 {dimension_numbers = #tpu.dot_dimension_numbers<[1], [0], [0], [1], [0, 0, 1, 1], [], []>} : vector<6x6xf32>, vector<6x256xf32>, vector<6x256xf32> -> vector<6x256xf32>
    %674 = arith.addf %670, %673 : vector<6x256xf32>
    %c29_501 = arith.constant 29 : index
    %c0_502 = arith.constant 0 : index
    %c0_503 = arith.constant 0 : index
    %675 = vector.load %arg11[%c29_501, %c0_502, %c0_503] : memref<49x6x6xf32, #tpu.memory_space<vmem>>, vector<1x6x6xf32>
    %676 = vector.shape_cast %675 : vector<1x6x6xf32> to vector<6x6xf32>
    %cst_504 = arith.constant dense<0.000000e+00> : vector<6x256xf32>
    %677 = tpu.matmul %676, %146, %cst_504 {dimension_numbers = #tpu.dot_dimension_numbers<[1], [0], [0], [1], [0, 0, 1, 1], [], []>} : vector<6x6xf32>, vector<6x256xf32>, vector<6x256xf32> -> vector<6x256xf32>
    %678 = arith.addf %674, %677 : vector<6x256xf32>
    %c30_505 = arith.constant 30 : index
    %c0_506 = arith.constant 0 : index
    %c0_507 = arith.constant 0 : index
    %679 = vector.load %arg11[%c30_505, %c0_506, %c0_507] : memref<49x6x6xf32, #tpu.memory_space<vmem>>, vector<1x6x6xf32>
    %680 = vector.shape_cast %679 : vector<1x6x6xf32> to vector<6x6xf32>
    %cst_508 = arith.constant dense<0.000000e+00> : vector<6x256xf32>
    %681 = tpu.matmul %680, %151, %cst_508 {dimension_numbers = #tpu.dot_dimension_numbers<[1], [0], [0], [1], [0, 0, 1, 1], [], []>} : vector<6x6xf32>, vector<6x256xf32>, vector<6x256xf32> -> vector<6x256xf32>
    %682 = arith.addf %678, %681 : vector<6x256xf32>
    %c31_509 = arith.constant 31 : index
    %c0_510 = arith.constant 0 : index
    %c0_511 = arith.constant 0 : index
    %683 = vector.load %arg11[%c31_509, %c0_510, %c0_511] : memref<49x6x6xf32, #tpu.memory_space<vmem>>, vector<1x6x6xf32>
    %684 = vector.shape_cast %683 : vector<1x6x6xf32> to vector<6x6xf32>
    %cst_512 = arith.constant dense<0.000000e+00> : vector<6x256xf32>
    %685 = tpu.matmul %684, %156, %cst_512 {dimension_numbers = #tpu.dot_dimension_numbers<[1], [0], [0], [1], [0, 0, 1, 1], [], []>} : vector<6x6xf32>, vector<6x256xf32>, vector<6x256xf32> -> vector<6x256xf32>
    %686 = arith.addf %682, %685 : vector<6x256xf32>
    %c32_513 = arith.constant 32 : index
    %c0_514 = arith.constant 0 : index
    %c0_515 = arith.constant 0 : index
    %687 = vector.load %arg11[%c32_513, %c0_514, %c0_515] : memref<49x6x6xf32, #tpu.memory_space<vmem>>, vector<1x6x6xf32>
    %688 = vector.shape_cast %687 : vector<1x6x6xf32> to vector<6x6xf32>
    %cst_516 = arith.constant dense<0.000000e+00> : vector<6x256xf32>
    %689 = tpu.matmul %688, %161, %cst_516 {dimension_numbers = #tpu.dot_dimension_numbers<[1], [0], [0], [1], [0, 0, 1, 1], [], []>} : vector<6x6xf32>, vector<6x256xf32>, vector<6x256xf32> -> vector<6x256xf32>
    %690 = arith.addf %686, %689 : vector<6x256xf32>
    %c33_517 = arith.constant 33 : index
    %c0_518 = arith.constant 0 : index
    %c0_519 = arith.constant 0 : index
    %691 = vector.load %arg11[%c33_517, %c0_518, %c0_519] : memref<49x6x6xf32, #tpu.memory_space<vmem>>, vector<1x6x6xf32>
    %692 = vector.shape_cast %691 : vector<1x6x6xf32> to vector<6x6xf32>
    %cst_520 = arith.constant dense<0.000000e+00> : vector<6x256xf32>
    %693 = tpu.matmul %692, %166, %cst_520 {dimension_numbers = #tpu.dot_dimension_numbers<[1], [0], [0], [1], [0, 0, 1, 1], [], []>} : vector<6x6xf32>, vector<6x256xf32>, vector<6x256xf32> -> vector<6x256xf32>
    %694 = arith.addf %690, %693 : vector<6x256xf32>
    %c34_521 = arith.constant 34 : index
    %c0_522 = arith.constant 0 : index
    %c0_523 = arith.constant 0 : index
    %695 = vector.load %arg11[%c34_521, %c0_522, %c0_523] : memref<49x6x6xf32, #tpu.memory_space<vmem>>, vector<1x6x6xf32>
    %696 = vector.shape_cast %695 : vector<1x6x6xf32> to vector<6x6xf32>
    %cst_524 = arith.constant dense<0.000000e+00> : vector<6x256xf32>
    %697 = tpu.matmul %696, %171, %cst_524 {dimension_numbers = #tpu.dot_dimension_numbers<[1], [0], [0], [1], [0, 0, 1, 1], [], []>} : vector<6x6xf32>, vector<6x256xf32>, vector<6x256xf32> -> vector<6x256xf32>
    %698 = arith.addf %694, %697 : vector<6x256xf32>
    %c35_525 = arith.constant 35 : index
    %c0_526 = arith.constant 0 : index
    %c0_527 = arith.constant 0 : index
    %699 = vector.load %arg11[%c35_525, %c0_526, %c0_527] : memref<49x6x6xf32, #tpu.memory_space<vmem>>, vector<1x6x6xf32>
    %700 = vector.shape_cast %699 : vector<1x6x6xf32> to vector<6x6xf32>
    %cst_528 = arith.constant dense<0.000000e+00> : vector<6x256xf32>
    %701 = tpu.matmul %700, %176, %cst_528 {dimension_numbers = #tpu.dot_dimension_numbers<[1], [0], [0], [1], [0, 0, 1, 1], [], []>} : vector<6x6xf32>, vector<6x256xf32>, vector<6x256xf32> -> vector<6x256xf32>
    %702 = arith.addf %698, %701 : vector<6x256xf32>
    %c36_529 = arith.constant 36 : index
    %c0_530 = arith.constant 0 : index
    %c0_531 = arith.constant 0 : index
    %703 = vector.load %arg11[%c36_529, %c0_530, %c0_531] : memref<49x6x6xf32, #tpu.memory_space<vmem>>, vector<1x6x6xf32>
    %704 = vector.shape_cast %703 : vector<1x6x6xf32> to vector<6x6xf32>
    %cst_532 = arith.constant dense<0.000000e+00> : vector<6x256xf32>
    %705 = tpu.matmul %704, %181, %cst_532 {dimension_numbers = #tpu.dot_dimension_numbers<[1], [0], [0], [1], [0, 0, 1, 1], [], []>} : vector<6x6xf32>, vector<6x256xf32>, vector<6x256xf32> -> vector<6x256xf32>
    %706 = arith.addf %702, %705 : vector<6x256xf32>
    %c37_533 = arith.constant 37 : index
    %c0_534 = arith.constant 0 : index
    %c0_535 = arith.constant 0 : index
    %707 = vector.load %arg11[%c37_533, %c0_534, %c0_535] : memref<49x6x6xf32, #tpu.memory_space<vmem>>, vector<1x6x6xf32>
    %708 = vector.shape_cast %707 : vector<1x6x6xf32> to vector<6x6xf32>
    %cst_536 = arith.constant dense<0.000000e+00> : vector<6x256xf32>
    %709 = tpu.matmul %708, %186, %cst_536 {dimension_numbers = #tpu.dot_dimension_numbers<[1], [0], [0], [1], [0, 0, 1, 1], [], []>} : vector<6x6xf32>, vector<6x256xf32>, vector<6x256xf32> -> vector<6x256xf32>
    %710 = arith.addf %706, %709 : vector<6x256xf32>
    %c38_537 = arith.constant 38 : index
    %c0_538 = arith.constant 0 : index
    %c0_539 = arith.constant 0 : index
    %711 = vector.load %arg11[%c38_537, %c0_538, %c0_539] : memref<49x6x6xf32, #tpu.memory_space<vmem>>, vector<1x6x6xf32>
    %712 = vector.shape_cast %711 : vector<1x6x6xf32> to vector<6x6xf32>
    %cst_540 = arith.constant dense<0.000000e+00> : vector<6x256xf32>
    %713 = tpu.matmul %712, %191, %cst_540 {dimension_numbers = #tpu.dot_dimension_numbers<[1], [0], [0], [1], [0, 0, 1, 1], [], []>} : vector<6x6xf32>, vector<6x256xf32>, vector<6x256xf32> -> vector<6x256xf32>
    %714 = arith.addf %710, %713 : vector<6x256xf32>
    %c39_541 = arith.constant 39 : index
    %c0_542 = arith.constant 0 : index
    %c0_543 = arith.constant 0 : index
    %715 = vector.load %arg11[%c39_541, %c0_542, %c0_543] : memref<49x6x6xf32, #tpu.memory_space<vmem>>, vector<1x6x6xf32>
    %716 = vector.shape_cast %715 : vector<1x6x6xf32> to vector<6x6xf32>
    %cst_544 = arith.constant dense<0.000000e+00> : vector<6x256xf32>
    %717 = tpu.matmul %716, %196, %cst_544 {dimension_numbers = #tpu.dot_dimension_numbers<[1], [0], [0], [1], [0, 0, 1, 1], [], []>} : vector<6x6xf32>, vector<6x256xf32>, vector<6x256xf32> -> vector<6x256xf32>
    %718 = arith.addf %714, %717 : vector<6x256xf32>
    %c40_545 = arith.constant 40 : index
    %c0_546 = arith.constant 0 : index
    %c0_547 = arith.constant 0 : index
    %719 = vector.load %arg11[%c40_545, %c0_546, %c0_547] : memref<49x6x6xf32, #tpu.memory_space<vmem>>, vector<1x6x6xf32>
    %720 = vector.shape_cast %719 : vector<1x6x6xf32> to vector<6x6xf32>
    %cst_548 = arith.constant dense<0.000000e+00> : vector<6x256xf32>
    %721 = tpu.matmul %720, %201, %cst_548 {dimension_numbers = #tpu.dot_dimension_numbers<[1], [0], [0], [1], [0, 0, 1, 1], [], []>} : vector<6x6xf32>, vector<6x256xf32>, vector<6x256xf32> -> vector<6x256xf32>
    %722 = arith.addf %718, %721 : vector<6x256xf32>
    %c41_549 = arith.constant 41 : index
    %c0_550 = arith.constant 0 : index
    %c0_551 = arith.constant 0 : index
    %723 = vector.load %arg11[%c41_549, %c0_550, %c0_551] : memref<49x6x6xf32, #tpu.memory_space<vmem>>, vector<1x6x6xf32>
    %724 = vector.shape_cast %723 : vector<1x6x6xf32> to vector<6x6xf32>
    %cst_552 = arith.constant dense<0.000000e+00> : vector<6x256xf32>
    %725 = tpu.matmul %724, %206, %cst_552 {dimension_numbers = #tpu.dot_dimension_numbers<[1], [0], [0], [1], [0, 0, 1, 1], [], []>} : vector<6x6xf32>, vector<6x256xf32>, vector<6x256xf32> -> vector<6x256xf32>
    %726 = arith.addf %722, %725 : vector<6x256xf32>
    %c42_553 = arith.constant 42 : index
    %c0_554 = arith.constant 0 : index
    %c0_555 = arith.constant 0 : index
    %727 = vector.load %arg11[%c42_553, %c0_554, %c0_555] : memref<49x6x6xf32, #tpu.memory_space<vmem>>, vector<1x6x6xf32>
    %728 = vector.shape_cast %727 : vector<1x6x6xf32> to vector<6x6xf32>
    %cst_556 = arith.constant dense<0.000000e+00> : vector<6x256xf32>
    %729 = tpu.matmul %728, %211, %cst_556 {dimension_numbers = #tpu.dot_dimension_numbers<[1], [0], [0], [1], [0, 0, 1, 1], [], []>} : vector<6x6xf32>, vector<6x256xf32>, vector<6x256xf32> -> vector<6x256xf32>
    %730 = arith.addf %726, %729 : vector<6x256xf32>
    %c43_557 = arith.constant 43 : index
    %c0_558 = arith.constant 0 : index
    %c0_559 = arith.constant 0 : index
    %731 = vector.load %arg11[%c43_557, %c0_558, %c0_559] : memref<49x6x6xf32, #tpu.memory_space<vmem>>, vector<1x6x6xf32>
    %732 = vector.shape_cast %731 : vector<1x6x6xf32> to vector<6x6xf32>
    %cst_560 = arith.constant dense<0.000000e+00> : vector<6x256xf32>
    %733 = tpu.matmul %732, %216, %cst_560 {dimension_numbers = #tpu.dot_dimension_numbers<[1], [0], [0], [1], [0, 0, 1, 1], [], []>} : vector<6x6xf32>, vector<6x256xf32>, vector<6x256xf32> -> vector<6x256xf32>
    %734 = arith.addf %730, %733 : vector<6x256xf32>
    %c44_561 = arith.constant 44 : index
    %c0_562 = arith.constant 0 : index
    %c0_563 = arith.constant 0 : index
    %735 = vector.load %arg11[%c44_561, %c0_562, %c0_563] : memref<49x6x6xf32, #tpu.memory_space<vmem>>, vector<1x6x6xf32>
    %736 = vector.shape_cast %735 : vector<1x6x6xf32> to vector<6x6xf32>
    %cst_564 = arith.constant dense<0.000000e+00> : vector<6x256xf32>
    %737 = tpu.matmul %736, %221, %cst_564 {dimension_numbers = #tpu.dot_dimension_numbers<[1], [0], [0], [1], [0, 0, 1, 1], [], []>} : vector<6x6xf32>, vector<6x256xf32>, vector<6x256xf32> -> vector<6x256xf32>
    %738 = arith.addf %734, %737 : vector<6x256xf32>
    %c45_565 = arith.constant 45 : index
    %c0_566 = arith.constant 0 : index
    %c0_567 = arith.constant 0 : index
    %739 = vector.load %arg11[%c45_565, %c0_566, %c0_567] : memref<49x6x6xf32, #tpu.memory_space<vmem>>, vector<1x6x6xf32>
    %740 = vector.shape_cast %739 : vector<1x6x6xf32> to vector<6x6xf32>
    %cst_568 = arith.constant dense<0.000000e+00> : vector<6x256xf32>
    %741 = tpu.matmul %740, %226, %cst_568 {dimension_numbers = #tpu.dot_dimension_numbers<[1], [0], [0], [1], [0, 0, 1, 1], [], []>} : vector<6x6xf32>, vector<6x256xf32>, vector<6x256xf32> -> vector<6x256xf32>
    %742 = arith.addf %738, %741 : vector<6x256xf32>
    %c46_569 = arith.constant 46 : index
    %c0_570 = arith.constant 0 : index
    %c0_571 = arith.constant 0 : index
    %743 = vector.load %arg11[%c46_569, %c0_570, %c0_571] : memref<49x6x6xf32, #tpu.memory_space<vmem>>, vector<1x6x6xf32>
    %744 = vector.shape_cast %743 : vector<1x6x6xf32> to vector<6x6xf32>
    %cst_572 = arith.constant dense<0.000000e+00> : vector<6x256xf32>
    %745 = tpu.matmul %744, %231, %cst_572 {dimension_numbers = #tpu.dot_dimension_numbers<[1], [0], [0], [1], [0, 0, 1, 1], [], []>} : vector<6x6xf32>, vector<6x256xf32>, vector<6x256xf32> -> vector<6x256xf32>
    %746 = arith.addf %742, %745 : vector<6x256xf32>
    %c47_573 = arith.constant 47 : index
    %c0_574 = arith.constant 0 : index
    %c0_575 = arith.constant 0 : index
    %747 = vector.load %arg11[%c47_573, %c0_574, %c0_575] : memref<49x6x6xf32, #tpu.memory_space<vmem>>, vector<1x6x6xf32>
    %748 = vector.shape_cast %747 : vector<1x6x6xf32> to vector<6x6xf32>
    %cst_576 = arith.constant dense<0.000000e+00> : vector<6x256xf32>
    %749 = tpu.matmul %748, %236, %cst_576 {dimension_numbers = #tpu.dot_dimension_numbers<[1], [0], [0], [1], [0, 0, 1, 1], [], []>} : vector<6x6xf32>, vector<6x256xf32>, vector<6x256xf32> -> vector<6x256xf32>
    %750 = arith.addf %746, %749 : vector<6x256xf32>
    %c48_577 = arith.constant 48 : index
    %c0_578 = arith.constant 0 : index
    %c0_579 = arith.constant 0 : index
    %751 = vector.load %arg11[%c48_577, %c0_578, %c0_579] : memref<49x6x6xf32, #tpu.memory_space<vmem>>, vector<1x6x6xf32>
    %752 = vector.shape_cast %751 : vector<1x6x6xf32> to vector<6x6xf32>
    %cst_580 = arith.constant dense<0.000000e+00> : vector<6x256xf32>
    %753 = tpu.matmul %752, %241, %cst_580 {dimension_numbers = #tpu.dot_dimension_numbers<[1], [0], [0], [1], [0, 0, 1, 1], [], []>} : vector<6x6xf32>, vector<6x256xf32>, vector<6x256xf32> -> vector<6x256xf32>
    %754 = arith.addf %750, %753 : vector<6x256xf32>
    %c0_581 = arith.constant 0 : index
    %c0_582 = arith.constant 0 : index
    %755 = vector.load %arg12[%c0_581, %c0_582] : memref<6x1xf32, #tpu.memory_space<vmem>>, vector<6x1xf32>
    %756 = vector.broadcast %755 : vector<6x1xf32> to vector<6x256xf32>
    %757 = arith.addf %754, %756 : vector<6x256xf32>
    %cst_583 = arith.constant 0.000000e+00 : f32
    %758 = vector.broadcast %cst_583 : f32 to vector<6x256xf32>
    %759 = arith.cmpf oge, %757, %758 : vector<6x256xf32>
    %cst_584 = arith.constant 2.000000e-01 : f32
    %760 = vector.broadcast %cst_584 : f32 to vector<6x256xf32>
    %761 = arith.mulf %760, %757 : vector<6x256xf32>
    %762 = arith.select %759, %757, %761 : vector<6x256xi1>, vector<6x256xf32>
    %c17_i32_585 = arith.constant 17 : i32
    %763 = tpu.dynamic_rotate %762 by %c17_i32_585 dim 1 : vector<6x256xf32>, i32 -> vector<6x256xf32>
    %c16_586 = arith.constant 16 : index
    %c0_587 = arith.constant 0 : index
    %c0_588 = arith.constant 0 : index
    %764 = vector.load %arg2[%c16_586, %c0_587, %c0_588] : memref<49x1x256xf32, #tpu.memory_space<vmem>>, vector<1x1x256xf32>
    %765 = vector.shape_cast %764 : vector<1x1x256xf32> to vector<1x256xf32>
    %766 = vector.broadcast %765 : vector<1x256xf32> to vector<6x256xf32>
    %767 = arith.mulf %763, %766 : vector<6x256xf32>
    %c16_i32_589 = arith.constant 16 : i32
    %768 = tpu.dynamic_rotate %762 by %c16_i32_589 dim 1 : vector<6x256xf32>, i32 -> vector<6x256xf32>
    %c17_590 = arith.constant 17 : index
    %c0_591 = arith.constant 0 : index
    %c0_592 = arith.constant 0 : index
    %769 = vector.load %arg2[%c17_590, %c0_591, %c0_592] : memref<49x1x256xf32, #tpu.memory_space<vmem>>, vector<1x1x256xf32>
    %770 = vector.shape_cast %769 : vector<1x1x256xf32> to vector<1x256xf32>
    %771 = vector.broadcast %770 : vector<1x256xf32> to vector<6x256xf32>
    %772 = arith.mulf %768, %771 : vector<6x256xf32>
    %c15_i32_593 = arith.constant 15 : i32
    %773 = tpu.dynamic_rotate %762 by %c15_i32_593 dim 1 : vector<6x256xf32>, i32 -> vector<6x256xf32>
    %c18_594 = arith.constant 18 : index
    %c0_595 = arith.constant 0 : index
    %c0_596 = arith.constant 0 : index
    %774 = vector.load %arg2[%c18_594, %c0_595, %c0_596] : memref<49x1x256xf32, #tpu.memory_space<vmem>>, vector<1x1x256xf32>
    %775 = vector.shape_cast %774 : vector<1x1x256xf32> to vector<1x256xf32>
    %776 = vector.broadcast %775 : vector<1x256xf32> to vector<6x256xf32>
    %777 = arith.mulf %773, %776 : vector<6x256xf32>
    %c1_i32_597 = arith.constant 1 : i32
    %778 = tpu.dynamic_rotate %762 by %c1_i32_597 dim 1 : vector<6x256xf32>, i32 -> vector<6x256xf32>
    %c23_598 = arith.constant 23 : index
    %c0_599 = arith.constant 0 : index
    %c0_600 = arith.constant 0 : index
    %779 = vector.load %arg2[%c23_598, %c0_599, %c0_600] : memref<49x1x256xf32, #tpu.memory_space<vmem>>, vector<1x1x256xf32>
    %780 = vector.shape_cast %779 : vector<1x1x256xf32> to vector<1x256xf32>
    %781 = vector.broadcast %780 : vector<1x256xf32> to vector<6x256xf32>
    %782 = arith.mulf %778, %781 : vector<6x256xf32>
    %c255_i32_601 = arith.constant 255 : i32
    %783 = tpu.dynamic_rotate %762 by %c255_i32_601 dim 1 : vector<6x256xf32>, i32 -> vector<6x256xf32>
    %c25_602 = arith.constant 25 : index
    %c0_603 = arith.constant 0 : index
    %c0_604 = arith.constant 0 : index
    %784 = vector.load %arg2[%c25_602, %c0_603, %c0_604] : memref<49x1x256xf32, #tpu.memory_space<vmem>>, vector<1x1x256xf32>
    %785 = vector.shape_cast %784 : vector<1x1x256xf32> to vector<1x256xf32>
    %786 = vector.broadcast %785 : vector<1x256xf32> to vector<6x256xf32>
    %787 = arith.mulf %783, %786 : vector<6x256xf32>
    %c241_i32_605 = arith.constant 241 : i32
    %788 = tpu.dynamic_rotate %762 by %c241_i32_605 dim 1 : vector<6x256xf32>, i32 -> vector<6x256xf32>
    %c30_606 = arith.constant 30 : index
    %c0_607 = arith.constant 0 : index
    %c0_608 = arith.constant 0 : index
    %789 = vector.load %arg2[%c30_606, %c0_607, %c0_608] : memref<49x1x256xf32, #tpu.memory_space<vmem>>, vector<1x1x256xf32>
    %790 = vector.shape_cast %789 : vector<1x1x256xf32> to vector<1x256xf32>
    %791 = vector.broadcast %790 : vector<1x256xf32> to vector<6x256xf32>
    %792 = arith.mulf %788, %791 : vector<6x256xf32>
    %c240_i32_609 = arith.constant 240 : i32
    %793 = tpu.dynamic_rotate %762 by %c240_i32_609 dim 1 : vector<6x256xf32>, i32 -> vector<6x256xf32>
    %c31_610 = arith.constant 31 : index
    %c0_611 = arith.constant 0 : index
    %c0_612 = arith.constant 0 : index
    %794 = vector.load %arg2[%c31_610, %c0_611, %c0_612] : memref<49x1x256xf32, #tpu.memory_space<vmem>>, vector<1x1x256xf32>
    %795 = vector.shape_cast %794 : vector<1x1x256xf32> to vector<1x256xf32>
    %796 = vector.broadcast %795 : vector<1x256xf32> to vector<6x256xf32>
    %797 = arith.mulf %793, %796 : vector<6x256xf32>
    %c239_i32_613 = arith.constant 239 : i32
    %798 = tpu.dynamic_rotate %762 by %c239_i32_613 dim 1 : vector<6x256xf32>, i32 -> vector<6x256xf32>
    %c32_614 = arith.constant 32 : index
    %c0_615 = arith.constant 0 : index
    %c0_616 = arith.constant 0 : index
    %799 = vector.load %arg2[%c32_614, %c0_615, %c0_616] : memref<49x1x256xf32, #tpu.memory_space<vmem>>, vector<1x1x256xf32>
    %800 = vector.shape_cast %799 : vector<1x1x256xf32> to vector<1x256xf32>
    %801 = vector.broadcast %800 : vector<1x256xf32> to vector<6x256xf32>
    %802 = arith.mulf %798, %801 : vector<6x256xf32>
    %c0_617 = arith.constant 0 : index
    %c0_618 = arith.constant 0 : index
    %c0_619 = arith.constant 0 : index
    %803 = vector.load %arg13[%c0_617, %c0_618, %c0_619] : memref<9x6x6xf32, #tpu.memory_space<vmem>>, vector<1x6x6xf32>
    %804 = vector.shape_cast %803 : vector<1x6x6xf32> to vector<6x6xf32>
    %cst_620 = arith.constant dense<0.000000e+00> : vector<6x256xf32>
    %805 = tpu.matmul %804, %767, %cst_620 {dimension_numbers = #tpu.dot_dimension_numbers<[1], [0], [0], [1], [0, 0, 1, 1], [], []>} : vector<6x6xf32>, vector<6x256xf32>, vector<6x256xf32> -> vector<6x256xf32>
    %c1_621 = arith.constant 1 : index
    %c0_622 = arith.constant 0 : index
    %c0_623 = arith.constant 0 : index
    %806 = vector.load %arg13[%c1_621, %c0_622, %c0_623] : memref<9x6x6xf32, #tpu.memory_space<vmem>>, vector<1x6x6xf32>
    %807 = vector.shape_cast %806 : vector<1x6x6xf32> to vector<6x6xf32>
    %cst_624 = arith.constant dense<0.000000e+00> : vector<6x256xf32>
    %808 = tpu.matmul %807, %772, %cst_624 {dimension_numbers = #tpu.dot_dimension_numbers<[1], [0], [0], [1], [0, 0, 1, 1], [], []>} : vector<6x6xf32>, vector<6x256xf32>, vector<6x256xf32> -> vector<6x256xf32>
    %809 = arith.addf %805, %808 : vector<6x256xf32>
    %c2_625 = arith.constant 2 : index
    %c0_626 = arith.constant 0 : index
    %c0_627 = arith.constant 0 : index
    %810 = vector.load %arg13[%c2_625, %c0_626, %c0_627] : memref<9x6x6xf32, #tpu.memory_space<vmem>>, vector<1x6x6xf32>
    %811 = vector.shape_cast %810 : vector<1x6x6xf32> to vector<6x6xf32>
    %cst_628 = arith.constant dense<0.000000e+00> : vector<6x256xf32>
    %812 = tpu.matmul %811, %777, %cst_628 {dimension_numbers = #tpu.dot_dimension_numbers<[1], [0], [0], [1], [0, 0, 1, 1], [], []>} : vector<6x6xf32>, vector<6x256xf32>, vector<6x256xf32> -> vector<6x256xf32>
    %813 = arith.addf %809, %812 : vector<6x256xf32>
    %c3_629 = arith.constant 3 : index
    %c0_630 = arith.constant 0 : index
    %c0_631 = arith.constant 0 : index
    %814 = vector.load %arg13[%c3_629, %c0_630, %c0_631] : memref<9x6x6xf32, #tpu.memory_space<vmem>>, vector<1x6x6xf32>
    %815 = vector.shape_cast %814 : vector<1x6x6xf32> to vector<6x6xf32>
    %cst_632 = arith.constant dense<0.000000e+00> : vector<6x256xf32>
    %816 = tpu.matmul %815, %782, %cst_632 {dimension_numbers = #tpu.dot_dimension_numbers<[1], [0], [0], [1], [0, 0, 1, 1], [], []>} : vector<6x6xf32>, vector<6x256xf32>, vector<6x256xf32> -> vector<6x256xf32>
    %817 = arith.addf %813, %816 : vector<6x256xf32>
    %c4_633 = arith.constant 4 : index
    %c0_634 = arith.constant 0 : index
    %c0_635 = arith.constant 0 : index
    %818 = vector.load %arg13[%c4_633, %c0_634, %c0_635] : memref<9x6x6xf32, #tpu.memory_space<vmem>>, vector<1x6x6xf32>
    %819 = vector.shape_cast %818 : vector<1x6x6xf32> to vector<6x6xf32>
    %cst_636 = arith.constant dense<0.000000e+00> : vector<6x256xf32>
    %820 = tpu.matmul %819, %762, %cst_636 {dimension_numbers = #tpu.dot_dimension_numbers<[1], [0], [0], [1], [0, 0, 1, 1], [], []>} : vector<6x6xf32>, vector<6x256xf32>, vector<6x256xf32> -> vector<6x256xf32>
    %821 = arith.addf %817, %820 : vector<6x256xf32>
    %c5_637 = arith.constant 5 : index
    %c0_638 = arith.constant 0 : index
    %c0_639 = arith.constant 0 : index
    %822 = vector.load %arg13[%c5_637, %c0_638, %c0_639] : memref<9x6x6xf32, #tpu.memory_space<vmem>>, vector<1x6x6xf32>
    %823 = vector.shape_cast %822 : vector<1x6x6xf32> to vector<6x6xf32>
    %cst_640 = arith.constant dense<0.000000e+00> : vector<6x256xf32>
    %824 = tpu.matmul %823, %787, %cst_640 {dimension_numbers = #tpu.dot_dimension_numbers<[1], [0], [0], [1], [0, 0, 1, 1], [], []>} : vector<6x6xf32>, vector<6x256xf32>, vector<6x256xf32> -> vector<6x256xf32>
    %825 = arith.addf %821, %824 : vector<6x256xf32>
    %c6_641 = arith.constant 6 : index
    %c0_642 = arith.constant 0 : index
    %c0_643 = arith.constant 0 : index
    %826 = vector.load %arg13[%c6_641, %c0_642, %c0_643] : memref<9x6x6xf32, #tpu.memory_space<vmem>>, vector<1x6x6xf32>
    %827 = vector.shape_cast %826 : vector<1x6x6xf32> to vector<6x6xf32>
    %cst_644 = arith.constant dense<0.000000e+00> : vector<6x256xf32>
    %828 = tpu.matmul %827, %792, %cst_644 {dimension_numbers = #tpu.dot_dimension_numbers<[1], [0], [0], [1], [0, 0, 1, 1], [], []>} : vector<6x6xf32>, vector<6x256xf32>, vector<6x256xf32> -> vector<6x256xf32>
    %829 = arith.addf %825, %828 : vector<6x256xf32>
    %c7_645 = arith.constant 7 : index
    %c0_646 = arith.constant 0 : index
    %c0_647 = arith.constant 0 : index
    %830 = vector.load %arg13[%c7_645, %c0_646, %c0_647] : memref<9x6x6xf32, #tpu.memory_space<vmem>>, vector<1x6x6xf32>
    %831 = vector.shape_cast %830 : vector<1x6x6xf32> to vector<6x6xf32>
    %cst_648 = arith.constant dense<0.000000e+00> : vector<6x256xf32>
    %832 = tpu.matmul %831, %797, %cst_648 {dimension_numbers = #tpu.dot_dimension_numbers<[1], [0], [0], [1], [0, 0, 1, 1], [], []>} : vector<6x6xf32>, vector<6x256xf32>, vector<6x256xf32> -> vector<6x256xf32>
    %833 = arith.addf %829, %832 : vector<6x256xf32>
    %c8_649 = arith.constant 8 : index
    %c0_650 = arith.constant 0 : index
    %c0_651 = arith.constant 0 : index
    %834 = vector.load %arg13[%c8_649, %c0_650, %c0_651] : memref<9x6x6xf32, #tpu.memory_space<vmem>>, vector<1x6x6xf32>
    %835 = vector.shape_cast %834 : vector<1x6x6xf32> to vector<6x6xf32>
    %cst_652 = arith.constant dense<0.000000e+00> : vector<6x256xf32>
    %836 = tpu.matmul %835, %802, %cst_652 {dimension_numbers = #tpu.dot_dimension_numbers<[1], [0], [0], [1], [0, 0, 1, 1], [], []>} : vector<6x6xf32>, vector<6x256xf32>, vector<6x256xf32> -> vector<6x256xf32>
    %837 = arith.addf %833, %836 : vector<6x256xf32>
    %c0_653 = arith.constant 0 : index
    %c0_654 = arith.constant 0 : index
    %838 = vector.load %arg14[%c0_653, %c0_654] : memref<6x1xf32, #tpu.memory_space<vmem>>, vector<6x1xf32>
    %839 = vector.broadcast %838 : vector<6x1xf32> to vector<6x256xf32>
    %840 = arith.addf %837, %839 : vector<6x256xf32>
    %841 = arith.addf %840, %1 : vector<6x256xf32>
    %cst_655 = arith.constant 0.000000e+00 : f32
    %842 = vector.broadcast %cst_655 : f32 to vector<6x256xf32>
    %843 = arith.cmpf oge, %841, %842 : vector<6x256xf32>
    %cst_656 = arith.constant 2.000000e-01 : f32
    %844 = vector.broadcast %cst_656 : f32 to vector<6x256xf32>
    %845 = arith.mulf %844, %841 : vector<6x256xf32>
    %846 = arith.select %843, %841, %845 : vector<6x256xi1>, vector<6x256xf32>
    %c0_657 = arith.constant 0 : index
    %c0_658 = arith.constant 0 : index
    %c0_659 = arith.constant 0 : index
    %847 = vector.load %arg15[%c0_657, %c0_658, %c0_659] : memref<100x6x6xf32, #tpu.memory_space<vmem>>, vector<1x6x6xf32>
    %848 = vector.shape_cast %847 : vector<1x6x6xf32> to vector<6x6xf32>
    %cst_660 = arith.constant dense<0.000000e+00> : vector<6x256xf32>
    %849 = tpu.matmul %848, %46, %cst_660 {dimension_numbers = #tpu.dot_dimension_numbers<[1], [0], [0], [1], [0, 0, 1, 1], [], []>} : vector<6x6xf32>, vector<6x256xf32>, vector<6x256xf32> -> vector<6x256xf32>
    %c1_661 = arith.constant 1 : index
    %c0_662 = arith.constant 0 : index
    %c0_663 = arith.constant 0 : index
    %850 = vector.load %arg15[%c1_661, %c0_662, %c0_663] : memref<100x6x6xf32, #tpu.memory_space<vmem>>, vector<1x6x6xf32>
    %851 = vector.shape_cast %850 : vector<1x6x6xf32> to vector<6x6xf32>
    %cst_664 = arith.constant dense<0.000000e+00> : vector<6x256xf32>
    %852 = tpu.matmul %851, %51, %cst_664 {dimension_numbers = #tpu.dot_dimension_numbers<[1], [0], [0], [1], [0, 0, 1, 1], [], []>} : vector<6x6xf32>, vector<6x256xf32>, vector<6x256xf32> -> vector<6x256xf32>
    %853 = arith.addf %849, %852 : vector<6x256xf32>
    %c2_665 = arith.constant 2 : index
    %c0_666 = arith.constant 0 : index
    %c0_667 = arith.constant 0 : index
    %854 = vector.load %arg15[%c2_665, %c0_666, %c0_667] : memref<100x6x6xf32, #tpu.memory_space<vmem>>, vector<1x6x6xf32>
    %855 = vector.shape_cast %854 : vector<1x6x6xf32> to vector<6x6xf32>
    %cst_668 = arith.constant dense<0.000000e+00> : vector<6x256xf32>
    %856 = tpu.matmul %855, %56, %cst_668 {dimension_numbers = #tpu.dot_dimension_numbers<[1], [0], [0], [1], [0, 0, 1, 1], [], []>} : vector<6x6xf32>, vector<6x256xf32>, vector<6x256xf32> -> vector<6x256xf32>
    %857 = arith.addf %853, %856 : vector<6x256xf32>
    %c3_669 = arith.constant 3 : index
    %c0_670 = arith.constant 0 : index
    %c0_671 = arith.constant 0 : index
    %858 = vector.load %arg15[%c3_669, %c0_670, %c0_671] : memref<100x6x6xf32, #tpu.memory_space<vmem>>, vector<1x6x6xf32>
    %859 = vector.shape_cast %858 : vector<1x6x6xf32> to vector<6x6xf32>
    %cst_672 = arith.constant dense<0.000000e+00> : vector<6x256xf32>
    %860 = tpu.matmul %859, %61, %cst_672 {dimension_numbers = #tpu.dot_dimension_numbers<[1], [0], [0], [1], [0, 0, 1, 1], [], []>} : vector<6x6xf32>, vector<6x256xf32>, vector<6x256xf32> -> vector<6x256xf32>
    %861 = arith.addf %857, %860 : vector<6x256xf32>
    %c4_673 = arith.constant 4 : index
    %c0_674 = arith.constant 0 : index
    %c0_675 = arith.constant 0 : index
    %862 = vector.load %arg15[%c4_673, %c0_674, %c0_675] : memref<100x6x6xf32, #tpu.memory_space<vmem>>, vector<1x6x6xf32>
    %863 = vector.shape_cast %862 : vector<1x6x6xf32> to vector<6x6xf32>
    %cst_676 = arith.constant dense<0.000000e+00> : vector<6x256xf32>
    %864 = tpu.matmul %863, %66, %cst_676 {dimension_numbers = #tpu.dot_dimension_numbers<[1], [0], [0], [1], [0, 0, 1, 1], [], []>} : vector<6x6xf32>, vector<6x256xf32>, vector<6x256xf32> -> vector<6x256xf32>
    %865 = arith.addf %861, %864 : vector<6x256xf32>
    %c5_677 = arith.constant 5 : index
    %c0_678 = arith.constant 0 : index
    %c0_679 = arith.constant 0 : index
    %866 = vector.load %arg15[%c5_677, %c0_678, %c0_679] : memref<100x6x6xf32, #tpu.memory_space<vmem>>, vector<1x6x6xf32>
    %867 = vector.shape_cast %866 : vector<1x6x6xf32> to vector<6x6xf32>
    %cst_680 = arith.constant dense<0.000000e+00> : vector<6x256xf32>
    %868 = tpu.matmul %867, %81, %cst_680 {dimension_numbers = #tpu.dot_dimension_numbers<[1], [0], [0], [1], [0, 0, 1, 1], [], []>} : vector<6x6xf32>, vector<6x256xf32>, vector<6x256xf32> -> vector<6x256xf32>
    %869 = arith.addf %865, %868 : vector<6x256xf32>
    %c6_681 = arith.constant 6 : index
    %c0_682 = arith.constant 0 : index
    %c0_683 = arith.constant 0 : index
    %870 = vector.load %arg15[%c6_681, %c0_682, %c0_683] : memref<100x6x6xf32, #tpu.memory_space<vmem>>, vector<1x6x6xf32>
    %871 = vector.shape_cast %870 : vector<1x6x6xf32> to vector<6x6xf32>
    %cst_684 = arith.constant dense<0.000000e+00> : vector<6x256xf32>
    %872 = tpu.matmul %871, %86, %cst_684 {dimension_numbers = #tpu.dot_dimension_numbers<[1], [0], [0], [1], [0, 0, 1, 1], [], []>} : vector<6x6xf32>, vector<6x256xf32>, vector<6x256xf32> -> vector<6x256xf32>
    %873 = arith.addf %869, %872 : vector<6x256xf32>
    %c7_685 = arith.constant 7 : index
    %c0_686 = arith.constant 0 : index
    %c0_687 = arith.constant 0 : index
    %874 = vector.load %arg15[%c7_685, %c0_686, %c0_687] : memref<100x6x6xf32, #tpu.memory_space<vmem>>, vector<1x6x6xf32>
    %875 = vector.shape_cast %874 : vector<1x6x6xf32> to vector<6x6xf32>
    %cst_688 = arith.constant dense<0.000000e+00> : vector<6x256xf32>
    %876 = tpu.matmul %875, %91, %cst_688 {dimension_numbers = #tpu.dot_dimension_numbers<[1], [0], [0], [1], [0, 0, 1, 1], [], []>} : vector<6x6xf32>, vector<6x256xf32>, vector<6x256xf32> -> vector<6x256xf32>
    %877 = arith.addf %873, %876 : vector<6x256xf32>
    %c8_689 = arith.constant 8 : index
    %c0_690 = arith.constant 0 : index
    %c0_691 = arith.constant 0 : index
    %878 = vector.load %arg15[%c8_689, %c0_690, %c0_691] : memref<100x6x6xf32, #tpu.memory_space<vmem>>, vector<1x6x6xf32>
    %879 = vector.shape_cast %878 : vector<1x6x6xf32> to vector<6x6xf32>
    %cst_692 = arith.constant dense<0.000000e+00> : vector<6x256xf32>
    %880 = tpu.matmul %879, %96, %cst_692 {dimension_numbers = #tpu.dot_dimension_numbers<[1], [0], [0], [1], [0, 0, 1, 1], [], []>} : vector<6x6xf32>, vector<6x256xf32>, vector<6x256xf32> -> vector<6x256xf32>
    %881 = arith.addf %877, %880 : vector<6x256xf32>
    %c9_693 = arith.constant 9 : index
    %c0_694 = arith.constant 0 : index
    %c0_695 = arith.constant 0 : index
    %882 = vector.load %arg15[%c9_693, %c0_694, %c0_695] : memref<100x6x6xf32, #tpu.memory_space<vmem>>, vector<1x6x6xf32>
    %883 = vector.shape_cast %882 : vector<1x6x6xf32> to vector<6x6xf32>
    %cst_696 = arith.constant dense<0.000000e+00> : vector<6x256xf32>
    %884 = tpu.matmul %883, %101, %cst_696 {dimension_numbers = #tpu.dot_dimension_numbers<[1], [0], [0], [1], [0, 0, 1, 1], [], []>} : vector<6x6xf32>, vector<6x256xf32>, vector<6x256xf32> -> vector<6x256xf32>
    %885 = arith.addf %881, %884 : vector<6x256xf32>
    %c10_697 = arith.constant 10 : index
    %c0_698 = arith.constant 0 : index
    %c0_699 = arith.constant 0 : index
    %886 = vector.load %arg15[%c10_697, %c0_698, %c0_699] : memref<100x6x6xf32, #tpu.memory_space<vmem>>, vector<1x6x6xf32>
    %887 = vector.shape_cast %886 : vector<1x6x6xf32> to vector<6x6xf32>
    %cst_700 = arith.constant dense<0.000000e+00> : vector<6x256xf32>
    %888 = tpu.matmul %887, %116, %cst_700 {dimension_numbers = #tpu.dot_dimension_numbers<[1], [0], [0], [1], [0, 0, 1, 1], [], []>} : vector<6x6xf32>, vector<6x256xf32>, vector<6x256xf32> -> vector<6x256xf32>
    %889 = arith.addf %885, %888 : vector<6x256xf32>
    %c11_701 = arith.constant 11 : index
    %c0_702 = arith.constant 0 : index
    %c0_703 = arith.constant 0 : index
    %890 = vector.load %arg15[%c11_701, %c0_702, %c0_703] : memref<100x6x6xf32, #tpu.memory_space<vmem>>, vector<1x6x6xf32>
    %891 = vector.shape_cast %890 : vector<1x6x6xf32> to vector<6x6xf32>
    %cst_704 = arith.constant dense<0.000000e+00> : vector<6x256xf32>
    %892 = tpu.matmul %891, %121, %cst_704 {dimension_numbers = #tpu.dot_dimension_numbers<[1], [0], [0], [1], [0, 0, 1, 1], [], []>} : vector<6x6xf32>, vector<6x256xf32>, vector<6x256xf32> -> vector<6x256xf32>
    %893 = arith.addf %889, %892 : vector<6x256xf32>
    %c12_705 = arith.constant 12 : index
    %c0_706 = arith.constant 0 : index
    %c0_707 = arith.constant 0 : index
    %894 = vector.load %arg15[%c12_705, %c0_706, %c0_707] : memref<100x6x6xf32, #tpu.memory_space<vmem>>, vector<1x6x6xf32>
    %895 = vector.shape_cast %894 : vector<1x6x6xf32> to vector<6x6xf32>
    %cst_708 = arith.constant dense<0.000000e+00> : vector<6x256xf32>
    %896 = tpu.matmul %895, %1, %cst_708 {dimension_numbers = #tpu.dot_dimension_numbers<[1], [0], [0], [1], [0, 0, 1, 1], [], []>} : vector<6x6xf32>, vector<6x256xf32>, vector<6x256xf32> -> vector<6x256xf32>
    %897 = arith.addf %893, %896 : vector<6x256xf32>
    %c13_709 = arith.constant 13 : index
    %c0_710 = arith.constant 0 : index
    %c0_711 = arith.constant 0 : index
    %898 = vector.load %arg15[%c13_709, %c0_710, %c0_711] : memref<100x6x6xf32, #tpu.memory_space<vmem>>, vector<1x6x6xf32>
    %899 = vector.shape_cast %898 : vector<1x6x6xf32> to vector<6x6xf32>
    %cst_712 = arith.constant dense<0.000000e+00> : vector<6x256xf32>
    %900 = tpu.matmul %899, %126, %cst_712 {dimension_numbers = #tpu.dot_dimension_numbers<[1], [0], [0], [1], [0, 0, 1, 1], [], []>} : vector<6x6xf32>, vector<6x256xf32>, vector<6x256xf32> -> vector<6x256xf32>
    %901 = arith.addf %897, %900 : vector<6x256xf32>
    %c14_713 = arith.constant 14 : index
    %c0_714 = arith.constant 0 : index
    %c0_715 = arith.constant 0 : index
    %902 = vector.load %arg15[%c14_713, %c0_714, %c0_715] : memref<100x6x6xf32, #tpu.memory_space<vmem>>, vector<1x6x6xf32>
    %903 = vector.shape_cast %902 : vector<1x6x6xf32> to vector<6x6xf32>
    %cst_716 = arith.constant dense<0.000000e+00> : vector<6x256xf32>
    %904 = tpu.matmul %903, %131, %cst_716 {dimension_numbers = #tpu.dot_dimension_numbers<[1], [0], [0], [1], [0, 0, 1, 1], [], []>} : vector<6x6xf32>, vector<6x256xf32>, vector<6x256xf32> -> vector<6x256xf32>
    %905 = arith.addf %901, %904 : vector<6x256xf32>
    %c15_717 = arith.constant 15 : index
    %c0_718 = arith.constant 0 : index
    %c0_719 = arith.constant 0 : index
    %906 = vector.load %arg15[%c15_717, %c0_718, %c0_719] : memref<100x6x6xf32, #tpu.memory_space<vmem>>, vector<1x6x6xf32>
    %907 = vector.shape_cast %906 : vector<1x6x6xf32> to vector<6x6xf32>
    %cst_720 = arith.constant dense<0.000000e+00> : vector<6x256xf32>
    %908 = tpu.matmul %907, %146, %cst_720 {dimension_numbers = #tpu.dot_dimension_numbers<[1], [0], [0], [1], [0, 0, 1, 1], [], []>} : vector<6x6xf32>, vector<6x256xf32>, vector<6x256xf32> -> vector<6x256xf32>
    %909 = arith.addf %905, %908 : vector<6x256xf32>
    %c16_721 = arith.constant 16 : index
    %c0_722 = arith.constant 0 : index
    %c0_723 = arith.constant 0 : index
    %910 = vector.load %arg15[%c16_721, %c0_722, %c0_723] : memref<100x6x6xf32, #tpu.memory_space<vmem>>, vector<1x6x6xf32>
    %911 = vector.shape_cast %910 : vector<1x6x6xf32> to vector<6x6xf32>
    %cst_724 = arith.constant dense<0.000000e+00> : vector<6x256xf32>
    %912 = tpu.matmul %911, %151, %cst_724 {dimension_numbers = #tpu.dot_dimension_numbers<[1], [0], [0], [1], [0, 0, 1, 1], [], []>} : vector<6x6xf32>, vector<6x256xf32>, vector<6x256xf32> -> vector<6x256xf32>
    %913 = arith.addf %909, %912 : vector<6x256xf32>
    %c17_725 = arith.constant 17 : index
    %c0_726 = arith.constant 0 : index
    %c0_727 = arith.constant 0 : index
    %914 = vector.load %arg15[%c17_725, %c0_726, %c0_727] : memref<100x6x6xf32, #tpu.memory_space<vmem>>, vector<1x6x6xf32>
    %915 = vector.shape_cast %914 : vector<1x6x6xf32> to vector<6x6xf32>
    %cst_728 = arith.constant dense<0.000000e+00> : vector<6x256xf32>
    %916 = tpu.matmul %915, %156, %cst_728 {dimension_numbers = #tpu.dot_dimension_numbers<[1], [0], [0], [1], [0, 0, 1, 1], [], []>} : vector<6x6xf32>, vector<6x256xf32>, vector<6x256xf32> -> vector<6x256xf32>
    %917 = arith.addf %913, %916 : vector<6x256xf32>
    %c18_729 = arith.constant 18 : index
    %c0_730 = arith.constant 0 : index
    %c0_731 = arith.constant 0 : index
    %918 = vector.load %arg15[%c18_729, %c0_730, %c0_731] : memref<100x6x6xf32, #tpu.memory_space<vmem>>, vector<1x6x6xf32>
    %919 = vector.shape_cast %918 : vector<1x6x6xf32> to vector<6x6xf32>
    %cst_732 = arith.constant dense<0.000000e+00> : vector<6x256xf32>
    %920 = tpu.matmul %919, %161, %cst_732 {dimension_numbers = #tpu.dot_dimension_numbers<[1], [0], [0], [1], [0, 0, 1, 1], [], []>} : vector<6x6xf32>, vector<6x256xf32>, vector<6x256xf32> -> vector<6x256xf32>
    %921 = arith.addf %917, %920 : vector<6x256xf32>
    %c19_733 = arith.constant 19 : index
    %c0_734 = arith.constant 0 : index
    %c0_735 = arith.constant 0 : index
    %922 = vector.load %arg15[%c19_733, %c0_734, %c0_735] : memref<100x6x6xf32, #tpu.memory_space<vmem>>, vector<1x6x6xf32>
    %923 = vector.shape_cast %922 : vector<1x6x6xf32> to vector<6x6xf32>
    %cst_736 = arith.constant dense<0.000000e+00> : vector<6x256xf32>
    %924 = tpu.matmul %923, %166, %cst_736 {dimension_numbers = #tpu.dot_dimension_numbers<[1], [0], [0], [1], [0, 0, 1, 1], [], []>} : vector<6x6xf32>, vector<6x256xf32>, vector<6x256xf32> -> vector<6x256xf32>
    %925 = arith.addf %921, %924 : vector<6x256xf32>
    %c20_737 = arith.constant 20 : index
    %c0_738 = arith.constant 0 : index
    %c0_739 = arith.constant 0 : index
    %926 = vector.load %arg15[%c20_737, %c0_738, %c0_739] : memref<100x6x6xf32, #tpu.memory_space<vmem>>, vector<1x6x6xf32>
    %927 = vector.shape_cast %926 : vector<1x6x6xf32> to vector<6x6xf32>
    %cst_740 = arith.constant dense<0.000000e+00> : vector<6x256xf32>
    %928 = tpu.matmul %927, %181, %cst_740 {dimension_numbers = #tpu.dot_dimension_numbers<[1], [0], [0], [1], [0, 0, 1, 1], [], []>} : vector<6x6xf32>, vector<6x256xf32>, vector<6x256xf32> -> vector<6x256xf32>
    %929 = arith.addf %925, %928 : vector<6x256xf32>
    %c21_741 = arith.constant 21 : index
    %c0_742 = arith.constant 0 : index
    %c0_743 = arith.constant 0 : index
    %930 = vector.load %arg15[%c21_741, %c0_742, %c0_743] : memref<100x6x6xf32, #tpu.memory_space<vmem>>, vector<1x6x6xf32>
    %931 = vector.shape_cast %930 : vector<1x6x6xf32> to vector<6x6xf32>
    %cst_744 = arith.constant dense<0.000000e+00> : vector<6x256xf32>
    %932 = tpu.matmul %931, %186, %cst_744 {dimension_numbers = #tpu.dot_dimension_numbers<[1], [0], [0], [1], [0, 0, 1, 1], [], []>} : vector<6x6xf32>, vector<6x256xf32>, vector<6x256xf32> -> vector<6x256xf32>
    %933 = arith.addf %929, %932 : vector<6x256xf32>
    %c22_745 = arith.constant 22 : index
    %c0_746 = arith.constant 0 : index
    %c0_747 = arith.constant 0 : index
    %934 = vector.load %arg15[%c22_745, %c0_746, %c0_747] : memref<100x6x6xf32, #tpu.memory_space<vmem>>, vector<1x6x6xf32>
    %935 = vector.shape_cast %934 : vector<1x6x6xf32> to vector<6x6xf32>
    %cst_748 = arith.constant dense<0.000000e+00> : vector<6x256xf32>
    %936 = tpu.matmul %935, %191, %cst_748 {dimension_numbers = #tpu.dot_dimension_numbers<[1], [0], [0], [1], [0, 0, 1, 1], [], []>} : vector<6x6xf32>, vector<6x256xf32>, vector<6x256xf32> -> vector<6x256xf32>
    %937 = arith.addf %933, %936 : vector<6x256xf32>
    %c23_749 = arith.constant 23 : index
    %c0_750 = arith.constant 0 : index
    %c0_751 = arith.constant 0 : index
    %938 = vector.load %arg15[%c23_749, %c0_750, %c0_751] : memref<100x6x6xf32, #tpu.memory_space<vmem>>, vector<1x6x6xf32>
    %939 = vector.shape_cast %938 : vector<1x6x6xf32> to vector<6x6xf32>
    %cst_752 = arith.constant dense<0.000000e+00> : vector<6x256xf32>
    %940 = tpu.matmul %939, %196, %cst_752 {dimension_numbers = #tpu.dot_dimension_numbers<[1], [0], [0], [1], [0, 0, 1, 1], [], []>} : vector<6x6xf32>, vector<6x256xf32>, vector<6x256xf32> -> vector<6x256xf32>
    %941 = arith.addf %937, %940 : vector<6x256xf32>
    %c24_753 = arith.constant 24 : index
    %c0_754 = arith.constant 0 : index
    %c0_755 = arith.constant 0 : index
    %942 = vector.load %arg15[%c24_753, %c0_754, %c0_755] : memref<100x6x6xf32, #tpu.memory_space<vmem>>, vector<1x6x6xf32>
    %943 = vector.shape_cast %942 : vector<1x6x6xf32> to vector<6x6xf32>
    %cst_756 = arith.constant dense<0.000000e+00> : vector<6x256xf32>
    %944 = tpu.matmul %943, %201, %cst_756 {dimension_numbers = #tpu.dot_dimension_numbers<[1], [0], [0], [1], [0, 0, 1, 1], [], []>} : vector<6x6xf32>, vector<6x256xf32>, vector<6x256xf32> -> vector<6x256xf32>
    %945 = arith.addf %941, %944 : vector<6x256xf32>
    %c34_i32_757 = arith.constant 34 : i32
    %946 = tpu.dynamic_rotate %368 by %c34_i32_757 dim 1 : vector<6x256xf32>, i32 -> vector<6x256xf32>
    %c8_758 = arith.constant 8 : index
    %c0_759 = arith.constant 0 : index
    %c0_760 = arith.constant 0 : index
    %947 = vector.load %arg2[%c8_758, %c0_759, %c0_760] : memref<49x1x256xf32, #tpu.memory_space<vmem>>, vector<1x1x256xf32>
    %948 = vector.shape_cast %947 : vector<1x1x256xf32> to vector<1x256xf32>
    %949 = vector.broadcast %948 : vector<1x256xf32> to vector<6x256xf32>
    %950 = arith.mulf %946, %949 : vector<6x256xf32>
    %c33_i32_761 = arith.constant 33 : i32
    %951 = tpu.dynamic_rotate %368 by %c33_i32_761 dim 1 : vector<6x256xf32>, i32 -> vector<6x256xf32>
    %c9_762 = arith.constant 9 : index
    %c0_763 = arith.constant 0 : index
    %c0_764 = arith.constant 0 : index
    %952 = vector.load %arg2[%c9_762, %c0_763, %c0_764] : memref<49x1x256xf32, #tpu.memory_space<vmem>>, vector<1x1x256xf32>
    %953 = vector.shape_cast %952 : vector<1x1x256xf32> to vector<1x256xf32>
    %954 = vector.broadcast %953 : vector<1x256xf32> to vector<6x256xf32>
    %955 = arith.mulf %951, %954 : vector<6x256xf32>
    %c32_i32_765 = arith.constant 32 : i32
    %956 = tpu.dynamic_rotate %368 by %c32_i32_765 dim 1 : vector<6x256xf32>, i32 -> vector<6x256xf32>
    %c10_766 = arith.constant 10 : index
    %c0_767 = arith.constant 0 : index
    %c0_768 = arith.constant 0 : index
    %957 = vector.load %arg2[%c10_766, %c0_767, %c0_768] : memref<49x1x256xf32, #tpu.memory_space<vmem>>, vector<1x1x256xf32>
    %958 = vector.shape_cast %957 : vector<1x1x256xf32> to vector<1x256xf32>
    %959 = vector.broadcast %958 : vector<1x256xf32> to vector<6x256xf32>
    %960 = arith.mulf %956, %959 : vector<6x256xf32>
    %c31_i32_769 = arith.constant 31 : i32
    %961 = tpu.dynamic_rotate %368 by %c31_i32_769 dim 1 : vector<6x256xf32>, i32 -> vector<6x256xf32>
    %c11_770 = arith.constant 11 : index
    %c0_771 = arith.constant 0 : index
    %c0_772 = arith.constant 0 : index
    %962 = vector.load %arg2[%c11_770, %c0_771, %c0_772] : memref<49x1x256xf32, #tpu.memory_space<vmem>>, vector<1x1x256xf32>
    %963 = vector.shape_cast %962 : vector<1x1x256xf32> to vector<1x256xf32>
    %964 = vector.broadcast %963 : vector<1x256xf32> to vector<6x256xf32>
    %965 = arith.mulf %961, %964 : vector<6x256xf32>
    %c30_i32_773 = arith.constant 30 : i32
    %966 = tpu.dynamic_rotate %368 by %c30_i32_773 dim 1 : vector<6x256xf32>, i32 -> vector<6x256xf32>
    %c12_774 = arith.constant 12 : index
    %c0_775 = arith.constant 0 : index
    %c0_776 = arith.constant 0 : index
    %967 = vector.load %arg2[%c12_774, %c0_775, %c0_776] : memref<49x1x256xf32, #tpu.memory_space<vmem>>, vector<1x1x256xf32>
    %968 = vector.shape_cast %967 : vector<1x1x256xf32> to vector<1x256xf32>
    %969 = vector.broadcast %968 : vector<1x256xf32> to vector<6x256xf32>
    %970 = arith.mulf %966, %969 : vector<6x256xf32>
    %c18_i32_777 = arith.constant 18 : i32
    %971 = tpu.dynamic_rotate %368 by %c18_i32_777 dim 1 : vector<6x256xf32>, i32 -> vector<6x256xf32>
    %c15_778 = arith.constant 15 : index
    %c0_779 = arith.constant 0 : index
    %c0_780 = arith.constant 0 : index
    %972 = vector.load %arg2[%c15_778, %c0_779, %c0_780] : memref<49x1x256xf32, #tpu.memory_space<vmem>>, vector<1x1x256xf32>
    %973 = vector.shape_cast %972 : vector<1x1x256xf32> to vector<1x256xf32>
    %974 = vector.broadcast %973 : vector<1x256xf32> to vector<6x256xf32>
    %975 = arith.mulf %971, %974 : vector<6x256xf32>
    %c17_i32_781 = arith.constant 17 : i32
    %976 = tpu.dynamic_rotate %368 by %c17_i32_781 dim 1 : vector<6x256xf32>, i32 -> vector<6x256xf32>
    %c16_782 = arith.constant 16 : index
    %c0_783 = arith.constant 0 : index
    %c0_784 = arith.constant 0 : index
    %977 = vector.load %arg2[%c16_782, %c0_783, %c0_784] : memref<49x1x256xf32, #tpu.memory_space<vmem>>, vector<1x1x256xf32>
    %978 = vector.shape_cast %977 : vector<1x1x256xf32> to vector<1x256xf32>
    %979 = vector.broadcast %978 : vector<1x256xf32> to vector<6x256xf32>
    %980 = arith.mulf %976, %979 : vector<6x256xf32>
    %c16_i32_785 = arith.constant 16 : i32
    %981 = tpu.dynamic_rotate %368 by %c16_i32_785 dim 1 : vector<6x256xf32>, i32 -> vector<6x256xf32>
    %c17_786 = arith.constant 17 : index
    %c0_787 = arith.constant 0 : index
    %c0_788 = arith.constant 0 : index
    %982 = vector.load %arg2[%c17_786, %c0_787, %c0_788] : memref<49x1x256xf32, #tpu.memory_space<vmem>>, vector<1x1x256xf32>
    %983 = vector.shape_cast %982 : vector<1x1x256xf32> to vector<1x256xf32>
    %984 = vector.broadcast %983 : vector<1x256xf32> to vector<6x256xf32>
    %985 = arith.mulf %981, %984 : vector<6x256xf32>
    %c15_i32_789 = arith.constant 15 : i32
    %986 = tpu.dynamic_rotate %368 by %c15_i32_789 dim 1 : vector<6x256xf32>, i32 -> vector<6x256xf32>
    %c18_790 = arith.constant 18 : index
    %c0_791 = arith.constant 0 : index
    %c0_792 = arith.constant 0 : index
    %987 = vector.load %arg2[%c18_790, %c0_791, %c0_792] : memref<49x1x256xf32, #tpu.memory_space<vmem>>, vector<1x1x256xf32>
    %988 = vector.shape_cast %987 : vector<1x1x256xf32> to vector<1x256xf32>
    %989 = vector.broadcast %988 : vector<1x256xf32> to vector<6x256xf32>
    %990 = arith.mulf %986, %989 : vector<6x256xf32>
    %c14_i32_793 = arith.constant 14 : i32
    %991 = tpu.dynamic_rotate %368 by %c14_i32_793 dim 1 : vector<6x256xf32>, i32 -> vector<6x256xf32>
    %c19_794 = arith.constant 19 : index
    %c0_795 = arith.constant 0 : index
    %c0_796 = arith.constant 0 : index
    %992 = vector.load %arg2[%c19_794, %c0_795, %c0_796] : memref<49x1x256xf32, #tpu.memory_space<vmem>>, vector<1x1x256xf32>
    %993 = vector.shape_cast %992 : vector<1x1x256xf32> to vector<1x256xf32>
    %994 = vector.broadcast %993 : vector<1x256xf32> to vector<6x256xf32>
    %995 = arith.mulf %991, %994 : vector<6x256xf32>
    %c2_i32_797 = arith.constant 2 : i32
    %996 = tpu.dynamic_rotate %368 by %c2_i32_797 dim 1 : vector<6x256xf32>, i32 -> vector<6x256xf32>
    %c22_798 = arith.constant 22 : index
    %c0_799 = arith.constant 0 : index
    %c0_800 = arith.constant 0 : index
    %997 = vector.load %arg2[%c22_798, %c0_799, %c0_800] : memref<49x1x256xf32, #tpu.memory_space<vmem>>, vector<1x1x256xf32>
    %998 = vector.shape_cast %997 : vector<1x1x256xf32> to vector<1x256xf32>
    %999 = vector.broadcast %998 : vector<1x256xf32> to vector<6x256xf32>
    %1000 = arith.mulf %996, %999 : vector<6x256xf32>
    %c1_i32_801 = arith.constant 1 : i32
    %1001 = tpu.dynamic_rotate %368 by %c1_i32_801 dim 1 : vector<6x256xf32>, i32 -> vector<6x256xf32>
    %c23_802 = arith.constant 23 : index
    %c0_803 = arith.constant 0 : index
    %c0_804 = arith.constant 0 : index
    %1002 = vector.load %arg2[%c23_802, %c0_803, %c0_804] : memref<49x1x256xf32, #tpu.memory_space<vmem>>, vector<1x1x256xf32>
    %1003 = vector.shape_cast %1002 : vector<1x1x256xf32> to vector<1x256xf32>
    %1004 = vector.broadcast %1003 : vector<1x256xf32> to vector<6x256xf32>
    %1005 = arith.mulf %1001, %1004 : vector<6x256xf32>
    %c255_i32_805 = arith.constant 255 : i32
    %1006 = tpu.dynamic_rotate %368 by %c255_i32_805 dim 1 : vector<6x256xf32>, i32 -> vector<6x256xf32>
    %c25_806 = arith.constant 25 : index
    %c0_807 = arith.constant 0 : index
    %c0_808 = arith.constant 0 : index
    %1007 = vector.load %arg2[%c25_806, %c0_807, %c0_808] : memref<49x1x256xf32, #tpu.memory_space<vmem>>, vector<1x1x256xf32>
    %1008 = vector.shape_cast %1007 : vector<1x1x256xf32> to vector<1x256xf32>
    %1009 = vector.broadcast %1008 : vector<1x256xf32> to vector<6x256xf32>
    %1010 = arith.mulf %1006, %1009 : vector<6x256xf32>
    %c254_i32_809 = arith.constant 254 : i32
    %1011 = tpu.dynamic_rotate %368 by %c254_i32_809 dim 1 : vector<6x256xf32>, i32 -> vector<6x256xf32>
    %c26_810 = arith.constant 26 : index
    %c0_811 = arith.constant 0 : index
    %c0_812 = arith.constant 0 : index
    %1012 = vector.load %arg2[%c26_810, %c0_811, %c0_812] : memref<49x1x256xf32, #tpu.memory_space<vmem>>, vector<1x1x256xf32>
    %1013 = vector.shape_cast %1012 : vector<1x1x256xf32> to vector<1x256xf32>
    %1014 = vector.broadcast %1013 : vector<1x256xf32> to vector<6x256xf32>
    %1015 = arith.mulf %1011, %1014 : vector<6x256xf32>
    %c242_i32_813 = arith.constant 242 : i32
    %1016 = tpu.dynamic_rotate %368 by %c242_i32_813 dim 1 : vector<6x256xf32>, i32 -> vector<6x256xf32>
    %c29_814 = arith.constant 29 : index
    %c0_815 = arith.constant 0 : index
    %c0_816 = arith.constant 0 : index
    %1017 = vector.load %arg2[%c29_814, %c0_815, %c0_816] : memref<49x1x256xf32, #tpu.memory_space<vmem>>, vector<1x1x256xf32>
    %1018 = vector.shape_cast %1017 : vector<1x1x256xf32> to vector<1x256xf32>
    %1019 = vector.broadcast %1018 : vector<1x256xf32> to vector<6x256xf32>
    %1020 = arith.mulf %1016, %1019 : vector<6x256xf32>
    %c241_i32_817 = arith.constant 241 : i32
    %1021 = tpu.dynamic_rotate %368 by %c241_i32_817 dim 1 : vector<6x256xf32>, i32 -> vector<6x256xf32>
    %c30_818 = arith.constant 30 : index
    %c0_819 = arith.constant 0 : index
    %c0_820 = arith.constant 0 : index
    %1022 = vector.load %arg2[%c30_818, %c0_819, %c0_820] : memref<49x1x256xf32, #tpu.memory_space<vmem>>, vector<1x1x256xf32>
    %1023 = vector.shape_cast %1022 : vector<1x1x256xf32> to vector<1x256xf32>
    %1024 = vector.broadcast %1023 : vector<1x256xf32> to vector<6x256xf32>
    %1025 = arith.mulf %1021, %1024 : vector<6x256xf32>
    %c240_i32_821 = arith.constant 240 : i32
    %1026 = tpu.dynamic_rotate %368 by %c240_i32_821 dim 1 : vector<6x256xf32>, i32 -> vector<6x256xf32>
    %c31_822 = arith.constant 31 : index
    %c0_823 = arith.constant 0 : index
    %c0_824 = arith.constant 0 : index
    %1027 = vector.load %arg2[%c31_822, %c0_823, %c0_824] : memref<49x1x256xf32, #tpu.memory_space<vmem>>, vector<1x1x256xf32>
    %1028 = vector.shape_cast %1027 : vector<1x1x256xf32> to vector<1x256xf32>
    %1029 = vector.broadcast %1028 : vector<1x256xf32> to vector<6x256xf32>
    %1030 = arith.mulf %1026, %1029 : vector<6x256xf32>
    %c239_i32_825 = arith.constant 239 : i32
    %1031 = tpu.dynamic_rotate %368 by %c239_i32_825 dim 1 : vector<6x256xf32>, i32 -> vector<6x256xf32>
    %c32_826 = arith.constant 32 : index
    %c0_827 = arith.constant 0 : index
    %c0_828 = arith.constant 0 : index
    %1032 = vector.load %arg2[%c32_826, %c0_827, %c0_828] : memref<49x1x256xf32, #tpu.memory_space<vmem>>, vector<1x1x256xf32>
    %1033 = vector.shape_cast %1032 : vector<1x1x256xf32> to vector<1x256xf32>
    %1034 = vector.broadcast %1033 : vector<1x256xf32> to vector<6x256xf32>
    %1035 = arith.mulf %1031, %1034 : vector<6x256xf32>
    %c238_i32_829 = arith.constant 238 : i32
    %1036 = tpu.dynamic_rotate %368 by %c238_i32_829 dim 1 : vector<6x256xf32>, i32 -> vector<6x256xf32>
    %c33_830 = arith.constant 33 : index
    %c0_831 = arith.constant 0 : index
    %c0_832 = arith.constant 0 : index
    %1037 = vector.load %arg2[%c33_830, %c0_831, %c0_832] : memref<49x1x256xf32, #tpu.memory_space<vmem>>, vector<1x1x256xf32>
    %1038 = vector.shape_cast %1037 : vector<1x1x256xf32> to vector<1x256xf32>
    %1039 = vector.broadcast %1038 : vector<1x256xf32> to vector<6x256xf32>
    %1040 = arith.mulf %1036, %1039 : vector<6x256xf32>
    %c226_i32_833 = arith.constant 226 : i32
    %1041 = tpu.dynamic_rotate %368 by %c226_i32_833 dim 1 : vector<6x256xf32>, i32 -> vector<6x256xf32>
    %c36_834 = arith.constant 36 : index
    %c0_835 = arith.constant 0 : index
    %c0_836 = arith.constant 0 : index
    %1042 = vector.load %arg2[%c36_834, %c0_835, %c0_836] : memref<49x1x256xf32, #tpu.memory_space<vmem>>, vector<1x1x256xf32>
    %1043 = vector.shape_cast %1042 : vector<1x1x256xf32> to vector<1x256xf32>
    %1044 = vector.broadcast %1043 : vector<1x256xf32> to vector<6x256xf32>
    %1045 = arith.mulf %1041, %1044 : vector<6x256xf32>
    %c225_i32_837 = arith.constant 225 : i32
    %1046 = tpu.dynamic_rotate %368 by %c225_i32_837 dim 1 : vector<6x256xf32>, i32 -> vector<6x256xf32>
    %c37_838 = arith.constant 37 : index
    %c0_839 = arith.constant 0 : index
    %c0_840 = arith.constant 0 : index
    %1047 = vector.load %arg2[%c37_838, %c0_839, %c0_840] : memref<49x1x256xf32, #tpu.memory_space<vmem>>, vector<1x1x256xf32>
    %1048 = vector.shape_cast %1047 : vector<1x1x256xf32> to vector<1x256xf32>
    %1049 = vector.broadcast %1048 : vector<1x256xf32> to vector<6x256xf32>
    %1050 = arith.mulf %1046, %1049 : vector<6x256xf32>
    %c224_i32_841 = arith.constant 224 : i32
    %1051 = tpu.dynamic_rotate %368 by %c224_i32_841 dim 1 : vector<6x256xf32>, i32 -> vector<6x256xf32>
    %c38_842 = arith.constant 38 : index
    %c0_843 = arith.constant 0 : index
    %c0_844 = arith.constant 0 : index
    %1052 = vector.load %arg2[%c38_842, %c0_843, %c0_844] : memref<49x1x256xf32, #tpu.memory_space<vmem>>, vector<1x1x256xf32>
    %1053 = vector.shape_cast %1052 : vector<1x1x256xf32> to vector<1x256xf32>
    %1054 = vector.broadcast %1053 : vector<1x256xf32> to vector<6x256xf32>
    %1055 = arith.mulf %1051, %1054 : vector<6x256xf32>
    %c223_i32_845 = arith.constant 223 : i32
    %1056 = tpu.dynamic_rotate %368 by %c223_i32_845 dim 1 : vector<6x256xf32>, i32 -> vector<6x256xf32>
    %c39_846 = arith.constant 39 : index
    %c0_847 = arith.constant 0 : index
    %c0_848 = arith.constant 0 : index
    %1057 = vector.load %arg2[%c39_846, %c0_847, %c0_848] : memref<49x1x256xf32, #tpu.memory_space<vmem>>, vector<1x1x256xf32>
    %1058 = vector.shape_cast %1057 : vector<1x1x256xf32> to vector<1x256xf32>
    %1059 = vector.broadcast %1058 : vector<1x256xf32> to vector<6x256xf32>
    %1060 = arith.mulf %1056, %1059 : vector<6x256xf32>
    %c222_i32_849 = arith.constant 222 : i32
    %1061 = tpu.dynamic_rotate %368 by %c222_i32_849 dim 1 : vector<6x256xf32>, i32 -> vector<6x256xf32>
    %c40_850 = arith.constant 40 : index
    %c0_851 = arith.constant 0 : index
    %c0_852 = arith.constant 0 : index
    %1062 = vector.load %arg2[%c40_850, %c0_851, %c0_852] : memref<49x1x256xf32, #tpu.memory_space<vmem>>, vector<1x1x256xf32>
    %1063 = vector.shape_cast %1062 : vector<1x1x256xf32> to vector<1x256xf32>
    %1064 = vector.broadcast %1063 : vector<1x256xf32> to vector<6x256xf32>
    %1065 = arith.mulf %1061, %1064 : vector<6x256xf32>
    %c25_853 = arith.constant 25 : index
    %c0_854 = arith.constant 0 : index
    %c0_855 = arith.constant 0 : index
    %1066 = vector.load %arg15[%c25_853, %c0_854, %c0_855] : memref<100x6x6xf32, #tpu.memory_space<vmem>>, vector<1x6x6xf32>
    %1067 = vector.shape_cast %1066 : vector<1x6x6xf32> to vector<6x6xf32>
    %cst_856 = arith.constant dense<0.000000e+00> : vector<6x256xf32>
    %1068 = tpu.matmul %1067, %950, %cst_856 {dimension_numbers = #tpu.dot_dimension_numbers<[1], [0], [0], [1], [0, 0, 1, 1], [], []>} : vector<6x6xf32>, vector<6x256xf32>, vector<6x256xf32> -> vector<6x256xf32>
    %c26_857 = arith.constant 26 : index
    %c0_858 = arith.constant 0 : index
    %c0_859 = arith.constant 0 : index
    %1069 = vector.load %arg15[%c26_857, %c0_858, %c0_859] : memref<100x6x6xf32, #tpu.memory_space<vmem>>, vector<1x6x6xf32>
    %1070 = vector.shape_cast %1069 : vector<1x6x6xf32> to vector<6x6xf32>
    %cst_860 = arith.constant dense<0.000000e+00> : vector<6x256xf32>
    %1071 = tpu.matmul %1070, %955, %cst_860 {dimension_numbers = #tpu.dot_dimension_numbers<[1], [0], [0], [1], [0, 0, 1, 1], [], []>} : vector<6x6xf32>, vector<6x256xf32>, vector<6x256xf32> -> vector<6x256xf32>
    %1072 = arith.addf %1068, %1071 : vector<6x256xf32>
    %c27_861 = arith.constant 27 : index
    %c0_862 = arith.constant 0 : index
    %c0_863 = arith.constant 0 : index
    %1073 = vector.load %arg15[%c27_861, %c0_862, %c0_863] : memref<100x6x6xf32, #tpu.memory_space<vmem>>, vector<1x6x6xf32>
    %1074 = vector.shape_cast %1073 : vector<1x6x6xf32> to vector<6x6xf32>
    %cst_864 = arith.constant dense<0.000000e+00> : vector<6x256xf32>
    %1075 = tpu.matmul %1074, %960, %cst_864 {dimension_numbers = #tpu.dot_dimension_numbers<[1], [0], [0], [1], [0, 0, 1, 1], [], []>} : vector<6x6xf32>, vector<6x256xf32>, vector<6x256xf32> -> vector<6x256xf32>
    %1076 = arith.addf %1072, %1075 : vector<6x256xf32>
    %c28_865 = arith.constant 28 : index
    %c0_866 = arith.constant 0 : index
    %c0_867 = arith.constant 0 : index
    %1077 = vector.load %arg15[%c28_865, %c0_866, %c0_867] : memref<100x6x6xf32, #tpu.memory_space<vmem>>, vector<1x6x6xf32>
    %1078 = vector.shape_cast %1077 : vector<1x6x6xf32> to vector<6x6xf32>
    %cst_868 = arith.constant dense<0.000000e+00> : vector<6x256xf32>
    %1079 = tpu.matmul %1078, %965, %cst_868 {dimension_numbers = #tpu.dot_dimension_numbers<[1], [0], [0], [1], [0, 0, 1, 1], [], []>} : vector<6x6xf32>, vector<6x256xf32>, vector<6x256xf32> -> vector<6x256xf32>
    %1080 = arith.addf %1076, %1079 : vector<6x256xf32>
    %c29_869 = arith.constant 29 : index
    %c0_870 = arith.constant 0 : index
    %c0_871 = arith.constant 0 : index
    %1081 = vector.load %arg15[%c29_869, %c0_870, %c0_871] : memref<100x6x6xf32, #tpu.memory_space<vmem>>, vector<1x6x6xf32>
    %1082 = vector.shape_cast %1081 : vector<1x6x6xf32> to vector<6x6xf32>
    %cst_872 = arith.constant dense<0.000000e+00> : vector<6x256xf32>
    %1083 = tpu.matmul %1082, %970, %cst_872 {dimension_numbers = #tpu.dot_dimension_numbers<[1], [0], [0], [1], [0, 0, 1, 1], [], []>} : vector<6x6xf32>, vector<6x256xf32>, vector<6x256xf32> -> vector<6x256xf32>
    %1084 = arith.addf %1080, %1083 : vector<6x256xf32>
    %c30_873 = arith.constant 30 : index
    %c0_874 = arith.constant 0 : index
    %c0_875 = arith.constant 0 : index
    %1085 = vector.load %arg15[%c30_873, %c0_874, %c0_875] : memref<100x6x6xf32, #tpu.memory_space<vmem>>, vector<1x6x6xf32>
    %1086 = vector.shape_cast %1085 : vector<1x6x6xf32> to vector<6x6xf32>
    %cst_876 = arith.constant dense<0.000000e+00> : vector<6x256xf32>
    %1087 = tpu.matmul %1086, %975, %cst_876 {dimension_numbers = #tpu.dot_dimension_numbers<[1], [0], [0], [1], [0, 0, 1, 1], [], []>} : vector<6x6xf32>, vector<6x256xf32>, vector<6x256xf32> -> vector<6x256xf32>
    %1088 = arith.addf %1084, %1087 : vector<6x256xf32>
    %c31_877 = arith.constant 31 : index
    %c0_878 = arith.constant 0 : index
    %c0_879 = arith.constant 0 : index
    %1089 = vector.load %arg15[%c31_877, %c0_878, %c0_879] : memref<100x6x6xf32, #tpu.memory_space<vmem>>, vector<1x6x6xf32>
    %1090 = vector.shape_cast %1089 : vector<1x6x6xf32> to vector<6x6xf32>
    %cst_880 = arith.constant dense<0.000000e+00> : vector<6x256xf32>
    %1091 = tpu.matmul %1090, %980, %cst_880 {dimension_numbers = #tpu.dot_dimension_numbers<[1], [0], [0], [1], [0, 0, 1, 1], [], []>} : vector<6x6xf32>, vector<6x256xf32>, vector<6x256xf32> -> vector<6x256xf32>
    %1092 = arith.addf %1088, %1091 : vector<6x256xf32>
    %c32_881 = arith.constant 32 : index
    %c0_882 = arith.constant 0 : index
    %c0_883 = arith.constant 0 : index
    %1093 = vector.load %arg15[%c32_881, %c0_882, %c0_883] : memref<100x6x6xf32, #tpu.memory_space<vmem>>, vector<1x6x6xf32>
    %1094 = vector.shape_cast %1093 : vector<1x6x6xf32> to vector<6x6xf32>
    %cst_884 = arith.constant dense<0.000000e+00> : vector<6x256xf32>
    %1095 = tpu.matmul %1094, %985, %cst_884 {dimension_numbers = #tpu.dot_dimension_numbers<[1], [0], [0], [1], [0, 0, 1, 1], [], []>} : vector<6x6xf32>, vector<6x256xf32>, vector<6x256xf32> -> vector<6x256xf32>
    %1096 = arith.addf %1092, %1095 : vector<6x256xf32>
    %c33_885 = arith.constant 33 : index
    %c0_886 = arith.constant 0 : index
    %c0_887 = arith.constant 0 : index
    %1097 = vector.load %arg15[%c33_885, %c0_886, %c0_887] : memref<100x6x6xf32, #tpu.memory_space<vmem>>, vector<1x6x6xf32>
    %1098 = vector.shape_cast %1097 : vector<1x6x6xf32> to vector<6x6xf32>
    %cst_888 = arith.constant dense<0.000000e+00> : vector<6x256xf32>
    %1099 = tpu.matmul %1098, %990, %cst_888 {dimension_numbers = #tpu.dot_dimension_numbers<[1], [0], [0], [1], [0, 0, 1, 1], [], []>} : vector<6x6xf32>, vector<6x256xf32>, vector<6x256xf32> -> vector<6x256xf32>
    %1100 = arith.addf %1096, %1099 : vector<6x256xf32>
    %c34_889 = arith.constant 34 : index
    %c0_890 = arith.constant 0 : index
    %c0_891 = arith.constant 0 : index
    %1101 = vector.load %arg15[%c34_889, %c0_890, %c0_891] : memref<100x6x6xf32, #tpu.memory_space<vmem>>, vector<1x6x6xf32>
    %1102 = vector.shape_cast %1101 : vector<1x6x6xf32> to vector<6x6xf32>
    %cst_892 = arith.constant dense<0.000000e+00> : vector<6x256xf32>
    %1103 = tpu.matmul %1102, %995, %cst_892 {dimension_numbers = #tpu.dot_dimension_numbers<[1], [0], [0], [1], [0, 0, 1, 1], [], []>} : vector<6x6xf32>, vector<6x256xf32>, vector<6x256xf32> -> vector<6x256xf32>
    %1104 = arith.addf %1100, %1103 : vector<6x256xf32>
    %c35_893 = arith.constant 35 : index
    %c0_894 = arith.constant 0 : index
    %c0_895 = arith.constant 0 : index
    %1105 = vector.load %arg15[%c35_893, %c0_894, %c0_895] : memref<100x6x6xf32, #tpu.memory_space<vmem>>, vector<1x6x6xf32>
    %1106 = vector.shape_cast %1105 : vector<1x6x6xf32> to vector<6x6xf32>
    %cst_896 = arith.constant dense<0.000000e+00> : vector<6x256xf32>
    %1107 = tpu.matmul %1106, %1000, %cst_896 {dimension_numbers = #tpu.dot_dimension_numbers<[1], [0], [0], [1], [0, 0, 1, 1], [], []>} : vector<6x6xf32>, vector<6x256xf32>, vector<6x256xf32> -> vector<6x256xf32>
    %1108 = arith.addf %1104, %1107 : vector<6x256xf32>
    %c36_897 = arith.constant 36 : index
    %c0_898 = arith.constant 0 : index
    %c0_899 = arith.constant 0 : index
    %1109 = vector.load %arg15[%c36_897, %c0_898, %c0_899] : memref<100x6x6xf32, #tpu.memory_space<vmem>>, vector<1x6x6xf32>
    %1110 = vector.shape_cast %1109 : vector<1x6x6xf32> to vector<6x6xf32>
    %cst_900 = arith.constant dense<0.000000e+00> : vector<6x256xf32>
    %1111 = tpu.matmul %1110, %1005, %cst_900 {dimension_numbers = #tpu.dot_dimension_numbers<[1], [0], [0], [1], [0, 0, 1, 1], [], []>} : vector<6x6xf32>, vector<6x256xf32>, vector<6x256xf32> -> vector<6x256xf32>
    %1112 = arith.addf %1108, %1111 : vector<6x256xf32>
    %c37_901 = arith.constant 37 : index
    %c0_902 = arith.constant 0 : index
    %c0_903 = arith.constant 0 : index
    %1113 = vector.load %arg15[%c37_901, %c0_902, %c0_903] : memref<100x6x6xf32, #tpu.memory_space<vmem>>, vector<1x6x6xf32>
    %1114 = vector.shape_cast %1113 : vector<1x6x6xf32> to vector<6x6xf32>
    %cst_904 = arith.constant dense<0.000000e+00> : vector<6x256xf32>
    %1115 = tpu.matmul %1114, %368, %cst_904 {dimension_numbers = #tpu.dot_dimension_numbers<[1], [0], [0], [1], [0, 0, 1, 1], [], []>} : vector<6x6xf32>, vector<6x256xf32>, vector<6x256xf32> -> vector<6x256xf32>
    %1116 = arith.addf %1112, %1115 : vector<6x256xf32>
    %c38_905 = arith.constant 38 : index
    %c0_906 = arith.constant 0 : index
    %c0_907 = arith.constant 0 : index
    %1117 = vector.load %arg15[%c38_905, %c0_906, %c0_907] : memref<100x6x6xf32, #tpu.memory_space<vmem>>, vector<1x6x6xf32>
    %1118 = vector.shape_cast %1117 : vector<1x6x6xf32> to vector<6x6xf32>
    %cst_908 = arith.constant dense<0.000000e+00> : vector<6x256xf32>
    %1119 = tpu.matmul %1118, %1010, %cst_908 {dimension_numbers = #tpu.dot_dimension_numbers<[1], [0], [0], [1], [0, 0, 1, 1], [], []>} : vector<6x6xf32>, vector<6x256xf32>, vector<6x256xf32> -> vector<6x256xf32>
    %1120 = arith.addf %1116, %1119 : vector<6x256xf32>
    %c39_909 = arith.constant 39 : index
    %c0_910 = arith.constant 0 : index
    %c0_911 = arith.constant 0 : index
    %1121 = vector.load %arg15[%c39_909, %c0_910, %c0_911] : memref<100x6x6xf32, #tpu.memory_space<vmem>>, vector<1x6x6xf32>
    %1122 = vector.shape_cast %1121 : vector<1x6x6xf32> to vector<6x6xf32>
    %cst_912 = arith.constant dense<0.000000e+00> : vector<6x256xf32>
    %1123 = tpu.matmul %1122, %1015, %cst_912 {dimension_numbers = #tpu.dot_dimension_numbers<[1], [0], [0], [1], [0, 0, 1, 1], [], []>} : vector<6x6xf32>, vector<6x256xf32>, vector<6x256xf32> -> vector<6x256xf32>
    %1124 = arith.addf %1120, %1123 : vector<6x256xf32>
    %c40_913 = arith.constant 40 : index
    %c0_914 = arith.constant 0 : index
    %c0_915 = arith.constant 0 : index
    %1125 = vector.load %arg15[%c40_913, %c0_914, %c0_915] : memref<100x6x6xf32, #tpu.memory_space<vmem>>, vector<1x6x6xf32>
    %1126 = vector.shape_cast %1125 : vector<1x6x6xf32> to vector<6x6xf32>
    %cst_916 = arith.constant dense<0.000000e+00> : vector<6x256xf32>
    %1127 = tpu.matmul %1126, %1020, %cst_916 {dimension_numbers = #tpu.dot_dimension_numbers<[1], [0], [0], [1], [0, 0, 1, 1], [], []>} : vector<6x6xf32>, vector<6x256xf32>, vector<6x256xf32> -> vector<6x256xf32>
    %1128 = arith.addf %1124, %1127 : vector<6x256xf32>
    %c41_917 = arith.constant 41 : index
    %c0_918 = arith.constant 0 : index
    %c0_919 = arith.constant 0 : index
    %1129 = vector.load %arg15[%c41_917, %c0_918, %c0_919] : memref<100x6x6xf32, #tpu.memory_space<vmem>>, vector<1x6x6xf32>
    %1130 = vector.shape_cast %1129 : vector<1x6x6xf32> to vector<6x6xf32>
    %cst_920 = arith.constant dense<0.000000e+00> : vector<6x256xf32>
    %1131 = tpu.matmul %1130, %1025, %cst_920 {dimension_numbers = #tpu.dot_dimension_numbers<[1], [0], [0], [1], [0, 0, 1, 1], [], []>} : vector<6x6xf32>, vector<6x256xf32>, vector<6x256xf32> -> vector<6x256xf32>
    %1132 = arith.addf %1128, %1131 : vector<6x256xf32>
    %c42_921 = arith.constant 42 : index
    %c0_922 = arith.constant 0 : index
    %c0_923 = arith.constant 0 : index
    %1133 = vector.load %arg15[%c42_921, %c0_922, %c0_923] : memref<100x6x6xf32, #tpu.memory_space<vmem>>, vector<1x6x6xf32>
    %1134 = vector.shape_cast %1133 : vector<1x6x6xf32> to vector<6x6xf32>
    %cst_924 = arith.constant dense<0.000000e+00> : vector<6x256xf32>
    %1135 = tpu.matmul %1134, %1030, %cst_924 {dimension_numbers = #tpu.dot_dimension_numbers<[1], [0], [0], [1], [0, 0, 1, 1], [], []>} : vector<6x6xf32>, vector<6x256xf32>, vector<6x256xf32> -> vector<6x256xf32>
    %1136 = arith.addf %1132, %1135 : vector<6x256xf32>
    %c43_925 = arith.constant 43 : index
    %c0_926 = arith.constant 0 : index
    %c0_927 = arith.constant 0 : index
    %1137 = vector.load %arg15[%c43_925, %c0_926, %c0_927] : memref<100x6x6xf32, #tpu.memory_space<vmem>>, vector<1x6x6xf32>
    %1138 = vector.shape_cast %1137 : vector<1x6x6xf32> to vector<6x6xf32>
    %cst_928 = arith.constant dense<0.000000e+00> : vector<6x256xf32>
    %1139 = tpu.matmul %1138, %1035, %cst_928 {dimension_numbers = #tpu.dot_dimension_numbers<[1], [0], [0], [1], [0, 0, 1, 1], [], []>} : vector<6x6xf32>, vector<6x256xf32>, vector<6x256xf32> -> vector<6x256xf32>
    %1140 = arith.addf %1136, %1139 : vector<6x256xf32>
    %c44_929 = arith.constant 44 : index
    %c0_930 = arith.constant 0 : index
    %c0_931 = arith.constant 0 : index
    %1141 = vector.load %arg15[%c44_929, %c0_930, %c0_931] : memref<100x6x6xf32, #tpu.memory_space<vmem>>, vector<1x6x6xf32>
    %1142 = vector.shape_cast %1141 : vector<1x6x6xf32> to vector<6x6xf32>
    %cst_932 = arith.constant dense<0.000000e+00> : vector<6x256xf32>
    %1143 = tpu.matmul %1142, %1040, %cst_932 {dimension_numbers = #tpu.dot_dimension_numbers<[1], [0], [0], [1], [0, 0, 1, 1], [], []>} : vector<6x6xf32>, vector<6x256xf32>, vector<6x256xf32> -> vector<6x256xf32>
    %1144 = arith.addf %1140, %1143 : vector<6x256xf32>
    %c45_933 = arith.constant 45 : index
    %c0_934 = arith.constant 0 : index
    %c0_935 = arith.constant 0 : index
    %1145 = vector.load %arg15[%c45_933, %c0_934, %c0_935] : memref<100x6x6xf32, #tpu.memory_space<vmem>>, vector<1x6x6xf32>
    %1146 = vector.shape_cast %1145 : vector<1x6x6xf32> to vector<6x6xf32>
    %cst_936 = arith.constant dense<0.000000e+00> : vector<6x256xf32>
    %1147 = tpu.matmul %1146, %1045, %cst_936 {dimension_numbers = #tpu.dot_dimension_numbers<[1], [0], [0], [1], [0, 0, 1, 1], [], []>} : vector<6x6xf32>, vector<6x256xf32>, vector<6x256xf32> -> vector<6x256xf32>
    %1148 = arith.addf %1144, %1147 : vector<6x256xf32>
    %c46_937 = arith.constant 46 : index
    %c0_938 = arith.constant 0 : index
    %c0_939 = arith.constant 0 : index
    %1149 = vector.load %arg15[%c46_937, %c0_938, %c0_939] : memref<100x6x6xf32, #tpu.memory_space<vmem>>, vector<1x6x6xf32>
    %1150 = vector.shape_cast %1149 : vector<1x6x6xf32> to vector<6x6xf32>
    %cst_940 = arith.constant dense<0.000000e+00> : vector<6x256xf32>
    %1151 = tpu.matmul %1150, %1050, %cst_940 {dimension_numbers = #tpu.dot_dimension_numbers<[1], [0], [0], [1], [0, 0, 1, 1], [], []>} : vector<6x6xf32>, vector<6x256xf32>, vector<6x256xf32> -> vector<6x256xf32>
    %1152 = arith.addf %1148, %1151 : vector<6x256xf32>
    %c47_941 = arith.constant 47 : index
    %c0_942 = arith.constant 0 : index
    %c0_943 = arith.constant 0 : index
    %1153 = vector.load %arg15[%c47_941, %c0_942, %c0_943] : memref<100x6x6xf32, #tpu.memory_space<vmem>>, vector<1x6x6xf32>
    %1154 = vector.shape_cast %1153 : vector<1x6x6xf32> to vector<6x6xf32>
    %cst_944 = arith.constant dense<0.000000e+00> : vector<6x256xf32>
    %1155 = tpu.matmul %1154, %1055, %cst_944 {dimension_numbers = #tpu.dot_dimension_numbers<[1], [0], [0], [1], [0, 0, 1, 1], [], []>} : vector<6x6xf32>, vector<6x256xf32>, vector<6x256xf32> -> vector<6x256xf32>
    %1156 = arith.addf %1152, %1155 : vector<6x256xf32>
    %c48_945 = arith.constant 48 : index
    %c0_946 = arith.constant 0 : index
    %c0_947 = arith.constant 0 : index
    %1157 = vector.load %arg15[%c48_945, %c0_946, %c0_947] : memref<100x6x6xf32, #tpu.memory_space<vmem>>, vector<1x6x6xf32>
    %1158 = vector.shape_cast %1157 : vector<1x6x6xf32> to vector<6x6xf32>
    %cst_948 = arith.constant dense<0.000000e+00> : vector<6x256xf32>
    %1159 = tpu.matmul %1158, %1060, %cst_948 {dimension_numbers = #tpu.dot_dimension_numbers<[1], [0], [0], [1], [0, 0, 1, 1], [], []>} : vector<6x6xf32>, vector<6x256xf32>, vector<6x256xf32> -> vector<6x256xf32>
    %1160 = arith.addf %1156, %1159 : vector<6x256xf32>
    %c49 = arith.constant 49 : index
    %c0_949 = arith.constant 0 : index
    %c0_950 = arith.constant 0 : index
    %1161 = vector.load %arg15[%c49, %c0_949, %c0_950] : memref<100x6x6xf32, #tpu.memory_space<vmem>>, vector<1x6x6xf32>
    %1162 = vector.shape_cast %1161 : vector<1x6x6xf32> to vector<6x6xf32>
    %cst_951 = arith.constant dense<0.000000e+00> : vector<6x256xf32>
    %1163 = tpu.matmul %1162, %1065, %cst_951 {dimension_numbers = #tpu.dot_dimension_numbers<[1], [0], [0], [1], [0, 0, 1, 1], [], []>} : vector<6x6xf32>, vector<6x256xf32>, vector<6x256xf32> -> vector<6x256xf32>
    %1164 = arith.addf %1160, %1163 : vector<6x256xf32>
    %1165 = arith.addf %945, %1164 : vector<6x256xf32>
    %c34_i32_952 = arith.constant 34 : i32
    %1166 = tpu.dynamic_rotate %559 by %c34_i32_952 dim 1 : vector<6x256xf32>, i32 -> vector<6x256xf32>
    %c8_953 = arith.constant 8 : index
    %c0_954 = arith.constant 0 : index
    %c0_955 = arith.constant 0 : index
    %1167 = vector.load %arg2[%c8_953, %c0_954, %c0_955] : memref<49x1x256xf32, #tpu.memory_space<vmem>>, vector<1x1x256xf32>
    %1168 = vector.shape_cast %1167 : vector<1x1x256xf32> to vector<1x256xf32>
    %1169 = vector.broadcast %1168 : vector<1x256xf32> to vector<6x256xf32>
    %1170 = arith.mulf %1166, %1169 : vector<6x256xf32>
    %c33_i32_956 = arith.constant 33 : i32
    %1171 = tpu.dynamic_rotate %559 by %c33_i32_956 dim 1 : vector<6x256xf32>, i32 -> vector<6x256xf32>
    %c9_957 = arith.constant 9 : index
    %c0_958 = arith.constant 0 : index
    %c0_959 = arith.constant 0 : index
    %1172 = vector.load %arg2[%c9_957, %c0_958, %c0_959] : memref<49x1x256xf32, #tpu.memory_space<vmem>>, vector<1x1x256xf32>
    %1173 = vector.shape_cast %1172 : vector<1x1x256xf32> to vector<1x256xf32>
    %1174 = vector.broadcast %1173 : vector<1x256xf32> to vector<6x256xf32>
    %1175 = arith.mulf %1171, %1174 : vector<6x256xf32>
    %c32_i32_960 = arith.constant 32 : i32
    %1176 = tpu.dynamic_rotate %559 by %c32_i32_960 dim 1 : vector<6x256xf32>, i32 -> vector<6x256xf32>
    %c10_961 = arith.constant 10 : index
    %c0_962 = arith.constant 0 : index
    %c0_963 = arith.constant 0 : index
    %1177 = vector.load %arg2[%c10_961, %c0_962, %c0_963] : memref<49x1x256xf32, #tpu.memory_space<vmem>>, vector<1x1x256xf32>
    %1178 = vector.shape_cast %1177 : vector<1x1x256xf32> to vector<1x256xf32>
    %1179 = vector.broadcast %1178 : vector<1x256xf32> to vector<6x256xf32>
    %1180 = arith.mulf %1176, %1179 : vector<6x256xf32>
    %c31_i32_964 = arith.constant 31 : i32
    %1181 = tpu.dynamic_rotate %559 by %c31_i32_964 dim 1 : vector<6x256xf32>, i32 -> vector<6x256xf32>
    %c11_965 = arith.constant 11 : index
    %c0_966 = arith.constant 0 : index
    %c0_967 = arith.constant 0 : index
    %1182 = vector.load %arg2[%c11_965, %c0_966, %c0_967] : memref<49x1x256xf32, #tpu.memory_space<vmem>>, vector<1x1x256xf32>
    %1183 = vector.shape_cast %1182 : vector<1x1x256xf32> to vector<1x256xf32>
    %1184 = vector.broadcast %1183 : vector<1x256xf32> to vector<6x256xf32>
    %1185 = arith.mulf %1181, %1184 : vector<6x256xf32>
    %c30_i32_968 = arith.constant 30 : i32
    %1186 = tpu.dynamic_rotate %559 by %c30_i32_968 dim 1 : vector<6x256xf32>, i32 -> vector<6x256xf32>
    %c12_969 = arith.constant 12 : index
    %c0_970 = arith.constant 0 : index
    %c0_971 = arith.constant 0 : index
    %1187 = vector.load %arg2[%c12_969, %c0_970, %c0_971] : memref<49x1x256xf32, #tpu.memory_space<vmem>>, vector<1x1x256xf32>
    %1188 = vector.shape_cast %1187 : vector<1x1x256xf32> to vector<1x256xf32>
    %1189 = vector.broadcast %1188 : vector<1x256xf32> to vector<6x256xf32>
    %1190 = arith.mulf %1186, %1189 : vector<6x256xf32>
    %c18_i32_972 = arith.constant 18 : i32
    %1191 = tpu.dynamic_rotate %559 by %c18_i32_972 dim 1 : vector<6x256xf32>, i32 -> vector<6x256xf32>
    %c15_973 = arith.constant 15 : index
    %c0_974 = arith.constant 0 : index
    %c0_975 = arith.constant 0 : index
    %1192 = vector.load %arg2[%c15_973, %c0_974, %c0_975] : memref<49x1x256xf32, #tpu.memory_space<vmem>>, vector<1x1x256xf32>
    %1193 = vector.shape_cast %1192 : vector<1x1x256xf32> to vector<1x256xf32>
    %1194 = vector.broadcast %1193 : vector<1x256xf32> to vector<6x256xf32>
    %1195 = arith.mulf %1191, %1194 : vector<6x256xf32>
    %c17_i32_976 = arith.constant 17 : i32
    %1196 = tpu.dynamic_rotate %559 by %c17_i32_976 dim 1 : vector<6x256xf32>, i32 -> vector<6x256xf32>
    %c16_977 = arith.constant 16 : index
    %c0_978 = arith.constant 0 : index
    %c0_979 = arith.constant 0 : index
    %1197 = vector.load %arg2[%c16_977, %c0_978, %c0_979] : memref<49x1x256xf32, #tpu.memory_space<vmem>>, vector<1x1x256xf32>
    %1198 = vector.shape_cast %1197 : vector<1x1x256xf32> to vector<1x256xf32>
    %1199 = vector.broadcast %1198 : vector<1x256xf32> to vector<6x256xf32>
    %1200 = arith.mulf %1196, %1199 : vector<6x256xf32>
    %c16_i32_980 = arith.constant 16 : i32
    %1201 = tpu.dynamic_rotate %559 by %c16_i32_980 dim 1 : vector<6x256xf32>, i32 -> vector<6x256xf32>
    %c17_981 = arith.constant 17 : index
    %c0_982 = arith.constant 0 : index
    %c0_983 = arith.constant 0 : index
    %1202 = vector.load %arg2[%c17_981, %c0_982, %c0_983] : memref<49x1x256xf32, #tpu.memory_space<vmem>>, vector<1x1x256xf32>
    %1203 = vector.shape_cast %1202 : vector<1x1x256xf32> to vector<1x256xf32>
    %1204 = vector.broadcast %1203 : vector<1x256xf32> to vector<6x256xf32>
    %1205 = arith.mulf %1201, %1204 : vector<6x256xf32>
    %c15_i32_984 = arith.constant 15 : i32
    %1206 = tpu.dynamic_rotate %559 by %c15_i32_984 dim 1 : vector<6x256xf32>, i32 -> vector<6x256xf32>
    %c18_985 = arith.constant 18 : index
    %c0_986 = arith.constant 0 : index
    %c0_987 = arith.constant 0 : index
    %1207 = vector.load %arg2[%c18_985, %c0_986, %c0_987] : memref<49x1x256xf32, #tpu.memory_space<vmem>>, vector<1x1x256xf32>
    %1208 = vector.shape_cast %1207 : vector<1x1x256xf32> to vector<1x256xf32>
    %1209 = vector.broadcast %1208 : vector<1x256xf32> to vector<6x256xf32>
    %1210 = arith.mulf %1206, %1209 : vector<6x256xf32>
    %c14_i32_988 = arith.constant 14 : i32
    %1211 = tpu.dynamic_rotate %559 by %c14_i32_988 dim 1 : vector<6x256xf32>, i32 -> vector<6x256xf32>
    %c19_989 = arith.constant 19 : index
    %c0_990 = arith.constant 0 : index
    %c0_991 = arith.constant 0 : index
    %1212 = vector.load %arg2[%c19_989, %c0_990, %c0_991] : memref<49x1x256xf32, #tpu.memory_space<vmem>>, vector<1x1x256xf32>
    %1213 = vector.shape_cast %1212 : vector<1x1x256xf32> to vector<1x256xf32>
    %1214 = vector.broadcast %1213 : vector<1x256xf32> to vector<6x256xf32>
    %1215 = arith.mulf %1211, %1214 : vector<6x256xf32>
    %c2_i32_992 = arith.constant 2 : i32
    %1216 = tpu.dynamic_rotate %559 by %c2_i32_992 dim 1 : vector<6x256xf32>, i32 -> vector<6x256xf32>
    %c22_993 = arith.constant 22 : index
    %c0_994 = arith.constant 0 : index
    %c0_995 = arith.constant 0 : index
    %1217 = vector.load %arg2[%c22_993, %c0_994, %c0_995] : memref<49x1x256xf32, #tpu.memory_space<vmem>>, vector<1x1x256xf32>
    %1218 = vector.shape_cast %1217 : vector<1x1x256xf32> to vector<1x256xf32>
    %1219 = vector.broadcast %1218 : vector<1x256xf32> to vector<6x256xf32>
    %1220 = arith.mulf %1216, %1219 : vector<6x256xf32>
    %c1_i32_996 = arith.constant 1 : i32
    %1221 = tpu.dynamic_rotate %559 by %c1_i32_996 dim 1 : vector<6x256xf32>, i32 -> vector<6x256xf32>
    %c23_997 = arith.constant 23 : index
    %c0_998 = arith.constant 0 : index
    %c0_999 = arith.constant 0 : index
    %1222 = vector.load %arg2[%c23_997, %c0_998, %c0_999] : memref<49x1x256xf32, #tpu.memory_space<vmem>>, vector<1x1x256xf32>
    %1223 = vector.shape_cast %1222 : vector<1x1x256xf32> to vector<1x256xf32>
    %1224 = vector.broadcast %1223 : vector<1x256xf32> to vector<6x256xf32>
    %1225 = arith.mulf %1221, %1224 : vector<6x256xf32>
    %c255_i32_1000 = arith.constant 255 : i32
    %1226 = tpu.dynamic_rotate %559 by %c255_i32_1000 dim 1 : vector<6x256xf32>, i32 -> vector<6x256xf32>
    %c25_1001 = arith.constant 25 : index
    %c0_1002 = arith.constant 0 : index
    %c0_1003 = arith.constant 0 : index
    %1227 = vector.load %arg2[%c25_1001, %c0_1002, %c0_1003] : memref<49x1x256xf32, #tpu.memory_space<vmem>>, vector<1x1x256xf32>
    %1228 = vector.shape_cast %1227 : vector<1x1x256xf32> to vector<1x256xf32>
    %1229 = vector.broadcast %1228 : vector<1x256xf32> to vector<6x256xf32>
    %1230 = arith.mulf %1226, %1229 : vector<6x256xf32>
    %c254_i32_1004 = arith.constant 254 : i32
    %1231 = tpu.dynamic_rotate %559 by %c254_i32_1004 dim 1 : vector<6x256xf32>, i32 -> vector<6x256xf32>
    %c26_1005 = arith.constant 26 : index
    %c0_1006 = arith.constant 0 : index
    %c0_1007 = arith.constant 0 : index
    %1232 = vector.load %arg2[%c26_1005, %c0_1006, %c0_1007] : memref<49x1x256xf32, #tpu.memory_space<vmem>>, vector<1x1x256xf32>
    %1233 = vector.shape_cast %1232 : vector<1x1x256xf32> to vector<1x256xf32>
    %1234 = vector.broadcast %1233 : vector<1x256xf32> to vector<6x256xf32>
    %1235 = arith.mulf %1231, %1234 : vector<6x256xf32>
    %c242_i32_1008 = arith.constant 242 : i32
    %1236 = tpu.dynamic_rotate %559 by %c242_i32_1008 dim 1 : vector<6x256xf32>, i32 -> vector<6x256xf32>
    %c29_1009 = arith.constant 29 : index
    %c0_1010 = arith.constant 0 : index
    %c0_1011 = arith.constant 0 : index
    %1237 = vector.load %arg2[%c29_1009, %c0_1010, %c0_1011] : memref<49x1x256xf32, #tpu.memory_space<vmem>>, vector<1x1x256xf32>
    %1238 = vector.shape_cast %1237 : vector<1x1x256xf32> to vector<1x256xf32>
    %1239 = vector.broadcast %1238 : vector<1x256xf32> to vector<6x256xf32>
    %1240 = arith.mulf %1236, %1239 : vector<6x256xf32>
    %c241_i32_1012 = arith.constant 241 : i32
    %1241 = tpu.dynamic_rotate %559 by %c241_i32_1012 dim 1 : vector<6x256xf32>, i32 -> vector<6x256xf32>
    %c30_1013 = arith.constant 30 : index
    %c0_1014 = arith.constant 0 : index
    %c0_1015 = arith.constant 0 : index
    %1242 = vector.load %arg2[%c30_1013, %c0_1014, %c0_1015] : memref<49x1x256xf32, #tpu.memory_space<vmem>>, vector<1x1x256xf32>
    %1243 = vector.shape_cast %1242 : vector<1x1x256xf32> to vector<1x256xf32>
    %1244 = vector.broadcast %1243 : vector<1x256xf32> to vector<6x256xf32>
    %1245 = arith.mulf %1241, %1244 : vector<6x256xf32>
    %c240_i32_1016 = arith.constant 240 : i32
    %1246 = tpu.dynamic_rotate %559 by %c240_i32_1016 dim 1 : vector<6x256xf32>, i32 -> vector<6x256xf32>
    %c31_1017 = arith.constant 31 : index
    %c0_1018 = arith.constant 0 : index
    %c0_1019 = arith.constant 0 : index
    %1247 = vector.load %arg2[%c31_1017, %c0_1018, %c0_1019] : memref<49x1x256xf32, #tpu.memory_space<vmem>>, vector<1x1x256xf32>
    %1248 = vector.shape_cast %1247 : vector<1x1x256xf32> to vector<1x256xf32>
    %1249 = vector.broadcast %1248 : vector<1x256xf32> to vector<6x256xf32>
    %1250 = arith.mulf %1246, %1249 : vector<6x256xf32>
    %c239_i32_1020 = arith.constant 239 : i32
    %1251 = tpu.dynamic_rotate %559 by %c239_i32_1020 dim 1 : vector<6x256xf32>, i32 -> vector<6x256xf32>
    %c32_1021 = arith.constant 32 : index
    %c0_1022 = arith.constant 0 : index
    %c0_1023 = arith.constant 0 : index
    %1252 = vector.load %arg2[%c32_1021, %c0_1022, %c0_1023] : memref<49x1x256xf32, #tpu.memory_space<vmem>>, vector<1x1x256xf32>
    %1253 = vector.shape_cast %1252 : vector<1x1x256xf32> to vector<1x256xf32>
    %1254 = vector.broadcast %1253 : vector<1x256xf32> to vector<6x256xf32>
    %1255 = arith.mulf %1251, %1254 : vector<6x256xf32>
    %c238_i32_1024 = arith.constant 238 : i32
    %1256 = tpu.dynamic_rotate %559 by %c238_i32_1024 dim 1 : vector<6x256xf32>, i32 -> vector<6x256xf32>
    %c33_1025 = arith.constant 33 : index
    %c0_1026 = arith.constant 0 : index
    %c0_1027 = arith.constant 0 : index
    %1257 = vector.load %arg2[%c33_1025, %c0_1026, %c0_1027] : memref<49x1x256xf32, #tpu.memory_space<vmem>>, vector<1x1x256xf32>
    %1258 = vector.shape_cast %1257 : vector<1x1x256xf32> to vector<1x256xf32>
    %1259 = vector.broadcast %1258 : vector<1x256xf32> to vector<6x256xf32>
    %1260 = arith.mulf %1256, %1259 : vector<6x256xf32>
    %c226_i32_1028 = arith.constant 226 : i32
    %1261 = tpu.dynamic_rotate %559 by %c226_i32_1028 dim 1 : vector<6x256xf32>, i32 -> vector<6x256xf32>
    %c36_1029 = arith.constant 36 : index
    %c0_1030 = arith.constant 0 : index
    %c0_1031 = arith.constant 0 : index
    %1262 = vector.load %arg2[%c36_1029, %c0_1030, %c0_1031] : memref<49x1x256xf32, #tpu.memory_space<vmem>>, vector<1x1x256xf32>
    %1263 = vector.shape_cast %1262 : vector<1x1x256xf32> to vector<1x256xf32>
    %1264 = vector.broadcast %1263 : vector<1x256xf32> to vector<6x256xf32>
    %1265 = arith.mulf %1261, %1264 : vector<6x256xf32>
    %c225_i32_1032 = arith.constant 225 : i32
    %1266 = tpu.dynamic_rotate %559 by %c225_i32_1032 dim 1 : vector<6x256xf32>, i32 -> vector<6x256xf32>
    %c37_1033 = arith.constant 37 : index
    %c0_1034 = arith.constant 0 : index
    %c0_1035 = arith.constant 0 : index
    %1267 = vector.load %arg2[%c37_1033, %c0_1034, %c0_1035] : memref<49x1x256xf32, #tpu.memory_space<vmem>>, vector<1x1x256xf32>
    %1268 = vector.shape_cast %1267 : vector<1x1x256xf32> to vector<1x256xf32>
    %1269 = vector.broadcast %1268 : vector<1x256xf32> to vector<6x256xf32>
    %1270 = arith.mulf %1266, %1269 : vector<6x256xf32>
    %c224_i32_1036 = arith.constant 224 : i32
    %1271 = tpu.dynamic_rotate %559 by %c224_i32_1036 dim 1 : vector<6x256xf32>, i32 -> vector<6x256xf32>
    %c38_1037 = arith.constant 38 : index
    %c0_1038 = arith.constant 0 : index
    %c0_1039 = arith.constant 0 : index
    %1272 = vector.load %arg2[%c38_1037, %c0_1038, %c0_1039] : memref<49x1x256xf32, #tpu.memory_space<vmem>>, vector<1x1x256xf32>
    %1273 = vector.shape_cast %1272 : vector<1x1x256xf32> to vector<1x256xf32>
    %1274 = vector.broadcast %1273 : vector<1x256xf32> to vector<6x256xf32>
    %1275 = arith.mulf %1271, %1274 : vector<6x256xf32>
    %c223_i32_1040 = arith.constant 223 : i32
    %1276 = tpu.dynamic_rotate %559 by %c223_i32_1040 dim 1 : vector<6x256xf32>, i32 -> vector<6x256xf32>
    %c39_1041 = arith.constant 39 : index
    %c0_1042 = arith.constant 0 : index
    %c0_1043 = arith.constant 0 : index
    %1277 = vector.load %arg2[%c39_1041, %c0_1042, %c0_1043] : memref<49x1x256xf32, #tpu.memory_space<vmem>>, vector<1x1x256xf32>
    %1278 = vector.shape_cast %1277 : vector<1x1x256xf32> to vector<1x256xf32>
    %1279 = vector.broadcast %1278 : vector<1x256xf32> to vector<6x256xf32>
    %1280 = arith.mulf %1276, %1279 : vector<6x256xf32>
    %c222_i32_1044 = arith.constant 222 : i32
    %1281 = tpu.dynamic_rotate %559 by %c222_i32_1044 dim 1 : vector<6x256xf32>, i32 -> vector<6x256xf32>
    %c40_1045 = arith.constant 40 : index
    %c0_1046 = arith.constant 0 : index
    %c0_1047 = arith.constant 0 : index
    %1282 = vector.load %arg2[%c40_1045, %c0_1046, %c0_1047] : memref<49x1x256xf32, #tpu.memory_space<vmem>>, vector<1x1x256xf32>
    %1283 = vector.shape_cast %1282 : vector<1x1x256xf32> to vector<1x256xf32>
    %1284 = vector.broadcast %1283 : vector<1x256xf32> to vector<6x256xf32>
    %1285 = arith.mulf %1281, %1284 : vector<6x256xf32>
    %c50 = arith.constant 50 : index
    %c0_1048 = arith.constant 0 : index
    %c0_1049 = arith.constant 0 : index
    %1286 = vector.load %arg15[%c50, %c0_1048, %c0_1049] : memref<100x6x6xf32, #tpu.memory_space<vmem>>, vector<1x6x6xf32>
    %1287 = vector.shape_cast %1286 : vector<1x6x6xf32> to vector<6x6xf32>
    %cst_1050 = arith.constant dense<0.000000e+00> : vector<6x256xf32>
    %1288 = tpu.matmul %1287, %1170, %cst_1050 {dimension_numbers = #tpu.dot_dimension_numbers<[1], [0], [0], [1], [0, 0, 1, 1], [], []>} : vector<6x6xf32>, vector<6x256xf32>, vector<6x256xf32> -> vector<6x256xf32>
    %c51 = arith.constant 51 : index
    %c0_1051 = arith.constant 0 : index
    %c0_1052 = arith.constant 0 : index
    %1289 = vector.load %arg15[%c51, %c0_1051, %c0_1052] : memref<100x6x6xf32, #tpu.memory_space<vmem>>, vector<1x6x6xf32>
    %1290 = vector.shape_cast %1289 : vector<1x6x6xf32> to vector<6x6xf32>
    %cst_1053 = arith.constant dense<0.000000e+00> : vector<6x256xf32>
    %1291 = tpu.matmul %1290, %1175, %cst_1053 {dimension_numbers = #tpu.dot_dimension_numbers<[1], [0], [0], [1], [0, 0, 1, 1], [], []>} : vector<6x6xf32>, vector<6x256xf32>, vector<6x256xf32> -> vector<6x256xf32>
    %1292 = arith.addf %1288, %1291 : vector<6x256xf32>
    %c52 = arith.constant 52 : index
    %c0_1054 = arith.constant 0 : index
    %c0_1055 = arith.constant 0 : index
    %1293 = vector.load %arg15[%c52, %c0_1054, %c0_1055] : memref<100x6x6xf32, #tpu.memory_space<vmem>>, vector<1x6x6xf32>
    %1294 = vector.shape_cast %1293 : vector<1x6x6xf32> to vector<6x6xf32>
    %cst_1056 = arith.constant dense<0.000000e+00> : vector<6x256xf32>
    %1295 = tpu.matmul %1294, %1180, %cst_1056 {dimension_numbers = #tpu.dot_dimension_numbers<[1], [0], [0], [1], [0, 0, 1, 1], [], []>} : vector<6x6xf32>, vector<6x256xf32>, vector<6x256xf32> -> vector<6x256xf32>
    %1296 = arith.addf %1292, %1295 : vector<6x256xf32>
    %c53 = arith.constant 53 : index
    %c0_1057 = arith.constant 0 : index
    %c0_1058 = arith.constant 0 : index
    %1297 = vector.load %arg15[%c53, %c0_1057, %c0_1058] : memref<100x6x6xf32, #tpu.memory_space<vmem>>, vector<1x6x6xf32>
    %1298 = vector.shape_cast %1297 : vector<1x6x6xf32> to vector<6x6xf32>
    %cst_1059 = arith.constant dense<0.000000e+00> : vector<6x256xf32>
    %1299 = tpu.matmul %1298, %1185, %cst_1059 {dimension_numbers = #tpu.dot_dimension_numbers<[1], [0], [0], [1], [0, 0, 1, 1], [], []>} : vector<6x6xf32>, vector<6x256xf32>, vector<6x256xf32> -> vector<6x256xf32>
    %1300 = arith.addf %1296, %1299 : vector<6x256xf32>
    %c54 = arith.constant 54 : index
    %c0_1060 = arith.constant 0 : index
    %c0_1061 = arith.constant 0 : index
    %1301 = vector.load %arg15[%c54, %c0_1060, %c0_1061] : memref<100x6x6xf32, #tpu.memory_space<vmem>>, vector<1x6x6xf32>
    %1302 = vector.shape_cast %1301 : vector<1x6x6xf32> to vector<6x6xf32>
    %cst_1062 = arith.constant dense<0.000000e+00> : vector<6x256xf32>
    %1303 = tpu.matmul %1302, %1190, %cst_1062 {dimension_numbers = #tpu.dot_dimension_numbers<[1], [0], [0], [1], [0, 0, 1, 1], [], []>} : vector<6x6xf32>, vector<6x256xf32>, vector<6x256xf32> -> vector<6x256xf32>
    %1304 = arith.addf %1300, %1303 : vector<6x256xf32>
    %c55 = arith.constant 55 : index
    %c0_1063 = arith.constant 0 : index
    %c0_1064 = arith.constant 0 : index
    %1305 = vector.load %arg15[%c55, %c0_1063, %c0_1064] : memref<100x6x6xf32, #tpu.memory_space<vmem>>, vector<1x6x6xf32>
    %1306 = vector.shape_cast %1305 : vector<1x6x6xf32> to vector<6x6xf32>
    %cst_1065 = arith.constant dense<0.000000e+00> : vector<6x256xf32>
    %1307 = tpu.matmul %1306, %1195, %cst_1065 {dimension_numbers = #tpu.dot_dimension_numbers<[1], [0], [0], [1], [0, 0, 1, 1], [], []>} : vector<6x6xf32>, vector<6x256xf32>, vector<6x256xf32> -> vector<6x256xf32>
    %1308 = arith.addf %1304, %1307 : vector<6x256xf32>
    %c56 = arith.constant 56 : index
    %c0_1066 = arith.constant 0 : index
    %c0_1067 = arith.constant 0 : index
    %1309 = vector.load %arg15[%c56, %c0_1066, %c0_1067] : memref<100x6x6xf32, #tpu.memory_space<vmem>>, vector<1x6x6xf32>
    %1310 = vector.shape_cast %1309 : vector<1x6x6xf32> to vector<6x6xf32>
    %cst_1068 = arith.constant dense<0.000000e+00> : vector<6x256xf32>
    %1311 = tpu.matmul %1310, %1200, %cst_1068 {dimension_numbers = #tpu.dot_dimension_numbers<[1], [0], [0], [1], [0, 0, 1, 1], [], []>} : vector<6x6xf32>, vector<6x256xf32>, vector<6x256xf32> -> vector<6x256xf32>
    %1312 = arith.addf %1308, %1311 : vector<6x256xf32>
    %c57 = arith.constant 57 : index
    %c0_1069 = arith.constant 0 : index
    %c0_1070 = arith.constant 0 : index
    %1313 = vector.load %arg15[%c57, %c0_1069, %c0_1070] : memref<100x6x6xf32, #tpu.memory_space<vmem>>, vector<1x6x6xf32>
    %1314 = vector.shape_cast %1313 : vector<1x6x6xf32> to vector<6x6xf32>
    %cst_1071 = arith.constant dense<0.000000e+00> : vector<6x256xf32>
    %1315 = tpu.matmul %1314, %1205, %cst_1071 {dimension_numbers = #tpu.dot_dimension_numbers<[1], [0], [0], [1], [0, 0, 1, 1], [], []>} : vector<6x6xf32>, vector<6x256xf32>, vector<6x256xf32> -> vector<6x256xf32>
    %1316 = arith.addf %1312, %1315 : vector<6x256xf32>
    %c58 = arith.constant 58 : index
    %c0_1072 = arith.constant 0 : index
    %c0_1073 = arith.constant 0 : index
    %1317 = vector.load %arg15[%c58, %c0_1072, %c0_1073] : memref<100x6x6xf32, #tpu.memory_space<vmem>>, vector<1x6x6xf32>
    %1318 = vector.shape_cast %1317 : vector<1x6x6xf32> to vector<6x6xf32>
    %cst_1074 = arith.constant dense<0.000000e+00> : vector<6x256xf32>
    %1319 = tpu.matmul %1318, %1210, %cst_1074 {dimension_numbers = #tpu.dot_dimension_numbers<[1], [0], [0], [1], [0, 0, 1, 1], [], []>} : vector<6x6xf32>, vector<6x256xf32>, vector<6x256xf32> -> vector<6x256xf32>
    %1320 = arith.addf %1316, %1319 : vector<6x256xf32>
    %c59 = arith.constant 59 : index
    %c0_1075 = arith.constant 0 : index
    %c0_1076 = arith.constant 0 : index
    %1321 = vector.load %arg15[%c59, %c0_1075, %c0_1076] : memref<100x6x6xf32, #tpu.memory_space<vmem>>, vector<1x6x6xf32>
    %1322 = vector.shape_cast %1321 : vector<1x6x6xf32> to vector<6x6xf32>
    %cst_1077 = arith.constant dense<0.000000e+00> : vector<6x256xf32>
    %1323 = tpu.matmul %1322, %1215, %cst_1077 {dimension_numbers = #tpu.dot_dimension_numbers<[1], [0], [0], [1], [0, 0, 1, 1], [], []>} : vector<6x6xf32>, vector<6x256xf32>, vector<6x256xf32> -> vector<6x256xf32>
    %1324 = arith.addf %1320, %1323 : vector<6x256xf32>
    %c60 = arith.constant 60 : index
    %c0_1078 = arith.constant 0 : index
    %c0_1079 = arith.constant 0 : index
    %1325 = vector.load %arg15[%c60, %c0_1078, %c0_1079] : memref<100x6x6xf32, #tpu.memory_space<vmem>>, vector<1x6x6xf32>
    %1326 = vector.shape_cast %1325 : vector<1x6x6xf32> to vector<6x6xf32>
    %cst_1080 = arith.constant dense<0.000000e+00> : vector<6x256xf32>
    %1327 = tpu.matmul %1326, %1220, %cst_1080 {dimension_numbers = #tpu.dot_dimension_numbers<[1], [0], [0], [1], [0, 0, 1, 1], [], []>} : vector<6x6xf32>, vector<6x256xf32>, vector<6x256xf32> -> vector<6x256xf32>
    %1328 = arith.addf %1324, %1327 : vector<6x256xf32>
    %c61 = arith.constant 61 : index
    %c0_1081 = arith.constant 0 : index
    %c0_1082 = arith.constant 0 : index
    %1329 = vector.load %arg15[%c61, %c0_1081, %c0_1082] : memref<100x6x6xf32, #tpu.memory_space<vmem>>, vector<1x6x6xf32>
    %1330 = vector.shape_cast %1329 : vector<1x6x6xf32> to vector<6x6xf32>
    %cst_1083 = arith.constant dense<0.000000e+00> : vector<6x256xf32>
    %1331 = tpu.matmul %1330, %1225, %cst_1083 {dimension_numbers = #tpu.dot_dimension_numbers<[1], [0], [0], [1], [0, 0, 1, 1], [], []>} : vector<6x6xf32>, vector<6x256xf32>, vector<6x256xf32> -> vector<6x256xf32>
    %1332 = arith.addf %1328, %1331 : vector<6x256xf32>
    %c62 = arith.constant 62 : index
    %c0_1084 = arith.constant 0 : index
    %c0_1085 = arith.constant 0 : index
    %1333 = vector.load %arg15[%c62, %c0_1084, %c0_1085] : memref<100x6x6xf32, #tpu.memory_space<vmem>>, vector<1x6x6xf32>
    %1334 = vector.shape_cast %1333 : vector<1x6x6xf32> to vector<6x6xf32>
    %cst_1086 = arith.constant dense<0.000000e+00> : vector<6x256xf32>
    %1335 = tpu.matmul %1334, %559, %cst_1086 {dimension_numbers = #tpu.dot_dimension_numbers<[1], [0], [0], [1], [0, 0, 1, 1], [], []>} : vector<6x6xf32>, vector<6x256xf32>, vector<6x256xf32> -> vector<6x256xf32>
    %1336 = arith.addf %1332, %1335 : vector<6x256xf32>
    %c63 = arith.constant 63 : index
    %c0_1087 = arith.constant 0 : index
    %c0_1088 = arith.constant 0 : index
    %1337 = vector.load %arg15[%c63, %c0_1087, %c0_1088] : memref<100x6x6xf32, #tpu.memory_space<vmem>>, vector<1x6x6xf32>
    %1338 = vector.shape_cast %1337 : vector<1x6x6xf32> to vector<6x6xf32>
    %cst_1089 = arith.constant dense<0.000000e+00> : vector<6x256xf32>
    %1339 = tpu.matmul %1338, %1230, %cst_1089 {dimension_numbers = #tpu.dot_dimension_numbers<[1], [0], [0], [1], [0, 0, 1, 1], [], []>} : vector<6x6xf32>, vector<6x256xf32>, vector<6x256xf32> -> vector<6x256xf32>
    %1340 = arith.addf %1336, %1339 : vector<6x256xf32>
    %c64 = arith.constant 64 : index
    %c0_1090 = arith.constant 0 : index
    %c0_1091 = arith.constant 0 : index
    %1341 = vector.load %arg15[%c64, %c0_1090, %c0_1091] : memref<100x6x6xf32, #tpu.memory_space<vmem>>, vector<1x6x6xf32>
    %1342 = vector.shape_cast %1341 : vector<1x6x6xf32> to vector<6x6xf32>
    %cst_1092 = arith.constant dense<0.000000e+00> : vector<6x256xf32>
    %1343 = tpu.matmul %1342, %1235, %cst_1092 {dimension_numbers = #tpu.dot_dimension_numbers<[1], [0], [0], [1], [0, 0, 1, 1], [], []>} : vector<6x6xf32>, vector<6x256xf32>, vector<6x256xf32> -> vector<6x256xf32>
    %1344 = arith.addf %1340, %1343 : vector<6x256xf32>
    %c65 = arith.constant 65 : index
    %c0_1093 = arith.constant 0 : index
    %c0_1094 = arith.constant 0 : index
    %1345 = vector.load %arg15[%c65, %c0_1093, %c0_1094] : memref<100x6x6xf32, #tpu.memory_space<vmem>>, vector<1x6x6xf32>
    %1346 = vector.shape_cast %1345 : vector<1x6x6xf32> to vector<6x6xf32>
    %cst_1095 = arith.constant dense<0.000000e+00> : vector<6x256xf32>
    %1347 = tpu.matmul %1346, %1240, %cst_1095 {dimension_numbers = #tpu.dot_dimension_numbers<[1], [0], [0], [1], [0, 0, 1, 1], [], []>} : vector<6x6xf32>, vector<6x256xf32>, vector<6x256xf32> -> vector<6x256xf32>
    %1348 = arith.addf %1344, %1347 : vector<6x256xf32>
    %c66 = arith.constant 66 : index
    %c0_1096 = arith.constant 0 : index
    %c0_1097 = arith.constant 0 : index
    %1349 = vector.load %arg15[%c66, %c0_1096, %c0_1097] : memref<100x6x6xf32, #tpu.memory_space<vmem>>, vector<1x6x6xf32>
    %1350 = vector.shape_cast %1349 : vector<1x6x6xf32> to vector<6x6xf32>
    %cst_1098 = arith.constant dense<0.000000e+00> : vector<6x256xf32>
    %1351 = tpu.matmul %1350, %1245, %cst_1098 {dimension_numbers = #tpu.dot_dimension_numbers<[1], [0], [0], [1], [0, 0, 1, 1], [], []>} : vector<6x6xf32>, vector<6x256xf32>, vector<6x256xf32> -> vector<6x256xf32>
    %1352 = arith.addf %1348, %1351 : vector<6x256xf32>
    %c67 = arith.constant 67 : index
    %c0_1099 = arith.constant 0 : index
    %c0_1100 = arith.constant 0 : index
    %1353 = vector.load %arg15[%c67, %c0_1099, %c0_1100] : memref<100x6x6xf32, #tpu.memory_space<vmem>>, vector<1x6x6xf32>
    %1354 = vector.shape_cast %1353 : vector<1x6x6xf32> to vector<6x6xf32>
    %cst_1101 = arith.constant dense<0.000000e+00> : vector<6x256xf32>
    %1355 = tpu.matmul %1354, %1250, %cst_1101 {dimension_numbers = #tpu.dot_dimension_numbers<[1], [0], [0], [1], [0, 0, 1, 1], [], []>} : vector<6x6xf32>, vector<6x256xf32>, vector<6x256xf32> -> vector<6x256xf32>
    %1356 = arith.addf %1352, %1355 : vector<6x256xf32>
    %c68 = arith.constant 68 : index
    %c0_1102 = arith.constant 0 : index
    %c0_1103 = arith.constant 0 : index
    %1357 = vector.load %arg15[%c68, %c0_1102, %c0_1103] : memref<100x6x6xf32, #tpu.memory_space<vmem>>, vector<1x6x6xf32>
    %1358 = vector.shape_cast %1357 : vector<1x6x6xf32> to vector<6x6xf32>
    %cst_1104 = arith.constant dense<0.000000e+00> : vector<6x256xf32>
    %1359 = tpu.matmul %1358, %1255, %cst_1104 {dimension_numbers = #tpu.dot_dimension_numbers<[1], [0], [0], [1], [0, 0, 1, 1], [], []>} : vector<6x6xf32>, vector<6x256xf32>, vector<6x256xf32> -> vector<6x256xf32>
    %1360 = arith.addf %1356, %1359 : vector<6x256xf32>
    %c69 = arith.constant 69 : index
    %c0_1105 = arith.constant 0 : index
    %c0_1106 = arith.constant 0 : index
    %1361 = vector.load %arg15[%c69, %c0_1105, %c0_1106] : memref<100x6x6xf32, #tpu.memory_space<vmem>>, vector<1x6x6xf32>
    %1362 = vector.shape_cast %1361 : vector<1x6x6xf32> to vector<6x6xf32>
    %cst_1107 = arith.constant dense<0.000000e+00> : vector<6x256xf32>
    %1363 = tpu.matmul %1362, %1260, %cst_1107 {dimension_numbers = #tpu.dot_dimension_numbers<[1], [0], [0], [1], [0, 0, 1, 1], [], []>} : vector<6x6xf32>, vector<6x256xf32>, vector<6x256xf32> -> vector<6x256xf32>
    %1364 = arith.addf %1360, %1363 : vector<6x256xf32>
    %c70 = arith.constant 70 : index
    %c0_1108 = arith.constant 0 : index
    %c0_1109 = arith.constant 0 : index
    %1365 = vector.load %arg15[%c70, %c0_1108, %c0_1109] : memref<100x6x6xf32, #tpu.memory_space<vmem>>, vector<1x6x6xf32>
    %1366 = vector.shape_cast %1365 : vector<1x6x6xf32> to vector<6x6xf32>
    %cst_1110 = arith.constant dense<0.000000e+00> : vector<6x256xf32>
    %1367 = tpu.matmul %1366, %1265, %cst_1110 {dimension_numbers = #tpu.dot_dimension_numbers<[1], [0], [0], [1], [0, 0, 1, 1], [], []>} : vector<6x6xf32>, vector<6x256xf32>, vector<6x256xf32> -> vector<6x256xf32>
    %1368 = arith.addf %1364, %1367 : vector<6x256xf32>
    %c71 = arith.constant 71 : index
    %c0_1111 = arith.constant 0 : index
    %c0_1112 = arith.constant 0 : index
    %1369 = vector.load %arg15[%c71, %c0_1111, %c0_1112] : memref<100x6x6xf32, #tpu.memory_space<vmem>>, vector<1x6x6xf32>
    %1370 = vector.shape_cast %1369 : vector<1x6x6xf32> to vector<6x6xf32>
    %cst_1113 = arith.constant dense<0.000000e+00> : vector<6x256xf32>
    %1371 = tpu.matmul %1370, %1270, %cst_1113 {dimension_numbers = #tpu.dot_dimension_numbers<[1], [0], [0], [1], [0, 0, 1, 1], [], []>} : vector<6x6xf32>, vector<6x256xf32>, vector<6x256xf32> -> vector<6x256xf32>
    %1372 = arith.addf %1368, %1371 : vector<6x256xf32>
    %c72 = arith.constant 72 : index
    %c0_1114 = arith.constant 0 : index
    %c0_1115 = arith.constant 0 : index
    %1373 = vector.load %arg15[%c72, %c0_1114, %c0_1115] : memref<100x6x6xf32, #tpu.memory_space<vmem>>, vector<1x6x6xf32>
    %1374 = vector.shape_cast %1373 : vector<1x6x6xf32> to vector<6x6xf32>
    %cst_1116 = arith.constant dense<0.000000e+00> : vector<6x256xf32>
    %1375 = tpu.matmul %1374, %1275, %cst_1116 {dimension_numbers = #tpu.dot_dimension_numbers<[1], [0], [0], [1], [0, 0, 1, 1], [], []>} : vector<6x6xf32>, vector<6x256xf32>, vector<6x256xf32> -> vector<6x256xf32>
    %1376 = arith.addf %1372, %1375 : vector<6x256xf32>
    %c73 = arith.constant 73 : index
    %c0_1117 = arith.constant 0 : index
    %c0_1118 = arith.constant 0 : index
    %1377 = vector.load %arg15[%c73, %c0_1117, %c0_1118] : memref<100x6x6xf32, #tpu.memory_space<vmem>>, vector<1x6x6xf32>
    %1378 = vector.shape_cast %1377 : vector<1x6x6xf32> to vector<6x6xf32>
    %cst_1119 = arith.constant dense<0.000000e+00> : vector<6x256xf32>
    %1379 = tpu.matmul %1378, %1280, %cst_1119 {dimension_numbers = #tpu.dot_dimension_numbers<[1], [0], [0], [1], [0, 0, 1, 1], [], []>} : vector<6x6xf32>, vector<6x256xf32>, vector<6x256xf32> -> vector<6x256xf32>
    %1380 = arith.addf %1376, %1379 : vector<6x256xf32>
    %c74 = arith.constant 74 : index
    %c0_1120 = arith.constant 0 : index
    %c0_1121 = arith.constant 0 : index
    %1381 = vector.load %arg15[%c74, %c0_1120, %c0_1121] : memref<100x6x6xf32, #tpu.memory_space<vmem>>, vector<1x6x6xf32>
    %1382 = vector.shape_cast %1381 : vector<1x6x6xf32> to vector<6x6xf32>
    %cst_1122 = arith.constant dense<0.000000e+00> : vector<6x256xf32>
    %1383 = tpu.matmul %1382, %1285, %cst_1122 {dimension_numbers = #tpu.dot_dimension_numbers<[1], [0], [0], [1], [0, 0, 1, 1], [], []>} : vector<6x6xf32>, vector<6x256xf32>, vector<6x256xf32> -> vector<6x256xf32>
    %1384 = arith.addf %1380, %1383 : vector<6x256xf32>
    %1385 = arith.addf %1165, %1384 : vector<6x256xf32>
    %c34_i32_1123 = arith.constant 34 : i32
    %1386 = tpu.dynamic_rotate %846 by %c34_i32_1123 dim 1 : vector<6x256xf32>, i32 -> vector<6x256xf32>
    %c8_1124 = arith.constant 8 : index
    %c0_1125 = arith.constant 0 : index
    %c0_1126 = arith.constant 0 : index
    %1387 = vector.load %arg2[%c8_1124, %c0_1125, %c0_1126] : memref<49x1x256xf32, #tpu.memory_space<vmem>>, vector<1x1x256xf32>
    %1388 = vector.shape_cast %1387 : vector<1x1x256xf32> to vector<1x256xf32>
    %1389 = vector.broadcast %1388 : vector<1x256xf32> to vector<6x256xf32>
    %1390 = arith.mulf %1386, %1389 : vector<6x256xf32>
    %c33_i32_1127 = arith.constant 33 : i32
    %1391 = tpu.dynamic_rotate %846 by %c33_i32_1127 dim 1 : vector<6x256xf32>, i32 -> vector<6x256xf32>
    %c9_1128 = arith.constant 9 : index
    %c0_1129 = arith.constant 0 : index
    %c0_1130 = arith.constant 0 : index
    %1392 = vector.load %arg2[%c9_1128, %c0_1129, %c0_1130] : memref<49x1x256xf32, #tpu.memory_space<vmem>>, vector<1x1x256xf32>
    %1393 = vector.shape_cast %1392 : vector<1x1x256xf32> to vector<1x256xf32>
    %1394 = vector.broadcast %1393 : vector<1x256xf32> to vector<6x256xf32>
    %1395 = arith.mulf %1391, %1394 : vector<6x256xf32>
    %c32_i32_1131 = arith.constant 32 : i32
    %1396 = tpu.dynamic_rotate %846 by %c32_i32_1131 dim 1 : vector<6x256xf32>, i32 -> vector<6x256xf32>
    %c10_1132 = arith.constant 10 : index
    %c0_1133 = arith.constant 0 : index
    %c0_1134 = arith.constant 0 : index
    %1397 = vector.load %arg2[%c10_1132, %c0_1133, %c0_1134] : memref<49x1x256xf32, #tpu.memory_space<vmem>>, vector<1x1x256xf32>
    %1398 = vector.shape_cast %1397 : vector<1x1x256xf32> to vector<1x256xf32>
    %1399 = vector.broadcast %1398 : vector<1x256xf32> to vector<6x256xf32>
    %1400 = arith.mulf %1396, %1399 : vector<6x256xf32>
    %c31_i32_1135 = arith.constant 31 : i32
    %1401 = tpu.dynamic_rotate %846 by %c31_i32_1135 dim 1 : vector<6x256xf32>, i32 -> vector<6x256xf32>
    %c11_1136 = arith.constant 11 : index
    %c0_1137 = arith.constant 0 : index
    %c0_1138 = arith.constant 0 : index
    %1402 = vector.load %arg2[%c11_1136, %c0_1137, %c0_1138] : memref<49x1x256xf32, #tpu.memory_space<vmem>>, vector<1x1x256xf32>
    %1403 = vector.shape_cast %1402 : vector<1x1x256xf32> to vector<1x256xf32>
    %1404 = vector.broadcast %1403 : vector<1x256xf32> to vector<6x256xf32>
    %1405 = arith.mulf %1401, %1404 : vector<6x256xf32>
    %c30_i32_1139 = arith.constant 30 : i32
    %1406 = tpu.dynamic_rotate %846 by %c30_i32_1139 dim 1 : vector<6x256xf32>, i32 -> vector<6x256xf32>
    %c12_1140 = arith.constant 12 : index
    %c0_1141 = arith.constant 0 : index
    %c0_1142 = arith.constant 0 : index
    %1407 = vector.load %arg2[%c12_1140, %c0_1141, %c0_1142] : memref<49x1x256xf32, #tpu.memory_space<vmem>>, vector<1x1x256xf32>
    %1408 = vector.shape_cast %1407 : vector<1x1x256xf32> to vector<1x256xf32>
    %1409 = vector.broadcast %1408 : vector<1x256xf32> to vector<6x256xf32>
    %1410 = arith.mulf %1406, %1409 : vector<6x256xf32>
    %c18_i32_1143 = arith.constant 18 : i32
    %1411 = tpu.dynamic_rotate %846 by %c18_i32_1143 dim 1 : vector<6x256xf32>, i32 -> vector<6x256xf32>
    %c15_1144 = arith.constant 15 : index
    %c0_1145 = arith.constant 0 : index
    %c0_1146 = arith.constant 0 : index
    %1412 = vector.load %arg2[%c15_1144, %c0_1145, %c0_1146] : memref<49x1x256xf32, #tpu.memory_space<vmem>>, vector<1x1x256xf32>
    %1413 = vector.shape_cast %1412 : vector<1x1x256xf32> to vector<1x256xf32>
    %1414 = vector.broadcast %1413 : vector<1x256xf32> to vector<6x256xf32>
    %1415 = arith.mulf %1411, %1414 : vector<6x256xf32>
    %c17_i32_1147 = arith.constant 17 : i32
    %1416 = tpu.dynamic_rotate %846 by %c17_i32_1147 dim 1 : vector<6x256xf32>, i32 -> vector<6x256xf32>
    %c16_1148 = arith.constant 16 : index
    %c0_1149 = arith.constant 0 : index
    %c0_1150 = arith.constant 0 : index
    %1417 = vector.load %arg2[%c16_1148, %c0_1149, %c0_1150] : memref<49x1x256xf32, #tpu.memory_space<vmem>>, vector<1x1x256xf32>
    %1418 = vector.shape_cast %1417 : vector<1x1x256xf32> to vector<1x256xf32>
    %1419 = vector.broadcast %1418 : vector<1x256xf32> to vector<6x256xf32>
    %1420 = arith.mulf %1416, %1419 : vector<6x256xf32>
    %c16_i32_1151 = arith.constant 16 : i32
    %1421 = tpu.dynamic_rotate %846 by %c16_i32_1151 dim 1 : vector<6x256xf32>, i32 -> vector<6x256xf32>
    %c17_1152 = arith.constant 17 : index
    %c0_1153 = arith.constant 0 : index
    %c0_1154 = arith.constant 0 : index
    %1422 = vector.load %arg2[%c17_1152, %c0_1153, %c0_1154] : memref<49x1x256xf32, #tpu.memory_space<vmem>>, vector<1x1x256xf32>
    %1423 = vector.shape_cast %1422 : vector<1x1x256xf32> to vector<1x256xf32>
    %1424 = vector.broadcast %1423 : vector<1x256xf32> to vector<6x256xf32>
    %1425 = arith.mulf %1421, %1424 : vector<6x256xf32>
    %c15_i32_1155 = arith.constant 15 : i32
    %1426 = tpu.dynamic_rotate %846 by %c15_i32_1155 dim 1 : vector<6x256xf32>, i32 -> vector<6x256xf32>
    %c18_1156 = arith.constant 18 : index
    %c0_1157 = arith.constant 0 : index
    %c0_1158 = arith.constant 0 : index
    %1427 = vector.load %arg2[%c18_1156, %c0_1157, %c0_1158] : memref<49x1x256xf32, #tpu.memory_space<vmem>>, vector<1x1x256xf32>
    %1428 = vector.shape_cast %1427 : vector<1x1x256xf32> to vector<1x256xf32>
    %1429 = vector.broadcast %1428 : vector<1x256xf32> to vector<6x256xf32>
    %1430 = arith.mulf %1426, %1429 : vector<6x256xf32>
    %c14_i32_1159 = arith.constant 14 : i32
    %1431 = tpu.dynamic_rotate %846 by %c14_i32_1159 dim 1 : vector<6x256xf32>, i32 -> vector<6x256xf32>
    %c19_1160 = arith.constant 19 : index
    %c0_1161 = arith.constant 0 : index
    %c0_1162 = arith.constant 0 : index
    %1432 = vector.load %arg2[%c19_1160, %c0_1161, %c0_1162] : memref<49x1x256xf32, #tpu.memory_space<vmem>>, vector<1x1x256xf32>
    %1433 = vector.shape_cast %1432 : vector<1x1x256xf32> to vector<1x256xf32>
    %1434 = vector.broadcast %1433 : vector<1x256xf32> to vector<6x256xf32>
    %1435 = arith.mulf %1431, %1434 : vector<6x256xf32>
    %c2_i32_1163 = arith.constant 2 : i32
    %1436 = tpu.dynamic_rotate %846 by %c2_i32_1163 dim 1 : vector<6x256xf32>, i32 -> vector<6x256xf32>
    %c22_1164 = arith.constant 22 : index
    %c0_1165 = arith.constant 0 : index
    %c0_1166 = arith.constant 0 : index
    %1437 = vector.load %arg2[%c22_1164, %c0_1165, %c0_1166] : memref<49x1x256xf32, #tpu.memory_space<vmem>>, vector<1x1x256xf32>
    %1438 = vector.shape_cast %1437 : vector<1x1x256xf32> to vector<1x256xf32>
    %1439 = vector.broadcast %1438 : vector<1x256xf32> to vector<6x256xf32>
    %1440 = arith.mulf %1436, %1439 : vector<6x256xf32>
    %c1_i32_1167 = arith.constant 1 : i32
    %1441 = tpu.dynamic_rotate %846 by %c1_i32_1167 dim 1 : vector<6x256xf32>, i32 -> vector<6x256xf32>
    %c23_1168 = arith.constant 23 : index
    %c0_1169 = arith.constant 0 : index
    %c0_1170 = arith.constant 0 : index
    %1442 = vector.load %arg2[%c23_1168, %c0_1169, %c0_1170] : memref<49x1x256xf32, #tpu.memory_space<vmem>>, vector<1x1x256xf32>
    %1443 = vector.shape_cast %1442 : vector<1x1x256xf32> to vector<1x256xf32>
    %1444 = vector.broadcast %1443 : vector<1x256xf32> to vector<6x256xf32>
    %1445 = arith.mulf %1441, %1444 : vector<6x256xf32>
    %c255_i32_1171 = arith.constant 255 : i32
    %1446 = tpu.dynamic_rotate %846 by %c255_i32_1171 dim 1 : vector<6x256xf32>, i32 -> vector<6x256xf32>
    %c25_1172 = arith.constant 25 : index
    %c0_1173 = arith.constant 0 : index
    %c0_1174 = arith.constant 0 : index
    %1447 = vector.load %arg2[%c25_1172, %c0_1173, %c0_1174] : memref<49x1x256xf32, #tpu.memory_space<vmem>>, vector<1x1x256xf32>
    %1448 = vector.shape_cast %1447 : vector<1x1x256xf32> to vector<1x256xf32>
    %1449 = vector.broadcast %1448 : vector<1x256xf32> to vector<6x256xf32>
    %1450 = arith.mulf %1446, %1449 : vector<6x256xf32>
    %c254_i32_1175 = arith.constant 254 : i32
    %1451 = tpu.dynamic_rotate %846 by %c254_i32_1175 dim 1 : vector<6x256xf32>, i32 -> vector<6x256xf32>
    %c26_1176 = arith.constant 26 : index
    %c0_1177 = arith.constant 0 : index
    %c0_1178 = arith.constant 0 : index
    %1452 = vector.load %arg2[%c26_1176, %c0_1177, %c0_1178] : memref<49x1x256xf32, #tpu.memory_space<vmem>>, vector<1x1x256xf32>
    %1453 = vector.shape_cast %1452 : vector<1x1x256xf32> to vector<1x256xf32>
    %1454 = vector.broadcast %1453 : vector<1x256xf32> to vector<6x256xf32>
    %1455 = arith.mulf %1451, %1454 : vector<6x256xf32>
    %c242_i32_1179 = arith.constant 242 : i32
    %1456 = tpu.dynamic_rotate %846 by %c242_i32_1179 dim 1 : vector<6x256xf32>, i32 -> vector<6x256xf32>
    %c29_1180 = arith.constant 29 : index
    %c0_1181 = arith.constant 0 : index
    %c0_1182 = arith.constant 0 : index
    %1457 = vector.load %arg2[%c29_1180, %c0_1181, %c0_1182] : memref<49x1x256xf32, #tpu.memory_space<vmem>>, vector<1x1x256xf32>
    %1458 = vector.shape_cast %1457 : vector<1x1x256xf32> to vector<1x256xf32>
    %1459 = vector.broadcast %1458 : vector<1x256xf32> to vector<6x256xf32>
    %1460 = arith.mulf %1456, %1459 : vector<6x256xf32>
    %c241_i32_1183 = arith.constant 241 : i32
    %1461 = tpu.dynamic_rotate %846 by %c241_i32_1183 dim 1 : vector<6x256xf32>, i32 -> vector<6x256xf32>
    %c30_1184 = arith.constant 30 : index
    %c0_1185 = arith.constant 0 : index
    %c0_1186 = arith.constant 0 : index
    %1462 = vector.load %arg2[%c30_1184, %c0_1185, %c0_1186] : memref<49x1x256xf32, #tpu.memory_space<vmem>>, vector<1x1x256xf32>
    %1463 = vector.shape_cast %1462 : vector<1x1x256xf32> to vector<1x256xf32>
    %1464 = vector.broadcast %1463 : vector<1x256xf32> to vector<6x256xf32>
    %1465 = arith.mulf %1461, %1464 : vector<6x256xf32>
    %c240_i32_1187 = arith.constant 240 : i32
    %1466 = tpu.dynamic_rotate %846 by %c240_i32_1187 dim 1 : vector<6x256xf32>, i32 -> vector<6x256xf32>
    %c31_1188 = arith.constant 31 : index
    %c0_1189 = arith.constant 0 : index
    %c0_1190 = arith.constant 0 : index
    %1467 = vector.load %arg2[%c31_1188, %c0_1189, %c0_1190] : memref<49x1x256xf32, #tpu.memory_space<vmem>>, vector<1x1x256xf32>
    %1468 = vector.shape_cast %1467 : vector<1x1x256xf32> to vector<1x256xf32>
    %1469 = vector.broadcast %1468 : vector<1x256xf32> to vector<6x256xf32>
    %1470 = arith.mulf %1466, %1469 : vector<6x256xf32>
    %c239_i32_1191 = arith.constant 239 : i32
    %1471 = tpu.dynamic_rotate %846 by %c239_i32_1191 dim 1 : vector<6x256xf32>, i32 -> vector<6x256xf32>
    %c32_1192 = arith.constant 32 : index
    %c0_1193 = arith.constant 0 : index
    %c0_1194 = arith.constant 0 : index
    %1472 = vector.load %arg2[%c32_1192, %c0_1193, %c0_1194] : memref<49x1x256xf32, #tpu.memory_space<vmem>>, vector<1x1x256xf32>
    %1473 = vector.shape_cast %1472 : vector<1x1x256xf32> to vector<1x256xf32>
    %1474 = vector.broadcast %1473 : vector<1x256xf32> to vector<6x256xf32>
    %1475 = arith.mulf %1471, %1474 : vector<6x256xf32>
    %c238_i32_1195 = arith.constant 238 : i32
    %1476 = tpu.dynamic_rotate %846 by %c238_i32_1195 dim 1 : vector<6x256xf32>, i32 -> vector<6x256xf32>
    %c33_1196 = arith.constant 33 : index
    %c0_1197 = arith.constant 0 : index
    %c0_1198 = arith.constant 0 : index
    %1477 = vector.load %arg2[%c33_1196, %c0_1197, %c0_1198] : memref<49x1x256xf32, #tpu.memory_space<vmem>>, vector<1x1x256xf32>
    %1478 = vector.shape_cast %1477 : vector<1x1x256xf32> to vector<1x256xf32>
    %1479 = vector.broadcast %1478 : vector<1x256xf32> to vector<6x256xf32>
    %1480 = arith.mulf %1476, %1479 : vector<6x256xf32>
    %c226_i32_1199 = arith.constant 226 : i32
    %1481 = tpu.dynamic_rotate %846 by %c226_i32_1199 dim 1 : vector<6x256xf32>, i32 -> vector<6x256xf32>
    %c36_1200 = arith.constant 36 : index
    %c0_1201 = arith.constant 0 : index
    %c0_1202 = arith.constant 0 : index
    %1482 = vector.load %arg2[%c36_1200, %c0_1201, %c0_1202] : memref<49x1x256xf32, #tpu.memory_space<vmem>>, vector<1x1x256xf32>
    %1483 = vector.shape_cast %1482 : vector<1x1x256xf32> to vector<1x256xf32>
    %1484 = vector.broadcast %1483 : vector<1x256xf32> to vector<6x256xf32>
    %1485 = arith.mulf %1481, %1484 : vector<6x256xf32>
    %c225_i32_1203 = arith.constant 225 : i32
    %1486 = tpu.dynamic_rotate %846 by %c225_i32_1203 dim 1 : vector<6x256xf32>, i32 -> vector<6x256xf32>
    %c37_1204 = arith.constant 37 : index
    %c0_1205 = arith.constant 0 : index
    %c0_1206 = arith.constant 0 : index
    %1487 = vector.load %arg2[%c37_1204, %c0_1205, %c0_1206] : memref<49x1x256xf32, #tpu.memory_space<vmem>>, vector<1x1x256xf32>
    %1488 = vector.shape_cast %1487 : vector<1x1x256xf32> to vector<1x256xf32>
    %1489 = vector.broadcast %1488 : vector<1x256xf32> to vector<6x256xf32>
    %1490 = arith.mulf %1486, %1489 : vector<6x256xf32>
    %c224_i32_1207 = arith.constant 224 : i32
    %1491 = tpu.dynamic_rotate %846 by %c224_i32_1207 dim 1 : vector<6x256xf32>, i32 -> vector<6x256xf32>
    %c38_1208 = arith.constant 38 : index
    %c0_1209 = arith.constant 0 : index
    %c0_1210 = arith.constant 0 : index
    %1492 = vector.load %arg2[%c38_1208, %c0_1209, %c0_1210] : memref<49x1x256xf32, #tpu.memory_space<vmem>>, vector<1x1x256xf32>
    %1493 = vector.shape_cast %1492 : vector<1x1x256xf32> to vector<1x256xf32>
    %1494 = vector.broadcast %1493 : vector<1x256xf32> to vector<6x256xf32>
    %1495 = arith.mulf %1491, %1494 : vector<6x256xf32>
    %c223_i32_1211 = arith.constant 223 : i32
    %1496 = tpu.dynamic_rotate %846 by %c223_i32_1211 dim 1 : vector<6x256xf32>, i32 -> vector<6x256xf32>
    %c39_1212 = arith.constant 39 : index
    %c0_1213 = arith.constant 0 : index
    %c0_1214 = arith.constant 0 : index
    %1497 = vector.load %arg2[%c39_1212, %c0_1213, %c0_1214] : memref<49x1x256xf32, #tpu.memory_space<vmem>>, vector<1x1x256xf32>
    %1498 = vector.shape_cast %1497 : vector<1x1x256xf32> to vector<1x256xf32>
    %1499 = vector.broadcast %1498 : vector<1x256xf32> to vector<6x256xf32>
    %1500 = arith.mulf %1496, %1499 : vector<6x256xf32>
    %c222_i32_1215 = arith.constant 222 : i32
    %1501 = tpu.dynamic_rotate %846 by %c222_i32_1215 dim 1 : vector<6x256xf32>, i32 -> vector<6x256xf32>
    %c40_1216 = arith.constant 40 : index
    %c0_1217 = arith.constant 0 : index
    %c0_1218 = arith.constant 0 : index
    %1502 = vector.load %arg2[%c40_1216, %c0_1217, %c0_1218] : memref<49x1x256xf32, #tpu.memory_space<vmem>>, vector<1x1x256xf32>
    %1503 = vector.shape_cast %1502 : vector<1x1x256xf32> to vector<1x256xf32>
    %1504 = vector.broadcast %1503 : vector<1x256xf32> to vector<6x256xf32>
    %1505 = arith.mulf %1501, %1504 : vector<6x256xf32>
    %c75 = arith.constant 75 : index
    %c0_1219 = arith.constant 0 : index
    %c0_1220 = arith.constant 0 : index
    %1506 = vector.load %arg15[%c75, %c0_1219, %c0_1220] : memref<100x6x6xf32, #tpu.memory_space<vmem>>, vector<1x6x6xf32>
    %1507 = vector.shape_cast %1506 : vector<1x6x6xf32> to vector<6x6xf32>
    %cst_1221 = arith.constant dense<0.000000e+00> : vector<6x256xf32>
    %1508 = tpu.matmul %1507, %1390, %cst_1221 {dimension_numbers = #tpu.dot_dimension_numbers<[1], [0], [0], [1], [0, 0, 1, 1], [], []>} : vector<6x6xf32>, vector<6x256xf32>, vector<6x256xf32> -> vector<6x256xf32>
    %c76 = arith.constant 76 : index
    %c0_1222 = arith.constant 0 : index
    %c0_1223 = arith.constant 0 : index
    %1509 = vector.load %arg15[%c76, %c0_1222, %c0_1223] : memref<100x6x6xf32, #tpu.memory_space<vmem>>, vector<1x6x6xf32>
    %1510 = vector.shape_cast %1509 : vector<1x6x6xf32> to vector<6x6xf32>
    %cst_1224 = arith.constant dense<0.000000e+00> : vector<6x256xf32>
    %1511 = tpu.matmul %1510, %1395, %cst_1224 {dimension_numbers = #tpu.dot_dimension_numbers<[1], [0], [0], [1], [0, 0, 1, 1], [], []>} : vector<6x6xf32>, vector<6x256xf32>, vector<6x256xf32> -> vector<6x256xf32>
    %1512 = arith.addf %1508, %1511 : vector<6x256xf32>
    %c77 = arith.constant 77 : index
    %c0_1225 = arith.constant 0 : index
    %c0_1226 = arith.constant 0 : index
    %1513 = vector.load %arg15[%c77, %c0_1225, %c0_1226] : memref<100x6x6xf32, #tpu.memory_space<vmem>>, vector<1x6x6xf32>
    %1514 = vector.shape_cast %1513 : vector<1x6x6xf32> to vector<6x6xf32>
    %cst_1227 = arith.constant dense<0.000000e+00> : vector<6x256xf32>
    %1515 = tpu.matmul %1514, %1400, %cst_1227 {dimension_numbers = #tpu.dot_dimension_numbers<[1], [0], [0], [1], [0, 0, 1, 1], [], []>} : vector<6x6xf32>, vector<6x256xf32>, vector<6x256xf32> -> vector<6x256xf32>
    %1516 = arith.addf %1512, %1515 : vector<6x256xf32>
    %c78 = arith.constant 78 : index
    %c0_1228 = arith.constant 0 : index
    %c0_1229 = arith.constant 0 : index
    %1517 = vector.load %arg15[%c78, %c0_1228, %c0_1229] : memref<100x6x6xf32, #tpu.memory_space<vmem>>, vector<1x6x6xf32>
    %1518 = vector.shape_cast %1517 : vector<1x6x6xf32> to vector<6x6xf32>
    %cst_1230 = arith.constant dense<0.000000e+00> : vector<6x256xf32>
    %1519 = tpu.matmul %1518, %1405, %cst_1230 {dimension_numbers = #tpu.dot_dimension_numbers<[1], [0], [0], [1], [0, 0, 1, 1], [], []>} : vector<6x6xf32>, vector<6x256xf32>, vector<6x256xf32> -> vector<6x256xf32>
    %1520 = arith.addf %1516, %1519 : vector<6x256xf32>
    %c79 = arith.constant 79 : index
    %c0_1231 = arith.constant 0 : index
    %c0_1232 = arith.constant 0 : index
    %1521 = vector.load %arg15[%c79, %c0_1231, %c0_1232] : memref<100x6x6xf32, #tpu.memory_space<vmem>>, vector<1x6x6xf32>
    %1522 = vector.shape_cast %1521 : vector<1x6x6xf32> to vector<6x6xf32>
    %cst_1233 = arith.constant dense<0.000000e+00> : vector<6x256xf32>
    %1523 = tpu.matmul %1522, %1410, %cst_1233 {dimension_numbers = #tpu.dot_dimension_numbers<[1], [0], [0], [1], [0, 0, 1, 1], [], []>} : vector<6x6xf32>, vector<6x256xf32>, vector<6x256xf32> -> vector<6x256xf32>
    %1524 = arith.addf %1520, %1523 : vector<6x256xf32>
    %c80 = arith.constant 80 : index
    %c0_1234 = arith.constant 0 : index
    %c0_1235 = arith.constant 0 : index
    %1525 = vector.load %arg15[%c80, %c0_1234, %c0_1235] : memref<100x6x6xf32, #tpu.memory_space<vmem>>, vector<1x6x6xf32>
    %1526 = vector.shape_cast %1525 : vector<1x6x6xf32> to vector<6x6xf32>
    %cst_1236 = arith.constant dense<0.000000e+00> : vector<6x256xf32>
    %1527 = tpu.matmul %1526, %1415, %cst_1236 {dimension_numbers = #tpu.dot_dimension_numbers<[1], [0], [0], [1], [0, 0, 1, 1], [], []>} : vector<6x6xf32>, vector<6x256xf32>, vector<6x256xf32> -> vector<6x256xf32>
    %1528 = arith.addf %1524, %1527 : vector<6x256xf32>
    %c81 = arith.constant 81 : index
    %c0_1237 = arith.constant 0 : index
    %c0_1238 = arith.constant 0 : index
    %1529 = vector.load %arg15[%c81, %c0_1237, %c0_1238] : memref<100x6x6xf32, #tpu.memory_space<vmem>>, vector<1x6x6xf32>
    %1530 = vector.shape_cast %1529 : vector<1x6x6xf32> to vector<6x6xf32>
    %cst_1239 = arith.constant dense<0.000000e+00> : vector<6x256xf32>
    %1531 = tpu.matmul %1530, %1420, %cst_1239 {dimension_numbers = #tpu.dot_dimension_numbers<[1], [0], [0], [1], [0, 0, 1, 1], [], []>} : vector<6x6xf32>, vector<6x256xf32>, vector<6x256xf32> -> vector<6x256xf32>
    %1532 = arith.addf %1528, %1531 : vector<6x256xf32>
    %c82 = arith.constant 82 : index
    %c0_1240 = arith.constant 0 : index
    %c0_1241 = arith.constant 0 : index
    %1533 = vector.load %arg15[%c82, %c0_1240, %c0_1241] : memref<100x6x6xf32, #tpu.memory_space<vmem>>, vector<1x6x6xf32>
    %1534 = vector.shape_cast %1533 : vector<1x6x6xf32> to vector<6x6xf32>
    %cst_1242 = arith.constant dense<0.000000e+00> : vector<6x256xf32>
    %1535 = tpu.matmul %1534, %1425, %cst_1242 {dimension_numbers = #tpu.dot_dimension_numbers<[1], [0], [0], [1], [0, 0, 1, 1], [], []>} : vector<6x6xf32>, vector<6x256xf32>, vector<6x256xf32> -> vector<6x256xf32>
    %1536 = arith.addf %1532, %1535 : vector<6x256xf32>
    %c83 = arith.constant 83 : index
    %c0_1243 = arith.constant 0 : index
    %c0_1244 = arith.constant 0 : index
    %1537 = vector.load %arg15[%c83, %c0_1243, %c0_1244] : memref<100x6x6xf32, #tpu.memory_space<vmem>>, vector<1x6x6xf32>
    %1538 = vector.shape_cast %1537 : vector<1x6x6xf32> to vector<6x6xf32>
    %cst_1245 = arith.constant dense<0.000000e+00> : vector<6x256xf32>
    %1539 = tpu.matmul %1538, %1430, %cst_1245 {dimension_numbers = #tpu.dot_dimension_numbers<[1], [0], [0], [1], [0, 0, 1, 1], [], []>} : vector<6x6xf32>, vector<6x256xf32>, vector<6x256xf32> -> vector<6x256xf32>
    %1540 = arith.addf %1536, %1539 : vector<6x256xf32>
    %c84 = arith.constant 84 : index
    %c0_1246 = arith.constant 0 : index
    %c0_1247 = arith.constant 0 : index
    %1541 = vector.load %arg15[%c84, %c0_1246, %c0_1247] : memref<100x6x6xf32, #tpu.memory_space<vmem>>, vector<1x6x6xf32>
    %1542 = vector.shape_cast %1541 : vector<1x6x6xf32> to vector<6x6xf32>
    %cst_1248 = arith.constant dense<0.000000e+00> : vector<6x256xf32>
    %1543 = tpu.matmul %1542, %1435, %cst_1248 {dimension_numbers = #tpu.dot_dimension_numbers<[1], [0], [0], [1], [0, 0, 1, 1], [], []>} : vector<6x6xf32>, vector<6x256xf32>, vector<6x256xf32> -> vector<6x256xf32>
    %1544 = arith.addf %1540, %1543 : vector<6x256xf32>
    %c85 = arith.constant 85 : index
    %c0_1249 = arith.constant 0 : index
    %c0_1250 = arith.constant 0 : index
    %1545 = vector.load %arg15[%c85, %c0_1249, %c0_1250] : memref<100x6x6xf32, #tpu.memory_space<vmem>>, vector<1x6x6xf32>
    %1546 = vector.shape_cast %1545 : vector<1x6x6xf32> to vector<6x6xf32>
    %cst_1251 = arith.constant dense<0.000000e+00> : vector<6x256xf32>
    %1547 = tpu.matmul %1546, %1440, %cst_1251 {dimension_numbers = #tpu.dot_dimension_numbers<[1], [0], [0], [1], [0, 0, 1, 1], [], []>} : vector<6x6xf32>, vector<6x256xf32>, vector<6x256xf32> -> vector<6x256xf32>
    %1548 = arith.addf %1544, %1547 : vector<6x256xf32>
    %c86 = arith.constant 86 : index
    %c0_1252 = arith.constant 0 : index
    %c0_1253 = arith.constant 0 : index
    %1549 = vector.load %arg15[%c86, %c0_1252, %c0_1253] : memref<100x6x6xf32, #tpu.memory_space<vmem>>, vector<1x6x6xf32>
    %1550 = vector.shape_cast %1549 : vector<1x6x6xf32> to vector<6x6xf32>
    %cst_1254 = arith.constant dense<0.000000e+00> : vector<6x256xf32>
    %1551 = tpu.matmul %1550, %1445, %cst_1254 {dimension_numbers = #tpu.dot_dimension_numbers<[1], [0], [0], [1], [0, 0, 1, 1], [], []>} : vector<6x6xf32>, vector<6x256xf32>, vector<6x256xf32> -> vector<6x256xf32>
    %1552 = arith.addf %1548, %1551 : vector<6x256xf32>
    %c87 = arith.constant 87 : index
    %c0_1255 = arith.constant 0 : index
    %c0_1256 = arith.constant 0 : index
    %1553 = vector.load %arg15[%c87, %c0_1255, %c0_1256] : memref<100x6x6xf32, #tpu.memory_space<vmem>>, vector<1x6x6xf32>
    %1554 = vector.shape_cast %1553 : vector<1x6x6xf32> to vector<6x6xf32>
    %cst_1257 = arith.constant dense<0.000000e+00> : vector<6x256xf32>
    %1555 = tpu.matmul %1554, %846, %cst_1257 {dimension_numbers = #tpu.dot_dimension_numbers<[1], [0], [0], [1], [0, 0, 1, 1], [], []>} : vector<6x6xf32>, vector<6x256xf32>, vector<6x256xf32> -> vector<6x256xf32>
    %1556 = arith.addf %1552, %1555 : vector<6x256xf32>
    %c88 = arith.constant 88 : index
    %c0_1258 = arith.constant 0 : index
    %c0_1259 = arith.constant 0 : index
    %1557 = vector.load %arg15[%c88, %c0_1258, %c0_1259] : memref<100x6x6xf32, #tpu.memory_space<vmem>>, vector<1x6x6xf32>
    %1558 = vector.shape_cast %1557 : vector<1x6x6xf32> to vector<6x6xf32>
    %cst_1260 = arith.constant dense<0.000000e+00> : vector<6x256xf32>
    %1559 = tpu.matmul %1558, %1450, %cst_1260 {dimension_numbers = #tpu.dot_dimension_numbers<[1], [0], [0], [1], [0, 0, 1, 1], [], []>} : vector<6x6xf32>, vector<6x256xf32>, vector<6x256xf32> -> vector<6x256xf32>
    %1560 = arith.addf %1556, %1559 : vector<6x256xf32>
    %c89 = arith.constant 89 : index
    %c0_1261 = arith.constant 0 : index
    %c0_1262 = arith.constant 0 : index
    %1561 = vector.load %arg15[%c89, %c0_1261, %c0_1262] : memref<100x6x6xf32, #tpu.memory_space<vmem>>, vector<1x6x6xf32>
    %1562 = vector.shape_cast %1561 : vector<1x6x6xf32> to vector<6x6xf32>
    %cst_1263 = arith.constant dense<0.000000e+00> : vector<6x256xf32>
    %1563 = tpu.matmul %1562, %1455, %cst_1263 {dimension_numbers = #tpu.dot_dimension_numbers<[1], [0], [0], [1], [0, 0, 1, 1], [], []>} : vector<6x6xf32>, vector<6x256xf32>, vector<6x256xf32> -> vector<6x256xf32>
    %1564 = arith.addf %1560, %1563 : vector<6x256xf32>
    %c90 = arith.constant 90 : index
    %c0_1264 = arith.constant 0 : index
    %c0_1265 = arith.constant 0 : index
    %1565 = vector.load %arg15[%c90, %c0_1264, %c0_1265] : memref<100x6x6xf32, #tpu.memory_space<vmem>>, vector<1x6x6xf32>
    %1566 = vector.shape_cast %1565 : vector<1x6x6xf32> to vector<6x6xf32>
    %cst_1266 = arith.constant dense<0.000000e+00> : vector<6x256xf32>
    %1567 = tpu.matmul %1566, %1460, %cst_1266 {dimension_numbers = #tpu.dot_dimension_numbers<[1], [0], [0], [1], [0, 0, 1, 1], [], []>} : vector<6x6xf32>, vector<6x256xf32>, vector<6x256xf32> -> vector<6x256xf32>
    %1568 = arith.addf %1564, %1567 : vector<6x256xf32>
    %c91 = arith.constant 91 : index
    %c0_1267 = arith.constant 0 : index
    %c0_1268 = arith.constant 0 : index
    %1569 = vector.load %arg15[%c91, %c0_1267, %c0_1268] : memref<100x6x6xf32, #tpu.memory_space<vmem>>, vector<1x6x6xf32>
    %1570 = vector.shape_cast %1569 : vector<1x6x6xf32> to vector<6x6xf32>
    %cst_1269 = arith.constant dense<0.000000e+00> : vector<6x256xf32>
    %1571 = tpu.matmul %1570, %1465, %cst_1269 {dimension_numbers = #tpu.dot_dimension_numbers<[1], [0], [0], [1], [0, 0, 1, 1], [], []>} : vector<6x6xf32>, vector<6x256xf32>, vector<6x256xf32> -> vector<6x256xf32>
    %1572 = arith.addf %1568, %1571 : vector<6x256xf32>
    %c92 = arith.constant 92 : index
    %c0_1270 = arith.constant 0 : index
    %c0_1271 = arith.constant 0 : index
    %1573 = vector.load %arg15[%c92, %c0_1270, %c0_1271] : memref<100x6x6xf32, #tpu.memory_space<vmem>>, vector<1x6x6xf32>
    %1574 = vector.shape_cast %1573 : vector<1x6x6xf32> to vector<6x6xf32>
    %cst_1272 = arith.constant dense<0.000000e+00> : vector<6x256xf32>
    %1575 = tpu.matmul %1574, %1470, %cst_1272 {dimension_numbers = #tpu.dot_dimension_numbers<[1], [0], [0], [1], [0, 0, 1, 1], [], []>} : vector<6x6xf32>, vector<6x256xf32>, vector<6x256xf32> -> vector<6x256xf32>
    %1576 = arith.addf %1572, %1575 : vector<6x256xf32>
    %c93 = arith.constant 93 : index
    %c0_1273 = arith.constant 0 : index
    %c0_1274 = arith.constant 0 : index
    %1577 = vector.load %arg15[%c93, %c0_1273, %c0_1274] : memref<100x6x6xf32, #tpu.memory_space<vmem>>, vector<1x6x6xf32>
    %1578 = vector.shape_cast %1577 : vector<1x6x6xf32> to vector<6x6xf32>
    %cst_1275 = arith.constant dense<0.000000e+00> : vector<6x256xf32>
    %1579 = tpu.matmul %1578, %1475, %cst_1275 {dimension_numbers = #tpu.dot_dimension_numbers<[1], [0], [0], [1], [0, 0, 1, 1], [], []>} : vector<6x6xf32>, vector<6x256xf32>, vector<6x256xf32> -> vector<6x256xf32>
    %1580 = arith.addf %1576, %1579 : vector<6x256xf32>
    %c94 = arith.constant 94 : index
    %c0_1276 = arith.constant 0 : index
    %c0_1277 = arith.constant 0 : index
    %1581 = vector.load %arg15[%c94, %c0_1276, %c0_1277] : memref<100x6x6xf32, #tpu.memory_space<vmem>>, vector<1x6x6xf32>
    %1582 = vector.shape_cast %1581 : vector<1x6x6xf32> to vector<6x6xf32>
    %cst_1278 = arith.constant dense<0.000000e+00> : vector<6x256xf32>
    %1583 = tpu.matmul %1582, %1480, %cst_1278 {dimension_numbers = #tpu.dot_dimension_numbers<[1], [0], [0], [1], [0, 0, 1, 1], [], []>} : vector<6x6xf32>, vector<6x256xf32>, vector<6x256xf32> -> vector<6x256xf32>
    %1584 = arith.addf %1580, %1583 : vector<6x256xf32>
    %c95 = arith.constant 95 : index
    %c0_1279 = arith.constant 0 : index
    %c0_1280 = arith.constant 0 : index
    %1585 = vector.load %arg15[%c95, %c0_1279, %c0_1280] : memref<100x6x6xf32, #tpu.memory_space<vmem>>, vector<1x6x6xf32>
    %1586 = vector.shape_cast %1585 : vector<1x6x6xf32> to vector<6x6xf32>
    %cst_1281 = arith.constant dense<0.000000e+00> : vector<6x256xf32>
    %1587 = tpu.matmul %1586, %1485, %cst_1281 {dimension_numbers = #tpu.dot_dimension_numbers<[1], [0], [0], [1], [0, 0, 1, 1], [], []>} : vector<6x6xf32>, vector<6x256xf32>, vector<6x256xf32> -> vector<6x256xf32>
    %1588 = arith.addf %1584, %1587 : vector<6x256xf32>
    %c96 = arith.constant 96 : index
    %c0_1282 = arith.constant 0 : index
    %c0_1283 = arith.constant 0 : index
    %1589 = vector.load %arg15[%c96, %c0_1282, %c0_1283] : memref<100x6x6xf32, #tpu.memory_space<vmem>>, vector<1x6x6xf32>
    %1590 = vector.shape_cast %1589 : vector<1x6x6xf32> to vector<6x6xf32>
    %cst_1284 = arith.constant dense<0.000000e+00> : vector<6x256xf32>
    %1591 = tpu.matmul %1590, %1490, %cst_1284 {dimension_numbers = #tpu.dot_dimension_numbers<[1], [0], [0], [1], [0, 0, 1, 1], [], []>} : vector<6x6xf32>, vector<6x256xf32>, vector<6x256xf32> -> vector<6x256xf32>
    %1592 = arith.addf %1588, %1591 : vector<6x256xf32>
    %c97 = arith.constant 97 : index
    %c0_1285 = arith.constant 0 : index
    %c0_1286 = arith.constant 0 : index
    %1593 = vector.load %arg15[%c97, %c0_1285, %c0_1286] : memref<100x6x6xf32, #tpu.memory_space<vmem>>, vector<1x6x6xf32>
    %1594 = vector.shape_cast %1593 : vector<1x6x6xf32> to vector<6x6xf32>
    %cst_1287 = arith.constant dense<0.000000e+00> : vector<6x256xf32>
    %1595 = tpu.matmul %1594, %1495, %cst_1287 {dimension_numbers = #tpu.dot_dimension_numbers<[1], [0], [0], [1], [0, 0, 1, 1], [], []>} : vector<6x6xf32>, vector<6x256xf32>, vector<6x256xf32> -> vector<6x256xf32>
    %1596 = arith.addf %1592, %1595 : vector<6x256xf32>
    %c98 = arith.constant 98 : index
    %c0_1288 = arith.constant 0 : index
    %c0_1289 = arith.constant 0 : index
    %1597 = vector.load %arg15[%c98, %c0_1288, %c0_1289] : memref<100x6x6xf32, #tpu.memory_space<vmem>>, vector<1x6x6xf32>
    %1598 = vector.shape_cast %1597 : vector<1x6x6xf32> to vector<6x6xf32>
    %cst_1290 = arith.constant dense<0.000000e+00> : vector<6x256xf32>
    %1599 = tpu.matmul %1598, %1500, %cst_1290 {dimension_numbers = #tpu.dot_dimension_numbers<[1], [0], [0], [1], [0, 0, 1, 1], [], []>} : vector<6x6xf32>, vector<6x256xf32>, vector<6x256xf32> -> vector<6x256xf32>
    %1600 = arith.addf %1596, %1599 : vector<6x256xf32>
    %c99 = arith.constant 99 : index
    %c0_1291 = arith.constant 0 : index
    %c0_1292 = arith.constant 0 : index
    %1601 = vector.load %arg15[%c99, %c0_1291, %c0_1292] : memref<100x6x6xf32, #tpu.memory_space<vmem>>, vector<1x6x6xf32>
    %1602 = vector.shape_cast %1601 : vector<1x6x6xf32> to vector<6x6xf32>
    %cst_1293 = arith.constant dense<0.000000e+00> : vector<6x256xf32>
    %1603 = tpu.matmul %1602, %1505, %cst_1293 {dimension_numbers = #tpu.dot_dimension_numbers<[1], [0], [0], [1], [0, 0, 1, 1], [], []>} : vector<6x6xf32>, vector<6x256xf32>, vector<6x256xf32> -> vector<6x256xf32>
    %1604 = arith.addf %1600, %1603 : vector<6x256xf32>
    %1605 = arith.addf %1385, %1604 : vector<6x256xf32>
    %c0_1294 = arith.constant 0 : index
    %c0_1295 = arith.constant 0 : index
    %1606 = vector.load %arg16[%c0_1294, %c0_1295] : memref<6x1xf32, #tpu.memory_space<vmem>>, vector<6x1xf32>
    %1607 = vector.broadcast %1606 : vector<6x1xf32> to vector<6x256xf32>
    %1608 = arith.addf %1605, %1607 : vector<6x256xf32>
    %cst_1296 = arith.constant 0.000000e+00 : f32
    %1609 = vector.broadcast %cst_1296 : f32 to vector<6x256xf32>
    %1610 = arith.cmpf oge, %1608, %1609 : vector<6x256xf32>
    %cst_1297 = arith.constant 0.00999999977 : f32
    %1611 = vector.broadcast %cst_1297 : f32 to vector<6x256xf32>
    %1612 = arith.mulf %1611, %1608 : vector<6x256xf32>
    %1613 = arith.select %1610, %1608, %1612 : vector<6x256xi1>, vector<6x256xf32>
    %c17_i32_1298 = arith.constant 17 : i32
    %1614 = tpu.dynamic_rotate %1613 by %c17_i32_1298 dim 1 : vector<6x256xf32>, i32 -> vector<6x256xf32>
    %c16_1299 = arith.constant 16 : index
    %c0_1300 = arith.constant 0 : index
    %c0_1301 = arith.constant 0 : index
    %1615 = vector.load %arg2[%c16_1299, %c0_1300, %c0_1301] : memref<49x1x256xf32, #tpu.memory_space<vmem>>, vector<1x1x256xf32>
    %1616 = vector.shape_cast %1615 : vector<1x1x256xf32> to vector<1x256xf32>
    %1617 = vector.broadcast %1616 : vector<1x256xf32> to vector<6x256xf32>
    %1618 = arith.mulf %1614, %1617 : vector<6x256xf32>
    %c16_i32_1302 = arith.constant 16 : i32
    %1619 = tpu.dynamic_rotate %1613 by %c16_i32_1302 dim 1 : vector<6x256xf32>, i32 -> vector<6x256xf32>
    %c17_1303 = arith.constant 17 : index
    %c0_1304 = arith.constant 0 : index
    %c0_1305 = arith.constant 0 : index
    %1620 = vector.load %arg2[%c17_1303, %c0_1304, %c0_1305] : memref<49x1x256xf32, #tpu.memory_space<vmem>>, vector<1x1x256xf32>
    %1621 = vector.shape_cast %1620 : vector<1x1x256xf32> to vector<1x256xf32>
    %1622 = vector.broadcast %1621 : vector<1x256xf32> to vector<6x256xf32>
    %1623 = arith.mulf %1619, %1622 : vector<6x256xf32>
    %c15_i32_1306 = arith.constant 15 : i32
    %1624 = tpu.dynamic_rotate %1613 by %c15_i32_1306 dim 1 : vector<6x256xf32>, i32 -> vector<6x256xf32>
    %c18_1307 = arith.constant 18 : index
    %c0_1308 = arith.constant 0 : index
    %c0_1309 = arith.constant 0 : index
    %1625 = vector.load %arg2[%c18_1307, %c0_1308, %c0_1309] : memref<49x1x256xf32, #tpu.memory_space<vmem>>, vector<1x1x256xf32>
    %1626 = vector.shape_cast %1625 : vector<1x1x256xf32> to vector<1x256xf32>
    %1627 = vector.broadcast %1626 : vector<1x256xf32> to vector<6x256xf32>
    %1628 = arith.mulf %1624, %1627 : vector<6x256xf32>
    %c1_i32_1310 = arith.constant 1 : i32
    %1629 = tpu.dynamic_rotate %1613 by %c1_i32_1310 dim 1 : vector<6x256xf32>, i32 -> vector<6x256xf32>
    %c23_1311 = arith.constant 23 : index
    %c0_1312 = arith.constant 0 : index
    %c0_1313 = arith.constant 0 : index
    %1630 = vector.load %arg2[%c23_1311, %c0_1312, %c0_1313] : memref<49x1x256xf32, #tpu.memory_space<vmem>>, vector<1x1x256xf32>
    %1631 = vector.shape_cast %1630 : vector<1x1x256xf32> to vector<1x256xf32>
    %1632 = vector.broadcast %1631 : vector<1x256xf32> to vector<6x256xf32>
    %1633 = arith.mulf %1629, %1632 : vector<6x256xf32>
    %c255_i32_1314 = arith.constant 255 : i32
    %1634 = tpu.dynamic_rotate %1613 by %c255_i32_1314 dim 1 : vector<6x256xf32>, i32 -> vector<6x256xf32>
    %c25_1315 = arith.constant 25 : index
    %c0_1316 = arith.constant 0 : index
    %c0_1317 = arith.constant 0 : index
    %1635 = vector.load %arg2[%c25_1315, %c0_1316, %c0_1317] : memref<49x1x256xf32, #tpu.memory_space<vmem>>, vector<1x1x256xf32>
    %1636 = vector.shape_cast %1635 : vector<1x1x256xf32> to vector<1x256xf32>
    %1637 = vector.broadcast %1636 : vector<1x256xf32> to vector<6x256xf32>
    %1638 = arith.mulf %1634, %1637 : vector<6x256xf32>
    %c241_i32_1318 = arith.constant 241 : i32
    %1639 = tpu.dynamic_rotate %1613 by %c241_i32_1318 dim 1 : vector<6x256xf32>, i32 -> vector<6x256xf32>
    %c30_1319 = arith.constant 30 : index
    %c0_1320 = arith.constant 0 : index
    %c0_1321 = arith.constant 0 : index
    %1640 = vector.load %arg2[%c30_1319, %c0_1320, %c0_1321] : memref<49x1x256xf32, #tpu.memory_space<vmem>>, vector<1x1x256xf32>
    %1641 = vector.shape_cast %1640 : vector<1x1x256xf32> to vector<1x256xf32>
    %1642 = vector.broadcast %1641 : vector<1x256xf32> to vector<6x256xf32>
    %1643 = arith.mulf %1639, %1642 : vector<6x256xf32>
    %c240_i32_1322 = arith.constant 240 : i32
    %1644 = tpu.dynamic_rotate %1613 by %c240_i32_1322 dim 1 : vector<6x256xf32>, i32 -> vector<6x256xf32>
    %c31_1323 = arith.constant 31 : index
    %c0_1324 = arith.constant 0 : index
    %c0_1325 = arith.constant 0 : index
    %1645 = vector.load %arg2[%c31_1323, %c0_1324, %c0_1325] : memref<49x1x256xf32, #tpu.memory_space<vmem>>, vector<1x1x256xf32>
    %1646 = vector.shape_cast %1645 : vector<1x1x256xf32> to vector<1x256xf32>
    %1647 = vector.broadcast %1646 : vector<1x256xf32> to vector<6x256xf32>
    %1648 = arith.mulf %1644, %1647 : vector<6x256xf32>
    %c239_i32_1326 = arith.constant 239 : i32
    %1649 = tpu.dynamic_rotate %1613 by %c239_i32_1326 dim 1 : vector<6x256xf32>, i32 -> vector<6x256xf32>
    %c32_1327 = arith.constant 32 : index
    %c0_1328 = arith.constant 0 : index
    %c0_1329 = arith.constant 0 : index
    %1650 = vector.load %arg2[%c32_1327, %c0_1328, %c0_1329] : memref<49x1x256xf32, #tpu.memory_space<vmem>>, vector<1x1x256xf32>
    %1651 = vector.shape_cast %1650 : vector<1x1x256xf32> to vector<1x256xf32>
    %1652 = vector.broadcast %1651 : vector<1x256xf32> to vector<6x256xf32>
    %1653 = arith.mulf %1649, %1652 : vector<6x256xf32>
    %c0_1330 = arith.constant 0 : index
    %c0_1331 = arith.constant 0 : index
    %c0_1332 = arith.constant 0 : index
    %1654 = vector.load %arg17[%c0_1330, %c0_1331, %c0_1332] : memref<9x6x6xf32, #tpu.memory_space<vmem>>, vector<1x6x6xf32>
    %1655 = vector.shape_cast %1654 : vector<1x6x6xf32> to vector<6x6xf32>
    %cst_1333 = arith.constant dense<0.000000e+00> : vector<6x256xf32>
    %1656 = tpu.matmul %1655, %1618, %cst_1333 {dimension_numbers = #tpu.dot_dimension_numbers<[1], [0], [0], [1], [0, 0, 1, 1], [], []>} : vector<6x6xf32>, vector<6x256xf32>, vector<6x256xf32> -> vector<6x256xf32>
    %c1_1334 = arith.constant 1 : index
    %c0_1335 = arith.constant 0 : index
    %c0_1336 = arith.constant 0 : index
    %1657 = vector.load %arg17[%c1_1334, %c0_1335, %c0_1336] : memref<9x6x6xf32, #tpu.memory_space<vmem>>, vector<1x6x6xf32>
    %1658 = vector.shape_cast %1657 : vector<1x6x6xf32> to vector<6x6xf32>
    %cst_1337 = arith.constant dense<0.000000e+00> : vector<6x256xf32>
    %1659 = tpu.matmul %1658, %1623, %cst_1337 {dimension_numbers = #tpu.dot_dimension_numbers<[1], [0], [0], [1], [0, 0, 1, 1], [], []>} : vector<6x6xf32>, vector<6x256xf32>, vector<6x256xf32> -> vector<6x256xf32>
    %1660 = arith.addf %1656, %1659 : vector<6x256xf32>
    %c2_1338 = arith.constant 2 : index
    %c0_1339 = arith.constant 0 : index
    %c0_1340 = arith.constant 0 : index
    %1661 = vector.load %arg17[%c2_1338, %c0_1339, %c0_1340] : memref<9x6x6xf32, #tpu.memory_space<vmem>>, vector<1x6x6xf32>
    %1662 = vector.shape_cast %1661 : vector<1x6x6xf32> to vector<6x6xf32>
    %cst_1341 = arith.constant dense<0.000000e+00> : vector<6x256xf32>
    %1663 = tpu.matmul %1662, %1628, %cst_1341 {dimension_numbers = #tpu.dot_dimension_numbers<[1], [0], [0], [1], [0, 0, 1, 1], [], []>} : vector<6x6xf32>, vector<6x256xf32>, vector<6x256xf32> -> vector<6x256xf32>
    %1664 = arith.addf %1660, %1663 : vector<6x256xf32>
    %c3_1342 = arith.constant 3 : index
    %c0_1343 = arith.constant 0 : index
    %c0_1344 = arith.constant 0 : index
    %1665 = vector.load %arg17[%c3_1342, %c0_1343, %c0_1344] : memref<9x6x6xf32, #tpu.memory_space<vmem>>, vector<1x6x6xf32>
    %1666 = vector.shape_cast %1665 : vector<1x6x6xf32> to vector<6x6xf32>
    %cst_1345 = arith.constant dense<0.000000e+00> : vector<6x256xf32>
    %1667 = tpu.matmul %1666, %1633, %cst_1345 {dimension_numbers = #tpu.dot_dimension_numbers<[1], [0], [0], [1], [0, 0, 1, 1], [], []>} : vector<6x6xf32>, vector<6x256xf32>, vector<6x256xf32> -> vector<6x256xf32>
    %1668 = arith.addf %1664, %1667 : vector<6x256xf32>
    %c4_1346 = arith.constant 4 : index
    %c0_1347 = arith.constant 0 : index
    %c0_1348 = arith.constant 0 : index
    %1669 = vector.load %arg17[%c4_1346, %c0_1347, %c0_1348] : memref<9x6x6xf32, #tpu.memory_space<vmem>>, vector<1x6x6xf32>
    %1670 = vector.shape_cast %1669 : vector<1x6x6xf32> to vector<6x6xf32>
    %cst_1349 = arith.constant dense<0.000000e+00> : vector<6x256xf32>
    %1671 = tpu.matmul %1670, %1613, %cst_1349 {dimension_numbers = #tpu.dot_dimension_numbers<[1], [0], [0], [1], [0, 0, 1, 1], [], []>} : vector<6x6xf32>, vector<6x256xf32>, vector<6x256xf32> -> vector<6x256xf32>
    %1672 = arith.addf %1668, %1671 : vector<6x256xf32>
    %c5_1350 = arith.constant 5 : index
    %c0_1351 = arith.constant 0 : index
    %c0_1352 = arith.constant 0 : index
    %1673 = vector.load %arg17[%c5_1350, %c0_1351, %c0_1352] : memref<9x6x6xf32, #tpu.memory_space<vmem>>, vector<1x6x6xf32>
    %1674 = vector.shape_cast %1673 : vector<1x6x6xf32> to vector<6x6xf32>
    %cst_1353 = arith.constant dense<0.000000e+00> : vector<6x256xf32>
    %1675 = tpu.matmul %1674, %1638, %cst_1353 {dimension_numbers = #tpu.dot_dimension_numbers<[1], [0], [0], [1], [0, 0, 1, 1], [], []>} : vector<6x6xf32>, vector<6x256xf32>, vector<6x256xf32> -> vector<6x256xf32>
    %1676 = arith.addf %1672, %1675 : vector<6x256xf32>
    %c6_1354 = arith.constant 6 : index
    %c0_1355 = arith.constant 0 : index
    %c0_1356 = arith.constant 0 : index
    %1677 = vector.load %arg17[%c6_1354, %c0_1355, %c0_1356] : memref<9x6x6xf32, #tpu.memory_space<vmem>>, vector<1x6x6xf32>
    %1678 = vector.shape_cast %1677 : vector<1x6x6xf32> to vector<6x6xf32>
    %cst_1357 = arith.constant dense<0.000000e+00> : vector<6x256xf32>
    %1679 = tpu.matmul %1678, %1643, %cst_1357 {dimension_numbers = #tpu.dot_dimension_numbers<[1], [0], [0], [1], [0, 0, 1, 1], [], []>} : vector<6x6xf32>, vector<6x256xf32>, vector<6x256xf32> -> vector<6x256xf32>
    %1680 = arith.addf %1676, %1679 : vector<6x256xf32>
    %c7_1358 = arith.constant 7 : index
    %c0_1359 = arith.constant 0 : index
    %c0_1360 = arith.constant 0 : index
    %1681 = vector.load %arg17[%c7_1358, %c0_1359, %c0_1360] : memref<9x6x6xf32, #tpu.memory_space<vmem>>, vector<1x6x6xf32>
    %1682 = vector.shape_cast %1681 : vector<1x6x6xf32> to vector<6x6xf32>
    %cst_1361 = arith.constant dense<0.000000e+00> : vector<6x256xf32>
    %1683 = tpu.matmul %1682, %1648, %cst_1361 {dimension_numbers = #tpu.dot_dimension_numbers<[1], [0], [0], [1], [0, 0, 1, 1], [], []>} : vector<6x6xf32>, vector<6x256xf32>, vector<6x256xf32> -> vector<6x256xf32>
    %1684 = arith.addf %1680, %1683 : vector<6x256xf32>
    %c8_1362 = arith.constant 8 : index
    %c0_1363 = arith.constant 0 : index
    %c0_1364 = arith.constant 0 : index
    %1685 = vector.load %arg17[%c8_1362, %c0_1363, %c0_1364] : memref<9x6x6xf32, #tpu.memory_space<vmem>>, vector<1x6x6xf32>
    %1686 = vector.shape_cast %1685 : vector<1x6x6xf32> to vector<6x6xf32>
    %cst_1365 = arith.constant dense<0.000000e+00> : vector<6x256xf32>
    %1687 = tpu.matmul %1686, %1653, %cst_1365 {dimension_numbers = #tpu.dot_dimension_numbers<[1], [0], [0], [1], [0, 0, 1, 1], [], []>} : vector<6x6xf32>, vector<6x256xf32>, vector<6x256xf32> -> vector<6x256xf32>
    %1688 = arith.addf %1684, %1687 : vector<6x256xf32>
    %c0_1366 = arith.constant 0 : index
    %c0_1367 = arith.constant 0 : index
    %1689 = vector.load %arg18[%c0_1366, %c0_1367] : memref<6x1xf32, #tpu.memory_space<vmem>>, vector<6x1xf32>
    %1690 = vector.broadcast %1689 : vector<6x1xf32> to vector<6x256xf32>
    %1691 = arith.addf %1688, %1690 : vector<6x256xf32>
    %1692 = arith.addf %1691, %1 : vector<6x256xf32>
    %c0_1368 = arith.constant 0 : index
    %c0_1369 = arith.constant 0 : index
    %c0_1370 = arith.constant 0 : index
    %1693 = vector.load %arg19[%c0_1368, %c0_1369, %c0_1370] : memref<1x6x256xf32, #tpu.memory_space<vmem>>, vector<1x6x256xf32>
    %1694 = vector.shape_cast %1693 : vector<1x6x256xf32> to vector<6x256xf32>
    %1695 = vector.shape_cast %1692 : vector<6x256xf32> to vector<1x6x256xf32>
    tpu.vector_store %arg19[%c0_1368, %c0_1369, %c0_1370], %1695 {strides = array<i32>} : memref<1x6x256xf32, #tpu.memory_space<vmem>>, vector<1x6x256xf32>,
    return
  }
  func.func @transform_0(%arg0: i32) -> (i32, i32, i32) {
    %c0_i32 = arith.constant 0 : i32
    %c0_i32_0 = arith.constant 0 : i32
    %c0_i32_1 = arith.constant 0 : i32
    return %arg0, %c0_i32, %c0_i32_0 : i32, i32, i32
  }
  func.func @transform_1(%arg0: i32) -> (i32, i32, i32) {
    %c0_i32 = arith.constant 0 : i32
    %c0_i32_0 = arith.constant 0 : i32
    %c0_i32_1 = arith.constant 0 : i32
    %c0_i32_2 = arith.constant 0 : i32
    return %c0_i32, %c0_i32_0, %c0_i32_1 : i32, i32, i32
  }
  func.func @transform_2(%arg0: i32) -> (i32, i32, i32) {
    %c0_i32 = arith.constant 0 : i32
    %c0_i32_0 = arith.constant 0 : i32
    %c0_i32_1 = arith.constant 0 : i32
    %c0_i32_2 = arith.constant 0 : i32
    return %c0_i32, %c0_i32_0, %c0_i32_1 : i32, i32, i32
  }
  func.func @transform_3(%arg0: i32) -> (i32, i32) {
    %c0_i32 = arith.constant 0 : i32
    %c0_i32_0 = arith.constant 0 : i32
    %c0_i32_1 = arith.constant 0 : i32
    return %c0_i32, %c0_i32_0 : i32, i32
  }
  func.func @transform_4(%arg0: i32) -> (i32, i32, i32) {
    %c0_i32 = arith.constant 0 : i32
    %c0_i32_0 = arith.constant 0 : i32
    %c0_i32_1 = arith.constant 0 : i32
    %c0_i32_2 = arith.constant 0 : i32
    return %c0_i32, %c0_i32_0, %c0_i32_1 : i32, i32, i32
  }
  func.func @transform_5(%arg0: i32) -> (i32, i32) {
    %c0_i32 = arith.constant 0 : i32
    %c0_i32_0 = arith.constant 0 : i32
    %c0_i32_1 = arith.constant 0 : i32
    return %c0_i32, %c0_i32_0 : i32, i32
  }
  func.func @transform_6(%arg0: i32) -> (i32, i32, i32) {
    %c0_i32 = arith.constant 0 : i32
    %c0_i32_0 = arith.constant 0 : i32
    %c0_i32_1 = arith.constant 0 : i32
    %c0_i32_2 = arith.constant 0 : i32
    return %c0_i32, %c0_i32_0, %c0_i32_1 : i32, i32, i32
  }
  func.func @transform_7(%arg0: i32) -> (i32, i32) {
    %c0_i32 = arith.constant 0 : i32
    %c0_i32_0 = arith.constant 0 : i32
    %c0_i32_1 = arith.constant 0 : i32
    return %c0_i32, %c0_i32_0 : i32, i32
  }
  func.func @transform_8(%arg0: i32) -> (i32, i32, i32) {
    %c0_i32 = arith.constant 0 : i32
    %c0_i32_0 = arith.constant 0 : i32
    %c0_i32_1 = arith.constant 0 : i32
    %c0_i32_2 = arith.constant 0 : i32
    return %c0_i32, %c0_i32_0, %c0_i32_1 : i32, i32, i32
  }
  func.func @transform_9(%arg0: i32) -> (i32, i32) {
    %c0_i32 = arith.constant 0 : i32
    %c0_i32_0 = arith.constant 0 : i32
    %c0_i32_1 = arith.constant 0 : i32
    return %c0_i32, %c0_i32_0 : i32, i32
  }
  func.func @transform_10(%arg0: i32) -> (i32, i32, i32) {
    %c0_i32 = arith.constant 0 : i32
    %c0_i32_0 = arith.constant 0 : i32
    %c0_i32_1 = arith.constant 0 : i32
    %c0_i32_2 = arith.constant 0 : i32
    return %c0_i32, %c0_i32_0, %c0_i32_1 : i32, i32, i32
  }
  func.func @transform_11(%arg0: i32) -> (i32, i32) {
    %c0_i32 = arith.constant 0 : i32
    %c0_i32_0 = arith.constant 0 : i32
    %c0_i32_1 = arith.constant 0 : i32
    return %c0_i32, %c0_i32_0 : i32, i32
  }
  func.func @transform_12(%arg0: i32) -> (i32, i32, i32) {
    %c0_i32 = arith.constant 0 : i32
    %c0_i32_0 = arith.constant 0 : i32
    %c0_i32_1 = arith.constant 0 : i32
    %c0_i32_2 = arith.constant 0 : i32
    return %c0_i32, %c0_i32_0, %c0_i32_1 : i32, i32, i32
  }
  func.func @transform_13(%arg0: i32) -> (i32, i32) {
    %c0_i32 = arith.constant 0 : i32
    %c0_i32_0 = arith.constant 0 : i32
    %c0_i32_1 = arith.constant 0 : i32
    return %c0_i32, %c0_i32_0 : i32, i32
  }
  func.func @transform_14(%arg0: i32) -> (i32, i32, i32) {
    %c0_i32 = arith.constant 0 : i32
    %c0_i32_0 = arith.constant 0 : i32
    %c0_i32_1 = arith.constant 0 : i32
    %c0_i32_2 = arith.constant 0 : i32
    return %c0_i32, %c0_i32_0, %c0_i32_1 : i32, i32, i32
  }
  func.func @transform_15(%arg0: i32) -> (i32, i32) {
    %c0_i32 = arith.constant 0 : i32
    %c0_i32_0 = arith.constant 0 : i32
    %c0_i32_1 = arith.constant 0 : i32
    return %c0_i32, %c0_i32_0 : i32, i32
  }
  func.func @transform_16(%arg0: i32) -> (i32, i32, i32) {
    %c0_i32 = arith.constant 0 : i32
    %c0_i32_0 = arith.constant 0 : i32
    %c0_i32_1 = arith.constant 0 : i32
    %c0_i32_2 = arith.constant 0 : i32
    return %c0_i32, %c0_i32_0, %c0_i32_1 : i32, i32, i32
  }
  func.func @transform_17(%arg0: i32) -> (i32, i32) {
    %c0_i32 = arith.constant 0 : i32
    %c0_i32_0 = arith.constant 0 : i32
    %c0_i32_1 = arith.constant 0 : i32
    return %c0_i32, %c0_i32_0 : i32, i32
  }
  func.func @transform_18(%arg0: i32) -> (i32, i32, i32) {
    %c0_i32 = arith.constant 0 : i32
    %c0_i32_0 = arith.constant 0 : i32
    %c0_i32_1 = arith.constant 0 : i32
    return %arg0, %c0_i32, %c0_i32_0 : i32, i32, i32
  }
}

</mosaic_0001>

<bundles_post_ra>
// kernel: multiconv_forward.1
= control target key start
LH: loop header
LB: loop body
LE: loop exit
PB: predicated region body
PF: predicated region fallthrough
CT: control target
= control target key end

     0   :  { %s22207_s27 = smov 0   ;;  %s26232_s0 = inlined_call_operand.vmem [shape: f32[2,6,256], index: 0, kind: input, shape index: {}]   ;;  %s26233_s1 = inlined_call_operand.vmem [shape: f32[49,1,256], index: 1, kind: input, shape index: {}]   ;;  %s26234_s2 = inlined_call_operand.vmem [shape: f32[9,6,6], index: 2, kind: input, shape index: {}]   ;;  %s26235_s3 = inlined_call_operand.vmem [shape: f32[6,1], index: 3, kind: input, shape index: {}]   ;;  %s26236_s4 = inlined_call_operand.vmem [shape: f32[9,6,6], index: 4, kind: input, shape index: {}]   ;;  %s26237_s5 = inlined_call_operand.vmem [shape: f32[6,1], index: 5, kind: input, shape index: {}]   ;;  %s26238_s6 = inlined_call_operand.vmem [shape: f32[25,6,6], index: 6, kind: input, shape index: {}]   ;;  %s26239_s7 = inlined_call_operand.vmem [shape: f32[6,1], index: 7, kind: input, shape index: {}]   ;;  %s26240_s8 = inlined_call_operand.vmem [shape: f32[9,6,6], index: 8, kind: input, shape index: {}]   ;;  %s26241_s9 = inlined_call_operand.vmem [shape: f32[6,1], index: 9, kind: input, shape index: {}]   ;;  %s26242_s10 = inlined_call_operand.vmem [shape: f32[49,6,6], index: 10, kind: input, shape index: {}]   ;;  %s26243_s11 = inlined_call_operand.vmem [shape: f32[6,1], index: 11, kind: input, shape index: {}]   ;;  %s26244_s12 = inlined_call_operand.vmem [shape: f32[9,6,6], index: 12, kind: input, shape index: {}]   ;;  %s26245_s13 = inlined_call_operand.vmem [shape: f32[6,1], index: 13, kind: input, shape index: {}]   ;;  %s26246_s14 = inlined_call_operand.vmem [shape: f32[100,6,6], index: 14, kind: input, shape index: {}]   ;;  %s26247_s15 = inlined_call_operand.vmem [shape: f32[6,1], index: 15, kind: input, shape index: {}]   ;;  %s26248_s16 = inlined_call_operand.vmem [shape: f32[9,6,6], index: 16, kind: input, shape index: {}]   ;;  %s26249_s17 = inlined_call_operand.vmem [shape: f32[6,1], index: 17, kind: input, shape index: {}]   ;;  %s26250_s18 = inlined_call_operand.vmem [shape: f32[2,6,256], index: 18, kind: output, shape index: {}]  }
   0x1   :  { %26449 = sst [smem:[#allocation68_spill]] %s26232_s0 }
   0x2   :  { %26450 = sst [smem:[#allocation69_spill]] %s26233_s1 }
   0x3   :  { %26451 = sst [smem:[#allocation70_spill]] %s26234_s2 }
   0x4   :  { %26452 = sst [smem:[#allocation71_spill]] %s26235_s3 }
   0x5   :  { %26453 = sst [smem:[#allocation72_spill]] %s26236_s4 }
   0x6   :  { %26454 = sst [smem:[#allocation73_spill]] %s26237_s5 }
   0x7   :  { %26455 = sst [smem:[#allocation74_spill]] %s26238_s6 }
   0x8   :  { %26456 = sst [smem:[#allocation75_spill]] %s26239_s7 }
   0x9   :  { %26457 = sst [smem:[#allocation76_spill]] %s26240_s8 }
   0xa   :  { %26458 = sst [smem:[#allocation77_spill]] %s26241_s9 }
   0xb   :  { %26459 = sst [smem:[#allocation78_spill]] %s26242_s10 }
   0xc   :  { %26460 = sst [smem:[#allocation79_spill]] %s26243_s11 }
   0xd   :  { %26461 = sst [smem:[#allocation80_spill]] %s26244_s12 }
   0xe   :  { %26462 = sst [smem:[#allocation81_spill]] %s26247_s15 }
   0xf   :  { %26463 = sst [smem:[#allocation82_spill]] %s26248_s16 }
  0x10   :  { %26464 = sst [smem:[#allocation83_spill]] %s26249_s17 }
  0x11   :  { %26465 = sst [smem:[#allocation84_spill]] %s26250_s18 }
  0x12 LB: > { %26466 = sst [smem:[#allocation2_spill]] %s22060_s27  ;;  %s20636_s28 = sadd.s32 4294967295, %s22060_s27   ;;  %s22060_s27 = sphi %s22207_s27, %s28_s27  }
  0x13   : > { %p20640_p0 = scmp.ge.s32.totalorder %s22060_s27, 1  ;;  %p512_p1 = scmp.lt.s32.totalorder %s22060_s27, 3 }
  0x15   : > { %p513_p2 = pnand %p20640_p0, %p512_p1 }
  0x17   : > { %516 = sbr.rel (%p513_p2) target bundleno = 3429 (0xd65), region = 92 }
  0x1e   : > { %p566_p3 = scmp.lt.s32.totalorder %s20636_s28, 1  ;;  %v26298_v0 = vmov 0.0   ;;  %s26468_s19 = sld [smem:[#allocation68_spill]]  ;;  %v22071_v4 = vmov 0   ;;  %v582_v5 = vlaneseq  ;;  %vm1642_vm2 = vcmask 1045504  }
  0x1f   : > { %1713 = vmatprep.mubr.f32.mxu1 %v26298_v0  ;;  %5265 = vmatprep.mubr.f32.mxu0 %v26298_v0  ;;  %s26266_s20 = smov 17   ;;  %s26290_s21 = smov 16   ;;  %vm1638_vm4 = vcmask 48128  }
  0x20   : > { %s26750_s28 = smov (!%p566_p3, %s20636_s28), 1  ;;  %s26264_s22 = smov 15   ;;  %22044 = vset.pattern.permute.xlu0 %v22071_v4  ;;  %22045 = vset.pattern.permute.xlu1 %v22071_v4  ;;  %v590_v6 = vshrl.u32 %v582_v5, 7  ;;  %v22268_v7 = vand.u32 127, %v582_v5 }
  0x21   : > { %26467 = sst [smem:[#allocation3_spill]] %s26750_s28  ;;  %s26253_s29 = sshll.u32 %s26750_s28, 4 }
  0x22   : > { %s26262_s2 = smov 1   ;;  %s26260_s23 = smov 127   ;;  %v22270_v8 = vsub.s32 0, %v590_v6  ;;  %v22272_v9 = vsub.s32 1, %v590_v6  ;;  %vm935_vm0 = vcmp.lt.s32.totalorder %v22268_v7, 17  ;;  %vm957_vm1 = vcmp.lt.s32.totalorder %v22268_v7, 16 }
  0x23   : > { %s26258_s24 = smov 113   ;;  %s26254_s25 = smov 112   ;;  %vm979_vm3 = vcmp.lt.s32.totalorder %v22268_v7, 15  ;;  %vm1089_vm5 = vcmp.lt.s32.totalorder %v22268_v7, 1  ;;  %vm1111_vm6 = vcmp.lt.s32.totalorder %v22268_v7, 127  ;;  %vm1221_vm7 = vcmp.lt.s32.totalorder %v22268_v7, 113 }
  0x24   : > { %s22225_s1 = scalar_lea.vmem %s26468_s19, %s26253_s29  ;;  %s26256_s26 = smov 111   ;;  %vm1243_vm8 = vcmp.lt.s32.totalorder %v22268_v7, 112  ;;  %vm1265_vm9 = vcmp.lt.s32.totalorder %v22268_v7, 111  ;;  %vm781_vm12 = vcmp.lt.s32.totalorder %v22268_v7, 33  ;;  %vm759_vm13 = vcmp.lt.s32.totalorder %v22268_v7, 34 }
  0x25   : > { %v22228_v1 = vld [vmem:[%s22225_s1] sm:$0x3f]  ;;  %v22235_v2 = vld [vmem:[%s22225_s1 + $0x8] sm:$0x3f]  ;;  %s26469_s3 = sld [smem:[#allocation71_spill]]  ;;  %s26475_s0 = sld [smem:[#allocation70_spill]] }
  0x26   : > { %931 = vrot.lane.b32.xlu1 %v22228_v1, %s26266_s20  ;;  %953 = vrot.lane.b32.xlu0 %v22228_v1, %s26290_s21  ;;  %s26486_s29 = smov 113   ;;  %s26268_s30 = smov 33   ;;  %vm803_vm14 = vcmp.lt.s32.totalorder %v22268_v7, 32  ;;  %vm26421_vm15 = vcmp.lt.s32.totalorder %v22268_v7, 31 }
  0x27   : > { %s26270_s19 = smov 34   ;;  %s26489_s7 = sld [smem:[#allocation75_spill]] }
  0x28   : > { %s26490_s4 = sld [smem:[#allocation72_spill]]  ;;  %s26499_s6 = sld [smem:[#allocation74_spill]] }
  0x29   : > { %s26548_s8 = sld [smem:[#allocation76_spill]]  ;;  %s26549_s10 = sld [smem:[#allocation78_spill]] }
  0x2a   : > { %933 = vrot.lane.b32.xlu1 %v22235_v2, %s26266_s20  ;;  %955 = vrot.lane.b32.xlu0 %v22235_v2, %s26290_s21  ;;  %s26567_s11 = sld [smem:[#allocation79_spill]]  ;;  %s26571_s5 = sld [smem:[#allocation73_spill]] }
  0x2b   : > { %v2388_v3 = vld [vmem:[%s26469_s3] sm:$0x3f]  ;;  %v20692_v30 = vld [vmem:[%s26475_s0 + $0x8] sm:$0x3f]  ;;  %v20699_v48 = vld [vmem:[%s26475_s0 + $0x10] sm:$0x3f] }
  0x2c   : > { %v1635_v43 = vld [vmem:[%s26475_s0] sm:$0x3f]  ;;  %v20703_v54 = vld [vmem:[%s26475_s0 + $0x18] sm:$0x3f]  ;;  %s22091_s3 = smov 48   ;;  %s26572_s12 = sld [smem:[#allocation80_spill]] }
  0x2d   : > { %s26595_s9 = sld [smem:[#allocation77_spill]]  ;;  %s26605_s18 = smov 96  }
  0x2e   : > { %977 = vrot.lane.b32.xlu1 %v22235_v2, %s26264_s22  ;;  %975 = vrot.lane.b32.xlu0 %v22228_v1, %s26264_s22  ;;  %s26607_s28 = smov 95   ;;  %s26608_s16 = smov 94  }
  0x32   : > { %1087 = vrot.lane.b32.xlu1 %v22235_v2, %s26262_s2  ;;  %1085 = vrot.lane.b32.xlu0 %v22228_v1, %s26262_s2 }
  0x36   : > { %1109 = vrot.lane.b32.xlu1 %v22235_v2, %s26260_s23  ;;  %1107 = vrot.lane.b32.xlu0 %v22228_v1, %s26260_s23 }
  0x3a   : > { %1219 = vrot.lane.b32.xlu1 %v22235_v2, %s26258_s24  ;;  %1217 = vrot.lane.b32.xlu0 %v22228_v1, %s26258_s24  ;;  %s26487_s24 = smov 112  }
  0x3e   : > { %1241 = vrot.lane.b32.xlu1 %v22235_v2, %s26254_s25  ;;  %1239 = vrot.lane.b32.xlu0 %v22228_v1, %s26254_s25  ;;  %s26470_s25 = sld [smem:[#allocation69_spill]] }
  0x42   : > { %1263 = vrot.lane.b32.xlu1 %v22235_v2, %s26256_s26  ;;  %1261 = vrot.lane.b32.xlu0 %v22228_v1, %s26256_s26  ;;  %s26488_s26 = smov 111  }
  0x44   : > { %v20660_v10 = vld [vmem:[%s26470_s25 + $0x20] sm:$0x3]  ;;  %v20661_v11 = vld [vmem:[%s26470_s25 + $0x22] sm:$0x3]  ;;  %v20662_v18 = vld [vmem:[%s26470_s25 + $0x24] sm:$0x3] }
  0x45   : > { %v22282_v14 = vrot.slane %v20660_v10, %v22272_v9  ;;  %v22286_v15 = vrot.slane %v20661_v11, %v22270_v8  ;;  %v22289_v16 = vrot.slane %v20661_v11, %v22272_v9  ;;  %v22292_v17 = vrot.slane %v20660_v10, %v22270_v8  ;;  %v20667_v34 = vld [vmem:[%s26470_s25 + $0x2e] sm:$0x3]  ;;  %v20668_v49 = vld [vmem:[%s26470_s25 + $0x32] sm:$0x3]  ;;  %v20673_v56 = vld [vmem:[%s26470_s25 + $0x3c] sm:$0x3] }
  0x46   : > { %2391 = vperm.xlu0 %22044, %v2388_v3   ;;  %v22316_v28 = vrot.slane %v20662_v18, %v22272_v9  ;;  %v22343_v36 = vrot.slane %v20662_v18, %v22270_v8  ;;  %v22351_v39 = vrot.slane %v20667_v34, %v22272_v9  ;;  %v22368_v45 = vrot.slane %v20667_v34, %v22270_v8  ;;  %v20707_v3 = vld [vmem:[%s26475_s0 + $0x20] sm:$0x3f]  ;;  %v20674_v5 = vld [vmem:[%s26470_s25 + $0x3e] sm:$0x3] }
  0x47   : > { %v22392_v52 = vrot.slane %v20668_v49, %v22272_v9  ;;  %v22410_v59 = vrot.slane %v20668_v49, %v22270_v8  ;;  %v22418_v61 = vrot.slane %v20673_v56, %v22272_v9  ;;  %v22439_v11 = vrot.slane %v20673_v56, %v22270_v8 }
  0x49   : > { %26478 = vst [vmem:[#allocation10_spill] sm:$0xff] %v22392_v52  ;;  %26479 = vst [vmem:[#allocation11_spill] sm:$0xff] %v22410_v59 }
  0x4a   : > { %26480 = vst [vmem:[#allocation12_spill] sm:$0xff] %v22418_v61  ;;  %26481 = vst [vmem:[#allocation13_spill] sm:$0xff] %v22439_v11 }
  0x98   : > { %v932_v12 = vpop.permute.xlu1 %931  ;;  %v954_v13 = vpop.permute.xlu0 %953 }
  0x9c   : > { %v934_v19 = vpop.permute.xlu1 %933  ;;  %v956_v20 = vpop.permute.xlu0 %955 }
  0x9d   : > { %v936_v21 = vsel %vm935_vm0, %v932_v12, %v934_v19  ;;  %v937_v22 = vsel %vm935_vm0, %v934_v19, %v932_v12  ;;  %v958_v23 = vsel %vm957_vm1, %v954_v13, %v956_v20  ;;  %v959_v24 = vsel %vm957_vm1, %v956_v20, %v954_v13  ;;  %v20711_v20 = vld [vmem:[%s26475_s0 + $0x28] sm:$0x3f] }
  0x9e   : > { %v22307_v25 = vmul.f32 %v22282_v14, %v936_v21  ;;  %v22310_v26 = vmul.f32 %v22286_v15, %v959_v24  ;;  %v22313_v27 = vmul.f32 %v22289_v16, %v958_v23  ;;  %v22319_v29 = vmul.f32 %v22292_v17, %v937_v22  ;;  %v20675_v22 = vld [vmem:[%s26470_s25 + $0x40] sm:$0x3] }
  0x9f   : > { %v22447_v13 = vrot.slane %v20674_v5, %v22272_v9 }
  0xa0   : > { %26471 = vst [vmem:[#allocation4_spill] sm:$0xff] %v22307_v25  ;;  %26472 = vst [vmem:[#allocation5_spill] sm:$0xff] %v22310_v26  ;;  %20693 = vmatprep.subr.msk.mxu1 %vm1642_vm2, %v22313_v27  ;;  %v978_v31 = vpop.permute.xlu1 %977  ;;  %v976_v32 = vpop.permute.xlu0 %975 }
  0xa1   : > { %26473 = vst [vmem:[#allocation6_spill] sm:$0xff] %v22313_v27  ;;  %26474 = vst [vmem:[#allocation7_spill] sm:$0xff] %v22319_v29  ;;  %20694 = vmatpush1.msk.msra.mxu1 %vm1642_vm2, %v22310_v26  ;;  %v980_v33 = vsel %vm979_vm3, %v976_v32, %v978_v31  ;;  %v981_v37 = vsel %vm979_vm3, %v978_v31, %v976_v32  ;;  %v22476_v32 = vrot.slane %v20675_v22, %v22272_v9 }
  0xa2   : > { %20695 = vmatmul.mubr.msk.f32.vlgmr.msra.gmra.mrb[0].mxu1 %vm1638_vm4, %v20692_v30  ;;  %20696 = vmatprep.subr.msk.mxu1 %vm1642_vm2, %v22307_v25  ;;  %v22337_v35 = vmul.f32 %v22316_v28, %v980_v33  ;;  %v22356_v42 = vmul.f32 %v22343_v36, %v981_v37  ;;  %26482 = vst [vmem:[#allocation14_spill] sm:$0xff] %v22447_v13  ;;  %v20715_v37 = vld [vmem:[%s26475_s0 + $0x30] sm:$0x3f] }
  0xa3   : > { %20697 = vmatpush1.msk.msra.mxu1 %vm1642_vm2, %v22319_v29  ;;  %1793 = vmatprep.mubr.f32.mxu1 %v26298_v0  ;;  %v22468_v30 = vrot.slane %v20674_v5, %v22270_v8  ;;  %26484 = vst [vmem:[#allocation16_spill] sm:$0xff] %v22476_v32 }
  0xa4   : > { %26476 = vst [vmem:[#allocation8_spill] sm:$0xff] %v22337_v35  ;;  %20700 = vmatprep.subr.msk.mxu1 %vm1642_vm2, %v22337_v35  ;;  %v1088_v38 = vpop.permute.xlu1 %1087  ;;  %v1086_v40 = vpop.permute.xlu0 %1085  ;;  %26477 = vst [vmem:[#allocation9_spill] sm:$0xff] %v22356_v42 }
  0xa5   : > { %v1090_v41 = vsel %vm1089_vm5, %v1086_v40, %v1088_v38  ;;  %v1091_v46 = vsel %vm1089_vm5, %v1088_v38, %v1086_v40  ;;  %26483 = vst [vmem:[#allocation15_spill] sm:$0xff] %v22468_v30  ;;  %v22493_v40 = vrot.slane %v20675_v22, %v22270_v8 }
  0xa6   : > { %v22362_v44 = vmul.f32 %v22351_v39, %v1090_v41  ;;  %v22376_v47 = vmul.f32 %v22368_v45, %v1091_v46  ;;  %v20719_v46 = vld [vmem:[%s26475_s0 + $0x38] sm:$0x3f] }
  0xa7   : > { %26485 = vst [vmem:[#allocation17_spill] sm:$0xff] %v22493_v40 }
  0xa8   : > { %v1110_v50 = vpop.permute.xlu1 %1109  ;;  %v1108_v51 = vpop.permute.xlu0 %1107 }
  0xa9   : > { %v1113_v53 = vsel %vm1111_vm6, %v1110_v50, %v1108_v51  ;;  %v1112_v60 = vsel %vm1111_vm6, %v1108_v51, %v1110_v50 }
  0xaa   : > { %20698 = vmatmul.mubr.msk.f32.vlgmr.msra.gmra.mrb[0].mxu1 %vm1638_vm4, %v1635_v43  ;;  %v22400_v55 = vmul.f32 %v22392_v52, %v1113_v53  ;;  %v22423_v63 = vmul.f32 %v22410_v59, %v1112_v60 }
  0xab   : > { %20701 = vmatpush1.msk.msra.mxu1 %vm1642_vm2, %v22356_v42  ;;  %1875 = vmatprep.mubr.f32.mxu1 %v26298_v0 }
  0xac   : > { %20704 = vmatprep.subr.msk.mxu1 %vm1642_vm2, %v22362_v44  ;;  %v1220_v57 = vpop.permute.xlu1 %1219  ;;  %v1218_v58 = vpop.permute.xlu0 %1217 }
  0xad   : > { %v1223_v62 = vsel %vm1221_vm7, %v1220_v57, %v1218_v58  ;;  %v1222_v12 = vsel %vm1221_vm7, %v1218_v58, %v1220_v57 }
  0xae   : > { %v22429_v4 = vmul.f32 %v22418_v61, %v1223_v62  ;;  %v22452_v19 = vmul.f32 %v22439_v11, %v1222_v12  ;;  %v5274_v62 = vld [vmem:[%s26489_s7] sm:$0x3f] }
  0xb0   : > { %v1242_v6 = vpop.permute.xlu1 %1241  ;;  %v1240_v10 = vpop.permute.xlu0 %1239 }
  0xb1   : > { %v1245_v18 = vsel %vm1243_vm8, %v1242_v6, %v1240_v10  ;;  %v1244_v31 = vsel %vm1243_vm8, %v1240_v10, %v1242_v6 }
  0xb2   : > { %20702 = vmatmul.mubr.msk.f32.vlgmr.msra.gmra.mrb[0].mxu1 %vm1638_vm4, %v20699_v48  ;;  %v22458_v21 = vmul.f32 %v22447_v13, %v1245_v18  ;;  %v22481_v34 = vmul.f32 %v22468_v30, %v1244_v31  ;;  %v20723_v48 = vld [vmem:[%s26475_s0 + $0x40] sm:$0x3f]  ;;  %s22090_s0 = smov 49  }
  0xb3   : > { %20705 = vmatpush1.msk.msra.mxu1 %vm1642_vm2, %v22376_v47  ;;  %1959 = vmatprep.mubr.f32.mxu1 %v26298_v0 }
  0xb4   : > { %20708 = vmatprep.subr.msk.mxu1 %vm1642_vm2, %v22235_v2  ;;  %v1264_v23 = vpop.permute.xlu1 %1263  ;;  %v1262_v24 = vpop.permute.xlu0 %1261 }
  0xb5   : > { %v1267_v33 = vsel %vm1265_vm9, %v1264_v23, %v1262_v24  ;;  %v1266_v41 = vsel %vm1265_vm9, %v1262_v24, %v1264_v23  ;;  %v20727_v23 = vld [vmem:[%s26490_s4 + $0x8] sm:$0x3f] }
  0xb6   : > { %v22487_v38 = vmul.f32 %v22476_v32, %v1267_v33  ;;  %v22501_v43 = vmul.f32 %v22493_v40, %v1266_v41 }
  0xba   : > { %20706 = vmatmul.mubr.msk.f32.vlgmr.msra.gmra.mrb[0].mxu1 %vm1638_vm4, %v20703_v54 }
  0xbb   : > { %20709 = vmatpush1.msk.msra.mxu1 %vm1642_vm2, %v22228_v1  ;;  %2043 = vmatprep.mubr.f32.mxu1 %v26298_v0 }
  0xbc   : > { %20712 = vmatprep.subr.msk.mxu1 %vm1642_vm2, %v22400_v55 }
  0xc2   : > { %20710 = vmatmul.mubr.msk.f32.vlgmr.msra.gmra.mrb[0].mxu1 %vm1638_vm4, %v20707_v3 }
  0xc3   : > { %20713 = vmatpush1.msk.msra.mxu1 %vm1642_vm2, %v22423_v63  ;;  %2127 = vmatprep.mubr.f32.mxu1 %v26298_v0 }
  0xc4   : > { %20716 = vmatprep.subr.msk.mxu1 %vm1642_vm2, %v22429_v4 }
  0xc5   : > { %v2392_v49 = vpop.permute.xlu0 %2391 }
  0xca   : > { %20714 = vmatmul.mubr.msk.f32.vlgmr.msra.gmra.mrb[0].mxu1 %vm1638_vm4, %v20711_v20 }
  0xcb   : > { %20717 = vmatpush1.msk.msra.mxu1 %vm1642_vm2, %v22452_v19  ;;  %2211 = vmatprep.mubr.f32.mxu1 %v26298_v0 }
  0xcc   : > { %20720 = vmatprep.subr.msk.mxu1 %vm1642_vm2, %v22458_v21 }
  0xd2   : > { %20718 = vmatmul.mubr.msk.f32.vlgmr.msra.gmra.mrb[0].mxu1 %vm1638_vm4, %v20715_v37 }
  0xd3   : > { %20721 = vmatpush1.msk.msra.mxu1 %vm1642_vm2, %v22481_v34  ;;  %2295 = vmatprep.mubr.f32.mxu1 %v26298_v0 }
  0xd4   : > { %20724 = vmatprep.subr.msk.mxu1 %vm1642_vm2, %v22487_v38 }
  0xda   : > { %20722 = vmatmul.mubr.msk.f32.vlgmr.msra.gmra.mrb[0].mxu1 %vm1638_vm4, %v20719_v46 }
  0xdb   : > { %20725 = vmatpush1.msk.msra.mxu1 %vm1642_vm2, %v22501_v43  ;;  %2379 = vmatprep.mubr.f32.mxu1 %v26298_v0 }
  0xe2   : > { %20726 = vmatmul.mubr.msk.f32.vlgmr.msra.gmra.mrb[0].mxu1 %vm1638_vm4, %v20723_v48 }
  0xe3   : > { %2542 = vmatprep.mubr.f32.mxu1 %v26298_v0 }
 0x1b5   : > { %v2381_v50 = vpop.f32.mrb[0].mxu1 }
 0x1b6   : > { %v2394_v51 = vadd.f32 %v2392_v49, %v2381_v50  ;;  %v2383_v53 = vpop.f32.mrb[1].mxu1 }
 0x1b7   : > { %v2395_v54 = vadd.f32 %v2392_v49, %v2383_v53 }
 0x1b8   : > { %vm2396_vm10 = vcmp.ge.f32.partialorder %v2394_v51, 0.0  ;;  %v2398_v56 = vmul.f32 0.2, %v2394_v51 }
 0x1b9   : > { %v2399_v58 = vmul.f32 0.2, %v2395_v54  ;;  %vm2397_vm11 = vcmp.ge.f32.partialorder %v2395_v54, 0.0 }
 0x1ba   : > { %v22515_v57 = vsel %vm2396_vm10, %v2394_v51, %v2398_v56  ;;  %vm26337_vm10 = vcmp.lt.s32.totalorder %v22268_v7, 30 }
 0x1bb   : > { %2402 = vrot.lane.b32.xlu0 %v22515_v57, %s26266_s20  ;;  %2410 = vrot.lane.b32.xlu1 %v22515_v57, %s26290_s21  ;;  %v22521_v60 = vsel %vm2397_vm11, %v2395_v54, %v2399_v58  ;;  %v2466_v54 = vld [vmem:[%s26490_s4] sm:$0x3f]  ;;  %vm26336_vm11 = vcmp.lt.s32.totalorder %v22268_v7, 18 }
 0x1bf   : > { %2418 = vrot.lane.b32.xlu0 %v22515_v57, %s26264_s22  ;;  %2412 = vrot.lane.b32.xlu1 %v22521_v60, %s26290_s21  ;;  %s26543_s21 = smov 16  }
 0x1c3   : > { %2426 = vrot.lane.b32.xlu0 %v22515_v57, %s26262_s2  ;;  %2404 = vrot.lane.b32.xlu1 %v22521_v60, %s26266_s20  ;;  %s26278_s20 = smov 18  }
 0x1c7   : > { %2434 = vrot.lane.b32.xlu0 %v22515_v57, %s26260_s23  ;;  %2420 = vrot.lane.b32.xlu1 %v22521_v60, %s26264_s22  ;;  %s26276_s22 = smov 30  }
 0x1cb   : > { %2442 = vrot.lane.b32.xlu0 %v22515_v57, %s26486_s29  ;;  %2428 = vrot.lane.b32.xlu1 %v22521_v60, %s26262_s2  ;;  %s26274_s2 = smov 31  }
 0x1cf   : > { %2450 = vrot.lane.b32.xlu0 %v22515_v57, %s26487_s24  ;;  %2436 = vrot.lane.b32.xlu1 %v22521_v60, %s26260_s23  ;;  %s26272_s23 = smov 32  }
 0x1d3   : > { %2458 = vrot.lane.b32.xlu0 %v22515_v57, %s26488_s26  ;;  %2444 = vrot.lane.b32.xlu1 %v22521_v60, %s26486_s29 }
 0x1d7   : > { %777 = vrot.lane.b32.xlu0 %v22228_v1, %s26268_s30  ;;  %2452 = vrot.lane.b32.xlu1 %v22521_v60, %s26487_s24 }
 0x1db   : > { %755 = vrot.lane.b32.xlu0 %v22228_v1, %s26270_s19  ;;  %2460 = vrot.lane.b32.xlu1 %v22521_v60, %s26488_s26 }
 0x1df   : > { %799 = vrot.lane.b32.xlu0 %v22228_v1, %s26272_s23  ;;  %779 = vrot.lane.b32.xlu1 %v22235_v2, %s26268_s30  ;;  %s26280_s30 = smov 14  }
 0x1e3   : > { %821 = vrot.lane.b32.xlu0 %v22228_v1, %s26274_s2  ;;  %757 = vrot.lane.b32.xlu1 %v22235_v2, %s26270_s19  ;;  %s26282_s19 = smov 2  }
 0x1e7   : > { %843 = vrot.lane.b32.xlu0 %v22228_v1, %s26276_s22  ;;  %801 = vrot.lane.b32.xlu1 %v22235_v2, %s26272_s23  ;;  %s26284_s23 = smov 126  }
 0x1eb   : > { %909 = vrot.lane.b32.xlu0 %v22228_v1, %s26278_s20  ;;  %823 = vrot.lane.b32.xlu1 %v22235_v2, %s26274_s2  ;;  %s26286_s2 = smov 114  }
 0x1ef   : > { %997 = vrot.lane.b32.xlu0 %v22228_v1, %s26280_s30  ;;  %845 = vrot.lane.b32.xlu1 %v22235_v2, %s26276_s22  ;;  %s26288_s22 = smov 110  }
 0x1f3   : > { %1063 = vrot.lane.b32.xlu0 %v22228_v1, %s26282_s19  ;;  %911 = vrot.lane.b32.xlu1 %v22235_v2, %s26278_s20  ;;  %s26416_s20 = smov 98  }
 0x1f7   : > { %1129 = vrot.lane.b32.xlu0 %v22228_v1, %s26284_s23  ;;  %999 = vrot.lane.b32.xlu1 %v22235_v2, %s26280_s30  ;;  %s26358_s30 = smov 97  }
 0x1fb   : > { %1195 = vrot.lane.b32.xlu0 %v22228_v1, %s26286_s2  ;;  %1065 = vrot.lane.b32.xlu1 %v22235_v2, %s26282_s19  ;;  %s26356_s19 = smov 96  }
 0x1ff   : > { %1283 = vrot.lane.b32.xlu0 %v22228_v1, %s26288_s22  ;;  %1131 = vrot.lane.b32.xlu1 %v22235_v2, %s26284_s23  ;;  %s26294_s23 = smov 95  }
 0x203   : > { %1349 = vrot.lane.b32.xlu0 %v22228_v1, %s26416_s20  ;;  %1197 = vrot.lane.b32.xlu1 %v22235_v2, %s26286_s2  ;;  %s26292_s2 = smov 94  }
 0x207   : > { %1371 = vrot.lane.b32.xlu0 %v22228_v1, %s26358_s30  ;;  %1285 = vrot.lane.b32.xlu1 %v22235_v2, %s26288_s22  ;;  %s26544_s22 = smov 17  }
 0x20b   : > { %1393 = vrot.lane.b32.xlu0 %v22228_v1, %s26356_s19  ;;  %1351 = vrot.lane.b32.xlu1 %v22235_v2, %s26416_s20  ;;  %s22089_s20 = smov 51  }
 0x20f   : > { %1415 = vrot.lane.b32.xlu0 %v22228_v1, %s26294_s23  ;;  %1373 = vrot.lane.b32.xlu1 %v22235_v2, %s26358_s30  ;;  %s26545_s30 = smov 15  }
 0x213   : > { %1437 = vrot.lane.b32.xlu0 %v22228_v1, %s26292_s2  ;;  %1395 = vrot.lane.b32.xlu1 %v22235_v2, %s26356_s19  ;;  %s26546_s19 = smov 1  }
 0x217   : > { %5277 = vperm.xlu0 %22044, %v5274_v62   ;;  %1417 = vrot.lane.b32.xlu1 %v22235_v2, %s26294_s23  ;;  %s22088_s23 = smov 50  }
 0x21b   : > { %1439 = vrot.lane.b32.xlu1 %v22235_v2, %s26292_s2  ;;  %s26547_s2 = smov 127  }
 0x22d   : > { %v2403_v3 = vpop.permute.xlu0 %2402  ;;  %v2411_v5 = vpop.permute.xlu1 %2410 }
 0x231   : > { %v2419_v6 = vpop.permute.xlu0 %2418  ;;  %v2413_v10 = vpop.permute.xlu1 %2412 }
 0x232   : > { %v2414_v12 = vsel %vm957_vm1, %v2411_v5, %v2413_v10  ;;  %v2415_v18 = vsel %vm957_vm1, %v2413_v10, %v2411_v5  ;;  %v20734_v10 = vld [vmem:[%s26490_s4 + $0x10] sm:$0x3f] }
 0x233   : > { %v2416_v20 = vmul.f32 %v2415_v18, %v22286_v15  ;;  %v2417_v22 = vmul.f32 %v2414_v12, %v22289_v16 }
 0x235   : > { %v2427_v24 = vpop.permute.xlu0 %2426  ;;  %20728 = vmatprep.subr.msk.mxu1 %vm1642_vm2, %v2417_v22  ;;  %v2405_v31 = vpop.permute.xlu1 %2404 }
 0x236   : > { %v2406_v33 = vsel %vm935_vm0, %v2403_v3, %v2405_v31  ;;  %v2407_v37 = vsel %vm935_vm0, %v2405_v31, %v2403_v3  ;;  %20729 = vmatpush1.msk.msra.mxu1 %vm1642_vm2, %v2416_v20 }
 0x237   : > { %v2408_v41 = vmul.f32 %v2407_v37, %v22292_v17  ;;  %v2409_v46 = vmul.f32 %v2406_v33, %v22282_v14  ;;  %20730 = vmatmul.mubr.msk.f32.vlgmr.msra.gmra.mrb[2].mxu1 %vm1638_vm4, %v20727_v23  ;;  %v20738_v23 = vld [vmem:[%s26490_s4 + $0x18] sm:$0x3f] }
 0x238   : > { %2622 = vmatprep.mubr.f32.mxu1 %v26298_v0 }
 0x239   : > { %20731 = vmatprep.subr.msk.mxu1 %vm1642_vm2, %v2409_v46  ;;  %v2421_v48 = vpop.permute.xlu1 %2420  ;;  %v2435_v50 = vpop.permute.xlu0 %2434  ;;  %v20742_v46 = vld [vmem:[%s26490_s4 + $0x20] sm:$0x3f] }
 0x23a   : > { %v2422_v49 = vsel %vm979_vm3, %v2419_v6, %v2421_v48  ;;  %20732 = vmatpush1.msk.msra.mxu1 %vm1642_vm2, %v2408_v41  ;;  %v2423_v51 = vsel %vm979_vm3, %v2421_v48, %v2419_v6 }
 0x23b   : > { %v2425_v53 = vmul.f32 %v2422_v49, %v22316_v28  ;;  %v2424_v58 = vmul.f32 %v2423_v51, %v22343_v36 }
 0x23d   : > { %20735 = vmatprep.subr.msk.mxu1 %vm1642_vm2, %v2425_v53  ;;  %v2429_v56 = vpop.permute.xlu1 %2428  ;;  %v2443_v5 = vpop.permute.xlu0 %2442 }
 0x23e   : > { %v2430_v62 = vsel %vm1089_vm5, %v2427_v24, %v2429_v56  ;;  %v2431_v6 = vsel %vm1089_vm5, %v2429_v56, %v2427_v24 }
 0x23f   : > { %v2433_v3 = vmul.f32 %v2430_v62, %v22351_v39  ;;  %20733 = vmatmul.mubr.msk.f32.vlgmr.msra.gmra.mrb[2].mxu1 %vm1638_vm4, %v2466_v54  ;;  %v2432_v12 = vmul.f32 %v2431_v6, %v22368_v45  ;;  %v20746_v54 = vld [vmem:[%s26490_s4 + $0x28] sm:$0x3f] }
 0x240   : > { %20736 = vmatpush1.msk.msra.mxu1 %vm1642_vm2, %v2424_v58  ;;  %2704 = vmatprep.mubr.f32.mxu1 %v26298_v0 }
 0x241   : > { %20739 = vmatprep.subr.msk.mxu1 %vm1642_vm2, %v2433_v3  ;;  %v2451_v18 = vpop.permute.xlu0 %2450  ;;  %v2437_v20 = vpop.permute.xlu1 %2436 }
 0x242   : > { %v2439_v22 = vsel %vm1111_vm6, %v2437_v20, %v2435_v50  ;;  %v2438_v37 = vsel %vm1111_vm6, %v2435_v50, %v2437_v20 }
 0x243   : > { %v2441_v31 = vmul.f32 %v2439_v22, %v22392_v52  ;;  %v2440_v48 = vmul.f32 %v2438_v37, %v22410_v59 }
 0x245   : > { %v2459_v24 = vpop.permute.xlu0 %2458  ;;  %v2445_v33 = vpop.permute.xlu1 %2444 }
 0x246   : > { %v2447_v41 = vsel %vm1221_vm7, %v2445_v33, %v2443_v5  ;;  %v2446_v50 = vsel %vm1221_vm7, %v2443_v5, %v2445_v33 }
 0x247   : > { %20737 = vmatmul.mubr.msk.f32.vlgmr.msra.gmra.mrb[2].mxu1 %vm1638_vm4, %v20734_v10  ;;  %v2448_v58 = vmul.f32 %v2446_v50, %v22439_v11 }
 0x248   : > { %20740 = vmatpush1.msk.msra.mxu1 %vm1642_vm2, %v2432_v12  ;;  %2788 = vmatprep.mubr.f32.mxu1 %v26298_v0  ;;  %v20750_v12 = vld [vmem:[%s26490_s4 + $0x30] sm:$0x3f] }
 0x249   : > { %20743 = vmatprep.subr.msk.mxu1 %vm1642_vm2, %v22521_v60  ;;  %v778_v60 = vpop.permute.xlu0 %777  ;;  %v2453_v51 = vpop.permute.xlu1 %2452 }
 0x24a   : > { %v2455_v53 = vsel %vm1243_vm8, %v2453_v51, %v2451_v18  ;;  %v2454_v5 = vsel %vm1243_vm8, %v2451_v18, %v2453_v51 }
 0x24b   : > { %v2457_v62 = vmul.f32 %v2455_v53, %v22447_v13  ;;  %v2456_v22 = vmul.f32 %v2454_v5, %v22468_v30  ;;  %v20652_v53 = vld [vmem:[%s26470_s25 + $0x10] sm:$0x3] }
 0x24d   : > { %v756_v49 = vpop.permute.xlu0 %755  ;;  %v2461_v3 = vpop.permute.xlu1 %2460 }
 0x24e   : > { %v2463_v10 = vsel %vm1265_vm9, %v2461_v3, %v2459_v24 }
 0x24f   : > { %20741 = vmatmul.mubr.msk.f32.vlgmr.msra.gmra.mrb[2].mxu1 %vm1638_vm4, %v20738_v23  ;;  %v20653_v23 = vld [vmem:[%s26470_s25 + $0x12] sm:$0x3] }
 0x250   : > { %20744 = vmatpush1.msk.msra.mxu1 %vm1642_vm2, %v22515_v57  ;;  %2872 = vmatprep.mubr.f32.mxu1 %v26298_v0  ;;  %v2449_v57 = vmul.f32 %v2447_v41, %v22418_v61  ;;  %v22728_v33 = vrot.slane %v20653_v23, %v22272_v9 }
 0x251   : > { %20747 = vmatprep.subr.msk.mxu1 %vm1642_vm2, %v2441_v31  ;;  %v22698_v56 = vpop.permute.xlu0 %799  ;;  %v780_v20 = vpop.permute.xlu1 %779  ;;  %v2465_v31 = vmul.f32 %v2463_v10, %v22476_v32  ;;  %v20654_v10 = vld [vmem:[%s26470_s25 + $0x14] sm:$0x3] }
 0x252   : > { %26491 = vst [vmem:[#allocation18_spill] sm:$0xff] %v22728_v33  ;;  %v782_v41 = vsel %vm781_vm12, %v778_v60, %v780_v20 }
 0x255   : > { %v22708_v6 = vpop.permute.xlu0 %821  ;;  %v758_v37 = vpop.permute.xlu1 %757 }
 0x256   : > { %v760_v5 = vsel %vm759_vm13, %v756_v49, %v758_v37 }
 0x257   : > { %20745 = vmatmul.mubr.msk.f32.vlgmr.msra.gmra.mrb[2].mxu1 %vm1638_vm4, %v20742_v46  ;;  %v2462_v46 = vsel %vm1265_vm9, %v2459_v24, %v2461_v3  ;;  %v22750_v24 = vrot.slane %v20653_v23, %v22270_v8  ;;  %v761_v23 = vsel %vm759_vm13, %v758_v37, %v756_v49  ;;  %v20762_v49 = vld [vmem:[%s26499_s6 + $0x8] sm:$0x3f] }
 0x258   : > { %20748 = vmatpush1.msk.msra.mxu1 %vm1642_vm2, %v2440_v48  ;;  %2956 = vmatprep.mubr.f32.mxu1 %v26298_v0  ;;  %v20754_v48 = vld [vmem:[%s26490_s4 + $0x38] sm:$0x3f]  ;;  %v2464_v50 = vmul.f32 %v2462_v46, %v22493_v40 }
 0x259   : > { %20751 = vmatprep.subr.msk.mxu1 %vm1642_vm2, %v2449_v57  ;;  %v22724_v18 = vpop.permute.xlu0 %843  ;;  %v22738_v57 = vmul.f32 %v22728_v33, %v782_v41  ;;  %v802_v51 = vpop.permute.xlu1 %801  ;;  %26493 = vst [vmem:[#allocation20_spill] sm:$0xff] %v22750_v24  ;;  %v22783_v41 = vrot.slane %v20654_v10, %v22272_v9 }
 0x25b   : > { %26492 = vst [vmem:[#allocation19_spill] sm:$0xff] %v22738_v57  ;;  %26497 = vst [vmem:[#allocation24_spill] sm:$0xff] %v22783_v41 }
 0x25d   : > { %v824_v3 = vpop.permute.xlu1 %823 }
 0x25f   : > { %20749 = vmatmul.mubr.msk.f32.vlgmr.msra.gmra.mrb[2].mxu1 %vm1638_vm4, %v20746_v54  ;;  %v22744_v54 = vpop.permute.xlu0 %909 }
 0x260   : > { %20752 = vmatpush1.msk.msra.mxu1 %vm1642_vm2, %v2448_v58  ;;  %3040 = vmatprep.mubr.f32.mxu1 %v26298_v0  ;;  %v783_v58 = vsel %vm781_vm12, %v780_v20, %v778_v60  ;;  %v20758_v60 = vld [vmem:[%s26490_s4 + $0x40] sm:$0x3f]  ;;  %v22773_v20 = vrot.slane %v20652_v53, %v22270_v8  ;;  %s22092_s4 = smov 47  }
 0x261   : > { %20755 = vmatprep.subr.msk.mxu1 %vm1642_vm2, %v2457_v62  ;;  %v22758_v62 = vrot.slane %v20652_v53, %v22272_v9  ;;  %v846_v46 = vpop.permute.xlu1 %845  ;;  %v20655_v53 = vld [vmem:[%s26470_s25 + $0x16] sm:$0x3] }
 0x262   : > { %26496 = vst [vmem:[#allocation23_spill] sm:$0xff] %v22773_v20 }
 0x263   : > { %26494 = vst [vmem:[#allocation21_spill] sm:$0xff] %v22758_v62 }
 0x267   : > { %20753 = vmatmul.mubr.msk.f32.vlgmr.msra.gmra.mrb[2].mxu1 %vm1638_vm4, %v20750_v12  ;;  %v22767_v12 = vmul.f32 %v22750_v24, %v783_v58 }
 0x268   : > { %20756 = vmatpush1.msk.msra.mxu1 %vm1642_vm2, %v2456_v22  ;;  %3124 = vmatprep.mubr.f32.mxu1 %v26298_v0  ;;  %v22775_v22 = vpop.permute.xlu0 %997 }
 0x269   : > { %20759 = vmatprep.subr.msk.mxu1 %vm1642_vm2, %v2465_v31  ;;  %26495 = vst [vmem:[#allocation22_spill] sm:$0xff] %v22767_v12  ;;  %v22780_v31 = vmul.f32 %v22758_v62, %v760_v5  ;;  %v912_v5 = vpop.permute.xlu1 %911  ;;  %v848_v62 = vsel %vm26337_vm10, %v22724_v18, %v846_v46 }
 0x26c   : > { %v22806_v58 = vpop.permute.xlu0 %1063 }
 0x26f   : > { %20757 = vmatmul.mubr.msk.f32.vlgmr.msra.gmra.mrb[2].mxu1 %vm1638_vm4, %v20754_v48  ;;  %v804_v48 = vsel %vm803_vm14, %v22698_v56, %v802_v51 }
 0x270   : > { %20760 = vmatpush1.msk.msra.mxu1 %vm1642_vm2, %v2464_v50  ;;  %3208 = vmatprep.mubr.f32.mxu1 %v26298_v0  ;;  %v22790_v50 = vmul.f32 %v22773_v20, %v761_v23  ;;  %v22801_v37 = vmul.f32 %v22783_v41, %v804_v48  ;;  %v805_v23 = vsel %vm803_vm14, %v802_v51, %v22698_v56  ;;  %v22827_v41 = vpop.permute.xlu1 %999  ;;  %v22835_v56 = vpop.permute.xlu0 %1129  ;;  %v20656_v20 = vld [vmem:[%s26470_s25 + $0x18] sm:$0x3] }
 0x271   : > { %20763 = vmatprep.subr.msk.mxu1 %vm1642_vm2, %v22738_v57  ;;  %v22822_v48 = vrot.slane %v20655_v53, %v22272_v9 }
 0x272   : > { %26498 = vst [vmem:[#allocation25_spill] sm:$0xff] %v22790_v50  ;;  %26500 = vst [vmem:[#allocation26_spill] sm:$0xff] %v22801_v37 }
 0x273   : > { %26502 = vst [vmem:[#allocation28_spill] sm:$0xff] %v22822_v48 }
 0x277   : > { %20761 = vmatmul.mubr.msk.f32.vlgmr.msra.gmra.mrb[2].mxu1 %vm1638_vm4, %v20758_v60  ;;  %v22813_v60 = vrot.slane %v20654_v10, %v22270_v8 }
 0x278   : > { %20764 = vmatpush1.msk.msra.mxu1 %vm1642_vm2, %v22767_v12  ;;  %3309 = vmatprep.mubr.f32.mxu1 %v26298_v0 }
 0x279   : > { %20766 = vmatprep.subr.msk.mxu1 %vm1642_vm2, %v22780_v31  ;;  %26501 = vst [vmem:[#allocation27_spill] sm:$0xff] %v22813_v60  ;;  %v22830_v10 = vmul.f32 %v22813_v60, %v805_v23  ;;  %v22848_v23 = vrot.slane %v20655_v53, %v22270_v8  ;;  %v26506_v60 = vmov 0.0   ;;  %v22864_v53 = vpop.permute.xlu0 %1195 }
 0x27b   : > { %20765 = vmatmul.mubr.msk.f32.vlgmr.msra.gmra.mrb[4].mxu1 %vm1638_vm4, %v20762_v49  ;;  %v826_v49 = vsel %vm26421_vm15, %v22708_v6, %v824_v3  ;;  %26503 = vst [vmem:[#allocation29_spill] sm:$0xff] %v22830_v10  ;;  %26505 = vst [vmem:[#allocation31_spill] sm:$0xff] %v22848_v23 }
 0x27c   : > { %20767 = vmatpush1.msk.msra.mxu1 %vm1642_vm2, %v22790_v50  ;;  %3389 = vmatprep.mubr.f32.mxu1 %v26298_v0  ;;  %v3233_v0 = vld [vmem:[%s26499_s6] sm:$0x3f]  ;;  %v22838_v51 = vmul.f32 %v22822_v48, %v826_v49  ;;  %v827_v49 = vsel %vm26421_vm15, %v824_v3, %v22708_v6  ;;  %v22857_v48 = vrot.slane %v20656_v20, %v22272_v9  ;;  %v20769_v6 = vld [vmem:[%s26499_s6 + $0x10] sm:$0x3f]  ;;  %vm627_vm15 = vcmp.lt.s32.totalorder %v22268_v7, 49 }
 0x27d   : > { %20770 = vmatprep.subr.msk.mxu1 %vm1642_vm2, %v22801_v37  ;;  %v22867_v24 = vmul.f32 %v22848_v23, %v827_v49  ;;  %v22885_v49 = vrot.slane %v20656_v20, %v22270_v8  ;;  %v914_v23 = vsel %vm26336_vm11, %v22744_v54, %v912_v5 }
 0x27e   : > { %26504 = vst [vmem:[#allocation30_spill] sm:$0xff] %v22838_v51  ;;  %26507 = vst [vmem:[#allocation32_spill] sm:$0xff] %v22857_v48  ;;  %v22873_v3 = vmul.f32 %v22857_v48, %v848_v62  ;;  %v22888_v62 = vpop.permute.xlu0 %1283  ;;  %v849_v48 = vsel %vm26337_vm10, %v846_v46, %v22724_v18  ;;  %vm26360_vm10 = vcmp.lt.s32.totalorder %v22268_v7, 94 }
 0x27f   : > { %26508 = vst [vmem:[#allocation33_spill] sm:$0xff] %v22867_v24  ;;  %26510 = vst [vmem:[#allocation35_spill] sm:$0xff] %v22885_v49 }
 0x280   : > { %26509 = vst [vmem:[#allocation34_spill] sm:$0xff] %v22873_v3 }
 0x282   : > { %v22912_v46 = vpop.permute.xlu0 %1349 }
 0x283   : > { %20768 = vmatmul.mubr.msk.f32.vlgmr.msra.gmra.mrb[4].mxu1 %vm1638_vm4, %v3233_v0  ;;  %v22859_v0 = vpop.permute.xlu1 %1065 }
 0x284   : > { %20771 = vmatpush1.msk.msra.mxu1 %vm1642_vm2, %v22830_v10  ;;  %3471 = vmatprep.mubr.f32.mxu1 %v26506_v60  ;;  %v20773_v10 = vld [vmem:[%s26499_s6 + $0x18] sm:$0x3f] }
 0x285   : > { %20774 = vmatprep.subr.msk.mxu1 %vm1642_vm2, %v22838_v51  ;;  %v20659_v51 = vld [vmem:[%s26470_s25 + $0x1e] sm:$0x3] }
 0x286   : > { %v22920_v37 = vrot.slane %v20659_v51, %v22270_v8 }
 0x287   : > { %v22875_v33 = vpop.permute.xlu1 %1131 }
 0x288   : > { %26514 = vst [vmem:[#allocation39_spill] sm:$0xff] %v22920_v37 }
 0x28b   : > { %20772 = vmatmul.mubr.msk.f32.vlgmr.msra.gmra.mrb[4].mxu1 %vm1638_vm4, %v20769_v6  ;;  %v22896_v6 = vrot.slane %v20659_v51, %v22272_v9  ;;  %v22901_v20 = vpop.permute.xlu1 %1197  ;;  %v22936_v51 = vpop.permute.xlu0 %1371 }
 0x28c   : > { %20775 = vmatpush1.msk.msra.mxu1 %vm1642_vm2, %v22867_v24  ;;  %3555 = vmatprep.mubr.f32.mxu1 %v26506_v60  ;;  %v22904_v24 = vmul.f32 %v22885_v49, %v849_v48  ;;  %v915_v48 = vsel %vm26336_vm11, %v912_v5, %v22744_v54  ;;  %vm26364_vm11 = vcmp.lt.s32.totalorder %v22268_v7, 14 }
 0x28d   : > { %20778 = vmatprep.subr.msk.mxu1 %vm1642_vm2, %v22873_v3  ;;  %26511 = vst [vmem:[#allocation36_spill] sm:$0xff] %v22896_v6  ;;  %v22910_v18 = vmul.f32 %v22896_v6, %v914_v23  ;;  %v20777_v6 = vld [vmem:[%s26499_s6 + $0x20] sm:$0x3f] }
 0x28e   : > { %26512 = vst [vmem:[#allocation37_spill] sm:$0xff] %v22904_v24 }
 0x28f   : > { %26513 = vst [vmem:[#allocation38_spill] sm:$0xff] %v22910_v18  ;;  %v22915_v3 = vpop.permute.xlu1 %1285  ;;  %v22946_v54 = vpop.permute.xlu0 %1393 }
 0x293   : > { %20776 = vmatmul.mubr.msk.f32.vlgmr.msra.gmra.mrb[4].mxu1 %vm1638_vm4, %v20773_v10  ;;  %v22928_v23 = vpop.permute.xlu1 %1351  ;;  %v22931_v10 = vmul.f32 %v22920_v37, %v915_v48  ;;  %v20781_v48 = vld [vmem:[%s26499_s6 + $0x28] sm:$0x3f] }
 0x294   : > { %20779 = vmatpush1.msk.msra.mxu1 %vm1642_vm2, %v22904_v24  ;;  %3639 = vmatprep.mubr.f32.mxu1 %v26506_v60 }
 0x295   : > { %20782 = vmatprep.subr.msk.mxu1 %vm1642_vm2, %v22910_v18  ;;  %26515 = vst [vmem:[#allocation40_spill] sm:$0xff] %v22931_v10 }
 0x297   : > { %v22939_v49 = vpop.permute.xlu1 %1373 }
 0x29b   : > { %20780 = vmatmul.mubr.msk.f32.vlgmr.msra.gmra.mrb[4].mxu1 %vm1638_vm4, %v20777_v6  ;;  %v22948_v5 = vpop.permute.xlu1 %1395  ;;  %v22957_v6 = vpop.permute.xlu0 %1415 }
 0x29c   : > { %20783 = vmatpush1.msk.msra.mxu1 %vm1642_vm2, %v22931_v10  ;;  %3723 = vmatprep.mubr.f32.mxu1 %v26506_v60 }
 0x29d   : > { %20786 = vmatprep.subr.msk.mxu1 %vm1642_vm2, %v22307_v25  ;;  %v20785_v25 = vld [vmem:[%s26499_s6 + $0x30] sm:$0x3f] }
 0x29f   : > { %v22961_v37 = vpop.permute.xlu1 %1417  ;;  %v1438_v10 = vpop.permute.xlu0 %1437 }
 0x2a3   : > { %20784 = vmatmul.mubr.msk.f32.vlgmr.msra.gmra.mrb[4].mxu1 %vm1638_vm4, %v20781_v48  ;;  %v20663_v48 = vld [vmem:[%s26470_s25 + $0x26] sm:$0x3] }
 0x2a4   : > { %20787 = vmatpush1.msk.msra.mxu1 %vm1642_vm2, %v22319_v29  ;;  %3801 = vmatprep.mubr.f32.mxu1 %v26506_v60  ;;  %v1440_v29 = vpop.permute.xlu1 %1439  ;;  %v22985_v24 = vrot.slane %v20663_v48, %v22272_v9 }
 0x2a5   : > { %20790 = vmatprep.subr.msk.mxu1 %vm1642_vm2, %v22313_v27  ;;  %v1442_v27 = vsel %vm26360_vm10, %v1438_v10, %v1440_v29  ;;  %v1443_v18 = vsel %vm26360_vm10, %v1440_v29, %v1438_v10  ;;  %v1002_v29 = vsel %vm26364_vm11, %v22775_v22, %v22827_v41  ;;  %vm26363_vm10 = vcmp.lt.s32.totalorder %v22268_v7, 2 }
 0x2a6   : > { %26516 = vst [vmem:[#allocation41_spill] sm:$0xff] %v22985_v24  ;;  %v23010_v50 = vmul.f32 %v22985_v24, %v1002_v29  ;;  %v1003_v29 = vsel %vm26364_vm11, %v22827_v41, %v22775_v22  ;;  %v20793_v22 = vld [vmem:[%s26499_s6 + $0x40] sm:$0x3f]  ;;  %vm26369_vm11 = vcmp.lt.s32.totalorder %v22268_v7, 114 }
 0x2a8   : > { %26521 = vst [vmem:[#allocation46_spill] sm:$0xff] %v23010_v50 }
 0x2ab   : > { %20788 = vmatmul.mubr.msk.f32.vlgmr.msra.gmra.mrb[4].mxu1 %vm1638_vm4, %v20785_v25  ;;  %v20683_v25 = vld [vmem:[%s26470_s25 + $0x50] sm:$0x3] }
 0x2ac   : > { %20791 = vmatpush1.msk.msra.mxu1 %vm1642_vm2, %v22310_v26  ;;  %3879 = vmatprep.mubr.f32.mxu1 %v26506_v60  ;;  %v22988_v26 = vrot.slane %v20683_v25, %v22272_v9  ;;  %v22991_v12 = vrot.slane %v20683_v25, %v22270_v8  ;;  %v20857_v25 = vld [vmem:[%s26499_s6 + $0xc0] sm:$0x3f] }
 0x2ad   : > { %20794 = vmatprep.subr.msk.mxu1 %vm1642_vm2, %v22337_v35  ;;  %v20789_v35 = vld [vmem:[%s26499_s6 + $0x38] sm:$0x3f] }
 0x2ae   : > { %26517 = vst [vmem:[#allocation42_spill] sm:$0xff] %v22988_v26  ;;  %26518 = vst [vmem:[#allocation43_spill] sm:$0xff] %v22991_v12  ;;  %v22998_v10 = vmul.f32 %v22988_v26, %v1443_v18  ;;  %v23001_v57 = vmul.f32 %v22991_v12, %v1442_v27  ;;  %v20666_v18 = vld [vmem:[%s26470_s25 + $0x2c] sm:$0x3]  ;;  %v23025_v27 = vrot.slane %v20663_v48, %v22270_v8 }
 0x2af   : > { %v1068_v48 = vsel %vm26363_vm10, %v22806_v58, %v22859_v0  ;;  %v23055_v12 = vrot.slane %v20666_v18, %v22270_v8  ;;  %v1201_v26 = vsel %vm26369_vm11, %v22901_v20, %v22864_v53 }
 0x2b0   : > { %26519 = vst [vmem:[#allocation44_spill] sm:$0xff] %v22998_v10  ;;  %26520 = vst [vmem:[#allocation45_spill] sm:$0xff] %v23001_v57  ;;  %20858 = vmatprep.subr.msk.mxu0 %vm1642_vm2, %v22998_v10 }
 0x2b1   : > { %20859 = vmatpush1.msk.msra.mxu0 %vm1642_vm2, %v23001_v57  ;;  %26522 = vst [vmem:[#allocation47_spill] sm:$0xff] %v23025_v27  ;;  %26525 = vst [vmem:[#allocation50_spill] sm:$0xff] %v23055_v12 }
 0x2b2   : > { %20860 = vmatmul.mubr.msk.f32.vlgmr.msra.gmra.mrb[0].mxu0 %vm1638_vm4, %v20857_v25  ;;  %v23043_v25 = vmul.f32 %v23025_v27, %v1003_v29  ;;  %v1069_v29 = vsel %vm26363_vm10, %v22859_v0, %v22806_v58  ;;  %v20801_v58 = vld [vmem:[%s26499_s6 + $0x50] sm:$0x3f]  ;;  %v20805_v0 = vld [vmem:[%s26499_s6 + $0x58] sm:$0x3f]  ;;  %vm26372_vm10 = vcmp.lt.s32.totalorder %v22268_v7, 126 }
 0x2b3   : > { %20792 = vmatmul.mubr.msk.f32.vlgmr.msra.gmra.mrb[4].mxu1 %vm1638_vm4, %v20789_v35  ;;  %v23035_v35 = vrot.slane %v20666_v18, %v22272_v9  ;;  %10234 = vmatprep.mubr.f32.mxu0 %v26506_v60  ;;  %v20669_v18 = vld [vmem:[%s26470_s25 + $0x34] sm:$0x3] }
 0x2b4   : > { %20795 = vmatpush1.msk.msra.mxu1 %vm1642_vm2, %v22356_v42  ;;  %3957 = vmatprep.mubr.f32.mxu1 %v26506_v60  ;;  %26524 = vst [vmem:[#allocation49_spill] sm:$0xff] %v23043_v25 }
 0x2b5   : > { %20798 = vmatprep.subr.msk.mxu1 %vm1642_vm2, %v23010_v50  ;;  %26523 = vst [vmem:[#allocation48_spill] sm:$0xff] %v23035_v35  ;;  %v23049_v41 = vmul.f32 %v23035_v35, %v1068_v48  ;;  %v23065_v48 = vmul.f32 %v23055_v12, %v1069_v29  ;;  %v1135_v29 = vsel %vm26372_vm10, %v22875_v33, %v22835_v56  ;;  %v5278_v12 = vpop.permute.xlu0 %5277 }
 0x2bb   : > { %20796 = vmatmul.mubr.msk.f32.vlgmr.msra.gmra.mrb[4].mxu1 %vm1638_vm4, %v20793_v22  ;;  %v20797_v22 = vld [vmem:[%s26499_s6 + $0x48] sm:$0x3f] }
 0x2bc   : > { %20799 = vmatpush1.msk.msra.mxu1 %vm1642_vm2, %v23043_v25  ;;  %4041 = vmatprep.mubr.f32.mxu1 %v26506_v60 }
 0x2bd   : > { %20802 = vmatprep.subr.msk.mxu1 %vm1642_vm2, %v23049_v41 }
 0x2c3   : > { %20800 = vmatmul.mubr.msk.f32.vlgmr.msra.gmra.mrb[4].mxu1 %vm1638_vm4, %v20797_v22  ;;  %v20809_v22 = vld [vmem:[%s26499_s6 + $0x60] sm:$0x3f] }
 0x2c4   : > { %20803 = vmatpush1.msk.msra.mxu1 %vm1642_vm2, %v23065_v48  ;;  %4125 = vmatprep.mubr.f32.mxu1 %v26506_v60 }
 0x2c5   : > { %20806 = vmatprep.subr.msk.mxu1 %vm1642_vm2, %v22362_v44 }
 0x2cb   : > { %20804 = vmatmul.mubr.msk.f32.vlgmr.msra.gmra.mrb[4].mxu1 %vm1638_vm4, %v20801_v58 }
 0x2cc   : > { %20807 = vmatpush1.msk.msra.mxu1 %vm1642_vm2, %v22376_v47  ;;  %4203 = vmatprep.mubr.f32.mxu1 %v26506_v60 }
 0x2cd   : > { %20810 = vmatprep.subr.msk.mxu1 %vm1642_vm2, %v22235_v2  ;;  %v23099_v2 = vrot.slane %v20669_v18, %v22272_v9 }
 0x2cf   : > { %26526 = vst [vmem:[#allocation51_spill] sm:$0xff] %v23099_v2  ;;  %v23109_v58 = vmul.f32 %v23099_v2, %v1135_v29  ;;  %v1134_v29 = vsel %vm26372_vm10, %v22835_v56, %v22875_v33  ;;  %v20813_v2 = vld [vmem:[%s26499_s6 + $0x68] sm:$0x3f]  ;;  %vm26384_vm10 = vcmp.lt.s32.totalorder %v22268_v7, 98 }
 0x2d3   : > { %20808 = vmatmul.mubr.msk.f32.vlgmr.msra.gmra.mrb[4].mxu1 %vm1638_vm4, %v20805_v0  ;;  %v23119_v0 = vrot.slane %v20669_v18, %v22270_v8 }
 0x2d4   : > { %20811 = vmatpush1.msk.msra.mxu1 %vm1642_vm2, %v22228_v1  ;;  %4281 = vmatprep.mubr.f32.mxu1 %v26506_v60  ;;  %v20672_v1 = vld [vmem:[%s26470_s25 + $0x3a] sm:$0x3] }
 0x2d5   : > { %20814 = vmatprep.subr.msk.mxu1 %vm1642_vm2, %v22400_v55  ;;  %26527 = vst [vmem:[#allocation52_spill] sm:$0xff] %v23119_v0  ;;  %v23136_v18 = vmul.f32 %v23119_v0, %v1134_v29  ;;  %v23148_v56 = vrot.slane %v20672_v1, %v22270_v8  ;;  %v1200_v29 = vsel %vm26369_vm11, %v22864_v53, %v22901_v20  ;;  %v20821_v53 = vld [vmem:[%s26499_s6 + $0x78] sm:$0x3f]  ;;  %v20825_v20 = vld [vmem:[%s26499_s6 + $0x80] sm:$0x3f]  ;;  %vm26379_vm11 = vcmp.lt.s32.totalorder %v22268_v7, 110 }
 0x2d6   : > { %v20833_v0 = vld [vmem:[%s26499_s6 + $0x90] sm:$0x3f] }
 0x2d7   : > { %26529 = vst [vmem:[#allocation54_spill] sm:$0xff] %v23148_v56 }
 0x2db   : > { %20812 = vmatmul.mubr.msk.f32.vlgmr.msra.gmra.mrb[4].mxu1 %vm1638_vm4, %v20809_v22  ;;  %v23129_v22 = vrot.slane %v20672_v1, %v22272_v9  ;;  %v20676_v1 = vld [vmem:[%s26470_s25 + $0x42] sm:$0x3] }
 0x2dc   : > { %20815 = vmatpush1.msk.msra.mxu1 %vm1642_vm2, %v22423_v63  ;;  %4359 = vmatprep.mubr.f32.mxu1 %v26506_v60 }
 0x2dd   : > { %20818 = vmatprep.subr.msk.mxu1 %vm1642_vm2, %v23109_v58  ;;  %26528 = vst [vmem:[#allocation53_spill] sm:$0xff] %v23129_v22  ;;  %v23142_v33 = vmul.f32 %v23129_v22, %v1201_v26  ;;  %v23158_v26 = vmul.f32 %v23148_v56, %v1200_v29  ;;  %v23192_v29 = vrot.slane %v20676_v1, %v22272_v9  ;;  %v20679_v56 = vld [vmem:[%s26470_s25 + $0x48] sm:$0x3] }
 0x2de   : > { %v23212_v22 = vrot.slane %v20676_v1, %v22270_v8 }
 0x2df   : > { %26530 = vst [vmem:[#allocation55_spill] sm:$0xff] %v23192_v29 }
 0x2e0   : > { %26531 = vst [vmem:[#allocation56_spill] sm:$0xff] %v23212_v22 }
 0x2e3   : > { %20816 = vmatmul.mubr.msk.f32.vlgmr.msra.gmra.mrb[4].mxu1 %vm1638_vm4, %v20813_v2  ;;  %v20817_v2 = vld [vmem:[%s26499_s6 + $0x70] sm:$0x3f] }
 0x2e4   : > { %20819 = vmatpush1.msk.msra.mxu1 %vm1642_vm2, %v23136_v18  ;;  %4443 = vmatprep.mubr.f32.mxu1 %v26506_v60 }
 0x2e5   : > { %20822 = vmatprep.subr.msk.mxu1 %vm1642_vm2, %v23142_v33 }
 0x2eb   : > { %20820 = vmatmul.mubr.msk.f32.vlgmr.msra.gmra.mrb[4].mxu1 %vm1638_vm4, %v20817_v2  ;;  %v1289_v2 = vsel %vm26379_vm11, %v22915_v3, %v22888_v62 }
 0x2ec   : > { %20823 = vmatpush1.msk.msra.mxu1 %vm1642_vm2, %v23158_v26  ;;  %4527 = vmatprep.mubr.f32.mxu1 %v26506_v60 }
 0x2ed   : > { %20826 = vmatprep.subr.msk.mxu1 %vm1642_vm2, %v22429_v4 }
 0x2f3   : > { %20824 = vmatmul.mubr.msk.f32.vlgmr.msra.gmra.mrb[4].mxu1 %vm1638_vm4, %v20821_v53  ;;  %v20829_v53 = vld [vmem:[%s26499_s6 + $0x88] sm:$0x3f] }
 0x2f4   : > { %20827 = vmatpush1.msk.msra.mxu1 %vm1642_vm2, %v22452_v19  ;;  %4605 = vmatprep.mubr.f32.mxu1 %v26506_v60 }
 0x2f5   : > { %20830 = vmatprep.subr.msk.mxu1 %vm1642_vm2, %v22458_v21 }
 0x2fb   : > { %20828 = vmatmul.mubr.msk.f32.vlgmr.msra.gmra.mrb[4].mxu1 %vm1638_vm4, %v20825_v20  ;;  %v23202_v20 = vmul.f32 %v23192_v29, %v1289_v2  ;;  %v1288_v2 = vsel %vm26379_vm11, %v22888_v62, %v22915_v3  ;;  %v1355_v29 = vsel %vm26384_vm10, %v22928_v23, %v22912_v46  ;;  %v20680_v62 = vld [vmem:[%s26470_s25 + $0x4a] sm:$0x3]  ;;  %vm26389_vm11 = vcmp.lt.s32.totalorder %v22268_v7, 97 }
 0x2fc   : > { %20831 = vmatpush1.msk.msra.mxu1 %vm1642_vm2, %v22481_v34  ;;  %4683 = vmatprep.mubr.f32.mxu1 %v26506_v60  ;;  %v23229_v1 = vmul.f32 %v23212_v22, %v1288_v2  ;;  %v23245_v2 = vrot.slane %v20679_v56, %v22270_v8  ;;  %v20837_v22 = vld [vmem:[%s26499_s6 + $0x98] sm:$0x3f] }
 0x2fd   : > { %20834 = vmatprep.subr.msk.mxu1 %vm1642_vm2, %v22487_v38 }
 0x2fe   : > { %26533 = vst [vmem:[#allocation58_spill] sm:$0xff] %v23245_v2 }
 0x303   : > { %20832 = vmatmul.mubr.msk.f32.vlgmr.msra.gmra.mrb[4].mxu1 %vm1638_vm4, %v20829_v53  ;;  %v23222_v53 = vrot.slane %v20679_v56, %v22272_v9 }
 0x304   : > { %20835 = vmatpush1.msk.msra.mxu1 %vm1642_vm2, %v22501_v43  ;;  %4761 = vmatprep.mubr.f32.mxu1 %v26506_v60 }
 0x305   : > { %20838 = vmatprep.subr.msk.mxu1 %vm1642_vm2, %v23202_v20  ;;  %26532 = vst [vmem:[#allocation57_spill] sm:$0xff] %v23222_v53  ;;  %v23235_v3 = vmul.f32 %v23222_v53, %v1355_v29  ;;  %v1354_v29 = vsel %vm26384_vm10, %v22912_v46, %v22928_v23  ;;  %v1377_v53 = vsel %vm26389_vm11, %v22939_v49, %v22936_v51  ;;  %v20681_v23 = vld [vmem:[%s26470_s25 + $0x4c] sm:$0x3]  ;;  %vm26411_vm10 = vcmp.lt.s32.totalorder %v22268_v7, 96 }
 0x306   : > { %v23262_v56 = vmul.f32 %v23245_v2, %v1354_v29  ;;  %v23278_v29 = vrot.slane %v20680_v62, %v22270_v8  ;;  %v20841_v2 = vld [vmem:[%s26499_s6 + $0xa0] sm:$0x3f] }
 0x308   : > { %26535 = vst [vmem:[#allocation60_spill] sm:$0xff] %v23278_v29 }
 0x30b   : > { %20836 = vmatmul.mubr.msk.f32.vlgmr.msra.gmra.mrb[4].mxu1 %vm1638_vm4, %v20833_v0  ;;  %v23255_v0 = vrot.slane %v20680_v62, %v22272_v9 }
 0x30c   : > { %20839 = vmatpush1.msk.msra.mxu1 %vm1642_vm2, %v23229_v1  ;;  %4845 = vmatprep.mubr.f32.mxu1 %v26506_v60 }
 0x30d   : > { %20842 = vmatprep.subr.msk.mxu1 %vm1642_vm2, %v23235_v3  ;;  %26534 = vst [vmem:[#allocation59_spill] sm:$0xff] %v23255_v0  ;;  %v23268_v46 = vmul.f32 %v23255_v0, %v1377_v53  ;;  %v1376_v53 = vsel %vm26389_vm11, %v22936_v51, %v22939_v49  ;;  %v1399_v0 = vsel %vm26411_vm10, %v22948_v5, %v22946_v54  ;;  %v20682_v51 = vld [vmem:[%s26470_s25 + $0x4e] sm:$0x3]  ;;  %vm26408_vm11 = vcmp.lt.s32.totalorder %v22268_v7, 95 }
 0x30e   : > { %v23295_v62 = vmul.f32 %v23278_v29, %v1376_v53  ;;  %v23311_v53 = vrot.slane %v20681_v23, %v22270_v8  ;;  %v20845_v29 = vld [vmem:[%s26499_s6 + $0xa8] sm:$0x3f] }
 0x310   : > { %26537 = vst [vmem:[#allocation62_spill] sm:$0xff] %v23311_v53 }
 0x313   : > { %20840 = vmatmul.mubr.msk.f32.vlgmr.msra.gmra.mrb[4].mxu1 %vm1638_vm4, %v20837_v22  ;;  %v23288_v22 = vrot.slane %v20681_v23, %v22272_v9 }
 0x314   : > { %20843 = vmatpush1.msk.msra.mxu1 %vm1642_vm2, %v23262_v56  ;;  %4929 = vmatprep.mubr.f32.mxu1 %v26506_v60 }
 0x315   : > { %20846 = vmatprep.subr.msk.mxu1 %vm1642_vm2, %v23268_v46  ;;  %26536 = vst [vmem:[#allocation61_spill] sm:$0xff] %v23288_v22  ;;  %v23301_v49 = vmul.f32 %v23288_v22, %v1399_v0  ;;  %v1398_v0 = vsel %vm26411_vm10, %v22946_v54, %v22948_v5  ;;  %v1421_v22 = vsel %vm26408_vm11, %v22961_v37, %v22957_v6 }
 0x316   : > { %v23328_v23 = vmul.f32 %v23311_v53, %v1398_v0  ;;  %v23340_v5 = vrot.slane %v20682_v51, %v22270_v8  ;;  %v1420_v0 = vsel %vm26408_vm11, %v22957_v6, %v22961_v37  ;;  %v20853_v37 = vld [vmem:[%s26499_s6 + $0xb8] sm:$0x3f] }
 0x318   : > { %26539 = vst [vmem:[#allocation64_spill] sm:$0xff] %v23340_v5 }
 0x31b   : > { %20844 = vmatmul.mubr.msk.f32.vlgmr.msra.gmra.mrb[4].mxu1 %vm1638_vm4, %v20841_v2  ;;  %v23321_v2 = vrot.slane %v20682_v51, %v22272_v9 }
 0x31c   : > { %20847 = vmatpush1.msk.msra.mxu1 %vm1642_vm2, %v23295_v62  ;;  %5013 = vmatprep.mubr.f32.mxu1 %v26506_v60 }
 0x31d   : > { %20850 = vmatprep.subr.msk.mxu1 %vm1642_vm2, %v23301_v49  ;;  %26538 = vst [vmem:[#allocation63_spill] sm:$0xff] %v23321_v2  ;;  %v23334_v54 = vmul.f32 %v23321_v2, %v1421_v22  ;;  %v23350_v22 = vmul.f32 %v23340_v5, %v1420_v0 }
 0x31f   : > { %26540 = vst [vmem:[#allocation65_spill] sm:$0xff] %v23350_v22 }
 0x323   : > { %20848 = vmatmul.mubr.msk.f32.vlgmr.msra.gmra.mrb[4].mxu1 %vm1638_vm4, %v20845_v29  ;;  %v20849_v29 = vld [vmem:[%s26499_s6 + $0xb0] sm:$0x3f]  ;;  %s26585_s6 = smov 18  }
 0x324   : > { %20851 = vmatpush1.msk.msra.mxu1 %vm1642_vm2, %v23328_v23  ;;  %5097 = vmatprep.mubr.f32.mxu1 %v26506_v60 }
 0x325   : > { %20854 = vmatprep.subr.msk.mxu1 %vm1642_vm2, %v23334_v54 }
 0x32b   : > { %20852 = vmatmul.mubr.msk.f32.vlgmr.msra.gmra.mrb[4].mxu1 %vm1638_vm4, %v20849_v29 }
 0x32c   : > { %20855 = vmatpush1.msk.msra.mxu1 %vm1642_vm2, %v23350_v22  ;;  %5181 = vmatprep.mubr.f32.mxu1 %v26506_v60 }
 0x333   : > { %20856 = vmatmul.mubr.msk.f32.vlgmr.msra.gmra.mrb[4].mxu1 %vm1638_vm4, %v20853_v37 }
 0x334   : > { %5428 = vmatprep.mubr.f32.mxu1 %v26506_v60 }
 0x34a   : > { %v23364_v6 = vpop.f32.mrb[2].mxu1 }
 0x34b   : > { %26541 = vst [vmem:[#allocation66_spill] sm:$0xff] %v23364_v6  ;;  %v23366_v51 = vpop.f32.mrb[3].mxu1 }
 0x34c   : > { %26542 = vst [vmem:[#allocation67_spill] sm:$0xff] %v23366_v51 }
 0x385   : > { %v5267_v0 = vpop.f32.mrb[0].mxu0 }
 0x386   : > { %v5269_v5 = vpop.f32.mrb[1].mxu0 }
 0x406   : > { %v5183_v29 = vpop.f32.mrb[4].mxu1 }
 0x407   : > { %v21564_v2 = vadd.f32 %v5267_v0, %v5183_v29  ;;  %v5185_v53 = vpop.f32.mrb[5].mxu1  ;;  %v20861_v0 = vld [vmem:[%s26548_s8 + $0x8] sm:$0x3f] }
 0x408   : > { %v21565_v35 = vadd.f32 %v5269_v5, %v5185_v53 }
 0x409   : > { %v5280_v27 = vadd.f32 %v21564_v2, %v5278_v12 }
 0x40a   : > { %v5281_v24 = vadd.f32 %v21565_v35, %v5278_v12 }
 0x40b   : > { %vm5282_vm11 = vcmp.ge.f32.partialorder %v5280_v27, 0.0  ;;  %v5284_v57 = vmul.f32 0.2, %v5280_v27 }
 0x40c   : > { %vm5283_vm10 = vcmp.ge.f32.partialorder %v5281_v24, 0.0  ;;  %v5285_v10 = vmul.f32 0.2, %v5281_v24 }
 0x40d   : > { %v23368_v37 = vsel %vm5282_vm11, %v5280_v27, %v5284_v57  ;;  %v23405_v57 = vld [vmem:[%s22225_s1] sm:$0x3f]  ;;  %vm584_vm11 = vcmp.lt.s32.totalorder %v22268_v7, 51 }
 0x40e   : > { %v23370_v22 = vsel %vm5283_vm10, %v5281_v24, %v5285_v10  ;;  %5296 = vrot.lane.b32.xlu1 %v23368_v37, %s26543_s21  ;;  %v23409_v24 = vld [vmem:[%s22225_s1 + $0x8] sm:$0x3f]  ;;  %vm605_vm10 = vcmp.lt.s32.totalorder %v22268_v7, 50 }
 0x40f   : > { %5298 = vrot.lane.b32.xlu0 %v23370_v22, %s26543_s21 }
 0x412   : > { %5288 = vrot.lane.b32.xlu1 %v23368_v37, %s26544_s22 }
 0x413   : > { %5290 = vrot.lane.b32.xlu0 %v23370_v22, %s26544_s22 }
 0x416   : > { %5304 = vrot.lane.b32.xlu1 %v23368_v37, %s26545_s30 }
 0x417   : > { %5306 = vrot.lane.b32.xlu0 %v23370_v22, %s26545_s30 }
 0x41a   : > { %5312 = vrot.lane.b32.xlu1 %v23368_v37, %s26546_s19 }
 0x41b   : > { %5314 = vrot.lane.b32.xlu0 %v23370_v22, %s26546_s19 }
 0x41e   : > { %5320 = vrot.lane.b32.xlu1 %v23368_v37, %s26547_s2 }
 0x41f   : > { %5322 = vrot.lane.b32.xlu0 %v23370_v22, %s26547_s2 }
 0x422   : > { %5328 = vrot.lane.b32.xlu1 %v23368_v37, %s26486_s29 }
 0x423   : > { %5330 = vrot.lane.b32.xlu0 %v23370_v22, %s26486_s29 }
 0x426   : > { %5336 = vrot.lane.b32.xlu1 %v23368_v37, %s26487_s24 }
 0x427   : > { %5338 = vrot.lane.b32.xlu0 %v23370_v22, %s26487_s24 }
 0x42a   : > { %5344 = vrot.lane.b32.xlu1 %v23368_v37, %s26488_s26 }
 0x42b   : > { %5346 = vrot.lane.b32.xlu0 %v23370_v22, %s26488_s26 }
 0x42e   : > { %601 = vrot.lane.b32.xlu1 %v23405_v57, %s22088_s23 }
 0x42f   : > { %603 = vrot.lane.b32.xlu0 %v23409_v24, %s22088_s23  ;;  %s22093_s23 = smov 46  }
 0x432   : > { %578 = vrot.lane.b32.xlu1 %v23405_v57, %s22089_s20 }
 0x433   : > { %580 = vrot.lane.b32.xlu0 %v23409_v24, %s22089_s20  ;;  %s22094_s20 = smov 45  }
 0x436   : > { %623 = vrot.lane.b32.xlu1 %v23405_v57, %s22090_s0 }
 0x437   : > { %625 = vrot.lane.b32.xlu0 %v23409_v24, %s22090_s0  ;;  %s22095_s0 = smov 35  }
 0x43a   : > { %645 = vrot.lane.b32.xlu1 %v23405_v57, %s22091_s3 }
 0x43b   : > { %647 = vrot.lane.b32.xlu0 %v23409_v24, %s22091_s3  ;;  %s22096_s3 = smov 29  }
 0x43e   : > { %667 = vrot.lane.b32.xlu1 %v23405_v57, %s22092_s4 }
 0x43f   : > { %669 = vrot.lane.b32.xlu0 %v23409_v24, %s22092_s4  ;;  %s22097_s4 = smov 19  }
 0x442   : > { %689 = vrot.lane.b32.xlu1 %v23405_v57, %s22093_s23 }
 0x443   : > { %691 = vrot.lane.b32.xlu0 %v23409_v24, %s22093_s23  ;;  %s22098_s23 = smov 13  }
 0x446   : > { %711 = vrot.lane.b32.xlu1 %v23405_v57, %s22094_s20 }
 0x447   : > { %713 = vrot.lane.b32.xlu0 %v23409_v24, %s22094_s20  ;;  %s22099_s20 = smov 3  }
 0x44a   : > { %733 = vrot.lane.b32.xlu1 %v23405_v57, %s22095_s0 }
 0x44b   : > { %735 = vrot.lane.b32.xlu0 %v23409_v24, %s22095_s0  ;;  %s22100_s0 = smov 125  }
 0x44e   : > { %865 = vrot.lane.b32.xlu1 %v23405_v57, %s22096_s3 }
 0x44f   : > { %867 = vrot.lane.b32.xlu0 %v23409_v24, %s22096_s3  ;;  %s22107_s3 = smov 81  }
 0x452   : > { %887 = vrot.lane.b32.xlu1 %v23405_v57, %s22097_s4 }
 0x453   : > { %889 = vrot.lane.b32.xlu0 %v23409_v24, %s22097_s4  ;;  %s22109_s4 = smov 79  }
 0x456   : > { %1019 = vrot.lane.b32.xlu1 %v23405_v57, %s22098_s23 }
 0x457   : > { %1021 = vrot.lane.b32.xlu0 %v23409_v24, %s22098_s23  ;;  %s22101_s23 = smov 115  }
 0x45a   : > { %1041 = vrot.lane.b32.xlu1 %v23405_v57, %s22099_s20 }
 0x45b   : > { %1043 = vrot.lane.b32.xlu0 %v23409_v24, %s22099_s20  ;;  %s22108_s20 = smov 80  }
 0x45e   : > { %1151 = vrot.lane.b32.xlu1 %v23405_v57, %s22100_s0 }
 0x45f   : > { %1153 = vrot.lane.b32.xlu0 %v23409_v24, %s22100_s0  ;;  %s22110_s0 = smov 78  }
 0x462   : > { %1173 = vrot.lane.b32.xlu1 %v23405_v57, %s22101_s23 }
 0x463   : > { %1175 = vrot.lane.b32.xlu0 %v23409_v24, %s22101_s23  ;;  %s22102_s23 = smov 109  }
 0x466   : > { %1305 = vrot.lane.b32.xlu1 %v23405_v57, %s22102_s23 }
 0x467   : > { %1307 = vrot.lane.b32.xlu0 %v23409_v24, %s22102_s23  ;;  %s22103_s23 = smov 99  }
 0x46a   : > { %1327 = vrot.lane.b32.xlu1 %v23405_v57, %s22103_s23 }
 0x46b   : > { %1329 = vrot.lane.b32.xlu0 %v23409_v24, %s22103_s23  ;;  %s22104_s23 = smov 93  }
 0x46e   : > { %1459 = vrot.lane.b32.xlu1 %v23405_v57, %s22104_s23 }
 0x46f   : > { %1461 = vrot.lane.b32.xlu0 %v23409_v24, %s22104_s23  ;;  %s22105_s23 = smov 83  }
 0x472   : > { %1481 = vrot.lane.b32.xlu1 %v23405_v57, %s22105_s23 }
 0x473   : > { %1483 = vrot.lane.b32.xlu0 %v23409_v24, %s22105_s23  ;;  %s22106_s23 = smov 82  }
 0x476   : > { %1503 = vrot.lane.b32.xlu1 %v23405_v57, %s22106_s23 }
 0x477   : > { %1505 = vrot.lane.b32.xlu0 %v23409_v24, %s22106_s23  ;;  %s22111_s23 = smov 77  }
 0x47a   : > { %1525 = vrot.lane.b32.xlu1 %v23405_v57, %s22107_s3 }
 0x47b   : > { %1527 = vrot.lane.b32.xlu0 %v23409_v24, %s22107_s3  ;;  %s26581_s3 = smov 32  }
 0x47e   : > { %1547 = vrot.lane.b32.xlu1 %v23405_v57, %s22108_s20 }
 0x47f   : > { %1549 = vrot.lane.b32.xlu0 %v23409_v24, %s22108_s20  ;;  %s26580_s20 = smov 34  }
 0x480   : > { %v5297_v12 = vpop.permute.xlu1 %5296 }
 0x481   : > { %v5299_v10 = vpop.permute.xlu0 %5298 }
 0x482   : > { %v5300_v27 = vsel %vm957_vm1, %v5297_v12, %v5299_v10  ;;  %v5301_v35 = vsel %vm957_vm1, %v5299_v10, %v5297_v12  ;;  %1569 = vrot.lane.b32.xlu1 %v23405_v57, %s22109_s4 }
 0x483   : > { %v5302_v53 = vmul.f32 %v5301_v35, %v22286_v15  ;;  %v5303_v2 = vmul.f32 %v5300_v27, %v22289_v16  ;;  %1571 = vrot.lane.b32.xlu0 %v23409_v24, %s22109_s4  ;;  %s26583_s4 = smov 31  }
 0x484   : > { %v5289_v5 = vpop.permute.xlu1 %5288 }
 0x485   : > { %20862 = vmatprep.subr.msk.mxu1 %vm1642_vm2, %v5303_v2  ;;  %v5291_v29 = vpop.permute.xlu0 %5290 }
 0x486   : > { %v5292_v51 = vsel %vm935_vm0, %v5289_v5, %v5291_v29  ;;  %v5293_v6 = vsel %vm935_vm0, %v5291_v29, %v5289_v5  ;;  %20863 = vmatpush1.msk.msra.mxu1 %vm1642_vm2, %v5302_v53  ;;  %1591 = vrot.lane.b32.xlu1 %v23405_v57, %s22110_s0 }
 0x487   : > { %v5294_v12 = vmul.f32 %v5293_v6, %v22292_v17  ;;  %v5295_v10 = vmul.f32 %v5292_v51, %v22282_v14  ;;  %20864 = vmatmul.mubr.msk.f32.vlgmr.msra.gmra.mrb[6].mxu1 %vm1638_vm4, %v20861_v0  ;;  %v5352_v51 = vld [vmem:[%s26548_s8] sm:$0x3f]  ;;  %1593 = vrot.lane.b32.xlu0 %v23409_v24, %s22110_s0  ;;  %s26600_s0 = smov 110  }
 0x488   : > { %v5305_v27 = vpop.permute.xlu1 %5304  ;;  %5508 = vmatprep.mubr.f32.mxu1 %v26506_v60 }
 0x489   : > { %20865 = vmatprep.subr.msk.mxu1 %vm1642_vm2, %v5295_v10  ;;  %v5307_v35 = vpop.permute.xlu0 %5306 }
 0x48a   : > { %v5308_v2 = vsel %vm979_vm3, %v5305_v27, %v5307_v35  ;;  %20866 = vmatpush1.msk.msra.mxu1 %vm1642_vm2, %v5294_v12  ;;  %v5309_v53 = vsel %vm979_vm3, %v5307_v35, %v5305_v27  ;;  %v20868_v35 = vld [vmem:[%s26548_s8 + $0x10] sm:$0x3f]  ;;  %1613 = vrot.lane.b32.xlu1 %v23405_v57, %s22111_s23 }
 0x48b   : > { %v5311_v6 = vmul.f32 %v5308_v2, %v22316_v28  ;;  %v5310_v29 = vmul.f32 %v5309_v53, %v22343_v36  ;;  %1615 = vrot.lane.b32.xlu0 %v23409_v24, %s22111_s23  ;;  %s26577_s23 = smov 33  }
 0x48c   : > { %v5313_v5 = vpop.permute.xlu1 %5312 }
 0x48d   : > { %20869 = vmatprep.subr.msk.mxu1 %vm1642_vm2, %v5311_v6  ;;  %v5315_v0 = vpop.permute.xlu0 %5314 }
 0x48e   : > { %v5316_v10 = vsel %vm1089_vm5, %v5313_v5, %v5315_v0  ;;  %v5317_v27 = vsel %vm1089_vm5, %v5315_v0, %v5313_v5 }
 0x48f   : > { %v5319_v12 = vmul.f32 %v5316_v10, %v22351_v39  ;;  %20867 = vmatmul.mubr.msk.f32.vlgmr.msra.gmra.mrb[6].mxu1 %vm1638_vm4, %v5352_v51  ;;  %v5318_v2 = vmul.f32 %v5317_v27, %v22368_v45  ;;  %v20872_v51 = vld [vmem:[%s26548_s8 + $0x18] sm:$0x3f]  ;;  %v20876_v27 = vld [vmem:[%s26548_s8 + $0x20] sm:$0x3f] }
 0x490   : > { %20870 = vmatpush1.msk.msra.mxu1 %vm1642_vm2, %v5310_v29  ;;  %5590 = vmatprep.mubr.f32.mxu1 %v26506_v60  ;;  %v5321_v53 = vpop.permute.xlu1 %5320 }
 0x491   : > { %20873 = vmatprep.subr.msk.mxu1 %vm1642_vm2, %v5319_v12  ;;  %v5323_v6 = vpop.permute.xlu0 %5322 }
 0x492   : > { %v5325_v5 = vsel %vm1111_vm6, %v5323_v6, %v5321_v53 }
 0x493   : > { %v5327_v0 = vmul.f32 %v5325_v5, %v22392_v52 }
 0x494   : > { %v5329_v29 = vpop.permute.xlu1 %5328 }
 0x495   : > { %v5331_v10 = vpop.permute.xlu0 %5330 }
 0x496   : > { %v5333_v12 = vsel %vm1221_vm7, %v5331_v10, %v5329_v29 }
 0x497   : > { %20871 = vmatmul.mubr.msk.f32.vlgmr.msra.gmra.mrb[6].mxu1 %vm1638_vm4, %v20868_v35  ;;  %v5335_v35 = vmul.f32 %v5333_v12, %v22418_v61 }
 0x498   : > { %20874 = vmatpush1.msk.msra.mxu1 %vm1642_vm2, %v5318_v2  ;;  %5674 = vmatprep.mubr.f32.mxu1 %v26506_v60  ;;  %v5337_v2 = vpop.permute.xlu1 %5336 }
 0x499   : > { %20877 = vmatprep.subr.msk.mxu1 %vm1642_vm2, %v23370_v22  ;;  %v5324_v22 = vsel %vm1111_vm6, %v5321_v53, %v5323_v6  ;;  %v5339_v53 = vpop.permute.xlu0 %5338  ;;  %v5332_v6 = vsel %vm1221_vm7, %v5329_v29, %v5331_v10 }
 0x49a   : > { %v5341_v5 = vsel %vm1243_vm8, %v5339_v53, %v5337_v2  ;;  %v5340_v12 = vsel %vm1243_vm8, %v5337_v2, %v5339_v53 }
 0x49c   : > { %v5345_v29 = vpop.permute.xlu1 %5344 }
 0x49d   : > { %v5347_v10 = vpop.permute.xlu0 %5346 }
 0x49f   : > { %20875 = vmatmul.mubr.msk.f32.vlgmr.msra.gmra.mrb[6].mxu1 %vm1638_vm4, %v20872_v51  ;;  %v20880_v51 = vld [vmem:[%s26548_s8 + $0x28] sm:$0x3f] }
 0x4a0   : > { %20878 = vmatpush1.msk.msra.mxu1 %vm1642_vm2, %v23368_v37  ;;  %5758 = vmatprep.mubr.f32.mxu1 %v26506_v60  ;;  %v5326_v37 = vmul.f32 %v5324_v22, %v22410_v59  ;;  %v5343_v22 = vmul.f32 %v5341_v5, %v22447_v13 }
 0x4a1   : > { %20881 = vmatprep.subr.msk.mxu1 %vm1642_vm2, %v5327_v0  ;;  %v5334_v0 = vmul.f32 %v5332_v6, %v22439_v11  ;;  %v20645_v6 = vld [vmem:[%s26470_s25 + $0x2] sm:$0x3]  ;;  %v604_v2 = vpop.permute.xlu0 %603 }
 0x4a2   : > { %v618_v53 = vrot.slane %v20645_v6, %v22272_v9 }
 0x4a7   : > { %20879 = vmatmul.mubr.msk.f32.vlgmr.msra.gmra.mrb[6].mxu1 %vm1638_vm4, %v20876_v27  ;;  %v5349_v27 = vsel %vm1265_vm9, %v5347_v10, %v5345_v29 }
 0x4a8   : > { %20882 = vmatpush1.msk.msra.mxu1 %vm1642_vm2, %v5326_v37  ;;  %5842 = vmatprep.mubr.f32.mxu1 %v26506_v60  ;;  %v20884_v37 = vld [vmem:[%s26548_s8 + $0x30] sm:$0x3f]  ;;  %v5351_v5 = vmul.f32 %v5349_v27, %v22476_v32  ;;  %v581_v32 = vpop.permute.xlu0 %580 }
 0x4a9   : > { %20885 = vmatprep.subr.msk.mxu1 %vm1642_vm2, %v5335_v35  ;;  %v5342_v35 = vmul.f32 %v5340_v12, %v22468_v30  ;;  %v20888_v12 = vld [vmem:[%s26548_s8 + $0x38] sm:$0x3f] }
 0x4af   : > { %20883 = vmatmul.mubr.msk.f32.vlgmr.msra.gmra.mrb[6].mxu1 %vm1638_vm4, %v20880_v51  ;;  %v602_v51 = vpop.permute.xlu1 %601 }
 0x4b0   : > { %20886 = vmatpush1.msk.msra.mxu1 %vm1642_vm2, %v5334_v0  ;;  %5926 = vmatprep.mubr.f32.mxu1 %v26506_v60  ;;  %v606_v0 = vsel %vm605_vm10, %v602_v51, %v604_v2 }
 0x4b1   : > { %20889 = vmatprep.subr.msk.mxu1 %vm1642_vm2, %v5343_v22  ;;  %v5348_v22 = vsel %vm1265_vm9, %v5345_v29, %v5347_v10  ;;  %v622_v27 = vmul.f32 %v618_v53, %v606_v0  ;;  %v614_v29 = vrot.slane %v20645_v6, %v22270_v8  ;;  %v607_v10 = vsel %vm605_vm10, %v604_v2, %v602_v51  ;;  %v626_v6 = vpop.permute.xlu0 %625  ;;  %v20892_v51 = vld [vmem:[%s26548_s8 + $0x40] sm:$0x3f]  ;;  %s26587_s8 = smov 14  }
 0x4b2   : > { %vm649_vm10 = vcmp.lt.s32.totalorder %v22268_v7, 48 }
 0x4b7   : > { %20887 = vmatmul.mubr.msk.f32.vlgmr.msra.gmra.mrb[6].mxu1 %vm1638_vm4, %v20884_v37  ;;  %v5350_v37 = vmul.f32 %v5348_v22, %v22493_v40  ;;  %v20646_v22 = vld [vmem:[%s26470_s25 + $0x4] sm:$0x3] }
 0x4b8   : > { %20890 = vmatpush1.msk.msra.mxu1 %vm1642_vm2, %v5342_v35  ;;  %6010 = vmatprep.mubr.f32.mxu1 %v26506_v60  ;;  %v587_v35 = vld [vmem:[%s26470_s25] sm:$0x3]  ;;  %v640_v30 = vrot.slane %v20646_v22, %v22272_v9 }
 0x4b9   : > { %20893 = vmatprep.subr.msk.mxu1 %vm1642_vm2, %v5351_v5  ;;  %v579_v5 = vpop.permute.xlu1 %578  ;;  %v596_v53 = vrot.slane %v587_v35, %v22272_v9  ;;  %v592_v2 = vrot.slane %v587_v35, %v22270_v8  ;;  %v20896_v35 = vld [vmem:[%s26549_s10 + $0x8] sm:$0x3f] }
 0x4ba   : > { %v585_v0 = vsel %vm584_vm11, %v579_v5, %v581_v32 }
 0x4bb   : > { %v600_v40 = vmul.f32 %v596_v53, %v585_v0  ;;  %v636_v53 = vrot.slane %v20646_v22, %v22270_v8  ;;  %v20648_v22 = vld [vmem:[%s26470_s25 + $0x8] sm:$0x3] }
 0x4bf   : > { %20891 = vmatmul.mubr.msk.f32.vlgmr.msra.gmra.mrb[6].mxu1 %vm1638_vm4, %v20888_v12  ;;  %v624_v12 = vpop.permute.xlu1 %623 }
 0x4c0   : > { %20894 = vmatpush1.msk.msra.mxu1 %vm1642_vm2, %v5350_v37  ;;  %6094 = vmatprep.mubr.f32.mxu1 %v26506_v60  ;;  %v621_v37 = vmul.f32 %v614_v29, %v607_v10  ;;  %v628_v13 = vsel %vm627_vm15, %v624_v12, %v626_v6  ;;  %v648_v10 = vpop.permute.xlu0 %647 }
 0x4c1   : > { %20897 = vmatprep.subr.msk.mxu1 %vm1642_vm2, %v622_v27  ;;  %v586_v27 = vsel %vm584_vm11, %v581_v32, %v579_v5  ;;  %v644_v32 = vmul.f32 %v640_v30, %v628_v13  ;;  %v20647_v5 = vld [vmem:[%s26470_s25 + $0x6] sm:$0x3]  ;;  %vm693_vm11 = vcmp.lt.s32.totalorder %v22268_v7, 46 }
 0x4c2   : > { %v599_v11 = vmul.f32 %v592_v2, %v586_v27  ;;  %v662_v13 = vrot.slane %v20647_v5, %v22272_v9  ;;  %v684_v27 = vrot.slane %v20648_v22, %v22272_v9 }
 0x4c3   : > { %v646_v29 = vpop.permute.xlu1 %645 }
 0x4c4   : > { %v650_v30 = vsel %vm649_vm10, %v646_v29, %v648_v10  ;;  %v651_v2 = vsel %vm649_vm10, %v648_v10, %v646_v29  ;;  %vm715_vm10 = vcmp.lt.s32.totalorder %v22268_v7, 45 }
 0x4c7   : > { %20895 = vmatmul.mubr.msk.f32.vlgmr.msra.gmra.mrb[6].mxu1 %vm1638_vm4, %v20892_v51  ;;  %v658_v51 = vrot.slane %v20647_v5, %v22270_v8  ;;  %v20649_v5 = vld [vmem:[%s26470_s25 + $0xa] sm:$0x3] }
 0x4c8   : > { %20898 = vmatpush1.msk.msra.mxu1 %vm1642_vm2, %v621_v37  ;;  %6195 = vmatprep.mubr.f32.mxu1 %v26506_v60  ;;  %v6119_v37 = vld [vmem:[%s26549_s10] sm:$0x3f] }
 0x4c9   : > { %20900 = vmatprep.subr.msk.mxu1 %vm1642_vm2, %v600_v40  ;;  %v629_v40 = vsel %vm627_vm15, %v626_v6, %v624_v12  ;;  %v668_v12 = vpop.permute.xlu1 %667  ;;  %vm671_vm15 = vcmp.lt.s32.totalorder %v22268_v7, 47  ;;  %v670_v6 = vpop.permute.xlu0 %669 }
 0x4ca   : > { %v643_v0 = vmul.f32 %v636_v53, %v629_v40  ;;  %v20903_v53 = vld [vmem:[%s26549_s10 + $0x10] sm:$0x3f] }
 0x4cb   : > { %20899 = vmatmul.mubr.msk.f32.vlgmr.msra.gmra.mrb[8].mxu1 %vm1638_vm4, %v20896_v35  ;;  %v672_v35 = vsel %vm671_vm15, %v668_v12, %v670_v6 }
 0x4cc   : > { %20901 = vmatpush1.msk.msra.mxu1 %vm1642_vm2, %v599_v11  ;;  %6275 = vmatprep.mubr.f32.mxu1 %v26506_v60  ;;  %v666_v11 = vmul.f32 %v662_v13, %v650_v30  ;;  %v688_v40 = vmul.f32 %v684_v27, %v672_v35  ;;  %v680_v13 = vrot.slane %v20648_v22, %v22270_v8  ;;  %v20907_v22 = vld [vmem:[%s26549_s10 + $0x18] sm:$0x3f] }
 0x4cd   : > { %20904 = vmatprep.subr.msk.mxu1 %vm1642_vm2, %v644_v32  ;;  %v665_v32 = vmul.f32 %v658_v51, %v651_v2  ;;  %v690_v29 = vpop.permute.xlu1 %689  ;;  %v692_v10 = vpop.permute.xlu0 %691  ;;  %v673_v30 = vsel %vm671_vm15, %v670_v6, %v668_v12  ;;  %v20650_v12 = vld [vmem:[%s26470_s25 + $0xc] sm:$0x3]  ;;  %v702_v6 = vrot.slane %v20649_v5, %v22270_v8  ;;  %vm737_vm15 = vcmp.lt.s32.totalorder %v22268_v7, 35 }
 0x4ce   : > { %v695_v2 = vsel %vm693_vm11, %v692_v10, %v690_v29  ;;  %v728_v35 = vrot.slane %v20650_v12, %v22272_v9 }
 0x4d1   : > { %v712_v27 = vpop.permute.xlu1 %711 }
 0x4d3   : > { %20902 = vmatmul.mubr.msk.f32.vlgmr.msra.gmra.mrb[8].mxu1 %vm1638_vm4, %v6119_v37  ;;  %v694_v37 = vsel %vm693_vm11, %v690_v29, %v692_v10  ;;  %v20651_v10 = vld [vmem:[%s26470_s25 + $0xe] sm:$0x3]  ;;  %vm869_vm11 = vcmp.lt.s32.totalorder %v22268_v7, 29 }
 0x4d4   : > { %20905 = vmatpush1.msk.msra.mxu1 %vm1642_vm2, %v643_v0  ;;  %6357 = vmatprep.mubr.f32.mxu1 %v26506_v60  ;;  %v706_v0 = vrot.slane %v20649_v5, %v22272_v9  ;;  %v20911_v5 = vld [vmem:[%s26549_s10 + $0x20] sm:$0x3f] }
 0x4d5   : > { %20908 = vmatprep.subr.msk.mxu1 %vm1642_vm2, %v666_v11  ;;  %v687_v11 = vmul.f32 %v680_v13, %v673_v30  ;;  %v734_v13 = vpop.permute.xlu1 %733 }
 0x4d6   : > { %v710_v51 = vmul.f32 %v706_v0, %v694_v37  ;;  %v724_v0 = vrot.slane %v20650_v12, %v22270_v8  ;;  %v746_v12 = vrot.slane %v20651_v10, %v22270_v8 }
 0x4db   : > { %20906 = vmatmul.mubr.msk.f32.vlgmr.msra.gmra.mrb[8].mxu1 %vm1638_vm4, %v20903_v53 }
 0x4dc   : > { %20909 = vmatpush1.msk.msra.mxu1 %vm1642_vm2, %v665_v32  ;;  %6441 = vmatprep.mubr.f32.mxu1 %v26506_v60  ;;  %v714_v32 = vpop.permute.xlu0 %713 }
 0x4dd   : > { %20912 = vmatprep.subr.msk.mxu1 %vm1642_vm2, %v688_v40  ;;  %v716_v53 = vsel %vm715_vm10, %v712_v27, %v714_v32  ;;  %v709_v40 = vmul.f32 %v702_v6, %v695_v2  ;;  %v717_v37 = vsel %vm715_vm10, %v714_v32, %v712_v27  ;;  %v20915_v6 = vld [vmem:[%s26549_s10 + $0x28] sm:$0x3f]  ;;  %v20919_v32 = vld [vmem:[%s26549_s10 + $0x30] sm:$0x3f]  ;;  %vm891_vm10 = vcmp.lt.s32.totalorder %v22268_v7, 19 }
 0x4de   : > { %v732_v29 = vmul.f32 %v728_v35, %v716_v53  ;;  %v20923_v53 = vld [vmem:[%s26549_s10 + $0x38] sm:$0x3f] }
 0x4e0   : > { %v736_v30 = vpop.permute.xlu0 %735 }
 0x4e1   : > { %v739_v27 = vsel %vm737_vm15, %v736_v30, %v734_v13 }
 0x4e2   : > { %v753_v35 = vmul.f32 %v746_v12, %v739_v27 }
 0x4e3   : > { %20910 = vmatmul.mubr.msk.f32.vlgmr.msra.gmra.mrb[8].mxu1 %vm1638_vm4, %v20907_v22  ;;  %v738_v22 = vsel %vm737_vm15, %v734_v13, %v736_v30  ;;  %v26553_v13 = vld [vmem:[#allocation26_spill] sm:$0xff]  ;;  %v20931_v30 = vld [vmem:[%s26549_s10 + $0x48] sm:$0x3f]  ;;  %vm1023_vm15 = vcmp.lt.s32.totalorder %v22268_v7, 13 }
 0x4e4   : > { %20913 = vmatpush1.msk.msra.mxu1 %vm1642_vm2, %v687_v11  ;;  %6525 = vmatprep.mubr.f32.mxu1 %v26506_v60  ;;  %v750_v11 = vrot.slane %v20651_v10, %v22272_v9  ;;  %v26552_v10 = vld [vmem:[#allocation22_spill] sm:$0xff]  ;;  %v868_v27 = vpop.permute.xlu0 %867 }
 0x4e5   : > { %20916 = vmatprep.subr.msk.mxu1 %vm1642_vm2, %v710_v51  ;;  %v731_v51 = vmul.f32 %v724_v0, %v717_v37  ;;  %v26554_v0 = vld [vmem:[#allocation29_spill] sm:$0xff]  ;;  %v26555_v37 = vld [vmem:[#allocation30_spill] sm:$0xff] }
 0x4e6   : > { %v754_v2 = vmul.f32 %v750_v11, %v738_v22  ;;  %v20935_v11 = vld [vmem:[%s26549_s10 + $0x50] sm:$0x3f]  ;;  %v20657_v22 = vld [vmem:[%s26470_s25 + $0x1a] sm:$0x3] }
 0x4e7   : > { %v882_v12 = vrot.slane %v20657_v22, %v22272_v9 }
 0x4eb   : > { %20914 = vmatmul.mubr.msk.f32.vlgmr.msra.gmra.mrb[8].mxu1 %vm1638_vm4, %v20911_v5  ;;  %v26551_v5 = vld [vmem:[#allocation19_spill] sm:$0xff] }
 0x4ec   : > { %20917 = vmatpush1.msk.msra.mxu1 %vm1642_vm2, %v709_v40  ;;  %6609 = vmatprep.mubr.f32.mxu1 %v26506_v60  ;;  %v26550_v40 = vld [vmem:[#allocation25_spill] sm:$0xff] }
 0x4ed   : > { %20920 = vmatprep.subr.msk.mxu1 %vm1642_vm2, %v732_v29  ;;  %v20927_v29 = vld [vmem:[%s26549_s10 + $0x40] sm:$0x3f] }
 0x4f3   : > { %20918 = vmatmul.mubr.msk.f32.vlgmr.msra.gmra.mrb[8].mxu1 %vm1638_vm4, %v20915_v6  ;;  %v26557_v6 = vld [vmem:[#allocation34_spill] sm:$0xff] }
 0x4f4   : > { %20921 = vmatpush1.msk.msra.mxu1 %vm1642_vm2, %v731_v51  ;;  %6693 = vmatprep.mubr.f32.mxu1 %v26506_v60  ;;  %v26556_v51 = vld [vmem:[#allocation33_spill] sm:$0xff] }
 0x4f5   : > { %20924 = vmatprep.subr.msk.mxu1 %vm1642_vm2, %v754_v2  ;;  %v866_v2 = vpop.permute.xlu1 %865 }
 0x4fb   : > { %20922 = vmatmul.mubr.msk.f32.vlgmr.msra.gmra.mrb[8].mxu1 %vm1638_vm4, %v20919_v32  ;;  %v20939_v32 = vld [vmem:[%s26549_s10 + $0x58] sm:$0x3f] }
 0x4fc   : > { %20925 = vmatpush1.msk.msra.mxu1 %vm1642_vm2, %v753_v35  ;;  %6777 = vmatprep.mubr.f32.mxu1 %v26506_v60  ;;  %v870_v35 = vsel %vm869_vm11, %v866_v2, %v868_v27 }
 0x4fd   : > { %20928 = vmatprep.subr.msk.mxu1 %vm1642_vm2, %v22780_v31 }
 0x503   : > { %20926 = vmatmul.mubr.msk.f32.vlgmr.msra.gmra.mrb[8].mxu1 %vm1638_vm4, %v20923_v53  ;;  %v886_v53 = vmul.f32 %v882_v12, %v870_v35  ;;  %v871_v12 = vsel %vm869_vm11, %v868_v27, %v866_v2  ;;  %vm1045_vm11 = vcmp.lt.s32.totalorder %v22268_v7, 3 }
 0x504   : > { %20929 = vmatpush1.msk.msra.mxu1 %vm1642_vm2, %v26550_v40  ;;  %6855 = vmatprep.mubr.f32.mxu1 %v26506_v60 }
 0x505   : > { %20932 = vmatprep.subr.msk.mxu1 %vm1642_vm2, %v26551_v5 }
 0x50b   : > { %20930 = vmatmul.mubr.msk.f32.vlgmr.msra.gmra.mrb[8].mxu1 %vm1638_vm4, %v20927_v29  ;;  %v20658_v29 = vld [vmem:[%s26470_s25 + $0x1c] sm:$0x3] }
 0x50c   : > { %20933 = vmatpush1.msk.msra.mxu1 %vm1642_vm2, %v26552_v10  ;;  %6933 = vmatprep.mubr.f32.mxu1 %v26506_v60  ;;  %v904_v35 = vrot.slane %v20658_v29, %v22272_v9  ;;  %v900_v2 = vrot.slane %v20658_v29, %v22270_v8  ;;  %v26560_v29 = vld [vmem:[#allocation40_spill] sm:$0xff] }
 0x50d   : > { %20936 = vmatprep.subr.msk.mxu1 %vm1642_vm2, %v26553_v13 }
 0x513   : > { %20934 = vmatmul.mubr.msk.f32.vlgmr.msra.gmra.mrb[8].mxu1 %vm1638_vm4, %v20931_v30  ;;  %v888_v30 = vpop.permute.xlu1 %887 }
 0x514   : > { %20937 = vmatpush1.msk.msra.mxu1 %vm1642_vm2, %v26554_v0  ;;  %7011 = vmatprep.mubr.f32.mxu1 %v26506_v60 }
 0x515   : > { %20940 = vmatprep.subr.msk.mxu1 %vm1642_vm2, %v26555_v37 }
 0x51b   : > { %20938 = vmatmul.mubr.msk.f32.vlgmr.msra.gmra.mrb[8].mxu1 %vm1638_vm4, %v20935_v11  ;;  %v890_v11 = vpop.permute.xlu0 %889 }
 0x51c   : > { %20941 = vmatpush1.msk.msra.mxu1 %vm1642_vm2, %v26556_v51  ;;  %7089 = vmatprep.mubr.f32.mxu1 %v26506_v60  ;;  %v878_v51 = vrot.slane %v20657_v22, %v22270_v8  ;;  %v20943_v22 = vld [vmem:[%s26549_s10 + $0x60] sm:$0x3f]  ;;  %v893_v27 = vsel %vm891_vm10, %v890_v11, %v888_v30 }
 0x51d   : > { %20944 = vmatprep.subr.msk.mxu1 %vm1642_vm2, %v26557_v6  ;;  %v26558_v6 = vld [vmem:[#allocation37_spill] sm:$0xff] }
 0x523   : > { %20942 = vmatmul.mubr.msk.f32.vlgmr.msra.gmra.mrb[8].mxu1 %vm1638_vm4, %v20939_v32  ;;  %v892_v32 = vsel %vm891_vm10, %v888_v30, %v890_v11  ;;  %v26561_v30 = vld [vmem:[#allocation4_spill] sm:$0xff]  ;;  %v20955_v11 = vld [vmem:[%s26549_s10 + $0x78] sm:$0x3f]  ;;  %vm1155_vm10 = vcmp.lt.s32.totalorder %v22268_v7, 125 }
 0x524   : > { %20945 = vmatpush1.msk.msra.mxu1 %vm1642_vm2, %v26558_v6  ;;  %7167 = vmatprep.mubr.f32.mxu1 %v26506_v60  ;;  %v885_v6 = vmul.f32 %v878_v51, %v871_v12  ;;  %v908_v37 = vmul.f32 %v904_v35, %v892_v32  ;;  %v907_v51 = vmul.f32 %v900_v2, %v893_v27  ;;  %v26562_v12 = vld [vmem:[#allocation7_spill] sm:$0xff]  ;;  %v26563_v35 = vld [vmem:[#allocation6_spill] sm:$0xff]  ;;  %v20959_v32 = vld [vmem:[%s26549_s10 + $0x80] sm:$0x3f] }
 0x525   : > { %20948 = vmatprep.subr.msk.mxu1 %vm1642_vm2, %v886_v53  ;;  %v20947_v53 = vld [vmem:[%s26549_s10 + $0x68] sm:$0x3f]  ;;  %v26565_v2 = vld [vmem:[#allocation8_spill] sm:$0xff] }
 0x526   : > { %v20963_v27 = vld [vmem:[%s26549_s10 + $0x88] sm:$0x3f] }
 0x52b   : > { %20946 = vmatmul.mubr.msk.f32.vlgmr.msra.gmra.mrb[8].mxu1 %vm1638_vm4, %v20943_v22  ;;  %v26564_v22 = vld [vmem:[#allocation5_spill] sm:$0xff] }
 0x52c   : > { %20949 = vmatpush1.msk.msra.mxu1 %vm1642_vm2, %v885_v6  ;;  %7251 = vmatprep.mubr.f32.mxu1 %v26506_v60  ;;  %v26559_v6 = vld [vmem:[#allocation38_spill] sm:$0xff] }
 0x52d   : > { %20952 = vmatprep.subr.msk.mxu1 %vm1642_vm2, %v908_v37  ;;  %v20951_v37 = vld [vmem:[%s26549_s10 + $0x70] sm:$0x3f] }
 0x533   : > { %20950 = vmatmul.mubr.msk.f32.vlgmr.msra.gmra.mrb[8].mxu1 %vm1638_vm4, %v20947_v53  ;;  %v1020_v53 = vpop.permute.xlu1 %1019 }
 0x534   : > { %20953 = vmatpush1.msk.msra.mxu1 %vm1642_vm2, %v907_v51  ;;  %7335 = vmatprep.mubr.f32.mxu1 %v26506_v60  ;;  %v20664_v51 = vld [vmem:[%s26470_s25 + $0x28] sm:$0x3] }
 0x535   : > { %20956 = vmatprep.subr.msk.mxu1 %vm1642_vm2, %v26559_v6 }
 0x53b   : > { %20954 = vmatmul.mubr.msk.f32.vlgmr.msra.gmra.mrb[8].mxu1 %vm1638_vm4, %v20951_v37  ;;  %v1036_v37 = vrot.slane %v20664_v51, %v22272_v9 }
 0x53c   : > { %20957 = vmatpush1.msk.msra.mxu1 %vm1642_vm2, %v26560_v29  ;;  %7413 = vmatprep.mubr.f32.mxu1 %v26506_v60 }
 0x53d   : > { %20960 = vmatprep.subr.msk.mxu1 %vm1642_vm2, %v26561_v30  ;;  %v20971_v30 = vld [vmem:[%s26549_s10 + $0x98] sm:$0x3f] }
 0x543   : > { %20958 = vmatmul.mubr.msk.f32.vlgmr.msra.gmra.mrb[8].mxu1 %vm1638_vm4, %v20955_v11  ;;  %v1022_v11 = vpop.permute.xlu0 %1021 }
 0x544   : > { %20961 = vmatpush1.msk.msra.mxu1 %vm1642_vm2, %v26562_v12  ;;  %7491 = vmatprep.mubr.f32.mxu1 %v26506_v60 }
 0x545   : > { %20964 = vmatprep.subr.msk.mxu1 %vm1642_vm2, %v26563_v35  ;;  %v1032_v35 = vrot.slane %v20664_v51, %v22270_v8 }
 0x54b   : > { %20962 = vmatmul.mubr.msk.f32.vlgmr.msra.gmra.mrb[8].mxu1 %vm1638_vm4, %v20959_v32  ;;  %v1024_v32 = vsel %vm1023_vm15, %v1020_v53, %v1022_v11 }
 0x54c   : > { %20965 = vmatpush1.msk.msra.mxu1 %vm1642_vm2, %v26564_v22  ;;  %7569 = vmatprep.mubr.f32.mxu1 %v26506_v60  ;;  %v1042_v22 = vpop.permute.xlu1 %1041 }
 0x54d   : > { %20968 = vmatprep.subr.msk.mxu1 %vm1642_vm2, %v26565_v2  ;;  %v1040_v2 = vmul.f32 %v1036_v37, %v1024_v32  ;;  %v1025_v37 = vsel %vm1023_vm15, %v1022_v11, %v1020_v53  ;;  %vm1177_vm15 = vcmp.lt.s32.totalorder %v22268_v7, 115 }
 0x54e   : > { %v1039_v12 = vmul.f32 %v1032_v35, %v1025_v37  ;;  %v20975_v35 = vld [vmem:[%s26549_s10 + $0xa0] sm:$0x3f]  ;;  %v20995_v37 = vld [vmem:[%s26549_s10 + $0xc8] sm:$0x3f] }
 0x553   : > { %20966 = vmatmul.mubr.msk.f32.vlgmr.msra.gmra.mrb[8].mxu1 %vm1638_vm4, %v20963_v27  ;;  %v20967_v27 = vld [vmem:[%s26549_s10 + $0x90] sm:$0x3f] }
 0x554   : > { %20969 = vmatpush1.msk.msra.mxu1 %vm1642_vm2, %v22356_v42  ;;  %7647 = vmatprep.mubr.f32.mxu1 %v26506_v60  ;;  %v20665_v42 = vld [vmem:[%s26470_s25 + $0x2a] sm:$0x3] }
 0x555   : > { %20972 = vmatprep.subr.msk.mxu1 %vm1642_vm2, %v23010_v50  ;;  %v1044_v50 = vpop.permute.xlu0 %1043  ;;  %v1058_v32 = vrot.slane %v20665_v42, %v22272_v9  ;;  %v1054_v51 = vrot.slane %v20665_v42, %v22270_v8  ;;  %v20979_v42 = vld [vmem:[%s26549_s10 + $0xa8] sm:$0x3f] }
 0x55b   : > { %20970 = vmatmul.mubr.msk.f32.vlgmr.msra.gmra.mrb[8].mxu1 %vm1638_vm4, %v20967_v27  ;;  %v1046_v27 = vsel %vm1045_vm11, %v1042_v22, %v1044_v50 }
 0x55c   : > { %20973 = vmatpush1.msk.msra.mxu1 %vm1642_vm2, %v23043_v25  ;;  %7725 = vmatprep.mubr.f32.mxu1 %v26506_v60  ;;  %v1062_v25 = vmul.f32 %v1058_v32, %v1046_v27  ;;  %v20671_v27 = vld [vmem:[%s26470_s25 + $0x38] sm:$0x3] }
 0x55d   : > { %20976 = vmatprep.subr.msk.mxu1 %vm1642_vm2, %v1040_v2  ;;  %v1047_v2 = vsel %vm1045_vm11, %v1044_v50, %v1042_v22  ;;  %v20983_v50 = vld [vmem:[%s26549_s10 + $0xb0] sm:$0x3f]  ;;  %v1154_v22 = vpop.permute.xlu0 %1153  ;;  %vm1309_vm11 = vcmp.lt.s32.totalorder %v22268_v7, 109 }
 0x55e   : > { %v1061_v53 = vmul.f32 %v1054_v51, %v1047_v2 }
 0x561   : > { %v1176_v2 = vpop.permute.xlu0 %1175 }
 0x563   : > { %20974 = vmatmul.mubr.msk.f32.vlgmr.msra.gmra.mrb[8].mxu1 %vm1638_vm4, %v20971_v30  ;;  %v20991_v30 = vld [vmem:[%s26549_s10 + $0xc0] sm:$0x3f] }
 0x564   : > { %20977 = vmatpush1.msk.msra.mxu1 %vm1642_vm2, %v1039_v12  ;;  %7809 = vmatprep.mubr.f32.mxu1 %v26506_v60 }
 0x565   : > { %20980 = vmatprep.subr.msk.mxu1 %vm1642_vm2, %v1062_v25  ;;  %v20987_v25 = vld [vmem:[%s26549_s10 + $0xb8] sm:$0x3f] }
 0x56b   : > { %20978 = vmatmul.mubr.msk.f32.vlgmr.msra.gmra.mrb[8].mxu1 %vm1638_vm4, %v20975_v35 }
 0x56c   : > { %20981 = vmatpush1.msk.msra.mxu1 %vm1642_vm2, %v1061_v53  ;;  %7893 = vmatprep.mubr.f32.mxu1 %v26506_v60 }
 0x56d   : > { %20984 = vmatprep.subr.msk.mxu1 %vm1642_vm2, %v23049_v41 }
 0x573   : > { %20982 = vmatmul.mubr.msk.f32.vlgmr.msra.gmra.mrb[8].mxu1 %vm1638_vm4, %v20979_v42  ;;  %v1190_v42 = vrot.slane %v20671_v27, %v22272_v9 }
 0x574   : > { %20985 = vmatpush1.msk.msra.mxu1 %vm1642_vm2, %v23065_v48  ;;  %7971 = vmatprep.mubr.f32.mxu1 %v26506_v60 }
 0x575   : > { %20988 = vmatprep.subr.msk.mxu1 %vm1642_vm2, %v22362_v44 }
 0x57b   : > { %20986 = vmatmul.mubr.msk.f32.vlgmr.msra.gmra.mrb[8].mxu1 %vm1638_vm4, %v20983_v50 }
 0x57c   : > { %20989 = vmatpush1.msk.msra.mxu1 %vm1642_vm2, %v22376_v47  ;;  %8049 = vmatprep.mubr.f32.mxu1 %v26506_v60 }
 0x57d   : > { %20992 = vmatprep.subr.msk.mxu1 %vm1642_vm2, %v23409_v24  ;;  %v20670_v24 = vld [vmem:[%s26470_s25 + $0x36] sm:$0x3] }
 0x57e   : > { %v1168_v12 = vrot.slane %v20670_v24, %v22272_v9  ;;  %v1164_v53 = vrot.slane %v20670_v24, %v22270_v8 }
 0x583   : > { %20990 = vmatmul.mubr.msk.f32.vlgmr.msra.gmra.mrb[8].mxu1 %vm1638_vm4, %v20987_v25 }
 0x584   : > { %20993 = vmatpush1.msk.msra.mxu1 %vm1642_vm2, %v23405_v57  ;;  %8127 = vmatprep.mubr.f32.mxu1 %v26506_v60  ;;  %v1152_v57 = vpop.permute.xlu1 %1151 }
 0x585   : > { %20996 = vmatprep.subr.msk.mxu1 %vm1642_vm2, %v22400_v55  ;;  %v1157_v11 = vsel %vm1155_vm10, %v1154_v22, %v1152_v57  ;;  %v1156_v35 = vsel %vm1155_vm10, %v1152_v57, %v1154_v22  ;;  %v1186_v57 = vrot.slane %v20671_v27, %v22270_v8  ;;  %v21007_v27 = vld [vmem:[%s26549_s10 + $0xe0] sm:$0x3f]  ;;  %vm1331_vm10 = vcmp.lt.s32.totalorder %v22268_v7, 99 }
 0x586   : > { %v1172_v32 = vmul.f32 %v1168_v12, %v1157_v11  ;;  %v1171_v25 = vmul.f32 %v1164_v53, %v1156_v35  ;;  %v21019_v53 = vld [vmem:[%s26549_s10 + $0xf8] sm:$0x3f]  ;;  %v20677_v35 = vld [vmem:[%s26470_s25 + $0x44] sm:$0x3] }
 0x588   : > { %v1174_v51 = vpop.permute.xlu1 %1173 }
 0x589   : > { %v1179_v50 = vsel %vm1177_vm15, %v1176_v2, %v1174_v51  ;;  %v1178_v22 = vsel %vm1177_vm15, %v1174_v51, %v1176_v2  ;;  %v21011_v51 = vld [vmem:[%s26549_s10 + $0xe8] sm:$0x3f]  ;;  %v21015_v2 = vld [vmem:[%s26549_s10 + $0xf0] sm:$0x3f]  ;;  %vm1463_vm15 = vcmp.lt.s32.totalorder %v22268_v7, 93 }
 0x58a   : > { %v1194_v12 = vmul.f32 %v1190_v42, %v1179_v50  ;;  %v1322_v50 = vrot.slane %v20677_v35, %v22272_v9 }
 0x58b   : > { %20994 = vmatmul.mubr.msk.f32.vlgmr.msra.gmra.mrb[8].mxu1 %vm1638_vm4, %v20991_v30  ;;  %v20999_v30 = vld [vmem:[%s26549_s10 + $0xd0] sm:$0x3f] }
 0x58c   : > { %20997 = vmatpush1.msk.msra.mxu1 %vm1642_vm2, %v22423_v63  ;;  %8205 = vmatprep.mubr.f32.mxu1 %v26506_v60  ;;  %v1306_v42 = vpop.permute.xlu1 %1305 }
 0x58d   : > { %21000 = vmatprep.subr.msk.mxu1 %vm1642_vm2, %v23109_v58 }
 0x593   : > { %20998 = vmatmul.mubr.msk.f32.vlgmr.msra.gmra.mrb[8].mxu1 %vm1638_vm4, %v20995_v37  ;;  %v1193_v37 = vmul.f32 %v1186_v57, %v1178_v22  ;;  %v20678_v22 = vld [vmem:[%s26470_s25 + $0x46] sm:$0x3] }
 0x594   : > { %21001 = vmatpush1.msk.msra.mxu1 %vm1642_vm2, %v23136_v18  ;;  %8283 = vmatprep.mubr.f32.mxu1 %v26506_v60 }
 0x595   : > { %21004 = vmatprep.subr.msk.mxu1 %vm1642_vm2, %v1172_v32  ;;  %v21003_v32 = vld [vmem:[%s26549_s10 + $0xd8] sm:$0x3f] }
 0x59a   : > { %v23926_v11 = vpop.f32.mrb[6].mxu1 }
 0x59b   : > { %v23928_v24 = vpop.f32.mrb[7].mxu1  ;;  %21002 = vmatmul.mubr.msk.f32.vlgmr.msra.gmra.mrb[8].mxu1 %vm1638_vm4, %v20999_v30 }
 0x59c   : > { %26566 = vst [vmem:[#allocation25_spill] sm:$0xff] %v23928_v24  ;;  %21005 = vmatpush1.msk.msra.mxu1 %vm1642_vm2, %v1171_v25  ;;  %8367 = vmatprep.mubr.f32.mxu1 %v26506_v60  ;;  %v1308_v25 = vpop.permute.xlu0 %1307 }
 0x59d   : > { %21008 = vmatprep.subr.msk.mxu1 %vm1642_vm2, %v1194_v12  ;;  %v1311_v30 = vsel %vm1309_vm11, %v1308_v25, %v1306_v42  ;;  %v21023_v12 = vld [vmem:[%s26549_s10 + $0x100] sm:$0x3f] }
 0x59e   : > { %v1326_v57 = vmul.f32 %v1322_v50, %v1311_v30 }
 0x5a3   : > { %21006 = vmatmul.mubr.msk.f32.vlgmr.msra.gmra.mrb[8].mxu1 %vm1638_vm4, %v21003_v32  ;;  %v1330_v32 = vpop.permute.xlu0 %1329 }
 0x5a4   : > { %21009 = vmatpush1.msk.msra.mxu1 %vm1642_vm2, %v1193_v37  ;;  %8451 = vmatprep.mubr.f32.mxu1 %v26506_v60  ;;  %v1328_v37 = vpop.permute.xlu1 %1327 }
 0x5a5   : > { %21012 = vmatprep.subr.msk.mxu1 %vm1642_vm2, %v23142_v33  ;;  %v1333_v50 = vsel %vm1331_vm10, %v1330_v32, %v1328_v37 }
 0x5ab   : > { %21010 = vmatmul.mubr.msk.f32.vlgmr.msra.gmra.mrb[8].mxu1 %vm1638_vm4, %v21007_v27  ;;  %v10080_v27 = vld [vmem:[%s26567_s11] sm:$0x3f]  ;;  %s26592_s11 = smov 126  }
 0x5ac   : > { %21013 = vmatpush1.msk.msra.mxu1 %vm1642_vm2, %v23158_v26  ;;  %8529 = vmatprep.mubr.f32.mxu1 %v26506_v60 }
 0x5ad   : > { %21016 = vmatprep.subr.msk.mxu1 %vm1642_vm2, %v22429_v4  ;;  %10083 = vperm.xlu1 %22045, %v10080_v27   ;;  %v20684_v27 = vld [vmem:[%s26470_s25 + $0x52] sm:$0x3] }
 0x5b3   : > { %21014 = vmatmul.mubr.msk.f32.vlgmr.msra.gmra.mrb[8].mxu1 %vm1638_vm4, %v21011_v51  ;;  %v1318_v51 = vrot.slane %v20677_v35, %v22270_v8  ;;  %v1340_v35 = vrot.slane %v20678_v22, %v22270_v8 }
 0x5b4   : > { %21017 = vmatpush1.msk.msra.mxu1 %vm1642_vm2, %v22452_v19  ;;  %8607 = vmatprep.mubr.f32.mxu1 %v26506_v60 }
 0x5b5   : > { %21020 = vmatprep.subr.msk.mxu1 %vm1642_vm2, %v22458_v21 }
 0x5bb   : > { %21018 = vmatmul.mubr.msk.f32.vlgmr.msra.gmra.mrb[8].mxu1 %vm1638_vm4, %v21015_v2  ;;  %v1310_v2 = vsel %vm1309_vm11, %v1306_v42, %v1308_v25  ;;  %v1332_v42 = vsel %vm1331_vm10, %v1328_v37, %v1330_v32  ;;  %v21043_v37 = vld [vmem:[%s26549_s10 + $0x128] sm:$0x3f]  ;;  %v21047_v32 = vld [vmem:[%s26549_s10 + $0x130] sm:$0x3f]  ;;  %vm1485_vm11 = vcmp.lt.s32.totalorder %v22268_v7, 83  ;;  %vm1507_vm10 = vcmp.lt.s32.totalorder %v22268_v7, 82 }
 0x5bc   : > { %21021 = vmatpush1.msk.msra.mxu1 %vm1642_vm2, %v22481_v34  ;;  %8685 = vmatprep.mubr.f32.mxu1 %v26506_v60  ;;  %v1325_v30 = vmul.f32 %v1318_v51, %v1310_v2  ;;  %v1347_v25 = vmul.f32 %v1340_v35, %v1332_v42  ;;  %v1460_v51 = vpop.permute.xlu1 %1459  ;;  %v1462_v2 = vpop.permute.xlu0 %1461  ;;  %v21051_v35 = vld [vmem:[%s26549_s10 + $0x138] sm:$0x3f] }
 0x5bd   : > { %21024 = vmatprep.subr.msk.mxu1 %vm1642_vm2, %v22487_v38 }
 0x5c3   : > { %21022 = vmatmul.mubr.msk.f32.vlgmr.msra.gmra.mrb[8].mxu1 %vm1638_vm4, %v21019_v53  ;;  %v1344_v53 = vrot.slane %v20678_v22, %v22272_v9  ;;  %v21035_v22 = vld [vmem:[%s26549_s10 + $0x118] sm:$0x3f] }
 0x5c4   : > { %21025 = vmatpush1.msk.msra.mxu1 %vm1642_vm2, %v22501_v43  ;;  %8763 = vmatprep.mubr.f32.mxu1 %v26506_v60 }
 0x5c5   : > { %21028 = vmatprep.subr.msk.mxu1 %vm1642_vm2, %v23202_v20  ;;  %v1348_v24 = vmul.f32 %v1344_v53, %v1333_v50  ;;  %v26568_v53 = vld [vmem:[#allocation65_spill] sm:$0xff]  ;;  %v26569_v50 = vld [vmem:[#allocation44_spill] sm:$0xff] }
 0x5cb   : > { %21026 = vmatmul.mubr.msk.f32.vlgmr.msra.gmra.mrb[8].mxu1 %vm1638_vm4, %v21023_v12  ;;  %v21027_v12 = vld [vmem:[%s26549_s10 + $0x108] sm:$0x3f] }
 0x5cc   : > { %21029 = vmatpush1.msk.msra.mxu1 %vm1642_vm2, %v23229_v1  ;;  %8841 = vmatprep.mubr.f32.mxu1 %v26506_v60 }
 0x5cd   : > { %21032 = vmatprep.subr.msk.mxu1 %vm1642_vm2, %v1326_v57  ;;  %v21031_v57 = vld [vmem:[%s26549_s10 + $0x110] sm:$0x3f] }
 0x5d3   : > { %21030 = vmatmul.mubr.msk.f32.vlgmr.msra.gmra.mrb[8].mxu1 %vm1638_vm4, %v21027_v12  ;;  %v1465_v12 = vsel %vm1463_vm15, %v1462_v2, %v1460_v51 }
 0x5d4   : > { %21033 = vmatpush1.msk.msra.mxu1 %vm1642_vm2, %v1325_v30  ;;  %8925 = vmatprep.mubr.f32.mxu1 %v26506_v60  ;;  %v1476_v30 = vrot.slane %v20684_v27, %v22272_v9 }
 0x5d5   : > { %21036 = vmatprep.subr.msk.mxu1 %vm1642_vm2, %v1348_v24  ;;  %v21039_v24 = vld [vmem:[%s26549_s10 + $0x120] sm:$0x3f] }
 0x5d6   : > { %v1480_v42 = vmul.f32 %v1476_v30, %v1465_v12 }
 0x5db   : > { %21034 = vmatmul.mubr.msk.f32.vlgmr.msra.gmra.mrb[8].mxu1 %vm1638_vm4, %v21031_v57  ;;  %v1482_v57 = vpop.permute.xlu1 %1481 }
 0x5dc   : > { %21037 = vmatpush1.msk.msra.mxu1 %vm1642_vm2, %v1347_v25  ;;  %9009 = vmatprep.mubr.f32.mxu1 %v26506_v60  ;;  %v20685_v25 = vld [vmem:[%s26470_s25 + $0x54] sm:$0x3] }
 0x5dd   : > { %21040 = vmatprep.subr.msk.mxu1 %vm1642_vm2, %v23235_v3  ;;  %v1498_v30 = vrot.slane %v20685_v25, %v22272_v9 }
 0x5e3   : > { %21038 = vmatmul.mubr.msk.f32.vlgmr.msra.gmra.mrb[8].mxu1 %vm1638_vm4, %v21035_v22  ;;  %v1484_v22 = vpop.permute.xlu0 %1483 }
 0x5e4   : > { %21041 = vmatpush1.msk.msra.mxu1 %vm1642_vm2, %v23262_v56  ;;  %9087 = vmatprep.mubr.f32.mxu1 %v26506_v60  ;;  %v1487_v12 = vsel %vm1485_vm11, %v1484_v22, %v1482_v57 }
 0x5e5   : > { %21044 = vmatprep.subr.msk.mxu1 %vm1642_vm2, %v23268_v46 }
 0x5eb   : > { %21042 = vmatmul.mubr.msk.f32.vlgmr.msra.gmra.mrb[8].mxu1 %vm1638_vm4, %v21039_v24  ;;  %v26570_v24 = vld [vmem:[#allocation45_spill] sm:$0xff] }
 0x5ec   : > { %21045 = vmatpush1.msk.msra.mxu1 %vm1642_vm2, %v23295_v62  ;;  %9165 = vmatprep.mubr.f32.mxu1 %v26506_v60 }
 0x5ed   : > { %21048 = vmatprep.subr.msk.mxu1 %vm1642_vm2, %v23301_v49 }
 0x5f3   : > { %21046 = vmatmul.mubr.msk.f32.vlgmr.msra.gmra.mrb[8].mxu1 %vm1638_vm4, %v21043_v37  ;;  %v1472_v37 = vrot.slane %v20684_v27, %v22270_v8  ;;  %v20686_v27 = vld [vmem:[%s26470_s25 + $0x56] sm:$0x3] }
 0x5f4   : > { %21049 = vmatpush1.msk.msra.mxu1 %vm1642_vm2, %v23328_v23  ;;  %9243 = vmatprep.mubr.f32.mxu1 %v26506_v60 }
 0x5f5   : > { %21052 = vmatprep.subr.msk.mxu1 %vm1642_vm2, %v23334_v54 }
 0x5fb   : > { %21050 = vmatmul.mubr.msk.f32.vlgmr.msra.gmra.mrb[8].mxu1 %vm1638_vm4, %v21047_v32  ;;  %v1464_v32 = vsel %vm1463_vm15, %v1460_v51, %v1462_v2  ;;  %v1504_v51 = vpop.permute.xlu1 %1503  ;;  %v1506_v2 = vpop.permute.xlu0 %1505  ;;  %vm1529_vm15 = vcmp.lt.s32.totalorder %v22268_v7, 81 }
 0x5fc   : > { %21053 = vmatpush1.msk.msra.mxu1 %vm1642_vm2, %v26568_v53  ;;  %9321 = vmatprep.mubr.f32.mxu1 %v26506_v60 }
 0x5fd   : > { %21056 = vmatprep.subr.msk.mxu1 %vm1642_vm2, %v26569_v50  ;;  %v21055_v50 = vld [vmem:[%s26549_s10 + $0x140] sm:$0x3f] }
 0x603   : > { %21054 = vmatmul.mubr.msk.f32.vlgmr.msra.gmra.mrb[8].mxu1 %vm1638_vm4, %v21051_v35  ;;  %v1479_v35 = vmul.f32 %v1472_v37, %v1464_v32  ;;  %v1486_v37 = vsel %vm1485_vm11, %v1482_v57, %v1484_v22  ;;  %v1520_v32 = vrot.slane %v20686_v27, %v22272_v9  ;;  %v1526_v57 = vpop.permute.xlu1 %1525  ;;  %v1528_v22 = vpop.permute.xlu0 %1527  ;;  %vm1551_vm11 = vcmp.lt.s32.totalorder %v22268_v7, 80 }
 0x604   : > { %21057 = vmatpush1.msk.msra.mxu1 %vm1642_vm2, %v26570_v24  ;;  %9399 = vmatprep.mubr.f32.mxu1 %v26506_v60  ;;  %v1502_v24 = vmul.f32 %v1498_v30, %v1487_v12  ;;  %v21059_v12 = vld [vmem:[%s26549_s10 + $0x148] sm:$0x3f] }
 0x605   : > { %21060 = vmatprep.subr.msk.mxu1 %vm1642_vm2, %v1480_v42  ;;  %v1494_v42 = vrot.slane %v20685_v25, %v22270_v8  ;;  %v20687_v25 = vld [vmem:[%s26470_s25 + $0x58] sm:$0x3] }
 0x607   : > { %v1501_v30 = vmul.f32 %v1494_v42, %v1486_v37  ;;  %v1508_v42 = vsel %vm1507_vm10, %v1504_v51, %v1506_v2  ;;  %v1542_v37 = vrot.slane %v20687_v25, %v22272_v9 }
 0x60b   : > { %21058 = vmatmul.mubr.msk.f32.vlgmr.msra.gmra.mrb[8].mxu1 %vm1638_vm4, %v21055_v50  ;;  %v1509_v50 = vsel %vm1507_vm10, %v1506_v2, %v1504_v51  ;;  %v1548_v51 = vpop.permute.xlu1 %1547  ;;  %v1550_v2 = vpop.permute.xlu0 %1549  ;;  %vm1573_vm10 = vcmp.lt.s32.totalorder %v22268_v7, 79 }
 0x60c   : > { %21061 = vmatpush1.msk.msra.mxu1 %vm1642_vm2, %v1479_v35  ;;  %9483 = vmatprep.mubr.f32.mxu1 %v26506_v60  ;;  %v1524_v35 = vmul.f32 %v1520_v32, %v1509_v50  ;;  %v1531_v32 = vsel %vm1529_vm15, %v1528_v22, %v1526_v57 }
 0x60d   : > { %21064 = vmatprep.subr.msk.mxu1 %vm1642_vm2, %v1502_v24  ;;  %v1516_v24 = vrot.slane %v20686_v27, %v22270_v8  ;;  %v20688_v27 = vld [vmem:[%s26470_s25 + $0x5a] sm:$0x3] }
 0x60f   : > { %v1523_v50 = vmul.f32 %v1516_v24, %v1508_v42  ;;  %v1530_v24 = vsel %vm1529_vm15, %v1526_v57, %v1528_v22  ;;  %v1564_v42 = vrot.slane %v20688_v27, %v22272_v9  ;;  %v1570_v57 = vpop.permute.xlu1 %1569  ;;  %v1572_v22 = vpop.permute.xlu0 %1571  ;;  %vm1595_vm15 = vcmp.lt.s32.totalorder %v22268_v7, 78 }
 0x613   : > { %21062 = vmatmul.mubr.msk.f32.vlgmr.msra.gmra.mrb[8].mxu1 %vm1638_vm4, %v21059_v12  ;;  %v21063_v12 = vld [vmem:[%s26549_s10 + $0x150] sm:$0x3f] }
 0x614   : > { %21065 = vmatpush1.msk.msra.mxu1 %vm1642_vm2, %v1501_v30  ;;  %9567 = vmatprep.mubr.f32.mxu1 %v26506_v60  ;;  %v1546_v30 = vmul.f32 %v1542_v37, %v1531_v32  ;;  %v1553_v37 = vsel %vm1551_vm11, %v1550_v2, %v1548_v51 }
 0x615   : > { %21068 = vmatprep.subr.msk.mxu1 %vm1642_vm2, %v1524_v35  ;;  %v1538_v35 = vrot.slane %v20687_v25, %v22270_v8  ;;  %v20689_v25 = vld [vmem:[%s26470_s25 + $0x5c] sm:$0x3] }
 0x617   : > { %v1545_v32 = vmul.f32 %v1538_v35, %v1530_v24  ;;  %v1552_v35 = vsel %vm1551_vm11, %v1548_v51, %v1550_v2  ;;  %v1586_v24 = vrot.slane %v20689_v25, %v22272_v9  ;;  %v1592_v51 = vpop.permute.xlu1 %1591  ;;  %v1594_v2 = vpop.permute.xlu0 %1593  ;;  %vm1617_vm11 = vcmp.lt.s32.totalorder %v22268_v7, 77 }
 0x61b   : > { %21066 = vmatmul.mubr.msk.f32.vlgmr.msra.gmra.mrb[8].mxu1 %vm1638_vm4, %v21063_v12  ;;  %v21067_v12 = vld [vmem:[%s26549_s10 + $0x158] sm:$0x3f] }
 0x61c   : > { %21069 = vmatpush1.msk.msra.mxu1 %vm1642_vm2, %v1523_v50  ;;  %9651 = vmatprep.mubr.f32.mxu1 %v26506_v60  ;;  %v1568_v50 = vmul.f32 %v1564_v42, %v1553_v37  ;;  %v1575_v42 = vsel %vm1573_vm10, %v1572_v22, %v1570_v57 }
 0x61d   : > { %21072 = vmatprep.subr.msk.mxu1 %vm1642_vm2, %v1546_v30  ;;  %v1560_v30 = vrot.slane %v20688_v27, %v22270_v8  ;;  %v20690_v27 = vld [vmem:[%s26470_s25 + $0x5e] sm:$0x3] }
 0x61f   : > { %v1567_v37 = vmul.f32 %v1560_v30, %v1552_v35  ;;  %v1574_v30 = vsel %vm1573_vm10, %v1570_v57, %v1572_v22  ;;  %v1608_v35 = vrot.slane %v20690_v27, %v22272_v9  ;;  %v1614_v57 = vpop.permute.xlu1 %1613  ;;  %v1616_v22 = vpop.permute.xlu0 %1615 }
 0x623   : > { %21070 = vmatmul.mubr.msk.f32.vlgmr.msra.gmra.mrb[8].mxu1 %vm1638_vm4, %v21067_v12  ;;  %v21071_v12 = vld [vmem:[%s26549_s10 + $0x160] sm:$0x3f] }
 0x624   : > { %21073 = vmatpush1.msk.msra.mxu1 %vm1642_vm2, %v1545_v32  ;;  %9735 = vmatprep.mubr.f32.mxu1 %v26506_v60  ;;  %v1590_v32 = vmul.f32 %v1586_v24, %v1575_v42  ;;  %v1597_v24 = vsel %vm1595_vm15, %v1594_v2, %v1592_v51 }
 0x625   : > { %21076 = vmatprep.subr.msk.mxu1 %vm1642_vm2, %v1568_v50  ;;  %v1582_v50 = vrot.slane %v20689_v25, %v22270_v8  ;;  %v20691_v25 = vld [vmem:[%s26470_s25 + $0x60] sm:$0x3]  ;;  %s26601_s25 = smov 98  }
 0x627   : > { %v1589_v42 = vmul.f32 %v1582_v50, %v1574_v30  ;;  %v1596_v50 = vsel %vm1595_vm15, %v1592_v51, %v1594_v2  ;;  %v1630_v30 = vrot.slane %v20691_v25, %v22272_v9  ;;  %v1618_v9 = vsel %vm1617_vm11, %v1614_v57, %v1616_v22  ;;  %v21083_v2 = vld [vmem:[%s26549_s10 + $0x178] sm:$0x3f] }
 0x62b   : > { %21074 = vmatmul.mubr.msk.f32.vlgmr.msra.gmra.mrb[8].mxu1 %vm1638_vm4, %v21071_v12  ;;  %v21075_v12 = vld [vmem:[%s26549_s10 + $0x168] sm:$0x3f] }
 0x62c   : > { %21077 = vmatpush1.msk.msra.mxu1 %vm1642_vm2, %v1567_v37  ;;  %9819 = vmatprep.mubr.f32.mxu1 %v26506_v60  ;;  %v1612_v37 = vmul.f32 %v1608_v35, %v1597_v24  ;;  %v1619_v35 = vsel %vm1617_vm11, %v1616_v22, %v1614_v57 }
 0x62d   : > { %21080 = vmatprep.subr.msk.mxu1 %vm1642_vm2, %v1590_v32  ;;  %v1604_v32 = vrot.slane %v20690_v27, %v22270_v8  ;;  %v1626_v27 = vrot.slane %v20691_v25, %v22270_v8  ;;  %v21087_v8 = vld [vmem:[%s26549_s10 + $0x180] sm:$0x3f] }
 0x62f   : > { %v1611_v24 = vmul.f32 %v1604_v32, %v1596_v50  ;;  %v1633_v51 = vmul.f32 %v1626_v27, %v1618_v9 }
 0x633   : > { %21078 = vmatmul.mubr.msk.f32.vlgmr.msra.gmra.mrb[8].mxu1 %vm1638_vm4, %v21075_v12  ;;  %v21079_v12 = vld [vmem:[%s26549_s10 + $0x170] sm:$0x3f]  ;;  %s26590_s10 = smov 2  }
 0x634   : > { %21081 = vmatpush1.msk.msra.mxu1 %vm1642_vm2, %v1589_v42  ;;  %9903 = vmatprep.mubr.f32.mxu1 %v26506_v60  ;;  %v1634_v42 = vmul.f32 %v1630_v30, %v1619_v35 }
 0x635   : > { %21084 = vmatprep.subr.msk.mxu1 %vm1642_vm2, %v1612_v37  ;;  %v10084_v37 = vpop.permute.xlu1 %10083 }
 0x63b   : > { %21082 = vmatmul.mubr.msk.f32.vlgmr.msra.gmra.mrb[8].mxu1 %vm1638_vm4, %v21079_v12  ;;  %v3217_v12 = vld [vmem:[%s26571_s5] sm:$0x3f]  ;;  %s26584_s5 = smov 30  }
 0x63c   : > { %21085 = vmatpush1.msk.msra.mxu1 %vm1642_vm2, %v1611_v24  ;;  %9987 = vmatprep.mubr.f32.mxu1 %v26506_v60 }
 0x63d   : > { %21088 = vmatprep.subr.msk.mxu1 %vm1642_vm2, %v1634_v42 }
 0x643   : > { %21086 = vmatmul.mubr.msk.f32.vlgmr.msra.gmra.mrb[8].mxu1 %vm1638_vm4, %v21083_v2 }
 0x644   : > { %21089 = vmatpush1.msk.msra.mxu1 %vm1642_vm2, %v1633_v51  ;;  %10071 = vmatprep.mubr.f32.mxu1 %v26506_v60 }
 0x64b   : > { %21090 = vmatmul.mubr.msk.f32.vlgmr.msra.gmra.mrb[8].mxu1 %vm1638_vm4, %v21087_v8 }
 0x64c   : > { %19894 = vmatprep.mubr.f32.mxu1 %v26506_v60 }
 0x71e   : > { %v10073_v25 = vpop.f32.mrb[8].mxu1 }
 0x71f   : > { %v10086_v57 = vadd.f32 %v10084_v37, %v10073_v25  ;;  %v10075_v22 = vpop.f32.mrb[9].mxu1  ;;  %v21091_v25 = vld [vmem:[%s26572_s12 + $0x8] sm:$0x3f] }
 0x720   : > { %v10087_v32 = vadd.f32 %v10084_v37, %v10075_v22 }
 0x721   : > { %vm10088_vm10 = vcmp.ge.f32.partialorder %v10086_v57, 0.0  ;;  %v10090_v50 = vmul.f32 0.2, %v10086_v57 }
 0x722   : > { %vm10089_vm15 = vcmp.ge.f32.partialorder %v10087_v32, 0.0  ;;  %v10091_v30 = vmul.f32 0.2, %v10087_v32 }
 0x723   : > { %v24211_v35 = vsel %vm10088_vm10, %v10086_v57, %v10090_v50 }
 0x724   : > { %v10093_v24 = vsel %vm10089_vm15, %v10087_v32, %v10091_v30  ;;  %10102 = vrot.lane.b32.xlu0 %v24211_v35, %s26543_s21 }
 0x725   : > { %10104 = vrot.lane.b32.xlu1 %v10093_v24, %s26543_s21 }
 0x728   : > { %10094 = vrot.lane.b32.xlu0 %v24211_v35, %s26544_s22 }
 0x729   : > { %10096 = vrot.lane.b32.xlu1 %v10093_v24, %s26544_s22 }
 0x72c   : > { %10110 = vrot.lane.b32.xlu0 %v24211_v35, %s26545_s30 }
 0x72d   : > { %10112 = vrot.lane.b32.xlu1 %v10093_v24, %s26545_s30 }
 0x730   : > { %10118 = vrot.lane.b32.xlu0 %v24211_v35, %s26546_s19 }
 0x731   : > { %10120 = vrot.lane.b32.xlu1 %v10093_v24, %s26546_s19 }
 0x734   : > { %10126 = vrot.lane.b32.xlu0 %v24211_v35, %s26547_s2 }
 0x735   : > { %10128 = vrot.lane.b32.xlu1 %v10093_v24, %s26547_s2 }
 0x738   : > { %10134 = vrot.lane.b32.xlu0 %v24211_v35, %s26486_s29 }
 0x739   : > { %10136 = vrot.lane.b32.xlu1 %v10093_v24, %s26486_s29 }
 0x73c   : > { %10142 = vrot.lane.b32.xlu0 %v24211_v35, %s26487_s24 }
 0x73d   : > { %10144 = vrot.lane.b32.xlu1 %v10093_v24, %s26487_s24 }
 0x740   : > { %10150 = vrot.lane.b32.xlu0 %v24211_v35, %s26488_s26 }
 0x741   : > { %10152 = vrot.lane.b32.xlu1 %v10093_v24, %s26488_s26 }
 0x744   : > { %3220 = vperm.xlu0 %22044, %v3217_v12  }
 0x796   : > { %v10103_v42 = vpop.permute.xlu0 %10102 }
 0x797   : > { %v10105_v27 = vpop.permute.xlu1 %10104 }
 0x798   : > { %v10106_v9 = vsel %vm957_vm1, %v10103_v42, %v10105_v27  ;;  %v10107_v51 = vsel %vm957_vm1, %v10105_v27, %v10103_v42 }
 0x799   : > { %v10108_v2 = vmul.f32 %v10107_v51, %v22286_v15  ;;  %v10109_v8 = vmul.f32 %v10106_v9, %v22289_v16 }
 0x79a   : > { %v10095_v37 = vpop.permute.xlu0 %10094 }
 0x79b   : > { %21092 = vmatprep.subr.msk.mxu0 %vm1642_vm2, %v10109_v8  ;;  %v10097_v57 = vpop.permute.xlu1 %10096  ;;  %v10158_v8 = vld [vmem:[%s26572_s12] sm:$0x3f] }
 0x79c   : > { %v10098_v22 = vsel %vm935_vm0, %v10095_v37, %v10097_v57  ;;  %v10099_v32 = vsel %vm935_vm0, %v10097_v57, %v10095_v37  ;;  %21093 = vmatpush1.msk.msra.mxu0 %vm1642_vm2, %v10108_v2 }
 0x79d   : > { %v10100_v50 = vmul.f32 %v10099_v32, %v22292_v17  ;;  %v10101_v30 = vmul.f32 %v10098_v22, %v22282_v14  ;;  %21094 = vmatmul.mubr.msk.f32.vlgmr.msra.gmra.mrb[2].mxu0 %vm1638_vm4, %v21091_v25 }
 0x79e   : > { %v10111_v12 = vpop.permute.xlu0 %10110  ;;  %10314 = vmatprep.mubr.f32.mxu0 %v26506_v60 }
 0x79f   : > { %21095 = vmatprep.subr.msk.mxu0 %vm1642_vm2, %v10101_v30  ;;  %v10113_v42 = vpop.permute.xlu1 %10112 }
 0x7a0   : > { %v10114_v27 = vsel %vm979_vm3, %v10111_v12, %v10113_v42  ;;  %21096 = vmatpush1.msk.msra.mxu0 %vm1642_vm2, %v10100_v50  ;;  %v10115_v9 = vsel %vm979_vm3, %v10113_v42, %v10111_v12  ;;  %v21098_v50 = vld [vmem:[%s26572_s12 + $0x10] sm:$0x3f] }
 0x7a1   : > { %v10117_v51 = vmul.f32 %v10114_v27, %v22316_v28  ;;  %v10116_v25 = vmul.f32 %v10115_v9, %v22343_v36  ;;  %v21102_v9 = vld [vmem:[%s26572_s12 + $0x18] sm:$0x3f] }
 0x7a2   : > { %v10119_v2 = vpop.permute.xlu0 %10118 }
 0x7a3   : > { %21099 = vmatprep.subr.msk.mxu0 %vm1642_vm2, %v10117_v51  ;;  %v10121_v37 = vpop.permute.xlu1 %10120 }
 0x7a4   : > { %v10122_v57 = vsel %vm1089_vm5, %v10119_v2, %v10121_v37  ;;  %v10123_v32 = vsel %vm1089_vm5, %v10121_v37, %v10119_v2 }
 0x7a5   : > { %v10125_v22 = vmul.f32 %v10122_v57, %v22351_v39  ;;  %21097 = vmatmul.mubr.msk.f32.vlgmr.msra.gmra.mrb[2].mxu0 %vm1638_vm4, %v10158_v8  ;;  %v10124_v30 = vmul.f32 %v10123_v32, %v22368_v45  ;;  %v21106_v57 = vld [vmem:[%s26572_s12 + $0x20] sm:$0x3f] }
 0x7a6   : > { %21100 = vmatpush1.msk.msra.mxu0 %vm1642_vm2, %v10116_v25  ;;  %10396 = vmatprep.mubr.f32.mxu0 %v26506_v60  ;;  %v10127_v12 = vpop.permute.xlu0 %10126 }
 0x7a7   : > { %21103 = vmatprep.subr.msk.mxu0 %vm1642_vm2, %v10125_v22  ;;  %v10129_v42 = vpop.permute.xlu1 %10128 }
 0x7a8   : > { %v10131_v27 = vsel %vm1111_vm6, %v10129_v42, %v10127_v12 }
 0x7a9   : > { %v10133_v2 = vmul.f32 %v10131_v27, %v22392_v52 }
 0x7aa   : > { %v10135_v51 = vpop.permute.xlu0 %10134 }
 0x7ab   : > { %v10137_v8 = vpop.permute.xlu1 %10136 }
 0x7ac   : > { %v10139_v25 = vsel %vm1221_vm7, %v10137_v8, %v10135_v51 }
 0x7ad   : > { %21101 = vmatmul.mubr.msk.f32.vlgmr.msra.gmra.mrb[2].mxu0 %vm1638_vm4, %v21098_v50 }
 0x7ae   : > { %21104 = vmatpush1.msk.msra.mxu0 %vm1642_vm2, %v10124_v30  ;;  %10480 = vmatprep.mubr.f32.mxu0 %v26506_v60  ;;  %v10143_v37 = vpop.permute.xlu0 %10142  ;;  %v10138_v30 = vsel %vm1221_vm7, %v10135_v51, %v10137_v8  ;;  %v24329_v8 = vld [vmem:[%s22225_s1 + $0x8] sm:$0x3f] }
 0x7af   : > { %21107 = vmatprep.subr.msk.mxu0 %vm1642_vm2, %v10093_v24  ;;  %v10130_v24 = vsel %vm1111_vm6, %v10127_v12, %v10129_v42  ;;  %v10145_v32 = vpop.permute.xlu1 %10144  ;;  %v21110_v42 = vld [vmem:[%s26572_s12 + $0x28] sm:$0x3f] }
 0x7b0   : > { %v10132_v22 = vmul.f32 %v10130_v24, %v22410_v59  ;;  %v10147_v12 = vsel %vm1243_vm8, %v10145_v32, %v10143_v37  ;;  %v26574_v24 = vld [vmem:[#allocation66_spill] sm:$0xff] }
 0x7b2   : > { %v10151_v50 = vpop.permute.xlu0 %10150 }
 0x7b5   : > { %21105 = vmatmul.mubr.msk.f32.vlgmr.msra.gmra.mrb[2].mxu0 %vm1638_vm4, %v21102_v9  ;;  %v26573_v9 = vld [vmem:[#allocation13_spill] sm:$0xff] }
 0x7b6   : > { %21108 = vmatpush1.msk.msra.mxu0 %vm1642_vm2, %v24211_v35  ;;  %10564 = vmatprep.mubr.f32.mxu0 %v26506_v60  ;;  %v10141_v35 = vmul.f32 %v10139_v25, %v22418_v61  ;;  %v26576_v61 = vld [vmem:[#allocation14_spill] sm:$0xff] }
 0x7b7   : > { %21111 = vmatprep.subr.msk.mxu0 %vm1642_vm2, %v10133_v2  ;;  %v10140_v2 = vmul.f32 %v10138_v30, %v26573_v9  ;;  %v10149_v59 = vmul.f32 %v10147_v12, %v26576_v61  ;;  %v10153_v30 = vpop.permute.xlu1 %10152 }
 0x7bd   : > { %21109 = vmatmul.mubr.msk.f32.vlgmr.msra.gmra.mrb[2].mxu0 %vm1638_vm4, %v21106_v57  ;;  %v26575_v57 = vld [vmem:[#allocation67_spill] sm:$0xff] }
 0x7be   : > { %21112 = vmatpush1.msk.msra.mxu0 %vm1642_vm2, %v10132_v22  ;;  %10648 = vmatprep.mubr.f32.mxu0 %v26506_v60 }
 0x7bf   : > { %21115 = vmatprep.subr.msk.mxu0 %vm1642_vm2, %v10141_v35  ;;  %v24325_v35 = vld [vmem:[%s22225_s1] sm:$0x3f] }
 0x7c3   : > { %v3221_v27 = vpop.permute.xlu0 %3220 }
 0x7c4   : > { %v3223_v25 = vadd.f32 %v3221_v27, %v26574_v24  ;;  %v3224_v22 = vadd.f32 %v3221_v27, %v26575_v57  ;;  %v10155_v24 = vsel %vm1265_vm9, %v10153_v30, %v10151_v50 }
 0x7c5   : > { %21113 = vmatmul.mubr.msk.f32.vlgmr.msra.gmra.mrb[2].mxu0 %vm1638_vm4, %v21110_v42  ;;  %v10146_v42 = vsel %vm1243_vm8, %v10143_v37, %v10145_v32  ;;  %v26579_v37 = vld [vmem:[#allocation16_spill] sm:$0xff] }
 0x7c6   : > { %v3225_v51 = vadd.f32 %v24325_v35, %v3223_v25  ;;  %v3226_v52 = vadd.f32 %v24329_v8, %v3224_v22  ;;  %21116 = vmatpush1.msk.msra.mxu0 %vm1642_vm2, %v10140_v2  ;;  %10732 = vmatprep.mubr.f32.mxu0 %v26506_v60  ;;  %v21114_v2 = vld [vmem:[%s26572_s12 + $0x30] sm:$0x3f]  ;;  %v10157_v32 = vmul.f32 %v10155_v24, %v26579_v37  ;;  %v21141_v24 = vld [vmem:[%s26246_s14 + $0x20] sm:$0x3f] }
 0x7c7   : > { %21119 = vmatprep.subr.msk.mxu0 %vm1642_vm2, %v10149_v59  ;;  %v26578_v59 = vld [vmem:[#allocation15_spill] sm:$0xff] }
 0x7c8   : > { %vm3227_vm11 = vcmp.ge.f32.partialorder %v3225_v51, 0.0  ;;  %vm3228_vm10 = vcmp.ge.f32.partialorder %v3226_v52, 0.0  ;;  %v3229_v12 = vmul.f32 0.2, %v3225_v51  ;;  %v3230_v27 = vmul.f32 0.2, %v3226_v52 }
 0x7c9   : > { %v10148_v22 = vmul.f32 %v10146_v42, %v26578_v59  ;;  %v26591_v42 = vld [vmem:[#allocation37_spill] sm:$0xff] }
 0x7ca   : > { %v24339_v25 = vsel %vm3227_vm11, %v3225_v51, %v3229_v12  ;;  %v24341_v57 = vsel %vm3228_vm10, %v3226_v52, %v3230_v27  ;;  %v10154_v52 = vsel %vm1265_vm9, %v10151_v50, %v10153_v30  ;;  %v21118_v51 = vld [vmem:[%s26572_s12 + $0x38] sm:$0x3f]  ;;  %v26582_v12 = vld [vmem:[#allocation17_spill] sm:$0xff]  ;;  %v21122_v50 = vld [vmem:[%s26572_s12 + $0x40] sm:$0x3f]  ;;  %s26594_s12 = smov 114  }
 0x7cb   : > { %12880 = vrot.lane.b32.xlu0 %v24341_v57, %s26577_s23  ;;  %12878 = vrot.lane.b32.xlu1 %v24339_v25, %s26577_s23  ;;  %v10156_v27 = vmul.f32 %v10154_v52, %v26582_v12  ;;  %v21137_v30 = vld [vmem:[%s26246_s14 + $0x18] sm:$0x3f]  ;;  %v21149_v52 = vld [vmem:[%s26246_s14 + $0x30] sm:$0x3f]  ;;  %vm26617_vm10 = vcmp.lt.s32.totalorder %v22268_v7, 31 }
 0x7cd   : > { %21117 = vmatmul.mubr.msk.f32.vlgmr.msra.gmra.mrb[2].mxu0 %vm1638_vm4, %v21114_v2  ;;  %v6103_v2 = vld [vmem:[%s26595_s9] sm:$0x3f]  ;;  %s26604_s9 = smov 97  }
 0x7ce   : > { %21120 = vmatpush1.msk.msra.mxu0 %vm1642_vm2, %v10148_v22  ;;  %10816 = vmatprep.mubr.f32.mxu0 %v26506_v60  ;;  %v21145_v22 = vld [vmem:[%s26246_s14 + $0x28] sm:$0x3f] }
 0x7cf   : > { %21123 = vmatprep.subr.msk.mxu0 %vm1642_vm2, %v10157_v32  ;;  %12872 = vrot.lane.b32.xlu0 %v24341_v57, %s26580_s20  ;;  %v26597_v32 = vld [vmem:[#allocation6_spill] sm:$0xff] }
 0x7d0   : > { %12870 = vrot.lane.b32.xlu1 %v24339_v25, %s26580_s20 }
 0x7d3   : > { %12888 = vrot.lane.b32.xlu0 %v24341_v57, %s26581_s3 }
 0x7d4   : > { %12886 = vrot.lane.b32.xlu1 %v24339_v25, %s26581_s3 }
 0x7d5   : > { %21121 = vmatmul.mubr.msk.f32.vlgmr.msra.gmra.mrb[2].mxu0 %vm1638_vm4, %v21118_v51  ;;  %v26598_v51 = vld [vmem:[#allocation5_spill] sm:$0xff] }
 0x7d6   : > { %21124 = vmatpush1.msk.msra.mxu0 %vm1642_vm2, %v10156_v27  ;;  %10900 = vmatprep.mubr.f32.mxu0 %v26506_v60  ;;  %v26599_v27 = vld [vmem:[#allocation8_spill] sm:$0xff] }
 0x7d7   : > { %21127 = vmatprep.subr.msk.mxu0 %vm1642_vm2, %v26551_v5  ;;  %12896 = vrot.lane.b32.xlu0 %v24341_v57, %s26583_s4  ;;  %v21126_v5 = vld [vmem:[%s26246_s14 + $0x8] sm:$0x3f] }
 0x7d8   : > { %12894 = vrot.lane.b32.xlu1 %v24339_v25, %s26583_s4 }
 0x7db   : > { %12904 = vrot.lane.b32.xlu0 %v24341_v57, %s26584_s5 }
 0x7dc   : > { %12902 = vrot.lane.b32.xlu1 %v24339_v25, %s26584_s5 }
 0x7dd   : > { %21125 = vmatmul.mubr.msk.f32.vlgmr.msra.gmra.mrb[2].mxu0 %vm1638_vm4, %v21122_v50  ;;  %v21153_v50 = vld [vmem:[%s26246_s14 + $0x38] sm:$0x3f] }
 0x7de   : > { %21128 = vmatpush1.msk.msra.mxu0 %vm1642_vm2, %v26552_v10  ;;  %10995 = vmatprep.mubr.f32.mxu0 %v26506_v60  ;;  %v21133_v10 = vld [vmem:[%s26246_s14 + $0x10] sm:$0x3f] }
 0x7df   : > { %21130 = vmatprep.subr.msk.mxu0 %vm1642_vm2, %v22780_v31  ;;  %12912 = vrot.lane.b32.xlu0 %v24341_v57, %s26585_s6  ;;  %v10925_v31 = vld [vmem:[%s26246_s14] sm:$0x3f] }
 0x7e0   : > { %12910 = vrot.lane.b32.xlu1 %v24339_v25, %s26585_s6 }
 0x7e1   : > { %21129 = vmatmul.mubr.msk.f32.vlgmr.msra.gmra.mrb[4].mxu0 %vm1638_vm4, %v21126_v5  ;;  %v26602_v5 = vld [vmem:[#allocation9_spill] sm:$0xff] }
 0x7e2   : > { %21131 = vmatpush1.msk.msra.mxu0 %vm1642_vm2, %v26550_v40  ;;  %11069 = vmatprep.mubr.f32.mxu0 %v26506_v60  ;;  %v26586_v40 = vld [vmem:[#allocation30_spill] sm:$0xff] }
 0x7e3   : > { %21134 = vmatprep.subr.msk.mxu0 %vm1642_vm2, %v26553_v13  ;;  %12920 = vrot.lane.b32.xlu0 %v24341_v57, %s26544_s22  ;;  %v26588_v13 = vld [vmem:[#allocation33_spill] sm:$0xff] }
 0x7e4   : > { %12918 = vrot.lane.b32.xlu1 %v24339_v25, %s26544_s22 }
 0x7e7   : > { %12928 = vrot.lane.b32.xlu0 %v24341_v57, %s26543_s21 }
 0x7e8   : > { %12926 = vrot.lane.b32.xlu1 %v24339_v25, %s26543_s21 }
 0x7e9   : > { %21132 = vmatmul.mubr.msk.f32.vlgmr.msra.gmra.mrb[4].mxu0 %vm1638_vm4, %v10925_v31  ;;  %v26603_v31 = vld [vmem:[#allocation46_spill] sm:$0xff] }
 0x7ea   : > { %21135 = vmatpush1.msk.msra.mxu0 %vm1642_vm2, %v26554_v0  ;;  %11145 = vmatprep.mubr.f32.mxu0 %v26506_v60  ;;  %v26589_v0 = vld [vmem:[#allocation34_spill] sm:$0xff] }
 0x7eb   : > { %21138 = vmatprep.subr.msk.mxu0 %vm1642_vm2, %v26586_v40  ;;  %12936 = vrot.lane.b32.xlu0 %v24341_v57, %s26545_s30  ;;  %v21157_v40 = vld [vmem:[%s26246_s14 + $0x40] sm:$0x3f] }
 0x7ec   : > { %12934 = vrot.lane.b32.xlu1 %v24339_v25, %s26545_s30 }
 0x7ef   : > { %12944 = vrot.lane.b32.xlu0 %v24341_v57, %s26587_s8 }
 0x7f0   : > { %12942 = vrot.lane.b32.xlu1 %v24339_v25, %s26587_s8 }
 0x7f1   : > { %21136 = vmatmul.mubr.msk.f32.vlgmr.msra.gmra.mrb[4].mxu0 %vm1638_vm4, %v21133_v10  ;;  %v26606_v10 = vld [vmem:[#allocation49_spill] sm:$0xff] }
 0x7f2   : > { %21139 = vmatpush1.msk.msra.mxu0 %vm1642_vm2, %v26588_v13  ;;  %11223 = vmatprep.mubr.f32.mxu0 %v26506_v60  ;;  %v21161_v13 = vld [vmem:[%s26246_s14 + $0x48] sm:$0x3f] }
 0x7f3   : > { %21142 = vmatprep.subr.msk.mxu0 %vm1642_vm2, %v26589_v0  ;;  %12952 = vrot.lane.b32.xlu0 %v24341_v57, %s26590_s10 }
 0x7f4   : > { %12950 = vrot.lane.b32.xlu1 %v24339_v25, %s26590_s10 }
 0x7f7   : > { %12960 = vrot.lane.b32.xlu0 %v24341_v57, %s26546_s19 }
 0x7f8   : > { %12958 = vrot.lane.b32.xlu1 %v24339_v25, %s26546_s19 }
 0x7f9   : > { %21140 = vmatmul.mubr.msk.f32.vlgmr.msra.gmra.mrb[4].mxu0 %vm1638_vm4, %v21137_v30 }
 0x7fa   : > { %21143 = vmatpush1.msk.msra.mxu0 %vm1642_vm2, %v26591_v42  ;;  %11301 = vmatprep.mubr.f32.mxu0 %v26506_v60 }
 0x7fb   : > { %21146 = vmatprep.subr.msk.mxu0 %vm1642_vm2, %v26559_v6  ;;  %12968 = vrot.lane.b32.xlu0 %v24341_v57, %s26547_s2  ;;  %v26593_v6 = vld [vmem:[#allocation4_spill] sm:$0xff] }
 0x7fc   : > { %12966 = vrot.lane.b32.xlu1 %v24339_v25, %s26547_s2 }
 0x7ff   : > { %12976 = vrot.lane.b32.xlu0 %v24341_v57, %s26592_s11 }
 0x800   : > { %12974 = vrot.lane.b32.xlu1 %v24339_v25, %s26592_s11 }
 0x801   : > { %21144 = vmatmul.mubr.msk.f32.vlgmr.msra.gmra.mrb[4].mxu0 %vm1638_vm4, %v21141_v24 }
 0x802   : > { %21147 = vmatpush1.msk.msra.mxu0 %vm1642_vm2, %v26560_v29  ;;  %11379 = vmatprep.mubr.f32.mxu0 %v26506_v60  ;;  %v26596_v29 = vld [vmem:[#allocation7_spill] sm:$0xff] }
 0x803   : > { %21150 = vmatprep.subr.msk.mxu0 %vm1642_vm2, %v26593_v6  ;;  %12984 = vrot.lane.b32.xlu0 %v24341_v57, %s26594_s12 }
 0x804   : > { %12982 = vrot.lane.b32.xlu1 %v24339_v25, %s26594_s12 }
 0x807   : > { %12990 = vrot.lane.b32.xlu0 %v24339_v25, %s26486_s29 }
 0x808   : > { %6106 = vperm.xlu1 %22045, %v6103_v2  }
 0x809   : > { %21148 = vmatmul.mubr.msk.f32.vlgmr.msra.gmra.mrb[4].mxu0 %vm1638_vm4, %v21145_v22 }
 0x80a   : > { %21151 = vmatpush1.msk.msra.mxu0 %vm1642_vm2, %v26596_v29  ;;  %11457 = vmatprep.mubr.f32.mxu0 %v26506_v60 }
 0x80b   : > { %21154 = vmatprep.subr.msk.mxu0 %vm1642_vm2, %v26597_v32  ;;  %12998 = vrot.lane.b32.xlu0 %v24339_v25, %s26487_s24 }
 0x80c   : > { %12992 = vrot.lane.b32.xlu1 %v24341_v57, %s26486_s29 }
 0x80f   : > { %13006 = vrot.lane.b32.xlu0 %v24339_v25, %s26488_s26 }
 0x810   : > { %13000 = vrot.lane.b32.xlu1 %v24341_v57, %s26487_s24 }
 0x811   : > { %21152 = vmatmul.mubr.msk.f32.vlgmr.msra.gmra.mrb[4].mxu0 %vm1638_vm4, %v21149_v52  ;;  %v21209_v52 = vld [vmem:[%s26246_s14 + $0xa8] sm:$0x3f] }
 0x812   : > { %21155 = vmatpush1.msk.msra.mxu0 %vm1642_vm2, %v26598_v51  ;;  %11535 = vmatprep.mubr.f32.mxu0 %v26506_v60 }
 0x813   : > { %21158 = vmatprep.subr.msk.mxu0 %vm1642_vm2, %v26599_v27  ;;  %13014 = vrot.lane.b32.xlu0 %v24339_v25, %s26600_s0 }
 0x814   : > { %13008 = vrot.lane.b32.xlu1 %v24341_v57, %s26488_s26 }
 0x817   : > { %13022 = vrot.lane.b32.xlu0 %v24339_v25, %s26601_s25 }
 0x818   : > { %13016 = vrot.lane.b32.xlu1 %v24341_v57, %s26600_s0 }
 0x819   : > { %21156 = vmatmul.mubr.msk.f32.vlgmr.msra.gmra.mrb[4].mxu0 %vm1638_vm4, %v21153_v50  ;;  %v26609_v50 = vld [vmem:[#allocation25_spill] sm:$0xff] }
 0x81a   : > { %21159 = vmatpush1.msk.msra.mxu0 %vm1642_vm2, %v26602_v5  ;;  %11613 = vmatprep.mubr.f32.mxu0 %v26506_v60 }
 0x81b   : > { %21162 = vmatprep.subr.msk.mxu0 %vm1642_vm2, %v26603_v31  ;;  %13030 = vrot.lane.b32.xlu0 %v24339_v25, %s26604_s9 }
 0x81c   : > { %13024 = vrot.lane.b32.xlu1 %v24341_v57, %s26601_s25 }
 0x81f   : > { %13038 = vrot.lane.b32.xlu0 %v24339_v25, %s26605_s18 }
 0x820   : > { %13032 = vrot.lane.b32.xlu1 %v24341_v57, %s26604_s9 }
 0x821   : > { %21160 = vmatmul.mubr.msk.f32.vlgmr.msra.gmra.mrb[4].mxu0 %vm1638_vm4, %v21157_v40 }
 0x822   : > { %21163 = vmatpush1.msk.msra.mxu0 %vm1642_vm2, %v26606_v10  ;;  %11691 = vmatprep.mubr.f32.mxu0 %v26506_v60 }
 0x823   : > { %21166 = vmatprep.subr.msk.mxu0 %vm1642_vm2, %v23049_v41  ;;  %13046 = vrot.lane.b32.xlu0 %v24339_v25, %s26607_s28  ;;  %v21165_v41 = vld [vmem:[%s26246_s14 + $0x50] sm:$0x3f] }
 0x824   : > { %13040 = vrot.lane.b32.xlu1 %v24341_v57, %s26605_s18 }
 0x827   : > { %13054 = vrot.lane.b32.xlu0 %v24339_v25, %s26608_s16 }
 0x828   : > { %13048 = vrot.lane.b32.xlu1 %v24341_v57, %s26607_s28 }
 0x829   : > { %21164 = vmatmul.mubr.msk.f32.vlgmr.msra.gmra.mrb[4].mxu0 %vm1638_vm4, %v21161_v13 }
 0x82a   : > { %21167 = vmatpush1.msk.msra.mxu0 %vm1642_vm2, %v23065_v48  ;;  %11769 = vmatprep.mubr.f32.mxu0 %v26506_v60  ;;  %v21173_v48 = vld [vmem:[%s26246_s14 + $0x60] sm:$0x3f] }
 0x82b   : > { %21170 = vmatprep.subr.msk.mxu0 %vm1642_vm2, %v22362_v44  ;;  %v21169_v44 = vld [vmem:[%s26246_s14 + $0x58] sm:$0x3f] }
 0x82c   : > { %13056 = vrot.lane.b32.xlu1 %v24341_v57, %s26608_s16 }
 0x831   : > { %21168 = vmatmul.mubr.msk.f32.vlgmr.msra.gmra.mrb[4].mxu0 %vm1638_vm4, %v21165_v41  ;;  %v21217_v41 = vld [vmem:[%s26246_s14 + $0xb8] sm:$0x3f] }
 0x832   : > { %21171 = vmatpush1.msk.msra.mxu0 %vm1642_vm2, %v22376_v47  ;;  %11847 = vmatprep.mubr.f32.mxu0 %v26506_v60 }
 0x833   : > { %21174 = vmatprep.subr.msk.mxu0 %vm1642_vm2, %v24329_v8 }
 0x839   : > { %21172 = vmatmul.mubr.msk.f32.vlgmr.msra.gmra.mrb[4].mxu0 %vm1638_vm4, %v21169_v44  ;;  %v26611_v44 = vld [vmem:[#allocation18_spill] sm:$0xff] }
 0x83a   : > { %21175 = vmatpush1.msk.msra.mxu0 %vm1642_vm2, %v24325_v35  ;;  %11925 = vmatprep.mubr.f32.mxu0 %v26506_v60 }
 0x83b   : > { %21178 = vmatprep.subr.msk.mxu0 %vm1642_vm2, %v22400_v55  ;;  %v21177_v55 = vld [vmem:[%s26246_s14 + $0x68] sm:$0x3f] }
 0x83d   : > { %v24579_v47 = vpop.permute.xlu1 %12878 }
 0x841   : > { %21176 = vmatmul.mubr.msk.f32.vlgmr.msra.gmra.mrb[4].mxu0 %vm1638_vm4, %v21173_v48 }
 0x842   : > { %21179 = vmatpush1.msk.msra.mxu0 %vm1642_vm2, %v22423_v63  ;;  %v24587_v0 = vpop.permute.xlu1 %12870  ;;  %12003 = vmatprep.mubr.f32.mxu0 %v26506_v60 }
 0x843   : > { %21182 = vmatprep.subr.msk.mxu0 %vm1642_vm2, %v23109_v58  ;;  %v21181_v58 = vld [vmem:[%s26246_s14 + $0x70] sm:$0x3f] }
 0x846   : > { %v24592_v30 = vpop.permute.xlu1 %12886 }
 0x849   : > { %21180 = vmatmul.mubr.msk.f32.vlgmr.msra.gmra.mrb[4].mxu0 %vm1638_vm4, %v21177_v55  ;;  %v26612_v55 = vld [vmem:[#allocation45_spill] sm:$0xff] }
 0x84a   : > { %21183 = vmatpush1.msk.msra.mxu0 %vm1642_vm2, %v23136_v18  ;;  %v24600_v42 = vpop.permute.xlu1 %12894  ;;  %12081 = vmatprep.mubr.f32.mxu0 %v26506_v60 }
 0x84b   : > { %21186 = vmatprep.subr.msk.mxu0 %vm1642_vm2, %v23142_v33  ;;  %v21185_v33 = vld [vmem:[%s26246_s14 + $0x78] sm:$0x3f] }
 0x84e   : > { %v24605_v63 = vpop.permute.xlu1 %12902 }
 0x851   : > { %21184 = vmatmul.mubr.msk.f32.vlgmr.msra.gmra.mrb[4].mxu0 %vm1638_vm4, %v21181_v58 }
 0x852   : > { %21187 = vmatpush1.msk.msra.mxu0 %vm1642_vm2, %v23158_v26  ;;  %v24613_v24 = vpop.permute.xlu1 %12910  ;;  %12159 = vmatprep.mubr.f32.mxu0 %v26506_v60 }
 0x853   : > { %21190 = vmatprep.subr.msk.mxu0 %vm1642_vm2, %v22429_v4  ;;  %v21189_v4 = vld [vmem:[%s26246_s14 + $0x80] sm:$0x3f] }
 0x856   : > { %v24618_v18 = vpop.permute.xlu1 %12918 }
 0x859   : > { %21188 = vmatmul.mubr.msk.f32.vlgmr.msra.gmra.mrb[4].mxu0 %vm1638_vm4, %v21185_v33 }
 0x85a   : > { %21191 = vmatpush1.msk.msra.mxu0 %vm1642_vm2, %v22452_v19  ;;  %v24626_v6 = vpop.permute.xlu1 %12926  ;;  %12237 = vmatprep.mubr.f32.mxu0 %v26506_v60 }
 0x85b   : > { %21194 = vmatprep.subr.msk.mxu0 %vm1642_vm2, %v22458_v21  ;;  %v21193_v21 = vld [vmem:[%s26246_s14 + $0x88] sm:$0x3f] }
 0x85e   : > { %v24634_v26 = vpop.permute.xlu1 %12934 }
 0x861   : > { %21192 = vmatmul.mubr.msk.f32.vlgmr.msra.gmra.mrb[4].mxu0 %vm1638_vm4, %v21189_v4 }
 0x862   : > { %21195 = vmatpush1.msk.msra.mxu0 %vm1642_vm2, %v22481_v34  ;;  %12315 = vmatprep.mubr.f32.mxu0 %v26506_v60  ;;  %v24642_v19 = vpop.permute.xlu1 %12942  ;;  %v21197_v34 = vld [vmem:[%s26246_s14 + $0x90] sm:$0x3f] }
 0x863   : > { %21198 = vmatprep.subr.msk.mxu0 %vm1642_vm2, %v22487_v38 }
 0x866   : > { %v24651_v2 = vpop.permute.xlu1 %12950 }
 0x869   : > { %21196 = vmatmul.mubr.msk.f32.vlgmr.msra.gmra.mrb[4].mxu0 %vm1638_vm4, %v21193_v21  ;;  %v21221_v21 = vld [vmem:[%s26246_s14 + $0xc0] sm:$0x3f] }
 0x86a   : > { %21199 = vmatpush1.msk.msra.mxu0 %vm1642_vm2, %v22501_v43  ;;  %12393 = vmatprep.mubr.f32.mxu0 %v26506_v60  ;;  %v24658_v38 = vpop.permute.xlu1 %12958  ;;  %v12881_v43 = vpop.permute.xlu0 %12880 }
 0x86b   : > { %21202 = vmatprep.subr.msk.mxu0 %vm1642_vm2, %v23202_v20  ;;  %v21201_v20 = vld [vmem:[%s26246_s14 + $0x98] sm:$0x3f]  ;;  %v12883_v58 = vsel %vm781_vm12, %v12881_v43, %v24579_v47 }
 0x86e   : > { %v24669_v22 = vpop.permute.xlu1 %12966  ;;  %v24671_v29 = vpop.permute.xlu0 %12872 }
 0x86f   : > { %v12874_v4 = vsel %vm759_vm13, %v24587_v0, %v24671_v29 }
 0x871   : > { %21200 = vmatmul.mubr.msk.f32.vlgmr.msra.gmra.mrb[4].mxu0 %vm1638_vm4, %v21197_v34  ;;  %v26613_v34 = vld [vmem:[#allocation20_spill] sm:$0xff] }
 0x872   : > { %21203 = vmatpush1.msk.msra.mxu0 %vm1642_vm2, %v23229_v1  ;;  %12471 = vmatprep.mubr.f32.mxu0 %v26506_v60  ;;  %v24679_v1 = vpop.permute.xlu1 %12974  ;;  %v24684_v32 = vpop.permute.xlu0 %12888 }
 0x873   : > { %21206 = vmatprep.subr.msk.mxu0 %vm1642_vm2, %v23235_v3  ;;  %v21205_v3 = vld [vmem:[%s26246_s14 + $0xa0] sm:$0x3f] }
 0x879   : > { %21204 = vmatmul.mubr.msk.f32.vlgmr.msra.gmra.mrb[4].mxu0 %vm1638_vm4, %v21201_v20  ;;  %v12884_v20 = vmul.f32 %v12883_v58, %v26613_v34 }
 0x87a   : > { %21207 = vmatpush1.msk.msra.mxu0 %vm1642_vm2, %v23262_v56  ;;  %12549 = vmatprep.mubr.f32.mxu0 %v26506_v60  ;;  %v24690_v56 = vpop.permute.xlu1 %12982 }
 0x87b   : > { %21210 = vmatprep.subr.msk.mxu0 %vm1642_vm2, %v23268_v46  ;;  %v24694_v46 = vpop.permute.xlu0 %12896 }
 0x881   : > { %21208 = vmatmul.mubr.msk.f32.vlgmr.msra.gmra.mrb[4].mxu0 %vm1638_vm4, %v21205_v3 }
 0x882   : > { %21211 = vmatpush1.msk.msra.mxu0 %vm1642_vm2, %v23295_v62  ;;  %12627 = vmatprep.mubr.f32.mxu0 %v26506_v60 }
 0x883   : > { %21214 = vmatprep.subr.msk.mxu0 %vm1642_vm2, %v23301_v49  ;;  %v24707_v49 = vpop.permute.xlu0 %12904 }
 0x887   : > { %v6107_v51 = vpop.permute.xlu1 %6106 }
 0x888   : > { %v6109_v27 = vadd.f32 %v6107_v51, %v23926_v11  ;;  %v6110_v5 = vadd.f32 %v6107_v51, %v26609_v50  ;;  %v12890_v51 = vsel %vm803_vm14, %v24592_v30, %v24684_v32  ;;  %v26615_v50 = vld [vmem:[#allocation23_spill] sm:$0xff] }
 0x889   : > { %21212 = vmatmul.mubr.msk.f32.vlgmr.msra.gmra.mrb[4].mxu0 %vm1638_vm4, %v21209_v52  ;;  %v12875_v52 = vsel %vm759_vm13, %v24671_v29, %v24587_v0  ;;  %v12891_v29 = vsel %vm803_vm14, %v24684_v32, %v24592_v30  ;;  %v26619_v32 = vld [vmem:[#allocation28_spill] sm:$0xff] }
 0x88a   : > { %v6111_v62 = vadd.f32 %v24325_v35, %v6109_v27  ;;  %v6112_v31 = vadd.f32 %v24329_v8, %v6110_v5  ;;  %21215 = vmatpush1.msk.msra.mxu0 %vm1642_vm2, %v23328_v23  ;;  %12705 = vmatprep.mubr.f32.mxu0 %v26506_v60  ;;  %v21213_v35 = vld [vmem:[%s26246_s14 + $0xb0] sm:$0x3f]  ;;  %v24722_v23 = vpop.permute.xlu0 %12912  ;;  %v12882_v8 = vsel %vm781_vm12, %v24579_v47, %v12881_v43  ;;  %v26614_v47 = vld [vmem:[#allocation21_spill] sm:$0xff] }
 0x88b   : > { %21218 = vmatprep.subr.msk.mxu0 %vm1642_vm2, %v23334_v54  ;;  %v26610_v54 = vld [vmem:[#allocation44_spill] sm:$0xff]  ;;  %v12885_v48 = vmul.f32 %v12882_v8, %v26611_v44  ;;  %v12877_v43 = vmul.f32 %v12874_v4, %v26614_v47  ;;  %v21226_v27 = vld [vmem:[%s26246_s14 + $0xd0] sm:$0x3f]  ;;  %v12876_v5 = vmul.f32 %v12875_v52, %v26615_v50 }
 0x88c   : > { %vm6113_vm15 = vcmp.ge.f32.partialorder %v6111_v62, 0.0  ;;  %vm6114_vm11 = vcmp.ge.f32.partialorder %v6112_v31, 0.0  ;;  %v6115_v11 = vmul.f32 0.2, %v6111_v62  ;;  %v6116_v40 = vmul.f32 0.2, %v6112_v31 }
 0x88e   : > { %v24711_v10 = vsel %vm6113_vm15, %v6111_v62, %v6115_v11  ;;  %v24713_v13 = vsel %vm6114_vm11, %v6112_v31, %v6116_v40  ;;  %v26616_v62 = vld [vmem:[#allocation24_spill] sm:$0xff]  ;;  %v12898_v11 = vsel %vm26617_vm10, %v24600_v42, %v24694_v46  ;;  %v21225_v40 = vld [vmem:[%s26246_s14 + $0xc8] sm:$0x3f]  ;;  %vm26620_vm15 = vmmov %vm26617_vm10  ;;  %vm26621_vm11 = vcmp.lt.s32.totalorder %v22268_v7, 30 }
 0x88f   : > { %15170 = vrot.lane.b32.xlu1 %v24713_v13, %s26577_s23  ;;  %15168 = vrot.lane.b32.xlu0 %v24711_v10, %s26577_s23  ;;  %v12893_v31 = vmul.f32 %v12890_v51, %v26616_v62  ;;  %v12906_v4 = vsel %vm26621_vm11, %v24605_v63, %v24707_v49  ;;  %vm26624_vm10 = vmmov %vm26621_vm11 }
 0x890   : > { %v12907_v51 = vsel %vm26624_vm10, %v24707_v49, %v24605_v63  ;;  %vm26630_vm10 = vcmp.lt.s32.totalorder %v22268_v7, 14 }
 0x891   : > { %21216 = vmatmul.mubr.msk.f32.vlgmr.msra.gmra.mrb[4].mxu0 %vm1638_vm4, %v21213_v35 }
 0x892   : > { %21219 = vmatpush1.msk.msra.mxu0 %vm1642_vm2, %v26568_v53  ;;  %12783 = vmatprep.mubr.f32.mxu0 %v26506_v60  ;;  %v24740_v53 = vpop.permute.xlu0 %12920 }
 0x893   : > { %21222 = vmatprep.subr.msk.mxu0 %vm1642_vm2, %v26610_v54  ;;  %15162 = vrot.lane.b32.xlu1 %v24713_v13, %s26580_s20  ;;  %v26618_v54 = vld [vmem:[#allocation27_spill] sm:$0xff] }
 0x894   : > { %15160 = vrot.lane.b32.xlu0 %v24711_v10, %s26580_s20  ;;  %v12892_v8 = vmul.f32 %v12891_v29, %v26618_v54 }
 0x896   : > { %v24759_v33 = vpop.permute.xlu0 %12928 }
 0x897   : > { %15178 = vrot.lane.b32.xlu1 %v24713_v13, %s26581_s3 }
 0x898   : > { %15176 = vrot.lane.b32.xlu0 %v24711_v10, %s26581_s3 }
 0x899   : > { %21220 = vmatmul.mubr.msk.f32.vlgmr.msra.gmra.mrb[4].mxu0 %vm1638_vm4, %v21217_v41  ;;  %v12901_v41 = vmul.f32 %v12898_v11, %v26619_v32  ;;  %v26627_v11 = vld [vmem:[#allocation36_spill] sm:$0xff] }
 0x89a   : > { %21223 = vmatpush1.msk.msra.mxu0 %vm1642_vm2, %v26612_v55  ;;  %12861 = vmatprep.mubr.f32.mxu0 %v26506_v60  ;;  %v24777_v3 = vpop.permute.xlu0 %12936  ;;  %v12899_v55 = vsel %vm26620_vm15, %v24694_v46, %v24600_v42  ;;  %v26623_v42 = vld [vmem:[#allocation32_spill] sm:$0xff]  ;;  %vm26625_vm15 = vcmp.lt.s32.totalorder %v22268_v7, 18 }
 0x89b   : > { %21227 = vmatprep.subr.msk.mxu0 %vm1642_vm2, %v12885_v48  ;;  %15186 = vrot.lane.b32.xlu1 %v24713_v13, %s26583_s4  ;;  %v12909_v46 = vmul.f32 %v12906_v4, %v26623_v42  ;;  %vm26628_vm11 = vmmov %vm26625_vm15  ;;  %v26629_v4 = vld [vmem:[#allocation39_spill] sm:$0xff] }
 0x89c   : > { %15184 = vrot.lane.b32.xlu0 %v24711_v10, %s26583_s4  ;;  %v12915_v49 = vsel %vm26628_vm11, %v24722_v23, %v24613_v24  ;;  %vm26633_vm11 = vcmp.lt.s32.totalorder %v22268_v7, 2 }
 0x89e   : > { %v24801_v0 = vpop.permute.xlu0 %12944 }
 0x89f   : > { %15194 = vrot.lane.b32.xlu1 %v24713_v13, %s26584_s5 }
 0x8a0   : > { %15192 = vrot.lane.b32.xlu0 %v24711_v10, %s26584_s5 }
 0x8a1   : > { %21224 = vmatmul.mubr.msk.f32.vlgmr.msra.gmra.mrb[4].mxu0 %vm1638_vm4, %v21221_v21  ;;  %v21233_v21 = vld [vmem:[%s26246_s14 + $0xd8] sm:$0x3f] }
 0x8a2   : > { %21228 = vmatpush1.msk.msra.mxu0 %vm1642_vm2, %v12884_v20  ;;  %13139 = vmatprep.mubr.f32.mxu0 %v26506_v60  ;;  %v24822_v35 = vpop.permute.xlu0 %12952  ;;  %v26622_v20 = vld [vmem:[#allocation31_spill] sm:$0xff] }
 0x8a3   : > { %21230 = vmatprep.subr.msk.mxu0 %vm1642_vm2, %v12877_v43  ;;  %15202 = vrot.lane.b32.xlu1 %v24713_v13, %s26585_s6  ;;  %v12900_v43 = vmul.f32 %v12899_v55, %v26622_v20 }
 0x8a4   : > { %15200 = vrot.lane.b32.xlu0 %v24711_v10, %s26585_s6 }
 0x8a6   : > { %v24846_v58 = vpop.permute.xlu0 %12960 }
 0x8a7   : > { %15210 = vrot.lane.b32.xlu1 %v24713_v13, %s26544_s22 }
 0x8a8   : > { %15208 = vrot.lane.b32.xlu0 %v24711_v10, %s26544_s22 }
 0x8a9   : > { %21229 = vmatmul.mubr.msk.f32.vlgmr.msra.gmra.mrb[4].mxu0 %vm1638_vm4, %v21226_v27  ;;  %v12914_v27 = vsel %vm26625_vm15, %v24613_v24, %v24722_v23  ;;  %v10909_v23 = vld [vmem:[%s26245_s13] sm:$0x3f]  ;;  %vm26632_vm15 = vmmov %vm26630_vm10 }
 0x8aa   : > { %21231 = vmatpush1.msk.msra.mxu0 %vm1642_vm2, %v12876_v5  ;;  %13219 = vmatprep.mubr.f32.mxu0 %v26506_v60  ;;  %v24864_v52 = vpop.permute.xlu0 %12968  ;;  %v21237_v5 = vld [vmem:[%s26246_s14 + $0xe0] sm:$0x3f] }
 0x8ab   : > { %21234 = vmatprep.subr.msk.mxu0 %vm1642_vm2, %v12893_v31  ;;  %15218 = vrot.lane.b32.xlu1 %v24713_v13, %s26543_s21  ;;  %v26626_v31 = vld [vmem:[#allocation35_spill] sm:$0xff] }
 0x8ac   : > { %15216 = vrot.lane.b32.xlu0 %v24711_v10, %s26543_s21  ;;  %v12908_v29 = vmul.f32 %v12907_v51, %v26626_v31  ;;  %v12930_v51 = vsel %vm957_vm1, %v24626_v6, %v24759_v33 }
 0x8ae   : > { %v24888_v63 = vpop.permute.xlu0 %12976 }
 0x8af   : > { %15226 = vrot.lane.b32.xlu1 %v24713_v13, %s26545_s30 }
 0x8b0   : > { %15224 = vrot.lane.b32.xlu0 %v24711_v10, %s26545_s30  ;;  %v24829_v30 = vpop.f32.mrb[2].mxu0 }
 0x8b1   : > { %v24832_v48 = vpop.f32.mrb[3].mxu0  ;;  %21232 = vmatmul.mubr.msk.f32.vlgmr.msra.gmra.mrb[4].mxu0 %vm1638_vm4, %v21225_v40  ;;  %v12917_v40 = vmul.f32 %v12914_v27, %v26627_v11  ;;  %v21245_v27 = vld [vmem:[%s26246_s14 + $0xf0] sm:$0x3f] }
 0x8b2   : > { %21235 = vmatpush1.msk.msra.mxu0 %vm1642_vm2, %v12892_v8  ;;  %13301 = vmatprep.mubr.f32.mxu0 %v26506_v60  ;;  %v12922_v8 = vsel %vm935_vm0, %v24618_v18, %v24740_v53  ;;  %v24909_v55 = vpop.permute.xlu0 %12984 }
 0x8b3   : > { %21238 = vmatprep.subr.msk.mxu0 %vm1642_vm2, %v12901_v41  ;;  %15234 = vrot.lane.b32.xlu1 %v24713_v13, %s26587_s8  ;;  %v21241_v41 = vld [vmem:[%s26246_s14 + $0xe8] sm:$0x3f]  ;;  %v12925_v24 = vmul.f32 %v12922_v8, %v22282_v14 }
 0x8b4   : > { %15232 = vrot.lane.b32.xlu0 %v24711_v10, %s26587_s8 }
 0x8b7   : > { %15242 = vrot.lane.b32.xlu1 %v24713_v13, %s26590_s10 }
 0x8b8   : > { %15240 = vrot.lane.b32.xlu0 %v24711_v10, %s26590_s10 }
 0x8b9   : > { %21236 = vmatmul.mubr.msk.f32.vlgmr.msra.gmra.mrb[4].mxu0 %vm1638_vm4, %v21233_v21  ;;  %v12916_v21 = vmul.f32 %v12915_v49, %v26629_v4  ;;  %v21249_v49 = vld [vmem:[%s26246_s14 + $0xf8] sm:$0x3f] }
 0x8ba   : > { %21239 = vmatpush1.msk.msra.mxu0 %vm1642_vm2, %v12900_v43  ;;  %13385 = vmatprep.mubr.f32.mxu0 %v26506_v60  ;;  %v12923_v43 = vsel %vm935_vm0, %v24740_v53, %v24618_v18  ;;  %v12933_v18 = vmul.f32 %v12930_v51, %v22289_v16  ;;  %v12947_v51 = vsel %vm26632_vm15, %v24801_v0, %v24642_v19  ;;  %vm26639_vm15 = vcmp.lt.s32.totalorder %v22268_v7, 126 }
 0x8bb   : > { %21242 = vmatprep.subr.msk.mxu0 %vm1642_vm2, %v12909_v46  ;;  %15250 = vrot.lane.b32.xlu1 %v24713_v13, %s26546_s19  ;;  %v24930_v46 = vpop.permute.xlu0 %12990 }
 0x8bc   : > { %15248 = vrot.lane.b32.xlu0 %v24711_v10, %s26546_s19 }
 0x8bf   : > { %15258 = vrot.lane.b32.xlu1 %v24713_v13, %s26547_s2  ;;  %v24948_v53 = vpop.permute.xlu0 %12998 }
 0x8c0   : > { %15256 = vrot.lane.b32.xlu0 %v24711_v10, %s26547_s2 }
 0x8c1   : > { %21240 = vmatmul.mubr.msk.f32.vlgmr.msra.gmra.mrb[4].mxu0 %vm1638_vm4, %v21237_v5  ;;  %v12924_v5 = vmul.f32 %v12923_v43, %v22292_v17 }
 0x8c2   : > { %21243 = vmatpush1.msk.msra.mxu0 %vm1642_vm2, %v12908_v29  ;;  %13469 = vmatprep.mubr.f32.mxu0 %v26506_v60  ;;  %v12931_v29 = vsel %vm957_vm1, %v24759_v33, %v24626_v6  ;;  %v12939_v33 = vsel %vm979_vm3, %v24777_v3, %v24634_v26 }
 0x8c3   : > { %21246 = vmatprep.subr.msk.mxu0 %vm1642_vm2, %v12917_v40  ;;  %15266 = vrot.lane.b32.xlu1 %v24713_v13, %s26592_s11  ;;  %v12938_v40 = vsel %vm979_vm3, %v24634_v26, %v24777_v3  ;;  %v12932_v8 = vmul.f32 %v12931_v29, %v22286_v15  ;;  %v24972_v6 = vpop.permute.xlu0 %13006  ;;  %v12940_v43 = vmul.f32 %v12939_v33, %v22343_v36  ;;  %v26631_v26 = vld [vmem:[#allocation41_spill] sm:$0xff]  ;;  %v26634_v29 = vld [vmem:[#allocation47_spill] sm:$0xff]  ;;  %v21261_v33 = vld [vmem:[%s26246_s14 + $0x110] sm:$0x3f] }
 0x8c4   : > { %15264 = vrot.lane.b32.xlu0 %v24711_v10, %s26592_s11 }
 0x8c7   : > { %15274 = vrot.lane.b32.xlu1 %v24713_v13, %s26594_s12 }
 0x8c8   : > { %15272 = vrot.lane.b32.xlu0 %v24711_v10, %s26594_s12 }
 0x8c9   : > { %21244 = vmatmul.mubr.msk.f32.vlgmr.msra.gmra.mrb[4].mxu0 %vm1638_vm4, %v21241_v41  ;;  %v12941_v41 = vmul.f32 %v12938_v40, %v22316_v28  ;;  %v12948_v40 = vmul.f32 %v12947_v51, %v26634_v29 }
 0x8ca   : > { %21247 = vmatpush1.msk.msra.mxu0 %vm1642_vm2, %v12916_v21  ;;  %13553 = vmatprep.mubr.f32.mxu0 %v26506_v60  ;;  %v12946_v21 = vsel %vm26630_vm10, %v24642_v19, %v24801_v0  ;;  %v26635_v19 = vld [vmem:[#allocation48_spill] sm:$0xff]  ;;  %vm26636_vm10 = vmmov %vm26633_vm11 }
 0x8cb   : > { %21250 = vmatprep.subr.msk.mxu0 %vm1642_vm2, %v12925_v24  ;;  %15280 = vrot.lane.b32.xlu1 %v24711_v10, %s26486_s29  ;;  %v21253_v24 = vld [vmem:[%s26246_s14 + $0x100] sm:$0x3f]  ;;  %v12949_v3 = vmul.f32 %v12946_v21, %v26631_v26  ;;  %v26637_v21 = vld [vmem:[#allocation50_spill] sm:$0xff] }
 0x8cc   : > { %10912 = vperm.xlu0 %22044, %v10909_v23   ;;  %v24993_v23 = vpop.permute.xlu0 %13014 }
 0x8cf   : > { %15288 = vrot.lane.b32.xlu1 %v24711_v10, %s26487_s24 }
 0x8d0   : > { %15282 = vrot.lane.b32.xlu0 %v24713_v13, %s26486_s29 }
 0x8d1   : > { %21248 = vmatmul.mubr.msk.f32.vlgmr.msra.gmra.mrb[4].mxu0 %vm1638_vm4, %v21245_v27  ;;  %v25013_v27 = vpop.permute.xlu0 %13022 }
 0x8d2   : > { %21251 = vmatpush1.msk.msra.mxu0 %vm1642_vm2, %v12924_v5  ;;  %13637 = vmatprep.mubr.f32.mxu0 %v26506_v60  ;;  %v12954_v5 = vsel %vm26633_vm11, %v24651_v2, %v24822_v35  ;;  %vm26642_vm11 = vmmov %vm26639_vm15 }
 0x8d3   : > { %21254 = vmatprep.subr.msk.mxu0 %vm1642_vm2, %v12933_v18  ;;  %15296 = vrot.lane.b32.xlu1 %v24711_v10, %s26488_s26  ;;  %v21257_v18 = vld [vmem:[%s26246_s14 + $0x108] sm:$0x3f]  ;;  %v12957_v0 = vmul.f32 %v12954_v5, %v26635_v19 }
 0x8d4   : > { %15290 = vrot.lane.b32.xlu0 %v24713_v13, %s26487_s24 }
 0x8d7   : > { %15304 = vrot.lane.b32.xlu1 %v24711_v10, %s26600_s0 }
 0x8d8   : > { %15298 = vrot.lane.b32.xlu0 %v24713_v13, %s26488_s26 }
 0x8d9   : > { %21252 = vmatmul.mubr.msk.f32.vlgmr.msra.gmra.mrb[4].mxu0 %vm1638_vm4, %v21249_v49  ;;  %v25031_v49 = vpop.permute.xlu0 %13030 }
 0x8da   : > { %21255 = vmatpush1.msk.msra.mxu0 %vm1642_vm2, %v12932_v8  ;;  %13721 = vmatprep.mubr.f32.mxu0 %v26506_v60  ;;  %v12955_v8 = vsel %vm26636_vm10, %v24822_v35, %v24651_v2  ;;  %v12963_v2 = vsel %vm1089_vm5, %v24846_v58, %v24658_v38  ;;  %v21265_v35 = vld [vmem:[%s26246_s14 + $0x118] sm:$0x3f]  ;;  %vm26643_vm10 = vcmp.lt.s32.totalorder %v22268_v7, 114 }
 0x8db   : > { %21258 = vmatprep.subr.msk.mxu0 %vm1642_vm2, %v12941_v41  ;;  %15312 = vrot.lane.b32.xlu1 %v24711_v10, %s26601_s25  ;;  %v12962_v41 = vsel %vm1089_vm5, %v24658_v38, %v24846_v58  ;;  %v12964_v5 = vmul.f32 %v12963_v2, %v22368_v45  ;;  %v12971_v38 = vsel %vm1111_vm6, %v24864_v52, %v24669_v22  ;;  %v21269_v58 = vld [vmem:[%s26246_s14 + $0x120] sm:$0x3f]  ;;  %v26641_v2 = vld [vmem:[#allocation51_spill] sm:$0xff] }
 0x8dc   : > { %15306 = vrot.lane.b32.xlu0 %v24713_v13, %s26600_s0 }
 0x8df   : > { %15320 = vrot.lane.b32.xlu1 %v24711_v10, %s26604_s9 }
 0x8e0   : > { %15314 = vrot.lane.b32.xlu0 %v24713_v13, %s26601_s25 }
 0x8e1   : > { %21256 = vmatmul.mubr.msk.f32.vlgmr.msra.gmra.mrb[4].mxu0 %vm1638_vm4, %v21253_v24  ;;  %v12956_v24 = vmul.f32 %v12955_v8, %v26637_v21 }
 0x8e2   : > { %21259 = vmatpush1.msk.msra.mxu0 %vm1642_vm2, %v12940_v43  ;;  %13805 = vmatprep.mubr.f32.mxu0 %v26506_v60  ;;  %v12965_v43 = vmul.f32 %v12962_v41, %v22351_v39  ;;  %v12979_v41 = vsel %vm26639_vm15, %v24888_v63, %v24679_v1  ;;  %vm26646_vm15 = vmmov %vm26643_vm10 }
 0x8e3   : > { %21262 = vmatprep.subr.msk.mxu0 %vm1642_vm2, %v12949_v3  ;;  %15328 = vrot.lane.b32.xlu1 %v24711_v10, %s26605_s18  ;;  %v25053_v3 = vpop.permute.xlu0 %13038 }
 0x8e4   : > { %15322 = vrot.lane.b32.xlu0 %v24713_v13, %s26604_s9 }
 0x8e7   : > { %15336 = vrot.lane.b32.xlu1 %v24711_v10, %s26607_s28  ;;  %v25066_v51 = vpop.permute.xlu0 %13046 }
 0x8e8   : > { %15330 = vrot.lane.b32.xlu0 %v24713_v13, %s26605_s18 }
 0x8e9   : > { %21260 = vmatmul.mubr.msk.f32.vlgmr.msra.gmra.mrb[4].mxu0 %vm1638_vm4, %v21257_v18 }
 0x8ea   : > { %21263 = vmatpush1.msk.msra.mxu0 %vm1642_vm2, %v12948_v40  ;;  %13889 = vmatprep.mubr.f32.mxu0 %v26506_v60  ;;  %v26638_v40 = vld [vmem:[#allocation10_spill] sm:$0xff] }
 0x8eb   : > { %21266 = vmatprep.subr.msk.mxu0 %vm1642_vm2, %v12957_v0  ;;  %15344 = vrot.lane.b32.xlu1 %v24711_v10, %s26608_s16  ;;  %v25074_v18 = vpop.permute.xlu0 %13054  ;;  %v12973_v0 = vmul.f32 %v12971_v38, %v26638_v40 }
 0x8ec   : > { %15338 = vrot.lane.b32.xlu0 %v24713_v13, %s26607_s28 }
 0x8f0   : > { %15346 = vrot.lane.b32.xlu0 %v24713_v13, %s26608_s16 }
 0x8f1   : > { %21264 = vmatmul.mubr.msk.f32.vlgmr.msra.gmra.mrb[4].mxu0 %vm1638_vm4, %v21261_v33 }
 0x8f2   : > { %21267 = vmatpush1.msk.msra.mxu0 %vm1642_vm2, %v12956_v24  ;;  %13973 = vmatprep.mubr.f32.mxu0 %v26506_v60  ;;  %v26640_v24 = vld [vmem:[#allocation11_spill] sm:$0xff] }
 0x8f3   : > { %21270 = vmatprep.subr.msk.mxu0 %vm1642_vm2, %v12965_v43 }
 0x8f9   : > { %21268 = vmatmul.mubr.msk.f32.vlgmr.msra.gmra.mrb[4].mxu0 %vm1638_vm4, %v21265_v35  ;;  %v12981_v35 = vmul.f32 %v12979_v41, %v26641_v2  ;;  %v26645_v41 = vld [vmem:[#allocation53_spill] sm:$0xff] }
 0x8fa   : > { %21271 = vmatpush1.msk.msra.mxu0 %vm1642_vm2, %v12964_v5  ;;  %14057 = vmatprep.mubr.f32.mxu0 %v26506_v60 }
 0x8fb   : > { %21274 = vmatprep.subr.msk.mxu0 %vm1642_vm2, %v24341_v57  ;;  %v12970_v57 = vsel %vm1111_vm6, %v24669_v22, %v24864_v52  ;;  %v12978_v22 = vsel %vm26642_vm11, %v24679_v1, %v24888_v63  ;;  %v12987_v52 = vsel %vm26643_vm10, %v24909_v55, %v24690_v56  ;;  %v12993_v1 = vpop.permute.xlu1 %12992  ;;  %v12986_v63 = vsel %vm26646_vm15, %v24690_v56, %v24909_v55 }
 0x8fc   : > { %v12972_v43 = vmul.f32 %v12970_v57, %v26640_v24  ;;  %v12994_v55 = vsel %vm1221_vm7, %v24930_v46, %v12993_v1  ;;  %vm26649_vm11 = vcmp.lt.s32.totalorder %v22268_v7, 110  ;;  %vm26652_vm15 = vcmp.lt.s32.totalorder %v22268_v7, 98 }
 0x8fd   : > { %vm26651_vm10 = vmmov %vm26649_vm11 }
 0x8ff   : > { %v13001_v56 = vpop.permute.xlu1 %13000 }
 0x901   : > { %v25084_v8 = vpop.permute.xlu0 %15168  ;;  %21272 = vmatmul.mubr.msk.f32.vlgmr.msra.gmra.mrb[4].mxu0 %vm1638_vm4, %v21269_v58  ;;  %v21277_v58 = vld [vmem:[%s26246_s14 + $0x130] sm:$0x3f] }
 0x902   : > { %21275 = vmatpush1.msk.msra.mxu0 %vm1642_vm2, %v24339_v25  ;;  %14141 = vmatprep.mubr.f32.mxu0 %v26506_v60  ;;  %v21273_v25 = vld [vmem:[%s26246_s14 + $0x128] sm:$0x3f] }
 0x903   : > { %21278 = vmatprep.subr.msk.mxu0 %vm1642_vm2, %v12973_v0  ;;  %v26644_v0 = vld [vmem:[#allocation52_spill] sm:$0xff] }
 0x904   : > { %v12980_v57 = vmul.f32 %v12978_v22, %v26644_v0 }
 0x906   : > { %v25099_v33 = vpop.permute.xlu0 %15160 }
 0x909   : > { %21276 = vmatmul.mubr.msk.f32.vlgmr.msra.gmra.mrb[4].mxu0 %vm1638_vm4, %v21273_v25  ;;  %v12989_v25 = vmul.f32 %v12987_v52, %v26645_v41  ;;  %v21281_v52 = vld [vmem:[%s26246_s14 + $0x138] sm:$0x3f]  ;;  %v26648_v41 = vld [vmem:[#allocation12_spill] sm:$0xff] }
 0x90a   : > { %v25107_v5 = vpop.permute.xlu0 %15176  ;;  %21279 = vmatpush1.msk.msra.mxu0 %vm1642_vm2, %v12972_v43  ;;  %14225 = vmatprep.mubr.f32.mxu0 %v26506_v60 }
 0x90b   : > { %21282 = vmatprep.subr.msk.mxu0 %vm1642_vm2, %v12981_v35  ;;  %v12995_v35 = vsel %vm1221_vm7, %v12993_v1, %v24930_v46  ;;  %v13009_v46 = vpop.permute.xlu1 %13008  ;;  %v13002_v1 = vsel %vm1243_vm8, %v24948_v53, %v13001_v56 }
 0x90c   : > { %v12997_v0 = vmul.f32 %v12995_v35, %v26648_v41 }
 0x90e   : > { %v25120_v38 = vpop.permute.xlu0 %15184 }
 0x911   : > { %21280 = vmatmul.mubr.msk.f32.vlgmr.msra.gmra.mrb[4].mxu0 %vm1638_vm4, %v21277_v58  ;;  %v26647_v58 = vld [vmem:[#allocation54_spill] sm:$0xff] }
 0x912   : > { %v25128_v43 = vpop.permute.xlu0 %15192  ;;  %21283 = vmatpush1.msk.msra.mxu0 %vm1642_vm2, %v12980_v57  ;;  %14309 = vmatprep.mubr.f32.mxu0 %v26506_v60  ;;  %v12988_v57 = vmul.f32 %v12986_v63, %v26647_v58  ;;  %v13003_v63 = vsel %vm1243_vm8, %v13001_v56, %v24948_v53  ;;  %v13017_v53 = vpop.permute.xlu1 %13016  ;;  %v26665_v58 = vld [vmem:[#allocation62_spill] sm:$0xff] }
 0x913   : > { %21286 = vmatprep.subr.msk.mxu0 %vm1642_vm2, %v12989_v25  ;;  %v13005_v41 = vmul.f32 %v13003_v63, %v26576_v61  ;;  %v21289_v63 = vld [vmem:[%s26246_s14 + $0x148] sm:$0x3f]  ;;  %v13019_v56 = vsel %vm26649_vm11, %v13017_v53, %v24993_v23  ;;  %vm26655_vm11 = vmmov %vm26652_vm15 }
 0x916   : > { %v25140_v22 = vpop.permute.xlu0 %15200 }
 0x919   : > { %21284 = vmatmul.mubr.msk.f32.vlgmr.msra.gmra.mrb[4].mxu0 %vm1638_vm4, %v21281_v52  ;;  %v21285_v52 = vld [vmem:[%s26246_s14 + $0x140] sm:$0x3f] }
 0x91a   : > { %v25148_v25 = vpop.permute.xlu0 %15208  ;;  %21287 = vmatpush1.msk.msra.mxu0 %vm1642_vm2, %v12988_v57  ;;  %14393 = vmatprep.mubr.f32.mxu0 %v26506_v60  ;;  %v12996_v57 = vmul.f32 %v12994_v55, %v26573_v9  ;;  %v13011_v55 = vsel %vm1265_vm9, %v13009_v46, %v24972_v6 }
 0x91b   : > { %21290 = vmatprep.subr.msk.mxu0 %vm1642_vm2, %v12997_v0 }
 0x91e   : > { %v25159_v35 = vpop.permute.xlu0 %15216 }
 0x921   : > { %21288 = vmatmul.mubr.msk.f32.vlgmr.msra.gmra.mrb[4].mxu0 %vm1638_vm4, %v21285_v52  ;;  %v13004_v52 = vmul.f32 %v13002_v1, %v26578_v59  ;;  %v21293_v1 = vld [vmem:[%s26246_s14 + $0x150] sm:$0x3f] }
 0x922   : > { %21291 = vmatpush1.msk.msra.mxu0 %vm1642_vm2, %v12996_v57  ;;  %14477 = vmatprep.mubr.f32.mxu0 %v26506_v60  ;;  %v25169_v0 = vpop.permute.xlu0 %15224  ;;  %v13013_v57 = vmul.f32 %v13011_v55, %v26579_v37 }
 0x923   : > { %21294 = vmatprep.subr.msk.mxu0 %vm1642_vm2, %v13005_v41  ;;  %v13010_v41 = vsel %vm1265_vm9, %v24972_v6, %v13009_v46  ;;  %v13025_v6 = vpop.permute.xlu1 %13024  ;;  %v13018_v46 = vsel %vm26651_vm10, %v24993_v23, %v13017_v53  ;;  %vm26656_vm10 = vcmp.lt.s32.totalorder %v22268_v7, 97 }
 0x924   : > { %v13026_v53 = vsel %vm26655_vm11, %v25013_v27, %v13025_v6  ;;  %vm26660_vm11 = vcmp.lt.s32.totalorder %v22268_v7, 96 }
 0x926   : > { %v25183_v61 = vpop.permute.xlu0 %15232 }
 0x929   : > { %21292 = vmatmul.mubr.msk.f32.vlgmr.msra.gmra.mrb[4].mxu0 %vm1638_vm4, %v21289_v63  ;;  %v13012_v63 = vmul.f32 %v13010_v41, %v26582_v12  ;;  %v13027_v41 = vsel %vm26652_vm15, %v13025_v6, %v25013_v27  ;;  %vm26659_vm15 = vmmov %vm26656_vm10 }
 0x92a   : > { %21295 = vmatpush1.msk.msra.mxu0 %vm1642_vm2, %v13004_v52  ;;  %14561 = vmatprep.mubr.f32.mxu0 %v26506_v60  ;;  %v25198_v55 = vpop.permute.xlu0 %15240  ;;  %v26650_v52 = vld [vmem:[#allocation55_spill] sm:$0xff] }
 0x92b   : > { %21298 = vmatprep.subr.msk.mxu0 %vm1642_vm2, %v13013_v57  ;;  %v13021_v37 = vmul.f32 %v13019_v56, %v26650_v52  ;;  %v21297_v56 = vld [vmem:[%s26246_s14 + $0x158] sm:$0x3f]  ;;  %v26654_v52 = vld [vmem:[#allocation57_spill] sm:$0xff] }
 0x92c   : > { %v13029_v12 = vmul.f32 %v13027_v41, %v26654_v52  ;;  %v21301_v41 = vld [vmem:[%s26246_s14 + $0x160] sm:$0x3f]  ;;  %v26658_v52 = vld [vmem:[#allocation59_spill] sm:$0xff] }
 0x92e   : > { %v25209_v57 = vpop.permute.xlu0 %15248 }
 0x931   : > { %21296 = vmatmul.mubr.msk.f32.vlgmr.msra.gmra.mrb[4].mxu0 %vm1638_vm4, %v21293_v1  ;;  %v26653_v1 = vld [vmem:[#allocation56_spill] sm:$0xff] }
 0x932   : > { %21299 = vmatpush1.msk.msra.mxu0 %vm1642_vm2, %v13012_v63  ;;  %14645 = vmatprep.mubr.f32.mxu0 %v26506_v60  ;;  %v13020_v63 = vmul.f32 %v13018_v46, %v26653_v1  ;;  %v25222_v23 = vpop.permute.xlu0 %15256 }
 0x933   : > { %21302 = vmatprep.subr.msk.mxu0 %vm1642_vm2, %v13021_v37  ;;  %v13033_v37 = vpop.permute.xlu1 %13032 }
 0x934   : > { %v13035_v46 = vsel %vm26656_vm10, %v13033_v37, %v25031_v49  ;;  %v13034_v27 = vsel %vm26659_vm15, %v25031_v49, %v13033_v37  ;;  %vm26664_vm10 = vmmov %vm26660_vm11  ;;  %vm26666_vm15 = vcmp.lt.s32.totalorder %v22268_v7, 95 }
 0x935   : > { %v13037_v1 = vmul.f32 %v13035_v46, %v26658_v52  ;;  %v26663_v52 = vld [vmem:[#allocation61_spill] sm:$0xff] }
 0x936   : > { %v25236_v59 = vpop.permute.xlu0 %15264 }
 0x939   : > { %21300 = vmatmul.mubr.msk.f32.vlgmr.msra.gmra.mrb[4].mxu0 %vm1638_vm4, %v21297_v56  ;;  %v26657_v56 = vld [vmem:[#allocation58_spill] sm:$0xff] }
 0x93a   : > { %21303 = vmatpush1.msk.msra.mxu0 %vm1642_vm2, %v13020_v63  ;;  %14729 = vmatprep.mubr.f32.mxu0 %v26506_v60  ;;  %v13028_v63 = vmul.f32 %v13026_v53, %v26657_v56  ;;  %v21305_v53 = vld [vmem:[%s26246_s14 + $0x168] sm:$0x3f]  ;;  %v25251_v46 = vpop.permute.xlu0 %15272 }
 0x93b   : > { %21306 = vmatprep.subr.msk.mxu0 %vm1642_vm2, %v13029_v12  ;;  %v13041_v12 = vpop.permute.xlu1 %13040  ;;  %26661 = vst [vmem:[#allocation19_spill] sm:$0xff] %v25251_v46 }
 0x93c   : > { %v13043_v6 = vsel %vm26660_vm11, %v13041_v12, %v25053_v3  ;;  %v13042_v37 = vsel %vm26664_vm10, %v25053_v3, %v13041_v12 }
 0x93d   : > { %v13044_v46 = vmul.f32 %v13042_v37, %v26665_v58  ;;  %v21313_v37 = vld [vmem:[%s26246_s14 + $0x178] sm:$0x3f] }
 0x93f   : > { %v13049_v56 = vpop.permute.xlu1 %13048 }
 0x941   : > { %21304 = vmatmul.mubr.msk.f32.vlgmr.msra.gmra.mrb[4].mxu0 %vm1638_vm4, %v21301_v41  ;;  %v26662_v41 = vld [vmem:[#allocation60_spill] sm:$0xff] }
 0x942   : > { %21307 = vmatpush1.msk.msra.mxu0 %vm1642_vm2, %v13028_v63  ;;  %14813 = vmatprep.mubr.f32.mxu0 %v26506_v60  ;;  %v13036_v63 = vmul.f32 %v13034_v27, %v26662_v41  ;;  %v22050_v41 = vld [vmem:[%s22225_s1] sm:$0x3f] }
 0x943   : > { %21310 = vmatprep.subr.msk.mxu0 %vm1642_vm2, %v13037_v1  ;;  %v13045_v1 = vmul.f32 %v13043_v6, %v26663_v52  ;;  %v22051_v52 = vld [vmem:[%s22225_s1 + $0x8] sm:$0x3f] }
 0x949   : > { %21308 = vmatmul.mubr.msk.f32.vlgmr.msra.gmra.mrb[4].mxu0 %vm1638_vm4, %v21305_v53 }
 0x94a   : > { %21311 = vmatpush1.msk.msra.mxu0 %vm1642_vm2, %v13036_v63  ;;  %14897 = vmatprep.mubr.f32.mxu0 %v26506_v60  ;;  %v21309_v63 = vld [vmem:[%s26246_s14 + $0x170] sm:$0x3f] }
 0x94b   : > { %v10913_v49 = vpop.permute.xlu0 %10912  ;;  %21314 = vmatprep.subr.msk.mxu0 %vm1642_vm2, %v13045_v1  ;;  %v13051_v1 = vsel %vm26666_vm15, %v13049_v56, %v25066_v51 }
 0x94c   : > { %v10915_v9 = vadd.f32 %v10913_v49, %v24829_v30  ;;  %v10916_v27 = vadd.f32 %v10913_v49, %v24832_v48  ;;  %v26667_v48 = vld [vmem:[#allocation63_spill] sm:$0xff]  ;;  %v13050_v49 = vsel %vm26666_vm15, %v25066_v51, %v13049_v56  ;;  %vm26673_vm15 = vcmp.lt.s32.totalorder %v22268_v7, 31 }
 0x94e   : > { %v10917_v6 = vadd.f32 %v22050_v41, %v10915_v9  ;;  %v10918_v53 = vadd.f32 %v22051_v52, %v10916_v27  ;;  %v13053_v9 = vmul.f32 %v13051_v1, %v26667_v48  ;;  %v13057_v41 = vpop.permute.xlu1 %13056  ;;  %v26669_v27 = vld [vmem:[#allocation64_spill] sm:$0xff] }
 0x94f   : > { %v21317_v1 = vld [vmem:[%s26246_s14 + $0x180] sm:$0x3f] }
 0x950   : > { %vm10919_vm11 = vcmp.ge.f32.partialorder %v10917_v6, 0.0  ;;  %vm10920_vm10 = vcmp.ge.f32.partialorder %v10918_v53, 0.0  ;;  %v10921_v3 = vmul.f32 0.2, %v10917_v6  ;;  %v10922_v30 = vmul.f32 0.2, %v10918_v53 }
 0x951   : > { %21312 = vmatmul.mubr.msk.f32.vlgmr.msra.gmra.mrb[4].mxu0 %vm1638_vm4, %v21309_v63 }
 0x952   : > { %v25275_v12 = vsel %vm10919_vm11, %v10917_v6, %v10921_v3  ;;  %v25277_v52 = vsel %vm10920_vm10, %v10918_v53, %v10922_v30  ;;  %21315 = vmatpush1.msk.msra.mxu0 %vm1642_vm2, %v13044_v46  ;;  %14981 = vmatprep.mubr.f32.mxu0 %v26506_v60  ;;  %vm26668_vm11 = vcmp.lt.s32.totalorder %v22268_v7, 94  ;;  %v13052_v6 = vmul.f32 %v13050_v49, %v26669_v27  ;;  %v26670_v53 = vld [vmem:[#allocation42_spill] sm:$0xff]  ;;  %v15171_v56 = vpop.permute.xlu1 %15170  ;;  %v26672_v30 = vld [vmem:[#allocation43_spill] sm:$0xff] }
 0x953   : > { %17460 = vrot.lane.b32.xlu0 %v25277_v52, %s26577_s23  ;;  %17458 = vrot.lane.b32.xlu1 %v25275_v12, %s26577_s23  ;;  %v13059_v46 = vsel %vm26668_vm11, %v13057_v41, %v25074_v18  ;;  %vm26671_vm10 = vmmov %vm26668_vm11  ;;  %v15172_v3 = vsel %vm781_vm12, %v25084_v8, %v15171_v56  ;;  %v15173_v49 = vsel %vm781_vm12, %v15171_v56, %v25084_v8 }
 0x954   : > { %21318 = vmatprep.subr.msk.mxu0 %vm1642_vm2, %v13053_v9  ;;  %v13061_v51 = vmul.f32 %v13059_v46, %v26670_v53  ;;  %v13058_v63 = vsel %vm26671_vm10, %v25074_v18, %v13057_v41  ;;  %v15175_v18 = vmul.f32 %v15172_v3, %v26611_v44  ;;  %vm26674_vm11 = vmmov %vm26673_vm15  ;;  %vm26675_vm10 = vcmp.lt.s32.totalorder %v22268_v7, 30 }
 0x955   : > { %v13060_v9 = vmul.f32 %v13058_v63, %v26672_v30  ;;  %v21326_v63 = vld [vmem:[%s26246_s14 + $0x198] sm:$0x3f] }
 0x956   : > { %v15163_v41 = vpop.permute.xlu1 %15162 }
 0x957   : > { %17452 = vrot.lane.b32.xlu0 %v25277_v52, %s26580_s20  ;;  %17450 = vrot.lane.b32.xlu1 %v25275_v12, %s26580_s20  ;;  %v15164_v46 = vsel %vm759_vm13, %v25099_v33, %v15163_v41  ;;  %v15165_v56 = vsel %vm759_vm13, %v15163_v41, %v25099_v33  ;;  %v21325_v41 = vld [vmem:[%s26246_s14 + $0x190] sm:$0x3f] }
 0x958   : > { %v15167_v8 = vmul.f32 %v15164_v46, %v26614_v47  ;;  %v15166_v3 = vmul.f32 %v15165_v56, %v26615_v50 }
 0x959   : > { %21316 = vmatmul.mubr.msk.f32.vlgmr.msra.gmra.mrb[4].mxu0 %vm1638_vm4, %v21313_v37  ;;  %v21321_v37 = vld [vmem:[%s26246_s14 + $0x188] sm:$0x3f] }
 0x95a   : > { %21319 = vmatpush1.msk.msra.mxu0 %vm1642_vm2, %v13052_v6  ;;  %15065 = vmatprep.mubr.f32.mxu0 %v26506_v60  ;;  %v15174_v6 = vmul.f32 %v15173_v49, %v26613_v34 }
 0x95b   : > { %17468 = vrot.lane.b32.xlu0 %v25277_v52, %s26581_s3  ;;  %17466 = vrot.lane.b32.xlu1 %v25275_v12, %s26581_s3 }
 0x95c   : > { %21322 = vmatprep.subr.msk.mxu0 %vm1642_vm2, %v13061_v51  ;;  %v15179_v51 = vpop.permute.xlu1 %15178 }
 0x95f   : > { %17476 = vrot.lane.b32.xlu0 %v25277_v52, %s26583_s4  ;;  %17474 = vrot.lane.b32.xlu1 %v25275_v12, %s26583_s4  ;;  %s26745_s4 = sld [smem:[#allocation3_spill]] }
 0x961   : > { %21320 = vmatmul.mubr.msk.f32.vlgmr.msra.gmra.mrb[4].mxu0 %vm1638_vm4, %v21317_v1  ;;  %v15180_v1 = vsel %vm803_vm14, %v25107_v5, %v15179_v51 }
 0x962   : > { %21323 = vmatpush1.msk.msra.mxu0 %vm1642_vm2, %v13060_v9  ;;  %15149 = vmatprep.mubr.f32.mxu0 %v26506_v60  ;;  %v15183_v33 = vmul.f32 %v15180_v1, %v26616_v62  ;;  %v15187_v9 = vpop.permute.xlu1 %15186 }
 0x963   : > { %17484 = vrot.lane.b32.xlu0 %v25277_v52, %s26584_s5  ;;  %17482 = vrot.lane.b32.xlu1 %v25275_v12, %s26584_s5  ;;  %v15188_v49 = vsel %vm26673_vm15, %v25120_v38, %v15187_v9  ;;  %vm26676_vm15 = vmmov %vm26675_vm10 }
 0x964   : > { %21327 = vmatprep.subr.msk.mxu0 %vm1642_vm2, %v15175_v18  ;;  %v15181_v18 = vsel %vm803_vm14, %v15179_v51, %v25107_v5  ;;  %v15191_v5 = vmul.f32 %v15188_v49, %v26619_v32  ;;  %v21341_v49 = vld [vmem:[%s26246_s14 + $0x1b0] sm:$0x3f] }
 0x966   : > { %v15195_v46 = vpop.permute.xlu1 %15194 }
 0x967   : > { %17492 = vrot.lane.b32.xlu0 %v25277_v52, %s26585_s6  ;;  %17490 = vrot.lane.b32.xlu1 %v25275_v12, %s26585_s6  ;;  %v15196_v51 = vsel %vm26675_vm10, %v25128_v43, %v15195_v46  ;;  %v15197_v1 = vsel %vm26676_vm15, %v15195_v46, %v25128_v43  ;;  %vm26679_vm15 = vcmp.lt.s32.totalorder %v22268_v7, 14  ;;  %s26682_s6 = sld [smem:[#allocation81_spill]] }
 0x969   : > { %21324 = vmatmul.mubr.msk.f32.vlgmr.msra.gmra.mrb[4].mxu0 %vm1638_vm4, %v21321_v37  ;;  %v15182_v37 = vmul.f32 %v15181_v18, %v26618_v54 }
 0x96a   : > { %21328 = vmatpush1.msk.msra.mxu0 %vm1642_vm2, %v15174_v6  ;;  %15429 = vmatprep.mubr.f32.mxu0 %v26506_v60  ;;  %v15189_v6 = vsel %vm26674_vm11, %v15187_v9, %v25120_v38  ;;  %v15199_v38 = vmul.f32 %v15196_v51, %v26623_v42  ;;  %vm26677_vm11 = vcmp.lt.s32.totalorder %v22268_v7, 18  ;;  %v15198_v9 = vmul.f32 %v15197_v1, %v26626_v31  ;;  %v21349_v1 = vld [vmem:[%s26246_s14 + $0x1c0] sm:$0x3f] }
 0x96b   : > { %17500 = vrot.lane.b32.xlu0 %v25277_v52, %s26544_s22  ;;  %17498 = vrot.lane.b32.xlu1 %v25275_v12, %s26544_s22  ;;  %v15190_v56 = vmul.f32 %v15189_v6, %v26622_v20  ;;  %vm26678_vm10 = vmmov %vm26677_vm11 }
 0x96c   : > { %21330 = vmatprep.subr.msk.mxu0 %vm1642_vm2, %v15167_v8  ;;  %v21333_v8 = vld [vmem:[%s26246_s14 + $0x1a0] sm:$0x3f] }
 0x96f   : > { %17508 = vrot.lane.b32.xlu0 %v25277_v52, %s26543_s21  ;;  %17506 = vrot.lane.b32.xlu1 %v25275_v12, %s26543_s21 }
 0x971   : > { %21329 = vmatmul.mubr.msk.f32.vlgmr.msra.gmra.mrb[4].mxu0 %vm1638_vm4, %v21326_v63  ;;  %v15203_v63 = vpop.permute.xlu1 %15202 }
 0x972   : > { %21331 = vmatpush1.msk.msra.mxu0 %vm1642_vm2, %v15166_v3  ;;  %15509 = vmatprep.mubr.f32.mxu0 %v26506_v60  ;;  %v21337_v3 = vld [vmem:[%s26246_s14 + $0x1a8] sm:$0x3f] }
 0x973   : > { %17516 = vrot.lane.b32.xlu0 %v25277_v52, %s26545_s30  ;;  %17514 = vrot.lane.b32.xlu1 %v25275_v12, %s26545_s30 }
 0x974   : > { %21334 = vmatprep.subr.msk.mxu0 %vm1642_vm2, %v15183_v33  ;;  %v15204_v33 = vsel %vm26677_vm11, %v25140_v22, %v15203_v63  ;;  %vm26680_vm11 = vmmov %vm26679_vm15 }
 0x975   : > { %v15207_v43 = vmul.f32 %v15204_v33, %v26627_v11  ;;  %v15211_v18 = vpop.permute.xlu1 %15210 }
 0x976   : > { %v15213_v6 = vsel %vm935_vm0, %v15211_v18, %v25148_v25 }
 0x977   : > { %17524 = vrot.lane.b32.xlu0 %v25277_v52, %s26587_s8  ;;  %17522 = vrot.lane.b32.xlu1 %v25275_v12, %s26587_s8 }
 0x979   : > { %21332 = vmatmul.mubr.msk.f32.vlgmr.msra.gmra.mrb[4].mxu0 %vm1638_vm4, %v21325_v41  ;;  %v15205_v41 = vsel %vm26678_vm10, %v15203_v63, %v25140_v22  ;;  %v15219_v46 = vpop.permute.xlu1 %15218  ;;  %vm26681_vm10 = vcmp.lt.s32.totalorder %v22268_v7, 2 }
 0x97a   : > { %21335 = vmatpush1.msk.msra.mxu0 %vm1642_vm2, %v15182_v37  ;;  %15591 = vmatprep.mubr.f32.mxu0 %v26506_v60  ;;  %v15212_v37 = vsel %vm935_vm0, %v25148_v25, %v15211_v18  ;;  %v15220_v51 = vsel %vm957_vm1, %v25159_v35, %v15219_v46  ;;  %v15221_v63 = vsel %vm957_vm1, %v15219_v46, %v25159_v35  ;;  %v21353_v18 = vld [vmem:[%s26246_s14 + $0x1c8] sm:$0x3f]  ;;  %v21357_v46 = vld [vmem:[%s26246_s14 + $0x1d0] sm:$0x3f] }
 0x97b   : > { %17532 = vrot.lane.b32.xlu0 %v25277_v52, %s26590_s10  ;;  %17530 = vrot.lane.b32.xlu1 %v25275_v12, %s26590_s10  ;;  %v15215_v22 = vmul.f32 %v15212_v37, %v22282_v14  ;;  %v15223_v25 = vmul.f32 %v15220_v51, %v22289_v16  ;;  %v15222_v33 = vmul.f32 %v15221_v63, %v22286_v15 }
 0x97c   : > { %21338 = vmatprep.subr.msk.mxu0 %vm1642_vm2, %v15191_v5  ;;  %v15206_v5 = vmul.f32 %v15205_v41, %v26629_v4 }
 0x97f   : > { %17540 = vrot.lane.b32.xlu0 %v25277_v52, %s26546_s19  ;;  %17538 = vrot.lane.b32.xlu1 %v25275_v12, %s26546_s19 }
 0x981   : > { %21336 = vmatmul.mubr.msk.f32.vlgmr.msra.gmra.mrb[4].mxu0 %vm1638_vm4, %v21333_v8  ;;  %v21345_v8 = vld [vmem:[%s26246_s14 + $0x1b8] sm:$0x3f] }
 0x982   : > { %21339 = vmatpush1.msk.msra.mxu0 %vm1642_vm2, %v15190_v56  ;;  %15675 = vmatprep.mubr.f32.mxu0 %v26506_v60  ;;  %v15214_v56 = vmul.f32 %v15213_v6, %v22292_v17 }
 0x983   : > { %17548 = vrot.lane.b32.xlu0 %v25277_v52, %s26547_s2  ;;  %17546 = vrot.lane.b32.xlu1 %v25275_v12, %s26547_s2 }
 0x984   : > { %21342 = vmatprep.subr.msk.mxu0 %vm1642_vm2, %v15199_v38  ;;  %v15227_v38 = vpop.permute.xlu1 %15226 }
 0x987   : > { %17556 = vrot.lane.b32.xlu0 %v25277_v52, %s26592_s11  ;;  %17554 = vrot.lane.b32.xlu1 %v25275_v12, %s26592_s11 }
 0x989   : > { %21340 = vmatmul.mubr.msk.f32.vlgmr.msra.gmra.mrb[4].mxu0 %vm1638_vm4, %v21337_v3  ;;  %v15228_v3 = vsel %vm979_vm3, %v25169_v0, %v15227_v38 }
 0x98a   : > { %21343 = vmatpush1.msk.msra.mxu0 %vm1642_vm2, %v15198_v9  ;;  %15759 = vmatprep.mubr.f32.mxu0 %v26506_v60  ;;  %v15231_v35 = vmul.f32 %v15228_v3, %v22316_v28  ;;  %v15235_v9 = vpop.permute.xlu1 %15234  ;;  %v21365_v3 = vld [vmem:[%s26246_s14 + $0x1e0] sm:$0x3f] }
 0x98b   : > { %17564 = vrot.lane.b32.xlu0 %v25277_v52, %s26594_s12  ;;  %17562 = vrot.lane.b32.xlu1 %v25275_v12, %s26594_s12  ;;  %v15236_v41 = vsel %vm26679_vm15, %v25183_v61, %v15235_v9  ;;  %vm26683_vm15 = vmmov %vm26681_vm10 }
 0x98c   : > { %21346 = vmatprep.subr.msk.mxu0 %vm1642_vm2, %v15207_v43  ;;  %v15229_v43 = vsel %vm979_vm3, %v15227_v38, %v25169_v0  ;;  %v15239_v0 = vmul.f32 %v15236_v41, %v26631_v26  ;;  %v21361_v38 = vld [vmem:[%s26246_s14 + $0x1d8] sm:$0x3f] }
 0x98e   : > { %v15243_v37 = vpop.permute.xlu1 %15242 }
 0x98f   : > { %17572 = vrot.lane.b32.xlu0 %v25277_v52, %s26486_s29  ;;  %17570 = vrot.lane.b32.xlu1 %v25275_v12, %s26486_s29 }
 0x991   : > { %21344 = vmatmul.mubr.msk.f32.vlgmr.msra.gmra.mrb[4].mxu0 %vm1638_vm4, %v21341_v49  ;;  %v15230_v49 = vmul.f32 %v15229_v43, %v22343_v36 }
 0x992   : > { %21347 = vmatpush1.msk.msra.mxu0 %vm1642_vm2, %v15206_v5  ;;  %15843 = vmatprep.mubr.f32.mxu0 %v26506_v60  ;;  %v15237_v5 = vsel %vm26680_vm11, %v15235_v9, %v25183_v61  ;;  %v19740_v61 = vld [vmem:[%s26682_s6] sm:$0x3f]  ;;  %v15251_v51 = vpop.permute.xlu1 %15250  ;;  %v21369_v9 = vld [vmem:[%s26246_s14 + $0x1e8] sm:$0x3f]  ;;  %vm26684_vm11 = vcmp.lt.s32.totalorder %v22268_v7, 126 }
 0x993   : > { %17580 = vrot.lane.b32.xlu0 %v25277_v52, %s26487_s24  ;;  %17578 = vrot.lane.b32.xlu1 %v25275_v12, %s26487_s24  ;;  %v15238_v6 = vmul.f32 %v15237_v5, %v26634_v29  ;;  %v26686_v5 = vld [vmem:[#allocation19_spill] sm:$0xff] }
 0x994   : > { %21350 = vmatprep.subr.msk.mxu0 %vm1642_vm2, %v15215_v22  ;;  %v15244_v22 = vsel %vm26681_vm10, %v25198_v55, %v15243_v37  ;;  %vm26685_vm10 = vmmov %vm26684_vm11 }
 0x997   : > { %17588 = vrot.lane.b32.xlu0 %v25277_v52, %s26488_s26  ;;  %17586 = vrot.lane.b32.xlu1 %v25275_v12, %s26488_s26 }
 0x999   : > { %21348 = vmatmul.mubr.msk.f32.vlgmr.msra.gmra.mrb[4].mxu0 %vm1638_vm4, %v21345_v8  ;;  %v15247_v8 = vmul.f32 %v15244_v22, %v26635_v19 }
 0x99a   : > { %21351 = vmatpush1.msk.msra.mxu0 %vm1642_vm2, %v15214_v56  ;;  %15927 = vmatprep.mubr.f32.mxu0 %v26506_v60  ;;  %v15245_v56 = vsel %vm26683_vm15, %v15243_v37, %v25198_v55  ;;  %v15253_v55 = vsel %vm1089_vm5, %v15251_v51, %v25209_v57  ;;  %vm26687_vm15 = vcmp.lt.s32.totalorder %v22268_v7, 114 }
 0x99b   : > { %17596 = vrot.lane.b32.xlu0 %v25277_v52, %s26600_s0  ;;  %17594 = vrot.lane.b32.xlu1 %v25275_v12, %s26600_s0  ;;  %v15246_v63 = vmul.f32 %v15245_v56, %v26637_v21  ;;  %v15283_v56 = vpop.permute.xlu0 %15282 }
 0x99c   : > { %21354 = vmatprep.subr.msk.mxu0 %vm1642_vm2, %v15223_v25  ;;  %v15252_v25 = vsel %vm1089_vm5, %v25209_v57, %v15251_v51 }
 0x99f   : > { %17604 = vrot.lane.b32.xlu0 %v25277_v52, %s26601_s25  ;;  %17602 = vrot.lane.b32.xlu1 %v25275_v12, %s26601_s25 }
 0x9a1   : > { %21352 = vmatmul.mubr.msk.f32.vlgmr.msra.gmra.mrb[4].mxu0 %vm1638_vm4, %v21349_v1  ;;  %v15255_v1 = vmul.f32 %v15252_v25, %v22351_v39 }
 0x9a2   : > { %21355 = vmatpush1.msk.msra.mxu0 %vm1642_vm2, %v15222_v33  ;;  %16011 = vmatprep.mubr.f32.mxu0 %v26506_v60  ;;  %v15254_v33 = vmul.f32 %v15253_v55, %v22368_v45 }
 0x9a3   : > { %17612 = vrot.lane.b32.xlu0 %v25277_v52, %s26604_s9  ;;  %17610 = vrot.lane.b32.xlu1 %v25275_v12, %s26604_s9 }
 0x9a4   : > { %21358 = vmatprep.subr.msk.mxu0 %vm1642_vm2, %v15231_v35  ;;  %v15259_v35 = vpop.permute.xlu1 %15258 }
 0x9a5   : > { %v15261_v57 = vsel %vm1111_vm6, %v15259_v35, %v25222_v23 }
 0x9a6   : > { %v15263_v43 = vmul.f32 %v15261_v57, %v26638_v40 }
 0x9a7   : > { %17620 = vrot.lane.b32.xlu0 %v25277_v52, %s26605_s18  ;;  %17618 = vrot.lane.b32.xlu1 %v25275_v12, %s26605_s18 }
 0x9a9   : > { %21356 = vmatmul.mubr.msk.f32.vlgmr.msra.gmra.mrb[4].mxu0 %vm1638_vm4, %v21353_v18  ;;  %v15267_v18 = vpop.permute.xlu1 %15266 }
 0x9aa   : > { %21359 = vmatpush1.msk.msra.mxu0 %vm1642_vm2, %v15230_v49  ;;  %16095 = vmatprep.mubr.f32.mxu0 %v26506_v60  ;;  %v15269_v41 = vsel %vm26684_vm11, %v15267_v18, %v25236_v59  ;;  %v21373_v49 = vld [vmem:[%s26246_s14 + $0x1f0] sm:$0x3f]  ;;  %vm26690_vm11 = vmmov %vm26687_vm15 }
 0x9ab   : > { %17628 = vrot.lane.b32.xlu0 %v25277_v52, %s26607_s28  ;;  %17626 = vrot.lane.b32.xlu1 %v25275_v12, %s26607_s28  ;;  %s26746_s28 = sshll.u32 %s26745_s4, 4 }
 0x9ac   : > { %21362 = vmatprep.subr.msk.mxu0 %vm1642_vm2, %v15239_v0 }
 0x9ad   : > { %v15275_v37 = vpop.permute.xlu1 %15274 }
 0x9ae   : > { %v15277_v22 = vsel %vm26687_vm15, %v15275_v37, %v26686_v5 }
 0x9af   : > { %17636 = vrot.lane.b32.xlu0 %v25277_v52, %s26608_s16  ;;  %17634 = vrot.lane.b32.xlu1 %v25275_v12, %s26608_s16  ;;  %s26747_s16 = sld [smem:[#allocation84_spill]] }
 0x9b1   : > { %21360 = vmatmul.mubr.msk.f32.vlgmr.msra.gmra.mrb[4].mxu0 %vm1638_vm4, %v21357_v46  ;;  %v21377_v46 = vld [vmem:[%s26246_s14 + $0x1f8] sm:$0x3f]  ;;  %v15281_v25 = vpop.permute.xlu1 %15280 }
 0x9b2   : > { %21363 = vmatpush1.msk.msra.mxu0 %vm1642_vm2, %v15238_v6  ;;  %16179 = vmatprep.mubr.f32.mxu0 %v26506_v60  ;;  %v26688_v6 = vld [vmem:[#allocation52_spill] sm:$0xff] }
 0x9b3   : > { %19743 = vperm.xlu1 %22045, %v19740_v61   ;;  %21366 = vmatprep.subr.msk.mxu0 %vm1642_vm2, %v15247_v8  ;;  %v26689_v8 = vld [vmem:[#allocation53_spill] sm:$0xff] }
 0x9b4   : > { %v15279_v51 = vmul.f32 %v15277_v22, %v26689_v8  ;;  %v21389_v22 = vld [vmem:[%s26246_s14 + $0x210] sm:$0x3f] }
 0x9b5   : > { %v15289_v57 = vpop.permute.xlu1 %15288  ;;  %s575_s15 = scalar_lea.vmem %s26747_s16, %s26746_s28 }
 0x9b9   : > { %21364 = vmatmul.mubr.msk.f32.vlgmr.msra.gmra.mrb[4].mxu0 %vm1638_vm4, %v21361_v38  ;;  %v15285_v38 = vsel %vm1221_vm7, %v15283_v56, %v15281_v25 }
 0x9ba   : > { %21367 = vmatpush1.msk.msra.mxu0 %vm1642_vm2, %v15246_v63  ;;  %16263 = vmatprep.mubr.f32.mxu0 %v26506_v60  ;;  %v21381_v63 = vld [vmem:[%s26246_s14 + $0x200] sm:$0x3f] }
 0x9bb   : > { %21370 = vmatprep.subr.msk.mxu0 %vm1642_vm2, %v15255_v1  ;;  %v26691_v1 = vld [vmem:[#allocation54_spill] sm:$0xff] }
 0x9c1   : > { %21368 = vmatmul.mubr.msk.f32.vlgmr.msra.gmra.mrb[4].mxu0 %vm1638_vm4, %v21365_v3  ;;  %v26692_v3 = vld [vmem:[#allocation12_spill] sm:$0xff] }
 0x9c2   : > { %21371 = vmatpush1.msk.msra.mxu0 %vm1642_vm2, %v15254_v33  ;;  %16347 = vmatprep.mubr.f32.mxu0 %v26506_v60  ;;  %v15287_v33 = vmul.f32 %v15285_v38, %v26692_v3 }
 0x9c3   : > { %21374 = vmatprep.subr.msk.mxu0 %vm1642_vm2, %v24713_v13  ;;  %v15260_v13 = vsel %vm1111_vm6, %v25222_v23, %v15259_v35  ;;  %v15268_v23 = vsel %vm26685_vm10, %v25236_v59, %v15267_v18  ;;  %v15276_v59 = vsel %vm26690_vm11, %v26686_v5, %v15275_v37  ;;  %v15291_v35 = vpop.permute.xlu0 %15290  ;;  %v21385_v18 = vld [vmem:[%s26246_s14 + $0x208] sm:$0x3f]  ;;  %v15297_v37 = vpop.permute.xlu1 %15296  ;;  %vm26697_vm10 = vcmp.lt.s32.totalorder %v22268_v7, 110 }
 0x9c4   : > { %v15262_v0 = vmul.f32 %v15260_v13, %v26640_v24  ;;  %v15270_v61 = vmul.f32 %v15268_v23, %v26688_v6  ;;  %v15278_v55 = vmul.f32 %v15276_v59, %v26691_v1  ;;  %v26693_v13 = vld [vmem:[#allocation13_spill] sm:$0xff]  ;;  %v15292_v23 = vsel %vm1243_vm8, %v15289_v57, %v15291_v35  ;;  %vm26700_vm15 = vmmov %vm26697_vm10 }
 0x9c5   : > { %vm26701_vm11 = vcmp.lt.s32.totalorder %v22268_v7, 98 }
 0x9c9   : > { %21372 = vmatmul.mubr.msk.f32.vlgmr.msra.gmra.mrb[4].mxu0 %vm1638_vm4, %v21369_v9  ;;  %v15284_v9 = vsel %vm1221_vm7, %v15281_v25, %v15283_v56  ;;  %v15305_v25 = vpop.permute.xlu1 %15304 }
 0x9ca   : > { %21375 = vmatpush1.msk.msra.mxu0 %vm1642_vm2, %v24711_v10  ;;  %16431 = vmatprep.mubr.f32.mxu0 %v26506_v60  ;;  %v15271_v10 = vmul.f32 %v15269_v41, %v26641_v2  ;;  %v15286_v41 = vmul.f32 %v15284_v9, %v26693_v13 }
 0x9cb   : > { %21378 = vmatprep.subr.msk.mxu0 %vm1642_vm2, %v15263_v43  ;;  %v15293_v43 = vsel %vm1243_vm8, %v15291_v35, %v15289_v57  ;;  %v26699_v57 = vld [vmem:[#allocation55_spill] sm:$0xff] }
 0x9d1   : > { %21376 = vmatmul.mubr.msk.f32.vlgmr.msra.gmra.mrb[4].mxu0 %vm1638_vm4, %v21373_v49  ;;  %v26694_v49 = vld [vmem:[#allocation14_spill] sm:$0xff] }
 0x9d2   : > { %21379 = vmatpush1.msk.msra.mxu0 %vm1642_vm2, %v15262_v0  ;;  %16515 = vmatprep.mubr.f32.mxu0 %v26506_v60  ;;  %v15295_v0 = vmul.f32 %v15293_v43, %v26694_v49 }
 0x9d3   : > { %21382 = vmatprep.subr.msk.mxu0 %vm1642_vm2, %v15271_v10  ;;  %v15299_v10 = vpop.permute.xlu0 %15298 }
 0x9d4   : > { %v15301_v5 = vsel %vm1265_vm9, %v15299_v10, %v15297_v37  ;;  %v15300_v38 = vsel %vm1265_vm9, %v15297_v37, %v15299_v10  ;;  %v21397_v10 = vld [vmem:[%s26246_s14 + $0x220] sm:$0x3f] }
 0x9d5   : > { %v26702_v37 = vld [vmem:[#allocation56_spill] sm:$0xff] }
 0x9d7   : > { %v15307_v59 = vpop.permute.xlu0 %15306 }
 0x9d9   : > { %21380 = vmatmul.mubr.msk.f32.vlgmr.msra.gmra.mrb[4].mxu0 %vm1638_vm4, %v21377_v46  ;;  %v26695_v46 = vld [vmem:[#allocation15_spill] sm:$0xff] }
 0x9da   : > { %21383 = vmatpush1.msk.msra.mxu0 %vm1642_vm2, %v15270_v61  ;;  %16599 = vmatprep.mubr.f32.mxu0 %v26506_v60  ;;  %v15294_v61 = vmul.f32 %v15292_v23, %v26695_v46 }
 0x9db   : > { %21386 = vmatprep.subr.msk.mxu0 %vm1642_vm2, %v15279_v51  ;;  %v26696_v51 = vld [vmem:[#allocation16_spill] sm:$0xff]  ;;  %v15315_v43 = vpop.permute.xlu0 %15314 }
 0x9dc   : > { %v15303_v56 = vmul.f32 %v15301_v5, %v26696_v51  ;;  %v26703_v5 = vld [vmem:[#allocation57_spill] sm:$0xff] }
 0x9e1   : > { %21384 = vmatmul.mubr.msk.f32.vlgmr.msra.gmra.mrb[4].mxu0 %vm1638_vm4, %v21381_v63  ;;  %v15309_v63 = vsel %vm26697_vm10, %v15307_v59, %v15305_v25  ;;  %vm26704_vm10 = vmmov %vm26701_vm11 }
 0x9e2   : > { %21387 = vmatpush1.msk.msra.mxu0 %vm1642_vm2, %v15278_v55  ;;  %16683 = vmatprep.mubr.f32.mxu0 %v26506_v60  ;;  %v21393_v55 = vld [vmem:[%s26246_s14 + $0x218] sm:$0x3f]  ;;  %v15311_v9 = vmul.f32 %v15309_v63, %v26699_v57  ;;  %v26706_v63 = vld [vmem:[#allocation58_spill] sm:$0xff] }
 0x9e3   : > { %21390 = vmatprep.subr.msk.mxu0 %vm1642_vm2, %v15287_v33  ;;  %v26698_v33 = vld [vmem:[#allocation17_spill] sm:$0xff] }
 0x9e4   : > { %v15302_v35 = vmul.f32 %v15300_v38, %v26698_v33  ;;  %v21401_v38 = vld [vmem:[%s26246_s14 + $0x228] sm:$0x3f] }
 0x9e9   : > { %21388 = vmatmul.mubr.msk.f32.vlgmr.msra.gmra.mrb[4].mxu0 %vm1638_vm4, %v21385_v18  ;;  %v15313_v18 = vpop.permute.xlu1 %15312 }
 0x9ea   : > { %21391 = vmatpush1.msk.msra.mxu0 %vm1642_vm2, %v15286_v41  ;;  %16767 = vmatprep.mubr.f32.mxu0 %v26506_v60  ;;  %v15308_v41 = vsel %vm26700_vm15, %v15305_v25, %v15307_v59  ;;  %v15316_v59 = vsel %vm26704_vm10, %v15313_v18, %v15315_v43  ;;  %vm26705_vm15 = vcmp.lt.s32.totalorder %v22268_v7, 97  ;;  %vm26709_vm10 = vcmp.lt.s32.totalorder %v22268_v7, 96 }
 0x9eb   : > { %21394 = vmatprep.subr.msk.mxu0 %vm1642_vm2, %v15295_v0  ;;  %v15317_v0 = vsel %vm26701_vm11, %v15315_v43, %v15313_v18  ;;  %v15310_v23 = vmul.f32 %v15308_v41, %v26702_v37  ;;  %vm26708_vm11 = vmmov %vm26705_vm15 }
 0x9f1   : > { %21392 = vmatmul.mubr.msk.f32.vlgmr.msra.gmra.mrb[4].mxu0 %vm1638_vm4, %v21389_v22  ;;  %v15319_v22 = vmul.f32 %v15317_v0, %v26703_v5 }
 0x9f2   : > { %21395 = vmatpush1.msk.msra.mxu0 %vm1642_vm2, %v15294_v61  ;;  %16851 = vmatprep.mubr.f32.mxu0 %v26506_v60  ;;  %v15323_v61 = vpop.permute.xlu0 %15322 }
 0x9f3   : > { %21398 = vmatprep.subr.msk.mxu0 %vm1642_vm2, %v15303_v56  ;;  %v15321_v56 = vpop.permute.xlu1 %15320 }
 0x9f4   : > { %v15325_v25 = vsel %vm26705_vm15, %v15323_v61, %v15321_v56  ;;  %v15324_v18 = vsel %vm26708_vm11, %v15321_v56, %v15323_v61  ;;  %vm26712_vm15 = vmmov %vm26709_vm10  ;;  %vm26713_vm11 = vcmp.lt.s32.totalorder %v22268_v7, 95 }
 0x9f6   : > { %v15331_v41 = vpop.permute.xlu0 %15330 }
 0x9f7   : > { %v15329_v43 = vpop.permute.xlu1 %15328 }
 0x9f8   : > { %v15333_v0 = vsel %vm26709_vm10, %v15331_v41, %v15329_v43  ;;  %v15332_v56 = vsel %vm26712_vm15, %v15329_v43, %v15331_v41  ;;  %vm26714_vm10 = vmmov %vm26713_vm11  ;;  %vm26715_vm15 = vcmp.lt.s32.totalorder %v22268_v7, 94 }
 0x9f9   : > { %21396 = vmatmul.mubr.msk.f32.vlgmr.msra.gmra.mrb[4].mxu0 %vm1638_vm4, %v21393_v55  ;;  %v15318_v55 = vmul.f32 %v15316_v59, %v26706_v63  ;;  %v26711_v59 = vld [vmem:[#allocation61_spill] sm:$0xff] }
 0x9fa   : > { %21399 = vmatpush1.msk.msra.mxu0 %vm1642_vm2, %v15302_v35  ;;  %16935 = vmatprep.mubr.f32.mxu0 %v26506_v60  ;;  %v26707_v35 = vld [vmem:[#allocation59_spill] sm:$0xff] }
 0x9fb   : > { %21402 = vmatprep.subr.msk.mxu0 %vm1642_vm2, %v15311_v9  ;;  %v15327_v9 = vmul.f32 %v15325_v25, %v26707_v35  ;;  %v15335_v25 = vmul.f32 %v15333_v0, %v26711_v59  ;;  %v15337_v61 = vpop.permute.xlu1 %15336 }
 0x9ff   : > { %v15345_v41 = vpop.permute.xlu1 %15344 }
 0xa01   : > { %21400 = vmatmul.mubr.msk.f32.vlgmr.msra.gmra.mrb[4].mxu0 %vm1638_vm4, %v21397_v10  ;;  %v21405_v10 = vld [vmem:[%s26246_s14 + $0x230] sm:$0x3f] }
 0xa02   : > { %21403 = vmatpush1.msk.msra.mxu0 %vm1642_vm2, %v15310_v23  ;;  %17019 = vmatprep.mubr.f32.mxu0 %v26506_v60  ;;  %v26710_v23 = vld [vmem:[#allocation60_spill] sm:$0xff] }
 0xa03   : > { %21406 = vmatprep.subr.msk.mxu0 %vm1642_vm2, %v15319_v22  ;;  %v15326_v22 = vmul.f32 %v15324_v18, %v26710_v23  ;;  %v15334_v18 = vmul.f32 %v15332_v56, %v26665_v58 }
 0xa09   : > { %21404 = vmatmul.mubr.msk.f32.vlgmr.msra.gmra.mrb[4].mxu0 %vm1638_vm4, %v21401_v38  ;;  %v15339_v38 = vpop.permute.xlu0 %15338 }
 0xa0a   : > { %21407 = vmatpush1.msk.msra.mxu0 %vm1642_vm2, %v15318_v55  ;;  %17103 = vmatprep.mubr.f32.mxu0 %v26506_v60  ;;  %v15341_v55 = vsel %vm26713_vm11, %v15339_v38, %v15337_v61  ;;  %v15340_v43 = vsel %vm26714_vm10, %v15337_v61, %v15339_v38  ;;  %vm26716_vm11 = vmmov %vm26715_vm15 }
 0xa0b   : > { %21410 = vmatprep.subr.msk.mxu0 %vm1642_vm2, %v15327_v9  ;;  %v21409_v9 = vld [vmem:[%s26246_s14 + $0x238] sm:$0x3f]  ;;  %v15343_v0 = vmul.f32 %v15341_v55, %v26667_v48  ;;  %v15342_v56 = vmul.f32 %v15340_v43, %v26669_v27 }
 0xa11   : > { %21408 = vmatmul.mubr.msk.f32.vlgmr.msra.gmra.mrb[4].mxu0 %vm1638_vm4, %v21405_v10  ;;  %v15347_v10 = vpop.permute.xlu0 %15346 }
 0xa12   : > { %21411 = vmatpush1.msk.msra.mxu0 %vm1642_vm2, %v15326_v22  ;;  %17187 = vmatprep.mubr.f32.mxu0 %v26506_v60  ;;  %v15349_v22 = vsel %vm26715_vm15, %v15347_v10, %v15345_v41  ;;  %v15348_v38 = vsel %vm26716_vm11, %v15345_v41, %v15347_v10  ;;  %vm26721_vm15 = vcmp.lt.s32.totalorder %v22268_v7, 18 }
 0xa13   : > { %21414 = vmatprep.subr.msk.mxu0 %vm1642_vm2, %v15335_v25  ;;  %v21413_v25 = vld [vmem:[%s26246_s14 + $0x240] sm:$0x3f]  ;;  %v15351_v55 = vmul.f32 %v15349_v22, %v26670_v53  ;;  %v15350_v43 = vmul.f32 %v15348_v38, %v26672_v30  ;;  %vm26722_vm11 = vmmov %vm26721_vm15 }
 0xa19   : > { %21412 = vmatmul.mubr.msk.f32.vlgmr.msra.gmra.mrb[4].mxu0 %vm1638_vm4, %v21409_v9  ;;  %v17461_v9 = vpop.permute.xlu0 %17460 }
 0xa1a   : > { %21415 = vmatpush1.msk.msra.mxu0 %vm1642_vm2, %v15334_v18  ;;  %17271 = vmatprep.mubr.f32.mxu0 %v26506_v60  ;;  %v17459_v18 = vpop.permute.xlu1 %17458 }
 0xa1b   : > { %21418 = vmatprep.subr.msk.mxu0 %vm1642_vm2, %v15343_v0  ;;  %v17462_v61 = vsel %vm781_vm12, %v17459_v18, %v17461_v9  ;;  %v21417_v0 = vld [vmem:[%s26246_s14 + $0x248] sm:$0x3f]  ;;  %v17463_v10 = vsel %vm781_vm12, %v17461_v9, %v17459_v18  ;;  %vm26717_vm12 = vcmp.lt.s32.totalorder %v22268_v7, 31 }
 0xa1c   : > { %v17465_v22 = vmul.f32 %v17462_v61, %v26611_v44  ;;  %v21421_v44 = vld [vmem:[%s26246_s14 + $0x250] sm:$0x3f] }
 0xa21   : > { %21416 = vmatmul.mubr.msk.f32.vlgmr.msra.gmra.mrb[4].mxu0 %vm1638_vm4, %v21413_v25  ;;  %v17453_v25 = vpop.permute.xlu0 %17452 }
 0xa22   : > { %21419 = vmatpush1.msk.msra.mxu0 %vm1642_vm2, %v15342_v56  ;;  %17355 = vmatprep.mubr.f32.mxu0 %v26506_v60  ;;  %v17451_v56 = vpop.permute.xlu1 %17450 }
 0xa23   : > { %21422 = vmatprep.subr.msk.mxu0 %vm1642_vm2, %v15351_v55  ;;  %v17454_v41 = vsel %vm759_vm13, %v17451_v56, %v17453_v25  ;;  %v17464_v55 = vmul.f32 %v17463_v10, %v26613_v34  ;;  %v17455_v9 = vsel %vm759_vm13, %v17453_v25, %v17451_v56  ;;  %v21426_v34 = vld [vmem:[%s26246_s14 + $0x260] sm:$0x3f]  ;;  %vm26718_vm13 = vmmov %vm26717_vm12 }
 0xa24   : > { %v17457_v38 = vmul.f32 %v17454_v41, %v26614_v47  ;;  %v17456_v47 = vmul.f32 %v17455_v9, %v26615_v50  ;;  %v21425_v50 = vld [vmem:[%s26246_s14 + $0x258] sm:$0x3f] }
 0xa25   : > { %v17469_v61 = vpop.permute.xlu0 %17468 }
 0xa29   : > { %21420 = vmatmul.mubr.msk.f32.vlgmr.msra.gmra.mrb[4].mxu0 %vm1638_vm4, %v21417_v0  ;;  %v17467_v0 = vpop.permute.xlu1 %17466 }
 0xa2a   : > { %21423 = vmatpush1.msk.msra.mxu0 %vm1642_vm2, %v15350_v43  ;;  %17439 = vmatprep.mubr.f32.mxu0 %v26506_v60  ;;  %v17470_v18 = vsel %vm803_vm14, %v17467_v0, %v17469_v61  ;;  %v17471_v25 = vsel %vm803_vm14, %v17469_v61, %v17467_v0  ;;  %vm26719_vm14 = vcmp.lt.s32.totalorder %v22268_v7, 30 }
 0xa2b   : > { %21427 = vmatprep.subr.msk.mxu0 %vm1642_vm2, %v17465_v22  ;;  %v17473_v43 = vmul.f32 %v17470_v18, %v26616_v62  ;;  %v17477_v22 = vpop.permute.xlu0 %17476  ;;  %v17472_v62 = vmul.f32 %v17471_v25, %v26618_v54  ;;  %v21433_v54 = vld [vmem:[%s26246_s14 + $0x268] sm:$0x3f]  ;;  %vm26720_vm10 = vmmov %vm26719_vm14 }
 0xa2d   : > { %v17475_v10 = vpop.permute.xlu1 %17474 }
 0xa2e   : > { %v17478_v56 = vsel %vm26717_vm12, %v17475_v10, %v17477_v22  ;;  %vm26723_vm12 = vcmp.lt.s32.totalorder %v22268_v7, 14 }
 0xa2f   : > { %v17481_v41 = vmul.f32 %v17478_v56, %v26619_v32 }
 0xa31   : > { %21424 = vmatmul.mubr.msk.f32.vlgmr.msra.gmra.mrb[4].mxu0 %vm1638_vm4, %v21421_v44  ;;  %v17485_v44 = vpop.permute.xlu0 %17484 }
 0xa32   : > { %21428 = vmatpush1.msk.msra.mxu0 %vm1642_vm2, %v17464_v55  ;;  %17719 = vmatprep.mubr.f32.mxu0 %v26506_v60  ;;  %v17483_v55 = vpop.permute.xlu1 %17482 }
 0xa33   : > { %21430 = vmatprep.subr.msk.mxu0 %vm1642_vm2, %v17457_v38  ;;  %v17479_v38 = vsel %vm26718_vm13, %v17477_v22, %v17475_v10  ;;  %v17486_v61 = vsel %vm26719_vm14, %v17483_v55, %v17485_v44  ;;  %vm26724_vm13 = vmmov %vm26723_vm12  ;;  %vm26725_vm14 = vcmp.lt.s32.totalorder %v22268_v7, 2 }
 0xa34   : > { %v17480_v32 = vmul.f32 %v17479_v38, %v26622_v20  ;;  %v17489_v0 = vmul.f32 %v17486_v61, %v26623_v42  ;;  %v21437_v20 = vld [vmem:[%s26246_s14 + $0x270] sm:$0x3f] }
 0xa35   : > { %v17493_v9 = vpop.permute.xlu0 %17492 }
 0xa36   : > { %v17491_v18 = vpop.permute.xlu1 %17490 }
 0xa37   : > { %v17495_v25 = vsel %vm26722_vm11, %v17493_v9, %v17491_v18 }
 0xa39   : > { %21429 = vmatmul.mubr.msk.f32.vlgmr.msra.gmra.mrb[4].mxu0 %vm1638_vm4, %v21426_v34  ;;  %v17487_v34 = vsel %vm26720_vm10, %v17485_v44, %v17483_v55  ;;  %v17501_v22 = vpop.permute.xlu0 %17500  ;;  %vm26726_vm10 = vmmov %vm26725_vm14 }
 0xa3a   : > { %21431 = vmatpush1.msk.msra.mxu0 %vm1642_vm2, %v17456_v47  ;;  %17799 = vmatprep.mubr.f32.mxu0 %v26506_v60  ;;  %v17494_v47 = vsel %vm26721_vm15, %v17491_v18, %v17493_v9  ;;  %v17488_v42 = vmul.f32 %v17487_v34, %v26626_v31  ;;  %v17499_v10 = vpop.permute.xlu1 %17498  ;;  %v21441_v31 = vld [vmem:[%s26246_s14 + $0x278] sm:$0x3f]  ;;  %v21449_v18 = vld [vmem:[%s26246_s14 + $0x288] sm:$0x3f]  ;;  %vm26727_vm15 = vcmp.lt.s32.totalorder %v22268_v7, 126 }
 0xa3b   : > { %21434 = vmatprep.subr.msk.mxu0 %vm1642_vm2, %v17473_v43  ;;  %v17497_v43 = vmul.f32 %v17494_v47, %v26627_v11  ;;  %v17502_v56 = vsel %vm935_vm0, %v17499_v10, %v17501_v22  ;;  %v17496_v11 = vmul.f32 %v17495_v25, %v26629_v4  ;;  %v17503_v44 = vsel %vm935_vm0, %v17501_v22, %v17499_v10  ;;  %v21445_v4 = vld [vmem:[%s26246_s14 + $0x280] sm:$0x3f]  ;;  %v21453_v10 = vld [vmem:[%s26246_s14 + $0x290] sm:$0x3f]  ;;  %vm26728_vm11 = vmmov %vm26727_vm15 }
 0xa3c   : > { %v17504_v38 = vmul.f32 %v17503_v44, %v22292_v17 }
 0xa41   : > { %21432 = vmatmul.mubr.msk.f32.vlgmr.msra.gmra.mrb[4].mxu0 %vm1638_vm4, %v21425_v50  ;;  %v17505_v50 = vmul.f32 %v17502_v56, %v22282_v14 }
 0xa42   : > { %21435 = vmatpush1.msk.msra.mxu0 %vm1642_vm2, %v17472_v62  ;;  %17881 = vmatprep.mubr.f32.mxu0 %v26506_v60  ;;  %v17509_v62 = vpop.permute.xlu0 %17508 }
 0xa43   : > { %21438 = vmatprep.subr.msk.mxu0 %vm1642_vm2, %v17481_v41  ;;  %v17507_v41 = vpop.permute.xlu1 %17506 }
 0xa44   : > { %v17510_v55 = vsel %vm957_vm1, %v17507_v41, %v17509_v62 }
 0xa45   : > { %v17513_v61 = vmul.f32 %v17510_v55, %v22289_v16 }
 0xa49   : > { %21436 = vmatmul.mubr.msk.f32.vlgmr.msra.gmra.mrb[4].mxu0 %vm1638_vm4, %v21433_v54  ;;  %v17517_v54 = vpop.permute.xlu0 %17516 }
 0xa4a   : > { %21439 = vmatpush1.msk.msra.mxu0 %vm1642_vm2, %v17480_v32  ;;  %17965 = vmatprep.mubr.f32.mxu0 %v26506_v60  ;;  %v17515_v32 = vpop.permute.xlu1 %17514 }
 0xa4b   : > { %21442 = vmatprep.subr.msk.mxu0 %vm1642_vm2, %v17489_v0  ;;  %v17511_v0 = vsel %vm957_vm1, %v17509_v62, %v17507_v41  ;;  %v17518_v9 = vsel %vm979_vm3, %v17515_v32, %v17517_v54 }
 0xa4c   : > { %v17512_v34 = vmul.f32 %v17511_v0, %v22286_v15  ;;  %v17521_v47 = vmul.f32 %v17518_v9, %v22316_v28  ;;  %v21465_v0 = vld [vmem:[%s26246_s14 + $0x2a8] sm:$0x3f] }
 0xa51   : > { %21440 = vmatmul.mubr.msk.f32.vlgmr.msra.gmra.mrb[4].mxu0 %vm1638_vm4, %v21437_v20  ;;  %v17525_v20 = vpop.permute.xlu0 %17524 }
 0xa52   : > { %21443 = vmatpush1.msk.msra.mxu0 %vm1642_vm2, %v17488_v42  ;;  %18049 = vmatprep.mubr.f32.mxu0 %v26506_v60  ;;  %v17523_v42 = vpop.permute.xlu1 %17522 }
 0xa53   : > { %21446 = vmatprep.subr.msk.mxu0 %vm1642_vm2, %v17497_v43  ;;  %v17519_v43 = vsel %vm979_vm3, %v17517_v54, %v17515_v32  ;;  %v17526_v22 = vsel %vm26723_vm12, %v17523_v42, %v17525_v20  ;;  %vm26729_vm12 = vcmp.lt.s32.totalorder %v22268_v7, 114 }
 0xa54   : > { %v17520_v25 = vmul.f32 %v17519_v43, %v22343_v36  ;;  %v17529_v56 = vmul.f32 %v17526_v22, %v26631_v26  ;;  %v21457_v26 = vld [vmem:[%s26246_s14 + $0x298] sm:$0x3f] }
 0xa59   : > { %21444 = vmatmul.mubr.msk.f32.vlgmr.msra.gmra.mrb[4].mxu0 %vm1638_vm4, %v21441_v31  ;;  %v17533_v31 = vpop.permute.xlu0 %17532 }
 0xa5a   : > { %21447 = vmatpush1.msk.msra.mxu0 %vm1642_vm2, %v17496_v11  ;;  %18133 = vmatprep.mubr.f32.mxu0 %v26506_v60  ;;  %v17531_v11 = vpop.permute.xlu1 %17530 }
 0xa5b   : > { %21450 = vmatprep.subr.msk.mxu0 %vm1642_vm2, %v17505_v50  ;;  %v17527_v50 = vsel %vm26724_vm13, %v17525_v20, %v17523_v42  ;;  %v17534_v62 = vsel %vm26725_vm14, %v17531_v11, %v17533_v31  ;;  %vm26730_vm13 = vmmov %vm26729_vm12  ;;  %vm26731_vm14 = vcmp.lt.s32.totalorder %v22268_v7, 110 }
 0xa5c   : > { %v17528_v41 = vmul.f32 %v17527_v50, %v26634_v29  ;;  %v17537_v44 = vmul.f32 %v17534_v62, %v26635_v19  ;;  %v21461_v29 = vld [vmem:[%s26246_s14 + $0x2a0] sm:$0x3f] }
 0xa5d   : > { %v17541_v55 = vpop.permute.xlu0 %17540 }
 0xa61   : > { %21448 = vmatmul.mubr.msk.f32.vlgmr.msra.gmra.mrb[4].mxu0 %vm1638_vm4, %v21445_v4  ;;  %v17539_v4 = vpop.permute.xlu1 %17538 }
 0xa62   : > { %21451 = vmatpush1.msk.msra.mxu0 %vm1642_vm2, %v17504_v38  ;;  %18217 = vmatprep.mubr.f32.mxu0 %v26506_v60  ;;  %v17535_v38 = vsel %vm26726_vm10, %v17533_v31, %v17531_v11  ;;  %v17543_v32 = vsel %vm1089_vm5, %v17541_v55, %v17539_v4  ;;  %vm26732_vm10 = vmmov %vm26731_vm14 }
 0xa63   : > { %21454 = vmatprep.subr.msk.mxu0 %vm1642_vm2, %v17513_v61  ;;  %v17542_v61 = vsel %vm1089_vm5, %v17539_v4, %v17541_v55  ;;  %v17536_v19 = vmul.f32 %v17535_v38, %v26637_v21  ;;  %v17544_v9 = vmul.f32 %v17543_v32, %v22368_v45  ;;  %v17549_v21 = vpop.permute.xlu0 %17548 }
 0xa64   : > { %v17545_v54 = vmul.f32 %v17542_v61, %v22351_v39 }
 0xa67   : > { %v17557_v42 = vpop.permute.xlu0 %17556 }
 0xa69   : > { %21452 = vmatmul.mubr.msk.f32.vlgmr.msra.gmra.mrb[4].mxu0 %vm1638_vm4, %v21449_v18  ;;  %v17547_v18 = vpop.permute.xlu1 %17546 }
 0xa6a   : > { %21455 = vmatpush1.msk.msra.mxu0 %vm1642_vm2, %v17512_v34  ;;  %18301 = vmatprep.mubr.f32.mxu0 %v26506_v60  ;;  %v17551_v34 = vsel %vm1111_vm6, %v17549_v21, %v17547_v18 }
 0xa6b   : > { %21458 = vmatprep.subr.msk.mxu0 %vm1642_vm2, %v17521_v47  ;;  %v21469_v47 = vld [vmem:[%s26246_s14 + $0x2b0] sm:$0x3f]  ;;  %v17553_v20 = vmul.f32 %v17551_v34, %v26638_v40 }
 0xa6d   : > { %v17555_v43 = vpop.permute.xlu1 %17554 }
 0xa6e   : > { %v17559_v22 = vsel %vm26727_vm15, %v17557_v42, %v17555_v43  ;;  %v17558_v11 = vsel %vm26728_vm11, %v17555_v43, %v17557_v42  ;;  %vm26733_vm15 = vcmp.lt.s32.totalorder %v22268_v7, 98 }
 0xa6f   : > { %v17560_v62 = vmul.f32 %v17558_v11, %v26688_v6  ;;  %v21481_v6 = vld [vmem:[%s26246_s14 + $0x2c8] sm:$0x3f]  ;;  %vm26734_vm11 = vmmov %vm26733_vm15 }
 0xa71   : > { %21456 = vmatmul.mubr.msk.f32.vlgmr.msra.gmra.mrb[4].mxu0 %vm1638_vm4, %v21453_v10  ;;  %v21473_v10 = vld [vmem:[%s26246_s14 + $0x2b8] sm:$0x3f]  ;;  %v17563_v31 = vpop.permute.xlu1 %17562 }
 0xa72   : > { %21459 = vmatpush1.msk.msra.mxu0 %vm1642_vm2, %v17520_v25  ;;  %18385 = vmatprep.mubr.f32.mxu0 %v26506_v60 }
 0xa73   : > { %21462 = vmatprep.subr.msk.mxu0 %vm1642_vm2, %v17529_v56  ;;  %v17565_v56 = vpop.permute.xlu0 %17564 }
 0xa74   : > { %v17567_v50 = vsel %vm26729_vm12, %v17565_v56, %v17563_v31  ;;  %v17566_v55 = vsel %vm26730_vm13, %v17563_v31, %v17565_v56  ;;  %vm26735_vm12 = vcmp.lt.s32.totalorder %v22268_v7, 97 }
 0xa75   : > { %vm26736_vm13 = vmmov %vm26735_vm12 }
 0xa79   : > { %21460 = vmatmul.mubr.msk.f32.vlgmr.msra.gmra.mrb[4].mxu0 %vm1638_vm4, %v21457_v26  ;;  %v17569_v26 = vmul.f32 %v17567_v50, %v26689_v8  ;;  %v17568_v8 = vmul.f32 %v17566_v55, %v26691_v1  ;;  %v21485_v1 = vld [vmem:[%s26246_s14 + $0x2d0] sm:$0x3f] }
 0xa7a   : > { %21463 = vmatpush1.msk.msra.mxu0 %vm1642_vm2, %v17528_v41  ;;  %18469 = vmatprep.mubr.f32.mxu0 %v26506_v60  ;;  %v17573_v41 = vpop.permute.xlu0 %17572 }
 0xa7b   : > { %21466 = vmatprep.subr.msk.mxu0 %vm1642_vm2, %v17537_v44  ;;  %v17571_v44 = vpop.permute.xlu1 %17570 }
 0xa7c   : > { %v17575_v4 = vsel %vm1221_vm7, %v17573_v41, %v17571_v44 }
 0xa7d   : > { %v17577_v38 = vmul.f32 %v17575_v4, %v26692_v3 }
 0xa7e   : > { %v17581_v61 = vpop.permute.xlu0 %17580 }
 0xa81   : > { %21464 = vmatmul.mubr.msk.f32.vlgmr.msra.gmra.mrb[4].mxu0 %vm1638_vm4, %v21461_v29  ;;  %v17579_v29 = vpop.permute.xlu1 %17578 }
 0xa82   : > { %21467 = vmatpush1.msk.msra.mxu0 %vm1642_vm2, %v17536_v19  ;;  %18553 = vmatprep.mubr.f32.mxu0 %v26506_v60  ;;  %v17574_v19 = vsel %vm1221_vm7, %v17571_v44, %v17573_v41 }
 0xa83   : > { %21470 = vmatprep.subr.msk.mxu0 %vm1642_vm2, %v17545_v54  ;;  %v17583_v54 = vsel %vm1243_vm8, %v17581_v61, %v17579_v29  ;;  %v17576_v32 = vmul.f32 %v17574_v19, %v26693_v13 }
 0xa89   : > { %21468 = vmatmul.mubr.msk.f32.vlgmr.msra.gmra.mrb[4].mxu0 %vm1638_vm4, %v21465_v0  ;;  %v17585_v0 = vmul.f32 %v17583_v54, %v26694_v49 }
 0xa8a   : > { %21471 = vmatpush1.msk.msra.mxu0 %vm1642_vm2, %v17544_v9  ;;  %18637 = vmatprep.mubr.f32.mxu0 %v26506_v60  ;;  %v17589_v9 = vpop.permute.xlu0 %17588 }
 0xa8b   : > { %21474 = vmatprep.subr.msk.mxu0 %vm1642_vm2, %v25277_v52  ;;  %v17550_v52 = vsel %vm1111_vm6, %v17547_v18, %v17549_v21  ;;  %v17587_v21 = vpop.permute.xlu1 %17586  ;;  %v17582_v18 = vsel %vm1243_vm8, %v17579_v29, %v17581_v61 }
 0xa8c   : > { %v17552_v25 = vmul.f32 %v17550_v52, %v26640_v24  ;;  %v17591_v34 = vsel %vm1265_vm9, %v17589_v9, %v17587_v21 }
 0xa8d   : > { %v17593_v42 = vmul.f32 %v17591_v34, %v26696_v51 }
 0xa8e   : > { %v17597_v43 = vpop.permute.xlu0 %17596 }
 0xa8f   : > { %v17595_v52 = vpop.permute.xlu1 %17594 }
 0xa90   : > { %v17598_v50 = vsel %vm26732_vm10, %v17595_v52, %v17597_v43 }
 0xa91   : > { %21472 = vmatmul.mubr.msk.f32.vlgmr.msra.gmra.mrb[4].mxu0 %vm1638_vm4, %v21469_v47  ;;  %v21489_v47 = vld [vmem:[%s26246_s14 + $0x2d8] sm:$0x3f] }
 0xa92   : > { %21475 = vmatpush1.msk.msra.mxu0 %vm1642_vm2, %v25275_v12  ;;  %18721 = vmatprep.mubr.f32.mxu0 %v26506_v60  ;;  %v17561_v12 = vmul.f32 %v17559_v22, %v26641_v2  ;;  %v21477_v2 = vld [vmem:[%s26246_s14 + $0x2c0] sm:$0x3f]  ;;  %v17590_v22 = vsel %vm1265_vm9, %v17587_v21, %v17589_v9  ;;  %v17605_v31 = vpop.permute.xlu0 %17604 }
 0xa93   : > { %21478 = vmatprep.subr.msk.mxu0 %vm1642_vm2, %v17553_v20  ;;  %v17584_v20 = vmul.f32 %v17582_v18, %v26695_v46  ;;  %v17603_v11 = vpop.permute.xlu1 %17602 }
 0xa94   : > { %v17606_v55 = vsel %vm26734_vm11, %v17603_v11, %v17605_v31 }
 0xa96   : > { %v17613_v41 = vpop.permute.xlu0 %17612 }
 0xa97   : > { %v17611_v44 = vpop.permute.xlu1 %17610 }
 0xa98   : > { %v17615_v4 = vsel %vm26735_vm12, %v17613_v41, %v17611_v44  ;;  %v17614_v61 = vsel %vm26736_vm13, %v17611_v44, %v17613_v41  ;;  %vm26741_vm12 = vcmp.lt.s32.totalorder %v22268_v7, 94 }
 0xa99   : > { %21476 = vmatmul.mubr.msk.f32.vlgmr.msra.gmra.mrb[4].mxu0 %vm1638_vm4, %v21473_v10  ;;  %v17599_v10 = vsel %vm26731_vm14, %v17597_v43, %v17595_v52  ;;  %vm26737_vm14 = vcmp.lt.s32.totalorder %v22268_v7, 96  ;;  %vm26742_vm13 = vmmov %vm26741_vm12  ;;  %v21517_v43 = vld [vmem:[%s26246_s14 + $0x310] sm:$0x3f] }
 0xa9a   : > { %21479 = vmatpush1.msk.msra.mxu0 %vm1642_vm2, %v17552_v25  ;;  %18805 = vmatprep.mubr.f32.mxu0 %v26506_v60  ;;  %v21493_v25 = vld [vmem:[%s26246_s14 + $0x2e0] sm:$0x3f]  ;;  %v17601_v56 = vmul.f32 %v17599_v10, %v26699_v57  ;;  %v21497_v57 = vld [vmem:[%s26246_s14 + $0x2e8] sm:$0x3f]  ;;  %vm26738_vm10 = vmmov %vm26737_vm14 }
 0xa9b   : > { %21482 = vmatprep.subr.msk.mxu0 %vm1642_vm2, %v17561_v12  ;;  %v17592_v12 = vmul.f32 %v17590_v22, %v26698_v33 }
 0xaa1   : > { %21480 = vmatmul.mubr.msk.f32.vlgmr.msra.gmra.mrb[4].mxu0 %vm1638_vm4, %v21477_v2  ;;  %v17607_v2 = vsel %vm26733_vm15, %v17605_v31, %v17603_v11  ;;  %vm26739_vm15 = vcmp.lt.s32.totalorder %v22268_v7, 95 }
 0xaa2   : > { %21483 = vmatpush1.msk.msra.mxu0 %vm1642_vm2, %v17560_v62  ;;  %18889 = vmatprep.mubr.f32.mxu0 %v26506_v60  ;;  %v17600_v62 = vmul.f32 %v17598_v50, %v26702_v37  ;;  %v21501_v37 = vld [vmem:[%s26246_s14 + $0x2f0] sm:$0x3f]  ;;  %vm26740_vm11 = vmmov %vm26739_vm15 }
 0xaa3   : > { %21486 = vmatprep.subr.msk.mxu0 %vm1642_vm2, %v17569_v26  ;;  %v17609_v26 = vmul.f32 %v17607_v2, %v26703_v5  ;;  %v17608_v5 = vmul.f32 %v17606_v55, %v26706_v63  ;;  %v21505_v63 = vld [vmem:[%s26246_s14 + $0x2f8] sm:$0x3f] }
 0xaa9   : > { %21484 = vmatmul.mubr.msk.f32.vlgmr.msra.gmra.mrb[4].mxu0 %vm1638_vm4, %v21481_v6  ;;  %v17617_v6 = vmul.f32 %v17615_v4, %v26707_v35  ;;  %v17616_v35 = vmul.f32 %v17614_v61, %v26710_v23  ;;  %v21509_v23 = vld [vmem:[%s26246_s14 + $0x300] sm:$0x3f] }
 0xaaa   : > { %21487 = vmatpush1.msk.msra.mxu0 %vm1642_vm2, %v17568_v8  ;;  %18973 = vmatprep.mubr.f32.mxu0 %v26506_v60  ;;  %v17621_v8 = vpop.permute.xlu0 %17620 }
 0xaab   : > { %21490 = vmatprep.subr.msk.mxu0 %vm1642_vm2, %v17577_v38  ;;  %v17619_v38 = vpop.permute.xlu1 %17618 }
 0xaac   : > { %v17623_v29 = vsel %vm26737_vm14, %v17621_v8, %v17619_v38 }
 0xaad   : > { %v17625_v19 = vmul.f32 %v17623_v29, %v26711_v59 }
 0xaae   : > { %v17629_v54 = vpop.permute.xlu0 %17628 }
 0xab1   : > { %21488 = vmatmul.mubr.msk.f32.vlgmr.msra.gmra.mrb[4].mxu0 %vm1638_vm4, %v21485_v1  ;;  %v17627_v1 = vpop.permute.xlu1 %17626 }
 0xab2   : > { %21491 = vmatpush1.msk.msra.mxu0 %vm1642_vm2, %v17576_v32  ;;  %19057 = vmatprep.mubr.f32.mxu0 %v26506_v60  ;;  %v17622_v32 = vsel %vm26738_vm10, %v17619_v38, %v17621_v8  ;;  %v17637_v21 = vpop.permute.xlu0 %17636  ;;  %v17630_v34 = vsel %vm26740_vm11, %v17627_v1, %v17629_v54 }
 0xab3   : > { %21494 = vmatprep.subr.msk.mxu0 %vm1642_vm2, %v17585_v0  ;;  %v17631_v0 = vsel %vm26739_vm15, %v17629_v54, %v17627_v1  ;;  %v17624_v59 = vmul.f32 %v17622_v32, %v26665_v58  ;;  %v21513_v58 = vld [vmem:[%s26246_s14 + $0x308] sm:$0x3f] }
 0xab4   : > { %v17633_v9 = vmul.f32 %v17631_v0, %v26667_v48  ;;  %v17632_v48 = vmul.f32 %v17630_v34, %v26669_v27  ;;  %v21521_v27 = vld [vmem:[%s26246_s14 + $0x318] sm:$0x3f] }
 0xab5   : > { %v17635_v18 = vpop.permute.xlu1 %17634 }
 0xab9   : > { %21492 = vmatmul.mubr.msk.f32.vlgmr.msra.gmra.mrb[4].mxu0 %vm1638_vm4, %v21489_v47  ;;  %v17639_v47 = vsel %vm26741_vm12, %v17637_v21, %v17635_v18 }
 0xaba   : > { %21495 = vmatpush1.msk.msra.mxu0 %vm1642_vm2, %v17584_v20  ;;  %19141 = vmatprep.mubr.f32.mxu0 %v26506_v60  ;;  %v17641_v20 = vmul.f32 %v17639_v47, %v26670_v53  ;;  %v19744_v53 = vpop.permute.xlu1 %19743 }
 0xabb   : > { %21498 = vmatprep.subr.msk.mxu0 %vm1642_vm2, %v17593_v42  ;;  %v17638_v42 = vsel %vm26742_vm13, %v17635_v18, %v17637_v21 }
 0xabc   : > { %v17640_v52 = vmul.f32 %v17638_v42, %v26672_v30 }
 0xac1   : > { %21496 = vmatmul.mubr.msk.f32.vlgmr.msra.gmra.mrb[4].mxu0 %vm1638_vm4, %v21493_v25 }
 0xac2   : > { %21499 = vmatpush1.msk.msra.mxu0 %vm1642_vm2, %v17592_v12  ;;  %19225 = vmatprep.mubr.f32.mxu0 %v26506_v60 }
 0xac3   : > { %21502 = vmatprep.subr.msk.mxu0 %vm1642_vm2, %v17601_v56 }
 0xac9   : > { %21500 = vmatmul.mubr.msk.f32.vlgmr.msra.gmra.mrb[4].mxu0 %vm1638_vm4, %v21497_v57 }
 0xaca   : > { %21503 = vmatpush1.msk.msra.mxu0 %vm1642_vm2, %v17600_v62  ;;  %19309 = vmatprep.mubr.f32.mxu0 %v26506_v60 }
 0xacb   : > { %21506 = vmatprep.subr.msk.mxu0 %vm1642_vm2, %v17609_v26 }
 0xad1   : > { %21504 = vmatmul.mubr.msk.f32.vlgmr.msra.gmra.mrb[4].mxu0 %vm1638_vm4, %v21501_v37 }
 0xad2   : > { %21507 = vmatpush1.msk.msra.mxu0 %vm1642_vm2, %v17608_v5  ;;  %19393 = vmatprep.mubr.f32.mxu0 %v26506_v60 }
 0xad3   : > { %21510 = vmatprep.subr.msk.mxu0 %vm1642_vm2, %v17617_v6 }
 0xad9   : > { %21508 = vmatmul.mubr.msk.f32.vlgmr.msra.gmra.mrb[4].mxu0 %vm1638_vm4, %v21505_v63 }
 0xada   : > { %21511 = vmatpush1.msk.msra.mxu0 %vm1642_vm2, %v17616_v35  ;;  %19477 = vmatprep.mubr.f32.mxu0 %v26506_v60 }
 0xadb   : > { %21514 = vmatprep.subr.msk.mxu0 %vm1642_vm2, %v17625_v19 }
 0xae1   : > { %21512 = vmatmul.mubr.msk.f32.vlgmr.msra.gmra.mrb[4].mxu0 %vm1638_vm4, %v21509_v23 }
 0xae2   : > { %21515 = vmatpush1.msk.msra.mxu0 %vm1642_vm2, %v17624_v59  ;;  %19561 = vmatprep.mubr.f32.mxu0 %v26506_v60 }
 0xae3   : > { %21518 = vmatprep.subr.msk.mxu0 %vm1642_vm2, %v17633_v9 }
 0xae9   : > { %21516 = vmatmul.mubr.msk.f32.vlgmr.msra.gmra.mrb[4].mxu0 %vm1638_vm4, %v21513_v58 }
 0xaea   : > { %21519 = vmatpush1.msk.msra.mxu0 %vm1642_vm2, %v17632_v48  ;;  %19645 = vmatprep.mubr.f32.mxu0 %v26506_v60 }
 0xaeb   : > { %21522 = vmatprep.subr.msk.mxu0 %vm1642_vm2, %v17641_v20 }
 0xaf1   : > { %21520 = vmatmul.mubr.msk.f32.vlgmr.msra.gmra.mrb[4].mxu0 %vm1638_vm4, %v21517_v43 }
 0xaf2   : > { %21523 = vmatpush1.msk.msra.mxu0 %vm1642_vm2, %v17640_v52  ;;  %19729 = vmatprep.mubr.f32.mxu0 %v26506_v60 }
 0xaf9   : > { %21524 = vmatmul.mubr.msk.f32.vlgmr.msra.gmra.mrb[4].mxu0 %vm1638_vm4, %v21521_v27 }
 0xbcc   : > { %v19731_v22 = vpop.f32.mrb[4].mxu0 }
 0xbcd   : > { %v19746_v10 = vadd.f32 %v19744_v53, %v19731_v22  ;;  %v19733_v25 = vpop.f32.mrb[5].mxu0 }
 0xbce   : > { %v19747_v12 = vadd.f32 %v19744_v53, %v19733_v25 }
 0xbcf   : > { %vm19748_vm14 = vcmp.ge.f32.partialorder %v19746_v10, 0.0  ;;  %v19750_v56 = vmul.f32 0.01, %v19746_v10 }
 0xbd0   : > { %vm19749_vm10 = vcmp.ge.f32.partialorder %v19747_v12, 0.0  ;;  %v19751_v30 = vmul.f32 0.01, %v19747_v12 }
 0xbd1   : > { %v26082_v31 = vsel %vm19748_vm14, %v19746_v10, %v19750_v56 }
 0xbd2   : > { %v19753_v11 = vsel %vm19749_vm10, %v19747_v12, %v19751_v30  ;;  %19762 = vrot.lane.b32.xlu0 %v26082_v31, %s26543_s21 }
 0xbd3   : > { %19764 = vrot.lane.b32.xlu1 %v19753_v11, %s26543_s21 }
 0xbd6   : > { %19754 = vrot.lane.b32.xlu0 %v26082_v31, %s26544_s22 }
 0xbd7   : > { %19756 = vrot.lane.b32.xlu1 %v19753_v11, %s26544_s22 }
 0xbda   : > { %19770 = vrot.lane.b32.xlu0 %v26082_v31, %s26545_s30 }
 0xbdb   : > { %19772 = vrot.lane.b32.xlu1 %v19753_v11, %s26545_s30  ;;  %s26743_s30 = sld [smem:[#allocation83_spill]] }
 0xbde   : > { %19778 = vrot.lane.b32.xlu0 %v26082_v31, %s26546_s19 }
 0xbdf   : > { %19780 = vrot.lane.b32.xlu1 %v19753_v11, %s26546_s19 }
 0xbe1   : > { %v20569_v50 = vld [vmem:[%s26743_s30] sm:$0x3f] }
 0xbe2   : > { %19786 = vrot.lane.b32.xlu0 %v26082_v31, %s26547_s2 }
 0xbe3   : > { %19788 = vrot.lane.b32.xlu1 %v19753_v11, %s26547_s2 }
 0xbe6   : > { %19794 = vrot.lane.b32.xlu0 %v26082_v31, %s26486_s29 }
 0xbe7   : > { %19796 = vrot.lane.b32.xlu1 %v19753_v11, %s26486_s29 }
 0xbea   : > { %19802 = vrot.lane.b32.xlu0 %v26082_v31, %s26487_s24 }
 0xbeb   : > { %19804 = vrot.lane.b32.xlu1 %v19753_v11, %s26487_s24 }
 0xbee   : > { %19810 = vrot.lane.b32.xlu0 %v26082_v31, %s26488_s26 }
 0xbef   : > { %19812 = vrot.lane.b32.xlu1 %v19753_v11, %s26488_s26  ;;  %s26744_s26 = sld [smem:[#allocation82_spill]] }
 0xbf2   : > { %20572 = vperm.xlu0 %22044, %v20569_v50   ;;  %v22052_v50 = vld [vmem:[%s22225_s1] sm:$0x3f] }
 0xbf5   : > { %v21525_v4 = vld [vmem:[%s26744_s26 + $0x8] sm:$0x3f]  ;;  %v21536_v59 = vld [vmem:[%s26744_s26 + $0x18] sm:$0x3f]  ;;  %v21556_v56 = vld [vmem:[%s26744_s26 + $0x40] sm:$0x3f] }
 0xc44   : > { %v19763_v2 = vpop.permute.xlu0 %19762 }
 0xc45   : > { %v19765_v57 = vpop.permute.xlu1 %19764 }
 0xc46   : > { %v19766_v62 = vsel %vm957_vm1, %v19763_v2, %v19765_v57  ;;  %v19767_v26 = vsel %vm957_vm1, %v19765_v57, %v19763_v2  ;;  %v22053_v57 = vld [vmem:[%s22225_s1 + $0x8] sm:$0x3f] }
 0xc47   : > { %v19768_v41 = vmul.f32 %v19767_v26, %v22286_v15  ;;  %v19769_v44 = vmul.f32 %v19766_v62, %v22289_v16 }
 0xc48   : > { %v19755_v55 = vpop.permute.xlu0 %19754 }
 0xc49   : > { %v19757_v37 = vpop.permute.xlu1 %19756  ;;  %21526 = vmatprep.subr.msk.mxu1 %vm1642_vm2, %v19769_v44 }
 0xc4a   : > { %v19758_v5 = vsel %vm935_vm0, %v19755_v55, %v19757_v37  ;;  %v19759_v6 = vsel %vm935_vm0, %v19757_v37, %v19755_v55  ;;  %21527 = vmatpush1.msk.msra.mxu1 %vm1642_vm2, %v19768_v41 }
 0xc4b   : > { %v19760_v15 = vmul.f32 %v19759_v6, %v22292_v17  ;;  %v19761_v16 = vmul.f32 %v19758_v5, %v22282_v14  ;;  %21528 = vmatmul.mubr.msk.f32.vlgmr.msra.gmra.mrb[10].mxu1 %vm1638_vm4, %v21525_v4  ;;  %v19818_v14 = vld [vmem:[%s26744_s26] sm:$0x3f] }
 0xc4c   : > { %v19771_v8 = vpop.permute.xlu0 %19770  ;;  %19974 = vmatprep.mubr.f32.mxu1 %v26506_v60 }
 0xc4d   : > { %v19773_v38 = vpop.permute.xlu1 %19772  ;;  %21529 = vmatprep.subr.msk.mxu1 %vm1642_vm2, %v19761_v16 }
 0xc4e   : > { %v19774_v61 = vsel %vm979_vm3, %v19771_v8, %v19773_v38  ;;  %21530 = vmatpush1.msk.msra.mxu1 %vm1642_vm2, %v19760_v15  ;;  %v19775_v29 = vsel %vm979_vm3, %v19773_v38, %v19771_v8 }
 0xc4f   : > { %v19777_v17 = vmul.f32 %v19774_v61, %v22316_v28  ;;  %v19776_v19 = vmul.f32 %v19775_v29, %v22343_v36  ;;  %v21532_v36 = vld [vmem:[%s26744_s26 + $0x10] sm:$0x3f] }
 0xc50   : > { %v19779_v63 = vpop.permute.xlu0 %19778 }
 0xc51   : > { %v19781_v35 = vpop.permute.xlu1 %19780  ;;  %21533 = vmatprep.subr.msk.mxu1 %vm1642_vm2, %v19777_v17 }
 0xc52   : > { %v19782_v54 = vsel %vm1089_vm5, %v19779_v63, %v19781_v35  ;;  %v19783_v28 = vsel %vm1089_vm5, %v19781_v35, %v19779_v63 }
 0xc53   : > { %v19785_v1 = vmul.f32 %v19782_v54, %v22351_v39  ;;  %21531 = vmatmul.mubr.msk.f32.vlgmr.msra.gmra.mrb[10].mxu1 %vm1638_vm4, %v19818_v14  ;;  %v19784_v32 = vmul.f32 %v19783_v28, %v22368_v45 }
 0xc54   : > { %21534 = vmatpush1.msk.msra.mxu1 %vm1642_vm2, %v19776_v19  ;;  %20056 = vmatprep.mubr.f32.mxu1 %v26506_v60  ;;  %v19787_v39 = vpop.permute.xlu0 %19786 }
 0xc55   : > { %21537 = vmatprep.subr.msk.mxu1 %vm1642_vm2, %v19785_v1  ;;  %v19789_v0 = vpop.permute.xlu1 %19788 }
 0xc56   : > { %v19791_v23 = vsel %vm1111_vm6, %v19789_v0, %v19787_v39  ;;  %v19790_v18 = vsel %vm1111_vm6, %v19787_v39, %v19789_v0 }
 0xc57   : > { %v19793_v9 = vmul.f32 %v19791_v23, %v26638_v40  ;;  %v21540_v40 = vld [vmem:[%s26744_s26 + $0x20] sm:$0x3f]  ;;  %v19792_v47 = vmul.f32 %v19790_v18, %v26640_v24  ;;  %v21544_v24 = vld [vmem:[%s26744_s26 + $0x28] sm:$0x3f] }
 0xc58   : > { %v19795_v45 = vpop.permute.xlu0 %19794 }
 0xc59   : > { %v19797_v21 = vpop.permute.xlu1 %19796 }
 0xc5a   : > { %v19799_v34 = vsel %vm1221_vm7, %v19797_v21, %v19795_v45  ;;  %v19798_v42 = vsel %vm1221_vm7, %v19795_v45, %v19797_v21 }
 0xc5b   : > { %21535 = vmatmul.mubr.msk.f32.vlgmr.msra.gmra.mrb[10].mxu1 %vm1638_vm4, %v21532_v36  ;;  %v19801_v58 = vmul.f32 %v19799_v34, %v26692_v3  ;;  %v19800_v3 = vmul.f32 %v19798_v42, %v26693_v13  ;;  %v21548_v13 = vld [vmem:[%s26744_s26 + $0x30] sm:$0x3f] }
 0xc5c   : > { %21538 = vmatpush1.msk.msra.mxu1 %vm1642_vm2, %v19784_v32  ;;  %20140 = vmatprep.mubr.f32.mxu1 %v26506_v60  ;;  %v19803_v48 = vpop.permute.xlu0 %19802 }
 0xc5d   : > { %21541 = vmatprep.subr.msk.mxu1 %vm1642_vm2, %v19753_v11  ;;  %v19805_v20 = vpop.permute.xlu1 %19804 }
 0xc5e   : > { %v19807_v43 = vsel %vm1243_vm8, %v19805_v20, %v19803_v48  ;;  %v19806_v22 = vsel %vm1243_vm8, %v19803_v48, %v19805_v20 }
 0xc5f   : > { %v19809_v52 = vmul.f32 %v19807_v43, %v26694_v49  ;;  %v19808_v49 = vmul.f32 %v19806_v22, %v26695_v46  ;;  %v21552_v46 = vld [vmem:[%s26744_s26 + $0x38] sm:$0x3f] }
 0xc60   : > { %v19811_v27 = vpop.permute.xlu0 %19810 }
 0xc61   : > { %v19813_v53 = vpop.permute.xlu1 %19812 }
 0xc62   : > { %v19815_v10 = vsel %vm1265_vm9, %v19813_v53, %v19811_v27  ;;  %v19814_v12 = vsel %vm1265_vm9, %v19811_v27, %v19813_v53 }
 0xc63   : > { %21539 = vmatmul.mubr.msk.f32.vlgmr.msra.gmra.mrb[10].mxu1 %vm1638_vm4, %v21536_v59  ;;  %v19817_v25 = vmul.f32 %v19815_v10, %v26696_v51  ;;  %v19816_v51 = vmul.f32 %v19814_v12, %v26698_v33 }
 0xc64   : > { %21542 = vmatpush1.msk.msra.mxu1 %vm1642_vm2, %v26082_v31  ;;  %20224 = vmatprep.mubr.f32.mxu1 %v26506_v60 }
 0xc65   : > { %21545 = vmatprep.subr.msk.mxu1 %vm1642_vm2, %v19793_v9 }
 0xc6b   : > { %21543 = vmatmul.mubr.msk.f32.vlgmr.msra.gmra.mrb[10].mxu1 %vm1638_vm4, %v21540_v40 }
 0xc6c   : > { %21546 = vmatpush1.msk.msra.mxu1 %vm1642_vm2, %v19792_v47  ;;  %20308 = vmatprep.mubr.f32.mxu1 %v26506_v60 }
 0xc6d   : > { %21549 = vmatprep.subr.msk.mxu1 %vm1642_vm2, %v19801_v58 }
 0xc71   : > { %v20573_v7 = vpop.permute.xlu0 %20572 }
 0xc73   : > { %21547 = vmatmul.mubr.msk.f32.vlgmr.msra.gmra.mrb[10].mxu1 %vm1638_vm4, %v21544_v24 }
 0xc74   : > { %21550 = vmatpush1.msk.msra.mxu1 %vm1642_vm2, %v19800_v3  ;;  %20392 = vmatprep.mubr.f32.mxu1 %v26506_v60 }
 0xc75   : > { %21553 = vmatprep.subr.msk.mxu1 %vm1642_vm2, %v19809_v52 }
 0xc7b   : > { %21551 = vmatmul.mubr.msk.f32.vlgmr.msra.gmra.mrb[10].mxu1 %vm1638_vm4, %v21548_v13 }
 0xc7c   : > { %21554 = vmatpush1.msk.msra.mxu1 %vm1642_vm2, %v19808_v49  ;;  %20476 = vmatprep.mubr.f32.mxu1 %v26506_v60 }
 0xc7d   : > { %21557 = vmatprep.subr.msk.mxu1 %vm1642_vm2, %v19817_v25 }
 0xc83   : > { %21555 = vmatmul.mubr.msk.f32.vlgmr.msra.gmra.mrb[10].mxu1 %vm1638_vm4, %v21552_v46 }
 0xc84   : > { %21558 = vmatpush1.msk.msra.mxu1 %vm1642_vm2, %v19816_v51  ;;  %20560 = vmatprep.mubr.f32.mxu1 %v26506_v60 }
 0xc8b   : > { %21559 = vmatmul.mubr.msk.f32.vlgmr.msra.gmra.mrb[10].mxu1 %vm1638_vm4, %v21556_v56 }
 0xd5e   : > { %v20562_v30 = vpop.f32.mrb[10].mxu1 }
 0xd5f   : > { %v20575_v31 = vadd.f32 %v20573_v7, %v20562_v30  ;;  %v20564_v11 = vpop.f32.mrb[11].mxu1 }
 0xd60   : > { %v20576_v33 = vadd.f32 %v20573_v7, %v20564_v11 }
 0xd61   : > { %v20577_v2 = vadd.f32 %v22052_v50, %v20575_v31 }
 0xd62   : > { %v20578_v60 = vadd.f32 %v22053_v57, %v20576_v33 }
 0xd63   : > { %20579 = vst [vmem:[%s575_s15] sm:$0x3f] %v20577_v2 }
 0xd64   : > { %20580 = vst [vmem:[%s575_s15 + $0x8] sm:$0x3f] %v20578_v60 }
 0xd65 PF: > { %s26748_s21 = sld [smem:[#allocation2_spill]] }
 0xd6b   : > { %s28_s27 = sadd.s32 1, %s26748_s21  }
 0xd6c   : > { %p25_p4 = scmp.ge.s32.totalorder %s28_s27, 4  }
 0xd6e   :  { %27 = sbr.rel (!%p25_p4) target bundleno = 18 (0x12), region = 380 }

</bundles_post_ra>
